<compile_context>
chip_gen: v7x
topology: tpu7x:2x2x1
jax: 0.10.0
libtpu: 0.0.40
codegen_flags: <defaults>
</compile_context>

<pallas_src>
import jax
import jax.numpy as jnp
from jax import lax
from jax.experimental import pallas as pl
from jax.experimental.pallas import tpu as pltpu

H = 128            # GRU hidden size
G = 3 * H          # gate width (r,z,n)
D_IN = 29          # GRU input features
D_IN_PAD = 32      # padded input features
D_MOVIE = 28       # movie features
D_MOVIE_PAD = 32   # padded movie features
OUT1 = 128         # usernet linear1 out / head hidden
OUT2 = 256         # usernet linear2 out (user embedding)
B_BLK = 8          # batch rows per grid step (== f32 sublane tile)
MBLK = 128         # movie chunk width (lane tile) in the rating head


def content_rating_kernel(x_ref, movie_ref,
                          wih0_ref, bih0_ref, wcat_ref, bhh0n_ref,
                          bih1_ref, whh1_ref, bhh1n_ref,
                          wl1_ref, bl1_ref, wl2_ref, bl2_ref,
                          w1u_ref, w1m_ref, bh1_ref, w2h_ref,
                          b2_ref,
                          out_ref, gi0_ref, mproj_ref):
    bf = jnp.bfloat16
    f32 = jnp.float32
    T, Bp, _ = gi0_ref.shape
    Mp = mproj_ref.shape[0]

    # ---- hoisted precompute (off the recurrence critical path) -------------
    # Layer-0 input projection for all T steps in ONE matmul.  bih0 and the
    # r/z thirds of bhh0 are pre-folded on the host (bih0_ref).  Single
    # reshaped store: Bp == 8 matches the f32 sublane tile -> layout-free.
    x2 = x_ref[0]                                                  # (T*Bp, 32)
    gi0_all = jnp.dot(x2, wih0_ref[...], preferred_element_type=f32) \
        + jnp.broadcast_to(bih0_ref[...], (T * Bp, G))
    gi0_ref[...] = gi0_all.reshape(T, Bp, G)

    # Movie-side head projection with the head bias folded in; issued before
    # the latency-bound recurrence so the scheduler can overlap it (the MXU is
    # idle during the per-step gate math).
    mproj_ref[...] = (
        jnp.dot(movie_ref[...], w1m_ref[...], preferred_element_type=f32)
        + jnp.broadcast_to(bh1_ref[...], (Mp, OUT1)))

    # ---- hoisted bias broadcasts (JAX does not CSE broadcast_in_dim) -------
    bhh0n_b = jnp.broadcast_to(bhh0n_ref[...], (Bp, H))    # n-gate bias, layer 0
    bih1_b = jnp.broadcast_to(bih1_ref[...], (Bp, G))      # bih1 + r/z of bhh1
    bhh1n_b = jnp.broadcast_to(bhh1n_ref[...], (Bp, H))    # n-gate bias, layer 1

    def _gates(gi, gh_rz, gh_n, h_prev):
        # gi already carries all r/z biases; gh_n carries bhh_n (scaled by r).
        r = jax.nn.sigmoid(gi[:, 0 * H:1 * H] + gh_rz[:, 0 * H:1 * H])
        z = jax.nn.sigmoid(gi[:, 1 * H:2 * H] + gh_rz[:, 1 * H:2 * H])
        n = jnp.tanh(gi[:, 2 * H:3 * H] + r * gh_n)
        return (1.0 - z) * n + z * h_prev

    zeros_h = jnp.zeros((Bp, H), f32)
    zeros_2h = jnp.zeros((Bp, 2 * H), f32)

    # prologue (t = 0): h0_{-1} == 0, so gh0 reduces to the hh bias (r/z parts
    # already folded into gi0); layer 1 idles.  Uses the LIVE gi0 value.
    h0 = _gates(gi0_all[:Bp], zeros_2h, bhh0n_b, zeros_h)
    h1 = zeros_h

    # Wavefront loop: step t computes h0_t and (one step behind) h1_{t-1}.
    # h0_{t-1} @ [whh0 | wih1] is ONE fused matmul; h1_{t-2} @ whh1 overlaps.
    # TODO(synk): for long sequences use partial unroll (4..8) instead of full.
    def step(t, carry):
        h0, h1 = carry
        hcat = jnp.dot(h0.astype(bf), wcat_ref[...],
                       preferred_element_type=f32)                 # (Bp, 2G), no bias
        gh1 = jnp.dot(h1.astype(bf), whh1_ref[...],
                      preferred_element_type=f32)                  # (Bp, G), no bias
        h0_new = _gates(gi0_ref[t], hcat[:, :2 * H],
                        hcat[:, 2 * H:G] + bhh0n_b, h0)            # layer 0, step t
        h1_new = _gates(hcat[:, G:] + bih1_b, gh1[:, :2 * H],
                        gh1[:, 2 * H:] + bhh1n_b, h1)              # layer 1, step t-1
        return (h0_new, h1_new)

    h0, h1 = lax.fori_loop(1, T, step, (h0, h1), unroll=True)

    # epilogue: the last layer-1 step consumes h0_{T-1}.
    gi1 = jnp.dot(h0.astype(bf), wcat_ref[:, G:],
                  preferred_element_type=f32) + bih1_b
    gh1 = jnp.dot(h1.astype(bf), whh1_ref[...], preferred_element_type=f32)
    h1 = _gates(gi1, gh1[:, :2 * H], gh1[:, 2 * H:] + bhh1n_b, h1)  # == gru(x)[:, -1]

    # ---- usernet MLP tail ---------------------------------------------------
    y = jnp.maximum(jnp.dot(h1.astype(bf), wl1_ref[...],
                            preferred_element_type=f32) + bl1_ref[...], 0.0)
    u = jnp.maximum(jnp.dot(y.astype(bf), wl2_ref[...],
                            preferred_element_type=f32) + bl2_ref[...], 0.0)
    u_proj = jnp.dot(u.astype(bf), w1u_ref[...],
                     preferred_element_type=f32)                    # (Bp, 128)

    # ---- rating head: chunked over movies, per batch row --------------------
    # Head bias already folded into mproj; per (chunk, row) the live set is a
    # single (MBLK,128) f32 slab (16 vregs) and the lane reduce runs per chunk.
    # Output rows are lane-dense (multiples of 128 lanes).
    b2 = b2_ref[0, 0]
    w2_b = jnp.broadcast_to(w2h_ref[...], (MBLK, OUT1))             # hoisted
    for c in range(Mp // MBLK):                                     # static
        mp_c = mproj_ref[pl.ds(c * MBLK, MBLK), :]                  # (MBLK, 128)
        for b in range(Bp):                                         # static, Bp == 8
            hid = jnp.maximum(mp_c + u_proj[b:b + 1, :], 0.0)       # (MBLK, 128)
            out_ref[b, pl.ds(c * MBLK, MBLK)] = (
                jnp.sum(hid * w2_b, axis=-1) + b2)


def content_rating_forward(x, movie_feat, kp):
    """x: (B, T, 29) f32; movie_feat: (1, M, 28) f32 -> (B, M, 1) f32."""
    B, T, _ = x.shape
    M = movie_feat.shape[1]
    b_pad = ((B + B_BLK - 1) // B_BLK) * B_BLK
    m_pad = ((M + MBLK - 1) // MBLK) * MBLK
    nblk = b_pad // B_BLK

    # time-major, pad, and group into per-grid-step batch blocks so the kernel
    # sees a contiguous (T*B_BLK, 32) slab (layout plumbing, not compute).
    xt = jnp.transpose(x, (1, 0, 2))                                # (T, B, 29)
    x_pad = jnp.zeros((T, b_pad, D_IN_PAD), jnp.float32).at[:, :B, :D_IN].set(xt)
    x_g = (x_pad.reshape(T, nblk, B_BLK, D_IN_PAD)
           .transpose(1, 0, 2, 3)
           .reshape(nblk, T * B_BLK, D_IN_PAD)
           .astype(jnp.bfloat16))

    mv = (jnp.zeros((m_pad, D_MOVIE_PAD), jnp.float32)
          .at[:M, :D_MOVIE].set(movie_feat[0]).astype(jnp.bfloat16))

    weights = [kp["wih0"], kp["bih0"], kp["wcat"], kp["bhh0n"],
               kp["bih1"], kp["whh1"], kp["bhh1n"],
               kp["wl1"], kp["bl1"], kp["wl2"], kp["bl2"],
               kp["w1u"], kp["w1m"], kp["bh1"], kp["w2h"]]

    def _const_spec(arr):
        zeros = (0,) * arr.ndim
        return pl.BlockSpec(arr.shape, lambda i, _z=zeros: _z)

    in_specs = ([pl.BlockSpec((1, T * B_BLK, D_IN_PAD), lambda i: (i, 0, 0)),
                 _const_spec(mv)]
                + [_const_spec(w) for w in weights]
                + [pl.BlockSpec((1, 1), lambda i: (0, 0),
                                memory_space=pltpu.MemorySpace.SMEM)])

    out = pl.pallas_call(
        content_rating_kernel,
        out_shape=jax.ShapeDtypeStruct((b_pad, m_pad), jnp.float32),
        grid=(nblk,),                       # per-sample independent batch blocks
        in_specs=in_specs,
        out_specs=pl.BlockSpec((B_BLK, m_pad), lambda i: (i, 0)),
        scratch_shapes=[pltpu.VMEM((T, B_BLK, G), jnp.float32),
                        pltpu.VMEM((m_pad, OUT1), jnp.float32)],
        compiler_params=pltpu.CompilerParams(
            dimension_semantics=("parallel",)),   # dual-TC sharding on v7x
    )(x_g, mv, *weights, kp["b2h"])
    return out[:B, :M][..., None]


def init_raw_params(key):
    """PyTorch-shaped f32 parameters (deterministic)."""
    ks = jax.random.split(key, 16)

    def u(k, shape, bound):
        return jax.random.uniform(k, shape, jnp.float32, -bound, bound)

    kh = 1.0 / jnp.sqrt(H)
    kc = 1.0 / jnp.sqrt(D_MOVIE + OUT2)
    ko = 1.0 / jnp.sqrt(OUT1)
    return {
        "w_ih_l0": u(ks[0], (G, D_IN), kh), "w_hh_l0": u(ks[1], (G, H), kh),
        "b_ih_l0": u(ks[2], (G,), kh),      "b_hh_l0": u(ks[3], (G,), kh),
        "w_ih_l1": u(ks[4], (G, H), kh),    "w_hh_l1": u(ks[5], (G, H), kh),
        "b_ih_l1": u(ks[6], (G,), kh),      "b_hh_l1": u(ks[7], (G,), kh),
        "u_w1": u(ks[8], (OUT1, H), kh),    "u_b1": u(ks[9], (OUT1,), kh),
        "u_w2": u(ks[10], (OUT2, OUT1), ko), "u_b2": u(ks[11], (OUT2,), ko),
        "c_w1": u(ks[12], (OUT1, OUT2 + D_MOVIE), kc), "c_b1": u(ks[13], (OUT1,), kc),
        "c_w2": u(ks[14], (1, OUT1), ko),   "c_b2": u(ks[15], (1,), ko),
    }


def make_kernel_params(raw):
    """Kernel layout: (in, out) weight transposes, bf16 MXU operands, f32 biases.
    r/z thirds of b_hh are folded into the input-projection biases so the
    per-step critical path has a single add ahead of each sigmoid."""
    bf = jnp.bfloat16
    f32 = jnp.float32
    wih0 = jnp.zeros((D_IN_PAD, G), f32).at[:D_IN].set(raw["w_ih_l0"].T).astype(bf)
    w1m = jnp.zeros((D_MOVIE_PAD, OUT1), f32).at[:D_MOVIE].set(
        raw["c_w1"][:, OUT2:].T).astype(bf)
    bih0_eff = raw["b_ih_l0"] + jnp.concatenate(
        [raw["b_hh_l0"][:2 * H], jnp.zeros((H,), f32)])
    bih1_eff = raw["b_ih_l1"] + jnp.concatenate(
        [raw["b_hh_l1"][:2 * H], jnp.zeros((H,), f32)])
    return {
        "wih0": wih0,
        "bih0": bih0_eff.reshape(1, G),
        "wcat": jnp.concatenate([raw["w_hh_l0"].T, raw["w_ih_l1"].T], axis=1).astype(bf),
        "bhh0n": raw["b_hh_l0"][2 * H:].reshape(1, H),
        "bih1": bih1_eff.reshape(1, G),
        "whh1": raw["w_hh_l1"].T.astype(bf),
        "bhh1n": raw["b_hh_l1"][2 * H:].reshape(1, H),
        "wl1": raw["u_w1"].T.astype(bf), "bl1": raw["u_b1"].reshape(1, OUT1),
        "wl2": raw["u_w2"].T.astype(bf), "bl2": raw["u_b2"].reshape(1, OUT2),
        "w1u": raw["c_w1"][:, :OUT2].T.astype(bf),
        "w1m": w1m,
        "bh1": raw["c_b1"].reshape(1, OUT1),
        "w2h": raw["c_w2"].reshape(1, OUT1),      # final contraction stays f32
        "b2h": raw["c_b2"].reshape(1, 1),
    }


def reference_forward(x, movie_feat, raw):
    """Pure-JAX ContentRatingNetwork forward (inference), mirroring the kernel's
    bf16 MXU operands with f32 accumulation and f32 gate math."""
    B, T, _ = x.shape
    M = movie_feat.shape[1]
    bf = jnp.bfloat16
    f32 = jnp.float32

    def mm(a, w_pt):  # a: (..., K) f32, w_pt: (N, K) torch layout
        return jnp.dot(a.astype(bf), w_pt.T.astype(bf), preferred_element_type=f32)

    def cell(x_t, h, w_ih, w_hh, b_ih, b_hh):
        gi = mm(x_t, w_ih) + b_ih
        gh = mm(h, w_hh) + b_hh
        r = jax.nn.sigmoid(gi[:, :H] + gh[:, :H])
        z = jax.nn.sigmoid(gi[:, H:2 * H] + gh[:, H:2 * H])
        n = jnp.tanh(gi[:, 2 * H:] + r * gh[:, 2 * H:])
        return (1.0 - z) * n + z * h

    h0 = jnp.zeros((B, H), f32)
    h1 = jnp.zeros((B, H), f32)
    for t in range(T):   # dropout between layers is identity at inference
        h0 = cell(x[:, t], h0, raw["w_ih_l0"], raw["w_hh_l0"], raw["b_ih_l0"], raw["b_hh_l0"])
        h1 = cell(h0, h1, raw["w_ih_l1"], raw["w_hh_l1"], raw["b_ih_l1"], raw["b_hh_l1"])
    y = jnp.maximum(mm(h1, raw["u_w1"]) + raw["u_b1"], 0.0)
    u = jnp.maximum(mm(y, raw["u_w2"]) + raw["u_b2"], 0.0)

    x1 = jnp.broadcast_to(u[:, None, :], (B, M, OUT2))
    x2 = jnp.broadcast_to(movie_feat, (B, M, D_MOVIE))
    cat = jnp.concatenate([x1, x2], axis=-1)
    hid = jnp.maximum(
        jnp.einsum("bmk,nk->bmn", cat.astype(bf), raw["c_w1"].astype(bf),
                   preferred_element_type=f32) + raw["c_b1"], 0.0)
    return jnp.einsum("bmk,nk->bmn", hid, raw["c_w2"],
                      preferred_element_type=f32) + raw["c_b2"]


if __name__ == "__main__":
    key = jax.random.PRNGKey(0)
    kx, km, kp = jax.random.split(key, 3)
    B, T, M = 2, 8, 16
    x = jax.random.normal(kx, (B, T, D_IN), jnp.float32)
    movie_features_base = 0.5 * jax.random.normal(km, (1, M, D_MOVIE), jnp.float32)

    raw = init_raw_params(kp)
    kparams = make_kernel_params(raw)

    out = content_rating_forward(x, movie_features_base, kparams)
    out = jax.block_until_ready(out)

    ref = reference_forward(x, movie_features_base, raw)
    assert out.shape == (B, M, 1), out.shape
    max_err = float(jnp.max(jnp.abs(out - ref)))
    assert jnp.allclose(out, ref, rtol=2e-3, atol=2e-4), max_err

    print("KERNEL_OK")
</pallas_src>

<mosaic_0001>
module attributes {stable_mosaic.version = 11 : i64} {
  func.func @content_rating_kernel(%arg0: i32, %arg1: memref<1x64x32xbf16, #tpu.memory_space<vmem>>, %arg2: memref<128x32xbf16, #tpu.memory_space<vmem>>, %arg3: memref<32x384xbf16, #tpu.memory_space<vmem>>, %arg4: memref<1x384xf32, #tpu.memory_space<vmem>>, %arg5: memref<128x768xbf16, #tpu.memory_space<vmem>>, %arg6: memref<1x128xf32, #tpu.memory_space<vmem>>, %arg7: memref<1x384xf32, #tpu.memory_space<vmem>>, %arg8: memref<128x384xbf16, #tpu.memory_space<vmem>>, %arg9: memref<1x128xf32, #tpu.memory_space<vmem>>, %arg10: memref<128x128xbf16, #tpu.memory_space<vmem>>, %arg11: memref<1x128xf32, #tpu.memory_space<vmem>>, %arg12: memref<128x256xbf16, #tpu.memory_space<vmem>>, %arg13: memref<1x256xf32, #tpu.memory_space<vmem>>, %arg14: memref<256x128xbf16, #tpu.memory_space<vmem>>, %arg15: memref<32x128xbf16, #tpu.memory_space<vmem>>, %arg16: memref<1x128xf32, #tpu.memory_space<vmem>>, %arg17: memref<1x128xf32, #tpu.memory_space<vmem>>, %arg18: memref<1x1xf32, #tpu.memory_space<smem>>, %arg19: memref<8x128xf32, #tpu.memory_space<vmem>>, %arg20: memref<8x8x384xf32, #tpu.memory_space<vmem>>, %arg21: memref<128x128xf32, #tpu.memory_space<vmem>>) attributes {dimension_semantics = [#tpu.dimension_semantics<parallel>], iteration_bounds = array<i64: 1>, scalar_prefetch = 0 : i64, scratch_operands = 2 : i64, tpu.core_type = #tpu.core_type<tc>, window_params = [{transform_indices = @transform_0, window_bounds = array<i64: 1, 64, 32>}, {pipeline_mode = #tpu.pipeline_mode<synchronous>, transform_indices = @transform_1, window_bounds = array<i64: 128, 32>}, {pipeline_mode = #tpu.pipeline_mode<synchronous>, transform_indices = @transform_2, window_bounds = array<i64: 32, 384>}, {pipeline_mode = #tpu.pipeline_mode<synchronous>, transform_indices = @transform_3, window_bounds = array<i64: 1, 384>}, {pipeline_mode = #tpu.pipeline_mode<synchronous>, transform_indices = @transform_4, window_bounds = array<i64: 128, 768>}, {pipeline_mode = #tpu.pipeline_mode<synchronous>, transform_indices = @transform_5, window_bounds = array<i64: 1, 128>}, {pipeline_mode = #tpu.pipeline_mode<synchronous>, transform_indices = @transform_6, window_bounds = array<i64: 1, 384>}, {pipeline_mode = #tpu.pipeline_mode<synchronous>, transform_indices = @transform_7, window_bounds = array<i64: 128, 384>}, {pipeline_mode = #tpu.pipeline_mode<synchronous>, transform_indices = @transform_8, window_bounds = array<i64: 1, 128>}, {pipeline_mode = #tpu.pipeline_mode<synchronous>, transform_indices = @transform_9, window_bounds = array<i64: 128, 128>}, {pipeline_mode = #tpu.pipeline_mode<synchronous>, transform_indices = @transform_10, window_bounds = array<i64: 1, 128>}, {pipeline_mode = #tpu.pipeline_mode<synchronous>, transform_indices = @transform_11, window_bounds = array<i64: 128, 256>}, {pipeline_mode = #tpu.pipeline_mode<synchronous>, transform_indices = @transform_12, window_bounds = array<i64: 1, 256>}, {pipeline_mode = #tpu.pipeline_mode<synchronous>, transform_indices = @transform_13, window_bounds = array<i64: 256, 128>}, {pipeline_mode = #tpu.pipeline_mode<synchronous>, transform_indices = @transform_14, window_bounds = array<i64: 32, 128>}, {pipeline_mode = #tpu.pipeline_mode<synchronous>, transform_indices = @transform_15, window_bounds = array<i64: 1, 128>}, {pipeline_mode = #tpu.pipeline_mode<synchronous>, transform_indices = @transform_16, window_bounds = array<i64: 1, 128>}, {transform_indices = @transform_17, window_bounds = array<i64: 1, 1>}, {transform_indices = @transform_18, window_bounds = array<i64: 8, 128>}]} {
    %c0 = arith.constant 0 : index
    %c0_0 = arith.constant 0 : index
    %c0_1 = arith.constant 0 : index
    %0 = vector.load %arg1[%c0, %c0_0, %c0_1] : memref<1x64x32xbf16, #tpu.memory_space<vmem>>, vector<1x64x32xbf16>
    %1 = vector.shape_cast %0 : vector<1x64x32xbf16> to vector<64x32xbf16>
    %c0_2 = arith.constant 0 : index
    %c0_3 = arith.constant 0 : index
    %2 = vector.load %arg3[%c0_2, %c0_3] : memref<32x384xbf16, #tpu.memory_space<vmem>>, vector<32x384xbf16>
    %cst = arith.constant dense<0.000000e+00> : vector<64x384xf32>
    %3 = tpu.matmul %1, %2, %cst {dimension_numbers = #tpu.dot_dimension_numbers<[1], [0], [0], [1], [0, 0, 1, 1], [], []>} : vector<64x32xbf16>, vector<32x384xbf16>, vector<64x384xf32> -> vector<64x384xf32>
    %c0_4 = arith.constant 0 : index
    %c0_5 = arith.constant 0 : index
    %4 = vector.load %arg4[%c0_4, %c0_5] : memref<1x384xf32, #tpu.memory_space<vmem>>, vector<1x384xf32>
    %5 = vector.shape_cast %4 : vector<1x384xf32> to vector<1x384xf32>
    %6 = vector.broadcast %5 : vector<1x384xf32> to vector<64x384xf32>
    %7 = arith.addf %3, %6 : vector<64x384xf32>
    %8 = vector.shape_cast %7 : vector<64x384xf32> to vector<8x8x384xf32>
    %c0_6 = arith.constant 0 : index
    %c0_7 = arith.constant 0 : index
    %c0_8 = arith.constant 0 : index
    %9 = vector.load %arg20[%c0_6, %c0_7, %c0_8] : memref<8x8x384xf32, #tpu.memory_space<vmem>>, vector<8x8x384xf32>
    tpu.vector_store %arg20[%c0_6, %c0_7, %c0_8], %8 {strides = array<i32>} : memref<8x8x384xf32, #tpu.memory_space<vmem>>, vector<8x8x384xf32>,
    %c0_9 = arith.constant 0 : index
    %c0_10 = arith.constant 0 : index
    %10 = vector.load %arg2[%c0_9, %c0_10] : memref<128x32xbf16, #tpu.memory_space<vmem>>, vector<128x32xbf16>
    %c0_11 = arith.constant 0 : index
    %c0_12 = arith.constant 0 : index
    %11 = vector.load %arg15[%c0_11, %c0_12] : memref<32x128xbf16, #tpu.memory_space<vmem>>, vector<32x128xbf16>
    %cst_13 = arith.constant dense<0.000000e+00> : vector<128x128xf32>
    %12 = tpu.matmul %10, %11, %cst_13 {dimension_numbers = #tpu.dot_dimension_numbers<[1], [0], [0], [1], [0, 0, 1, 1], [], []>} : vector<128x32xbf16>, vector<32x128xbf16>, vector<128x128xf32> -> vector<128x128xf32>
    %c0_14 = arith.constant 0 : index
    %c0_15 = arith.constant 0 : index
    %13 = vector.load %arg16[%c0_14, %c0_15] : memref<1x128xf32, #tpu.memory_space<vmem>>, vector<1x128xf32>
    %14 = vector.shape_cast %13 : vector<1x128xf32> to vector<1x128xf32>
    %15 = vector.broadcast %14 : vector<1x128xf32> to vector<128x128xf32>
    %16 = arith.addf %12, %15 : vector<128x128xf32>
    %c0_16 = arith.constant 0 : index
    %c0_17 = arith.constant 0 : index
    %17 = vector.load %arg21[%c0_16, %c0_17] : memref<128x128xf32, #tpu.memory_space<vmem>>, vector<128x128xf32>
    tpu.vector_store %arg21[%c0_16, %c0_17], %16 {strides = array<i32>} : memref<128x128xf32, #tpu.memory_space<vmem>>, vector<128x128xf32>,
    %c0_18 = arith.constant 0 : index
    %c0_19 = arith.constant 0 : index
    %18 = vector.load %arg6[%c0_18, %c0_19] : memref<1x128xf32, #tpu.memory_space<vmem>>, vector<1x128xf32>
    %19 = vector.shape_cast %18 : vector<1x128xf32> to vector<1x128xf32>
    %20 = vector.broadcast %19 : vector<1x128xf32> to vector<8x128xf32>
    %c0_20 = arith.constant 0 : index
    %c0_21 = arith.constant 0 : index
    %21 = vector.load %arg7[%c0_20, %c0_21] : memref<1x384xf32, #tpu.memory_space<vmem>>, vector<1x384xf32>
    %22 = vector.shape_cast %21 : vector<1x384xf32> to vector<1x384xf32>
    %23 = vector.broadcast %22 : vector<1x384xf32> to vector<8x384xf32>
    %c0_22 = arith.constant 0 : index
    %c0_23 = arith.constant 0 : index
    %24 = vector.load %arg9[%c0_22, %c0_23] : memref<1x128xf32, #tpu.memory_space<vmem>>, vector<1x128xf32>
    %25 = vector.shape_cast %24 : vector<1x128xf32> to vector<1x128xf32>
    %26 = vector.broadcast %25 : vector<1x128xf32> to vector<8x128xf32>
    %cst_24 = arith.constant 0.000000e+00 : f32
    %27 = vector.broadcast %cst_24 : f32 to vector<8x128xf32>
    %cst_25 = arith.constant 0.000000e+00 : f32
    %28 = vector.broadcast %cst_25 : f32 to vector<8x256xf32>
    %29 = vector.extract_strided_slice %7 {offsets = [0, 0], sizes = [8, 384], strides = [1, 1]} : vector<64x384xf32> to vector<8x384xf32>
    %30 = vector.extract_strided_slice %29 {offsets = [0, 0], sizes = [8, 128], strides = [1, 1]} : vector<8x384xf32> to vector<8x128xf32>
    %31 = vector.extract_strided_slice %28 {offsets = [0, 0], sizes = [8, 128], strides = [1, 1]} : vector<8x256xf32> to vector<8x128xf32>
    %32 = arith.addf %30, %31 : vector<8x128xf32>
    %33 = arith.negf %32 : vector<8x128xf32>
    %34 = math.exp %33 : vector<8x128xf32>
    %cst_26 = arith.constant 1.000000e+00 : f32
    %35 = vector.broadcast %cst_26 : f32 to vector<8x128xf32>
    %36 = arith.addf %35, %34 : vector<8x128xf32>
    %37 = arith.divf %35, %36 : vector<8x128xf32>
    %38 = vector.extract_strided_slice %29 {offsets = [0, 128], sizes = [8, 128], strides = [1, 1]} : vector<8x384xf32> to vector<8x128xf32>
    %39 = vector.extract_strided_slice %28 {offsets = [0, 128], sizes = [8, 128], strides = [1, 1]} : vector<8x256xf32> to vector<8x128xf32>
    %40 = arith.addf %38, %39 : vector<8x128xf32>
    %41 = arith.negf %40 : vector<8x128xf32>
    %42 = math.exp %41 : vector<8x128xf32>
    %cst_27 = arith.constant 1.000000e+00 : f32
    %43 = vector.broadcast %cst_27 : f32 to vector<8x128xf32>
    %44 = arith.addf %43, %42 : vector<8x128xf32>
    %45 = arith.divf %43, %44 : vector<8x128xf32>
    %46 = vector.extract_strided_slice %29 {offsets = [0, 256], sizes = [8, 128], strides = [1, 1]} : vector<8x384xf32> to vector<8x128xf32>
    %47 = arith.mulf %37, %20 : vector<8x128xf32>
    %48 = arith.addf %46, %47 : vector<8x128xf32>
    %49 = math.tanh %48 : vector<8x128xf32>
    %cst_28 = arith.constant 1.000000e+00 : f32
    %50 = vector.broadcast %cst_28 : f32 to vector<8x128xf32>
    %51 = arith.subf %50, %45 : vector<8x128xf32>
    %52 = arith.mulf %51, %49 : vector<8x128xf32>
    %53 = arith.mulf %45, %27 : vector<8x128xf32>
    %54 = arith.addf %52, %53 : vector<8x128xf32>
    %c1_i32 = arith.constant 1 : i32
    %55 = arith.truncf %54 : vector<8x128xf32> to vector<8x128xbf16>
    %c0_29 = arith.constant 0 : index
    %c0_30 = arith.constant 0 : index
    %56 = vector.load %arg5[%c0_29, %c0_30] : memref<128x768xbf16, #tpu.memory_space<vmem>>, vector<128x768xbf16>
    %cst_31 = arith.constant dense<0.000000e+00> : vector<8x768xf32>
    %57 = tpu.matmul %55, %56, %cst_31 {dimension_numbers = #tpu.dot_dimension_numbers<[1], [0], [0], [1], [0, 0, 1, 1], [], []>} : vector<8x128xbf16>, vector<128x768xbf16>, vector<8x768xf32> -> vector<8x768xf32>
    %58 = arith.truncf %27 : vector<8x128xf32> to vector<8x128xbf16>
    %c0_32 = arith.constant 0 : index
    %c0_33 = arith.constant 0 : index
    %59 = vector.load %arg8[%c0_32, %c0_33] : memref<128x384xbf16, #tpu.memory_space<vmem>>, vector<128x384xbf16>
    %cst_34 = arith.constant dense<0.000000e+00> : vector<8x384xf32>
    %60 = tpu.matmul %58, %59, %cst_34 {dimension_numbers = #tpu.dot_dimension_numbers<[1], [0], [0], [1], [0, 0, 1, 1], [], []>} : vector<8x128xbf16>, vector<128x384xbf16>, vector<8x384xf32> -> vector<8x384xf32>
    %61 = arith.index_cast %c1_i32 : i32 to index
    %c0_35 = arith.constant 0 : index
    %c0_36 = arith.constant 0 : index
    %62 = vector.load %arg20[%61, %c0_35, %c0_36] : memref<8x8x384xf32, #tpu.memory_space<vmem>>, vector<1x8x384xf32>
    %63 = vector.shape_cast %62 : vector<1x8x384xf32> to vector<8x384xf32>
    %64 = vector.extract_strided_slice %57 {offsets = [0, 0], sizes = [8, 256], strides = [1, 1]} : vector<8x768xf32> to vector<8x256xf32>
    %65 = vector.extract_strided_slice %57 {offsets = [0, 256], sizes = [8, 128], strides = [1, 1]} : vector<8x768xf32> to vector<8x128xf32>
    %66 = arith.addf %65, %20 : vector<8x128xf32>
    %67 = vector.extract_strided_slice %63 {offsets = [0, 0], sizes = [8, 128], strides = [1, 1]} : vector<8x384xf32> to vector<8x128xf32>
    %68 = vector.extract_strided_slice %64 {offsets = [0, 0], sizes = [8, 128], strides = [1, 1]} : vector<8x256xf32> to vector<8x128xf32>
    %69 = arith.addf %67, %68 : vector<8x128xf32>
    %70 = arith.negf %69 : vector<8x128xf32>
    %71 = math.exp %70 : vector<8x128xf32>
    %cst_37 = arith.constant 1.000000e+00 : f32
    %72 = vector.broadcast %cst_37 : f32 to vector<8x128xf32>
    %73 = arith.addf %72, %71 : vector<8x128xf32>
    %74 = arith.divf %72, %73 : vector<8x128xf32>
    %75 = vector.extract_strided_slice %63 {offsets = [0, 128], sizes = [8, 128], strides = [1, 1]} : vector<8x384xf32> to vector<8x128xf32>
    %76 = vector.extract_strided_slice %64 {offsets = [0, 128], sizes = [8, 128], strides = [1, 1]} : vector<8x256xf32> to vector<8x128xf32>
    %77 = arith.addf %75, %76 : vector<8x128xf32>
    %78 = arith.negf %77 : vector<8x128xf32>
    %79 = math.exp %78 : vector<8x128xf32>
    %cst_38 = arith.constant 1.000000e+00 : f32
    %80 = vector.broadcast %cst_38 : f32 to vector<8x128xf32>
    %81 = arith.addf %80, %79 : vector<8x128xf32>
    %82 = arith.divf %80, %81 : vector<8x128xf32>
    %83 = vector.extract_strided_slice %63 {offsets = [0, 256], sizes = [8, 128], strides = [1, 1]} : vector<8x384xf32> to vector<8x128xf32>
    %84 = arith.mulf %74, %66 : vector<8x128xf32>
    %85 = arith.addf %83, %84 : vector<8x128xf32>
    %86 = math.tanh %85 : vector<8x128xf32>
    %cst_39 = arith.constant 1.000000e+00 : f32
    %87 = vector.broadcast %cst_39 : f32 to vector<8x128xf32>
    %88 = arith.subf %87, %82 : vector<8x128xf32>
    %89 = arith.mulf %88, %86 : vector<8x128xf32>
    %90 = arith.mulf %82, %54 : vector<8x128xf32>
    %91 = arith.addf %89, %90 : vector<8x128xf32>
    %92 = vector.extract_strided_slice %57 {offsets = [0, 384], sizes = [8, 384], strides = [1, 1]} : vector<8x768xf32> to vector<8x384xf32>
    %93 = arith.addf %92, %23 : vector<8x384xf32>
    %94 = vector.extract_strided_slice %60 {offsets = [0, 0], sizes = [8, 256], strides = [1, 1]} : vector<8x384xf32> to vector<8x256xf32>
    %95 = vector.extract_strided_slice %60 {offsets = [0, 256], sizes = [8, 128], strides = [1, 1]} : vector<8x384xf32> to vector<8x128xf32>
    %96 = arith.addf %95, %26 : vector<8x128xf32>
    %97 = vector.extract_strided_slice %93 {offsets = [0, 0], sizes = [8, 128], strides = [1, 1]} : vector<8x384xf32> to vector<8x128xf32>
    %98 = vector.extract_strided_slice %94 {offsets = [0, 0], sizes = [8, 128], strides = [1, 1]} : vector<8x256xf32> to vector<8x128xf32>
    %99 = arith.addf %97, %98 : vector<8x128xf32>
    %100 = arith.negf %99 : vector<8x128xf32>
    %101 = math.exp %100 : vector<8x128xf32>
    %cst_40 = arith.constant 1.000000e+00 : f32
    %102 = vector.broadcast %cst_40 : f32 to vector<8x128xf32>
    %103 = arith.addf %102, %101 : vector<8x128xf32>
    %104 = arith.divf %102, %103 : vector<8x128xf32>
    %105 = vector.extract_strided_slice %93 {offsets = [0, 128], sizes = [8, 128], strides = [1, 1]} : vector<8x384xf32> to vector<8x128xf32>
    %106 = vector.extract_strided_slice %94 {offsets = [0, 128], sizes = [8, 128], strides = [1, 1]} : vector<8x256xf32> to vector<8x128xf32>
    %107 = arith.addf %105, %106 : vector<8x128xf32>
    %108 = arith.negf %107 : vector<8x128xf32>
    %109 = math.exp %108 : vector<8x128xf32>
    %cst_41 = arith.constant 1.000000e+00 : f32
    %110 = vector.broadcast %cst_41 : f32 to vector<8x128xf32>
    %111 = arith.addf %110, %109 : vector<8x128xf32>
    %112 = arith.divf %110, %111 : vector<8x128xf32>
    %113 = vector.extract_strided_slice %93 {offsets = [0, 256], sizes = [8, 128], strides = [1, 1]} : vector<8x384xf32> to vector<8x128xf32>
    %114 = arith.mulf %104, %96 : vector<8x128xf32>
    %115 = arith.addf %113, %114 : vector<8x128xf32>
    %116 = math.tanh %115 : vector<8x128xf32>
    %cst_42 = arith.constant 1.000000e+00 : f32
    %117 = vector.broadcast %cst_42 : f32 to vector<8x128xf32>
    %118 = arith.subf %117, %112 : vector<8x128xf32>
    %119 = arith.mulf %118, %116 : vector<8x128xf32>
    %120 = arith.mulf %112, %27 : vector<8x128xf32>
    %121 = arith.addf %119, %120 : vector<8x128xf32>
    %c2_i32 = arith.constant 2 : i32
    %122 = arith.truncf %91 : vector<8x128xf32> to vector<8x128xbf16>
    %c0_43 = arith.constant 0 : index
    %c0_44 = arith.constant 0 : index
    %123 = vector.load %arg5[%c0_43, %c0_44] : memref<128x768xbf16, #tpu.memory_space<vmem>>, vector<128x768xbf16>
    %cst_45 = arith.constant dense<0.000000e+00> : vector<8x768xf32>
    %124 = tpu.matmul %122, %123, %cst_45 {dimension_numbers = #tpu.dot_dimension_numbers<[1], [0], [0], [1], [0, 0, 1, 1], [], []>} : vector<8x128xbf16>, vector<128x768xbf16>, vector<8x768xf32> -> vector<8x768xf32>
    %125 = arith.truncf %121 : vector<8x128xf32> to vector<8x128xbf16>
    %c0_46 = arith.constant 0 : index
    %c0_47 = arith.constant 0 : index
    %126 = vector.load %arg8[%c0_46, %c0_47] : memref<128x384xbf16, #tpu.memory_space<vmem>>, vector<128x384xbf16>
    %cst_48 = arith.constant dense<0.000000e+00> : vector<8x384xf32>
    %127 = tpu.matmul %125, %126, %cst_48 {dimension_numbers = #tpu.dot_dimension_numbers<[1], [0], [0], [1], [0, 0, 1, 1], [], []>} : vector<8x128xbf16>, vector<128x384xbf16>, vector<8x384xf32> -> vector<8x384xf32>
    %128 = arith.index_cast %c2_i32 : i32 to index
    %c0_49 = arith.constant 0 : index
    %c0_50 = arith.constant 0 : index
    %129 = vector.load %arg20[%128, %c0_49, %c0_50] : memref<8x8x384xf32, #tpu.memory_space<vmem>>, vector<1x8x384xf32>
    %130 = vector.shape_cast %129 : vector<1x8x384xf32> to vector<8x384xf32>
    %131 = vector.extract_strided_slice %124 {offsets = [0, 0], sizes = [8, 256], strides = [1, 1]} : vector<8x768xf32> to vector<8x256xf32>
    %132 = vector.extract_strided_slice %124 {offsets = [0, 256], sizes = [8, 128], strides = [1, 1]} : vector<8x768xf32> to vector<8x128xf32>
    %133 = arith.addf %132, %20 : vector<8x128xf32>
    %134 = vector.extract_strided_slice %130 {offsets = [0, 0], sizes = [8, 128], strides = [1, 1]} : vector<8x384xf32> to vector<8x128xf32>
    %135 = vector.extract_strided_slice %131 {offsets = [0, 0], sizes = [8, 128], strides = [1, 1]} : vector<8x256xf32> to vector<8x128xf32>
    %136 = arith.addf %134, %135 : vector<8x128xf32>
    %137 = arith.negf %136 : vector<8x128xf32>
    %138 = math.exp %137 : vector<8x128xf32>
    %cst_51 = arith.constant 1.000000e+00 : f32
    %139 = vector.broadcast %cst_51 : f32 to vector<8x128xf32>
    %140 = arith.addf %139, %138 : vector<8x128xf32>
    %141 = arith.divf %139, %140 : vector<8x128xf32>
    %142 = vector.extract_strided_slice %130 {offsets = [0, 128], sizes = [8, 128], strides = [1, 1]} : vector<8x384xf32> to vector<8x128xf32>
    %143 = vector.extract_strided_slice %131 {offsets = [0, 128], sizes = [8, 128], strides = [1, 1]} : vector<8x256xf32> to vector<8x128xf32>
    %144 = arith.addf %142, %143 : vector<8x128xf32>
    %145 = arith.negf %144 : vector<8x128xf32>
    %146 = math.exp %145 : vector<8x128xf32>
    %cst_52 = arith.constant 1.000000e+00 : f32
    %147 = vector.broadcast %cst_52 : f32 to vector<8x128xf32>
    %148 = arith.addf %147, %146 : vector<8x128xf32>
    %149 = arith.divf %147, %148 : vector<8x128xf32>
    %150 = vector.extract_strided_slice %130 {offsets = [0, 256], sizes = [8, 128], strides = [1, 1]} : vector<8x384xf32> to vector<8x128xf32>
    %151 = arith.mulf %141, %133 : vector<8x128xf32>
    %152 = arith.addf %150, %151 : vector<8x128xf32>
    %153 = math.tanh %152 : vector<8x128xf32>
    %cst_53 = arith.constant 1.000000e+00 : f32
    %154 = vector.broadcast %cst_53 : f32 to vector<8x128xf32>
    %155 = arith.subf %154, %149 : vector<8x128xf32>
    %156 = arith.mulf %155, %153 : vector<8x128xf32>
    %157 = arith.mulf %149, %91 : vector<8x128xf32>
    %158 = arith.addf %156, %157 : vector<8x128xf32>
    %159 = vector.extract_strided_slice %124 {offsets = [0, 384], sizes = [8, 384], strides = [1, 1]} : vector<8x768xf32> to vector<8x384xf32>
    %160 = arith.addf %159, %23 : vector<8x384xf32>
    %161 = vector.extract_strided_slice %127 {offsets = [0, 0], sizes = [8, 256], strides = [1, 1]} : vector<8x384xf32> to vector<8x256xf32>
    %162 = vector.extract_strided_slice %127 {offsets = [0, 256], sizes = [8, 128], strides = [1, 1]} : vector<8x384xf32> to vector<8x128xf32>
    %163 = arith.addf %162, %26 : vector<8x128xf32>
    %164 = vector.extract_strided_slice %160 {offsets = [0, 0], sizes = [8, 128], strides = [1, 1]} : vector<8x384xf32> to vector<8x128xf32>
    %165 = vector.extract_strided_slice %161 {offsets = [0, 0], sizes = [8, 128], strides = [1, 1]} : vector<8x256xf32> to vector<8x128xf32>
    %166 = arith.addf %164, %165 : vector<8x128xf32>
    %167 = arith.negf %166 : vector<8x128xf32>
    %168 = math.exp %167 : vector<8x128xf32>
    %cst_54 = arith.constant 1.000000e+00 : f32
    %169 = vector.broadcast %cst_54 : f32 to vector<8x128xf32>
    %170 = arith.addf %169, %168 : vector<8x128xf32>
    %171 = arith.divf %169, %170 : vector<8x128xf32>
    %172 = vector.extract_strided_slice %160 {offsets = [0, 128], sizes = [8, 128], strides = [1, 1]} : vector<8x384xf32> to vector<8x128xf32>
    %173 = vector.extract_strided_slice %161 {offsets = [0, 128], sizes = [8, 128], strides = [1, 1]} : vector<8x256xf32> to vector<8x128xf32>
    %174 = arith.addf %172, %173 : vector<8x128xf32>
    %175 = arith.negf %174 : vector<8x128xf32>
    %176 = math.exp %175 : vector<8x128xf32>
    %cst_55 = arith.constant 1.000000e+00 : f32
    %177 = vector.broadcast %cst_55 : f32 to vector<8x128xf32>
    %178 = arith.addf %177, %176 : vector<8x128xf32>
    %179 = arith.divf %177, %178 : vector<8x128xf32>
    %180 = vector.extract_strided_slice %160 {offsets = [0, 256], sizes = [8, 128], strides = [1, 1]} : vector<8x384xf32> to vector<8x128xf32>
    %181 = arith.mulf %171, %163 : vector<8x128xf32>
    %182 = arith.addf %180, %181 : vector<8x128xf32>
    %183 = math.tanh %182 : vector<8x128xf32>
    %cst_56 = arith.constant 1.000000e+00 : f32
    %184 = vector.broadcast %cst_56 : f32 to vector<8x128xf32>
    %185 = arith.subf %184, %179 : vector<8x128xf32>
    %186 = arith.mulf %185, %183 : vector<8x128xf32>
    %187 = arith.mulf %179, %121 : vector<8x128xf32>
    %188 = arith.addf %186, %187 : vector<8x128xf32>
    %c3_i32 = arith.constant 3 : i32
    %189 = arith.truncf %158 : vector<8x128xf32> to vector<8x128xbf16>
    %c0_57 = arith.constant 0 : index
    %c0_58 = arith.constant 0 : index
    %190 = vector.load %arg5[%c0_57, %c0_58] : memref<128x768xbf16, #tpu.memory_space<vmem>>, vector<128x768xbf16>
    %cst_59 = arith.constant dense<0.000000e+00> : vector<8x768xf32>
    %191 = tpu.matmul %189, %190, %cst_59 {dimension_numbers = #tpu.dot_dimension_numbers<[1], [0], [0], [1], [0, 0, 1, 1], [], []>} : vector<8x128xbf16>, vector<128x768xbf16>, vector<8x768xf32> -> vector<8x768xf32>
    %192 = arith.truncf %188 : vector<8x128xf32> to vector<8x128xbf16>
    %c0_60 = arith.constant 0 : index
    %c0_61 = arith.constant 0 : index
    %193 = vector.load %arg8[%c0_60, %c0_61] : memref<128x384xbf16, #tpu.memory_space<vmem>>, vector<128x384xbf16>
    %cst_62 = arith.constant dense<0.000000e+00> : vector<8x384xf32>
    %194 = tpu.matmul %192, %193, %cst_62 {dimension_numbers = #tpu.dot_dimension_numbers<[1], [0], [0], [1], [0, 0, 1, 1], [], []>} : vector<8x128xbf16>, vector<128x384xbf16>, vector<8x384xf32> -> vector<8x384xf32>
    %195 = arith.index_cast %c3_i32 : i32 to index
    %c0_63 = arith.constant 0 : index
    %c0_64 = arith.constant 0 : index
    %196 = vector.load %arg20[%195, %c0_63, %c0_64] : memref<8x8x384xf32, #tpu.memory_space<vmem>>, vector<1x8x384xf32>
    %197 = vector.shape_cast %196 : vector<1x8x384xf32> to vector<8x384xf32>
    %198 = vector.extract_strided_slice %191 {offsets = [0, 0], sizes = [8, 256], strides = [1, 1]} : vector<8x768xf32> to vector<8x256xf32>
    %199 = vector.extract_strided_slice %191 {offsets = [0, 256], sizes = [8, 128], strides = [1, 1]} : vector<8x768xf32> to vector<8x128xf32>
    %200 = arith.addf %199, %20 : vector<8x128xf32>
    %201 = vector.extract_strided_slice %197 {offsets = [0, 0], sizes = [8, 128], strides = [1, 1]} : vector<8x384xf32> to vector<8x128xf32>
    %202 = vector.extract_strided_slice %198 {offsets = [0, 0], sizes = [8, 128], strides = [1, 1]} : vector<8x256xf32> to vector<8x128xf32>
    %203 = arith.addf %201, %202 : vector<8x128xf32>
    %204 = arith.negf %203 : vector<8x128xf32>
    %205 = math.exp %204 : vector<8x128xf32>
    %cst_65 = arith.constant 1.000000e+00 : f32
    %206 = vector.broadcast %cst_65 : f32 to vector<8x128xf32>
    %207 = arith.addf %206, %205 : vector<8x128xf32>
    %208 = arith.divf %206, %207 : vector<8x128xf32>
    %209 = vector.extract_strided_slice %197 {offsets = [0, 128], sizes = [8, 128], strides = [1, 1]} : vector<8x384xf32> to vector<8x128xf32>
    %210 = vector.extract_strided_slice %198 {offsets = [0, 128], sizes = [8, 128], strides = [1, 1]} : vector<8x256xf32> to vector<8x128xf32>
    %211 = arith.addf %209, %210 : vector<8x128xf32>
    %212 = arith.negf %211 : vector<8x128xf32>
    %213 = math.exp %212 : vector<8x128xf32>
    %cst_66 = arith.constant 1.000000e+00 : f32
    %214 = vector.broadcast %cst_66 : f32 to vector<8x128xf32>
    %215 = arith.addf %214, %213 : vector<8x128xf32>
    %216 = arith.divf %214, %215 : vector<8x128xf32>
    %217 = vector.extract_strided_slice %197 {offsets = [0, 256], sizes = [8, 128], strides = [1, 1]} : vector<8x384xf32> to vector<8x128xf32>
    %218 = arith.mulf %208, %200 : vector<8x128xf32>
    %219 = arith.addf %217, %218 : vector<8x128xf32>
    %220 = math.tanh %219 : vector<8x128xf32>
    %cst_67 = arith.constant 1.000000e+00 : f32
    %221 = vector.broadcast %cst_67 : f32 to vector<8x128xf32>
    %222 = arith.subf %221, %216 : vector<8x128xf32>
    %223 = arith.mulf %222, %220 : vector<8x128xf32>
    %224 = arith.mulf %216, %158 : vector<8x128xf32>
    %225 = arith.addf %223, %224 : vector<8x128xf32>
    %226 = vector.extract_strided_slice %191 {offsets = [0, 384], sizes = [8, 384], strides = [1, 1]} : vector<8x768xf32> to vector<8x384xf32>
    %227 = arith.addf %226, %23 : vector<8x384xf32>
    %228 = vector.extract_strided_slice %194 {offsets = [0, 0], sizes = [8, 256], strides = [1, 1]} : vector<8x384xf32> to vector<8x256xf32>
    %229 = vector.extract_strided_slice %194 {offsets = [0, 256], sizes = [8, 128], strides = [1, 1]} : vector<8x384xf32> to vector<8x128xf32>
    %230 = arith.addf %229, %26 : vector<8x128xf32>
    %231 = vector.extract_strided_slice %227 {offsets = [0, 0], sizes = [8, 128], strides = [1, 1]} : vector<8x384xf32> to vector<8x128xf32>
    %232 = vector.extract_strided_slice %228 {offsets = [0, 0], sizes = [8, 128], strides = [1, 1]} : vector<8x256xf32> to vector<8x128xf32>
    %233 = arith.addf %231, %232 : vector<8x128xf32>
    %234 = arith.negf %233 : vector<8x128xf32>
    %235 = math.exp %234 : vector<8x128xf32>
    %cst_68 = arith.constant 1.000000e+00 : f32
    %236 = vector.broadcast %cst_68 : f32 to vector<8x128xf32>
    %237 = arith.addf %236, %235 : vector<8x128xf32>
    %238 = arith.divf %236, %237 : vector<8x128xf32>
    %239 = vector.extract_strided_slice %227 {offsets = [0, 128], sizes = [8, 128], strides = [1, 1]} : vector<8x384xf32> to vector<8x128xf32>
    %240 = vector.extract_strided_slice %228 {offsets = [0, 128], sizes = [8, 128], strides = [1, 1]} : vector<8x256xf32> to vector<8x128xf32>
    %241 = arith.addf %239, %240 : vector<8x128xf32>
    %242 = arith.negf %241 : vector<8x128xf32>
    %243 = math.exp %242 : vector<8x128xf32>
    %cst_69 = arith.constant 1.000000e+00 : f32
    %244 = vector.broadcast %cst_69 : f32 to vector<8x128xf32>
    %245 = arith.addf %244, %243 : vector<8x128xf32>
    %246 = arith.divf %244, %245 : vector<8x128xf32>
    %247 = vector.extract_strided_slice %227 {offsets = [0, 256], sizes = [8, 128], strides = [1, 1]} : vector<8x384xf32> to vector<8x128xf32>
    %248 = arith.mulf %238, %230 : vector<8x128xf32>
    %249 = arith.addf %247, %248 : vector<8x128xf32>
    %250 = math.tanh %249 : vector<8x128xf32>
    %cst_70 = arith.constant 1.000000e+00 : f32
    %251 = vector.broadcast %cst_70 : f32 to vector<8x128xf32>
    %252 = arith.subf %251, %246 : vector<8x128xf32>
    %253 = arith.mulf %252, %250 : vector<8x128xf32>
    %254 = arith.mulf %246, %188 : vector<8x128xf32>
    %255 = arith.addf %253, %254 : vector<8x128xf32>
    %c4_i32 = arith.constant 4 : i32
    %256 = arith.truncf %225 : vector<8x128xf32> to vector<8x128xbf16>
    %c0_71 = arith.constant 0 : index
    %c0_72 = arith.constant 0 : index
    %257 = vector.load %arg5[%c0_71, %c0_72] : memref<128x768xbf16, #tpu.memory_space<vmem>>, vector<128x768xbf16>
    %cst_73 = arith.constant dense<0.000000e+00> : vector<8x768xf32>
    %258 = tpu.matmul %256, %257, %cst_73 {dimension_numbers = #tpu.dot_dimension_numbers<[1], [0], [0], [1], [0, 0, 1, 1], [], []>} : vector<8x128xbf16>, vector<128x768xbf16>, vector<8x768xf32> -> vector<8x768xf32>
    %259 = arith.truncf %255 : vector<8x128xf32> to vector<8x128xbf16>
    %c0_74 = arith.constant 0 : index
    %c0_75 = arith.constant 0 : index
    %260 = vector.load %arg8[%c0_74, %c0_75] : memref<128x384xbf16, #tpu.memory_space<vmem>>, vector<128x384xbf16>
    %cst_76 = arith.constant dense<0.000000e+00> : vector<8x384xf32>
    %261 = tpu.matmul %259, %260, %cst_76 {dimension_numbers = #tpu.dot_dimension_numbers<[1], [0], [0], [1], [0, 0, 1, 1], [], []>} : vector<8x128xbf16>, vector<128x384xbf16>, vector<8x384xf32> -> vector<8x384xf32>
    %262 = arith.index_cast %c4_i32 : i32 to index
    %c0_77 = arith.constant 0 : index
    %c0_78 = arith.constant 0 : index
    %263 = vector.load %arg20[%262, %c0_77, %c0_78] : memref<8x8x384xf32, #tpu.memory_space<vmem>>, vector<1x8x384xf32>
    %264 = vector.shape_cast %263 : vector<1x8x384xf32> to vector<8x384xf32>
    %265 = vector.extract_strided_slice %258 {offsets = [0, 0], sizes = [8, 256], strides = [1, 1]} : vector<8x768xf32> to vector<8x256xf32>
    %266 = vector.extract_strided_slice %258 {offsets = [0, 256], sizes = [8, 128], strides = [1, 1]} : vector<8x768xf32> to vector<8x128xf32>
    %267 = arith.addf %266, %20 : vector<8x128xf32>
    %268 = vector.extract_strided_slice %264 {offsets = [0, 0], sizes = [8, 128], strides = [1, 1]} : vector<8x384xf32> to vector<8x128xf32>
    %269 = vector.extract_strided_slice %265 {offsets = [0, 0], sizes = [8, 128], strides = [1, 1]} : vector<8x256xf32> to vector<8x128xf32>
    %270 = arith.addf %268, %269 : vector<8x128xf32>
    %271 = arith.negf %270 : vector<8x128xf32>
    %272 = math.exp %271 : vector<8x128xf32>
    %cst_79 = arith.constant 1.000000e+00 : f32
    %273 = vector.broadcast %cst_79 : f32 to vector<8x128xf32>
    %274 = arith.addf %273, %272 : vector<8x128xf32>
    %275 = arith.divf %273, %274 : vector<8x128xf32>
    %276 = vector.extract_strided_slice %264 {offsets = [0, 128], sizes = [8, 128], strides = [1, 1]} : vector<8x384xf32> to vector<8x128xf32>
    %277 = vector.extract_strided_slice %265 {offsets = [0, 128], sizes = [8, 128], strides = [1, 1]} : vector<8x256xf32> to vector<8x128xf32>
    %278 = arith.addf %276, %277 : vector<8x128xf32>
    %279 = arith.negf %278 : vector<8x128xf32>
    %280 = math.exp %279 : vector<8x128xf32>
    %cst_80 = arith.constant 1.000000e+00 : f32
    %281 = vector.broadcast %cst_80 : f32 to vector<8x128xf32>
    %282 = arith.addf %281, %280 : vector<8x128xf32>
    %283 = arith.divf %281, %282 : vector<8x128xf32>
    %284 = vector.extract_strided_slice %264 {offsets = [0, 256], sizes = [8, 128], strides = [1, 1]} : vector<8x384xf32> to vector<8x128xf32>
    %285 = arith.mulf %275, %267 : vector<8x128xf32>
    %286 = arith.addf %284, %285 : vector<8x128xf32>
    %287 = math.tanh %286 : vector<8x128xf32>
    %cst_81 = arith.constant 1.000000e+00 : f32
    %288 = vector.broadcast %cst_81 : f32 to vector<8x128xf32>
    %289 = arith.subf %288, %283 : vector<8x128xf32>
    %290 = arith.mulf %289, %287 : vector<8x128xf32>
    %291 = arith.mulf %283, %225 : vector<8x128xf32>
    %292 = arith.addf %290, %291 : vector<8x128xf32>
    %293 = vector.extract_strided_slice %258 {offsets = [0, 384], sizes = [8, 384], strides = [1, 1]} : vector<8x768xf32> to vector<8x384xf32>
    %294 = arith.addf %293, %23 : vector<8x384xf32>
    %295 = vector.extract_strided_slice %261 {offsets = [0, 0], sizes = [8, 256], strides = [1, 1]} : vector<8x384xf32> to vector<8x256xf32>
    %296 = vector.extract_strided_slice %261 {offsets = [0, 256], sizes = [8, 128], strides = [1, 1]} : vector<8x384xf32> to vector<8x128xf32>
    %297 = arith.addf %296, %26 : vector<8x128xf32>
    %298 = vector.extract_strided_slice %294 {offsets = [0, 0], sizes = [8, 128], strides = [1, 1]} : vector<8x384xf32> to vector<8x128xf32>
    %299 = vector.extract_strided_slice %295 {offsets = [0, 0], sizes = [8, 128], strides = [1, 1]} : vector<8x256xf32> to vector<8x128xf32>
    %300 = arith.addf %298, %299 : vector<8x128xf32>
    %301 = arith.negf %300 : vector<8x128xf32>
    %302 = math.exp %301 : vector<8x128xf32>
    %cst_82 = arith.constant 1.000000e+00 : f32
    %303 = vector.broadcast %cst_82 : f32 to vector<8x128xf32>
    %304 = arith.addf %303, %302 : vector<8x128xf32>
    %305 = arith.divf %303, %304 : vector<8x128xf32>
    %306 = vector.extract_strided_slice %294 {offsets = [0, 128], sizes = [8, 128], strides = [1, 1]} : vector<8x384xf32> to vector<8x128xf32>
    %307 = vector.extract_strided_slice %295 {offsets = [0, 128], sizes = [8, 128], strides = [1, 1]} : vector<8x256xf32> to vector<8x128xf32>
    %308 = arith.addf %306, %307 : vector<8x128xf32>
    %309 = arith.negf %308 : vector<8x128xf32>
    %310 = math.exp %309 : vector<8x128xf32>
    %cst_83 = arith.constant 1.000000e+00 : f32
    %311 = vector.broadcast %cst_83 : f32 to vector<8x128xf32>
    %312 = arith.addf %311, %310 : vector<8x128xf32>
    %313 = arith.divf %311, %312 : vector<8x128xf32>
    %314 = vector.extract_strided_slice %294 {offsets = [0, 256], sizes = [8, 128], strides = [1, 1]} : vector<8x384xf32> to vector<8x128xf32>
    %315 = arith.mulf %305, %297 : vector<8x128xf32>
    %316 = arith.addf %314, %315 : vector<8x128xf32>
    %317 = math.tanh %316 : vector<8x128xf32>
    %cst_84 = arith.constant 1.000000e+00 : f32
    %318 = vector.broadcast %cst_84 : f32 to vector<8x128xf32>
    %319 = arith.subf %318, %313 : vector<8x128xf32>
    %320 = arith.mulf %319, %317 : vector<8x128xf32>
    %321 = arith.mulf %313, %255 : vector<8x128xf32>
    %322 = arith.addf %320, %321 : vector<8x128xf32>
    %c5_i32 = arith.constant 5 : i32
    %323 = arith.truncf %292 : vector<8x128xf32> to vector<8x128xbf16>
    %c0_85 = arith.constant 0 : index
    %c0_86 = arith.constant 0 : index
    %324 = vector.load %arg5[%c0_85, %c0_86] : memref<128x768xbf16, #tpu.memory_space<vmem>>, vector<128x768xbf16>
    %cst_87 = arith.constant dense<0.000000e+00> : vector<8x768xf32>
    %325 = tpu.matmul %323, %324, %cst_87 {dimension_numbers = #tpu.dot_dimension_numbers<[1], [0], [0], [1], [0, 0, 1, 1], [], []>} : vector<8x128xbf16>, vector<128x768xbf16>, vector<8x768xf32> -> vector<8x768xf32>
    %326 = arith.truncf %322 : vector<8x128xf32> to vector<8x128xbf16>
    %c0_88 = arith.constant 0 : index
    %c0_89 = arith.constant 0 : index
    %327 = vector.load %arg8[%c0_88, %c0_89] : memref<128x384xbf16, #tpu.memory_space<vmem>>, vector<128x384xbf16>
    %cst_90 = arith.constant dense<0.000000e+00> : vector<8x384xf32>
    %328 = tpu.matmul %326, %327, %cst_90 {dimension_numbers = #tpu.dot_dimension_numbers<[1], [0], [0], [1], [0, 0, 1, 1], [], []>} : vector<8x128xbf16>, vector<128x384xbf16>, vector<8x384xf32> -> vector<8x384xf32>
    %329 = arith.index_cast %c5_i32 : i32 to index
    %c0_91 = arith.constant 0 : index
    %c0_92 = arith.constant 0 : index
    %330 = vector.load %arg20[%329, %c0_91, %c0_92] : memref<8x8x384xf32, #tpu.memory_space<vmem>>, vector<1x8x384xf32>
    %331 = vector.shape_cast %330 : vector<1x8x384xf32> to vector<8x384xf32>
    %332 = vector.extract_strided_slice %325 {offsets = [0, 0], sizes = [8, 256], strides = [1, 1]} : vector<8x768xf32> to vector<8x256xf32>
    %333 = vector.extract_strided_slice %325 {offsets = [0, 256], sizes = [8, 128], strides = [1, 1]} : vector<8x768xf32> to vector<8x128xf32>
    %334 = arith.addf %333, %20 : vector<8x128xf32>
    %335 = vector.extract_strided_slice %331 {offsets = [0, 0], sizes = [8, 128], strides = [1, 1]} : vector<8x384xf32> to vector<8x128xf32>
    %336 = vector.extract_strided_slice %332 {offsets = [0, 0], sizes = [8, 128], strides = [1, 1]} : vector<8x256xf32> to vector<8x128xf32>
    %337 = arith.addf %335, %336 : vector<8x128xf32>
    %338 = arith.negf %337 : vector<8x128xf32>
    %339 = math.exp %338 : vector<8x128xf32>
    %cst_93 = arith.constant 1.000000e+00 : f32
    %340 = vector.broadcast %cst_93 : f32 to vector<8x128xf32>
    %341 = arith.addf %340, %339 : vector<8x128xf32>
    %342 = arith.divf %340, %341 : vector<8x128xf32>
    %343 = vector.extract_strided_slice %331 {offsets = [0, 128], sizes = [8, 128], strides = [1, 1]} : vector<8x384xf32> to vector<8x128xf32>
    %344 = vector.extract_strided_slice %332 {offsets = [0, 128], sizes = [8, 128], strides = [1, 1]} : vector<8x256xf32> to vector<8x128xf32>
    %345 = arith.addf %343, %344 : vector<8x128xf32>
    %346 = arith.negf %345 : vector<8x128xf32>
    %347 = math.exp %346 : vector<8x128xf32>
    %cst_94 = arith.constant 1.000000e+00 : f32
    %348 = vector.broadcast %cst_94 : f32 to vector<8x128xf32>
    %349 = arith.addf %348, %347 : vector<8x128xf32>
    %350 = arith.divf %348, %349 : vector<8x128xf32>
    %351 = vector.extract_strided_slice %331 {offsets = [0, 256], sizes = [8, 128], strides = [1, 1]} : vector<8x384xf32> to vector<8x128xf32>
    %352 = arith.mulf %342, %334 : vector<8x128xf32>
    %353 = arith.addf %351, %352 : vector<8x128xf32>
    %354 = math.tanh %353 : vector<8x128xf32>
    %cst_95 = arith.constant 1.000000e+00 : f32
    %355 = vector.broadcast %cst_95 : f32 to vector<8x128xf32>
    %356 = arith.subf %355, %350 : vector<8x128xf32>
    %357 = arith.mulf %356, %354 : vector<8x128xf32>
    %358 = arith.mulf %350, %292 : vector<8x128xf32>
    %359 = arith.addf %357, %358 : vector<8x128xf32>
    %360 = vector.extract_strided_slice %325 {offsets = [0, 384], sizes = [8, 384], strides = [1, 1]} : vector<8x768xf32> to vector<8x384xf32>
    %361 = arith.addf %360, %23 : vector<8x384xf32>
    %362 = vector.extract_strided_slice %328 {offsets = [0, 0], sizes = [8, 256], strides = [1, 1]} : vector<8x384xf32> to vector<8x256xf32>
    %363 = vector.extract_strided_slice %328 {offsets = [0, 256], sizes = [8, 128], strides = [1, 1]} : vector<8x384xf32> to vector<8x128xf32>
    %364 = arith.addf %363, %26 : vector<8x128xf32>
    %365 = vector.extract_strided_slice %361 {offsets = [0, 0], sizes = [8, 128], strides = [1, 1]} : vector<8x384xf32> to vector<8x128xf32>
    %366 = vector.extract_strided_slice %362 {offsets = [0, 0], sizes = [8, 128], strides = [1, 1]} : vector<8x256xf32> to vector<8x128xf32>
    %367 = arith.addf %365, %366 : vector<8x128xf32>
    %368 = arith.negf %367 : vector<8x128xf32>
    %369 = math.exp %368 : vector<8x128xf32>
    %cst_96 = arith.constant 1.000000e+00 : f32
    %370 = vector.broadcast %cst_96 : f32 to vector<8x128xf32>
    %371 = arith.addf %370, %369 : vector<8x128xf32>
    %372 = arith.divf %370, %371 : vector<8x128xf32>
    %373 = vector.extract_strided_slice %361 {offsets = [0, 128], sizes = [8, 128], strides = [1, 1]} : vector<8x384xf32> to vector<8x128xf32>
    %374 = vector.extract_strided_slice %362 {offsets = [0, 128], sizes = [8, 128], strides = [1, 1]} : vector<8x256xf32> to vector<8x128xf32>
    %375 = arith.addf %373, %374 : vector<8x128xf32>
    %376 = arith.negf %375 : vector<8x128xf32>
    %377 = math.exp %376 : vector<8x128xf32>
    %cst_97 = arith.constant 1.000000e+00 : f32
    %378 = vector.broadcast %cst_97 : f32 to vector<8x128xf32>
    %379 = arith.addf %378, %377 : vector<8x128xf32>
    %380 = arith.divf %378, %379 : vector<8x128xf32>
    %381 = vector.extract_strided_slice %361 {offsets = [0, 256], sizes = [8, 128], strides = [1, 1]} : vector<8x384xf32> to vector<8x128xf32>
    %382 = arith.mulf %372, %364 : vector<8x128xf32>
    %383 = arith.addf %381, %382 : vector<8x128xf32>
    %384 = math.tanh %383 : vector<8x128xf32>
    %cst_98 = arith.constant 1.000000e+00 : f32
    %385 = vector.broadcast %cst_98 : f32 to vector<8x128xf32>
    %386 = arith.subf %385, %380 : vector<8x128xf32>
    %387 = arith.mulf %386, %384 : vector<8x128xf32>
    %388 = arith.mulf %380, %322 : vector<8x128xf32>
    %389 = arith.addf %387, %388 : vector<8x128xf32>
    %c6_i32 = arith.constant 6 : i32
    %390 = arith.truncf %359 : vector<8x128xf32> to vector<8x128xbf16>
    %c0_99 = arith.constant 0 : index
    %c0_100 = arith.constant 0 : index
    %391 = vector.load %arg5[%c0_99, %c0_100] : memref<128x768xbf16, #tpu.memory_space<vmem>>, vector<128x768xbf16>
    %cst_101 = arith.constant dense<0.000000e+00> : vector<8x768xf32>
    %392 = tpu.matmul %390, %391, %cst_101 {dimension_numbers = #tpu.dot_dimension_numbers<[1], [0], [0], [1], [0, 0, 1, 1], [], []>} : vector<8x128xbf16>, vector<128x768xbf16>, vector<8x768xf32> -> vector<8x768xf32>
    %393 = arith.truncf %389 : vector<8x128xf32> to vector<8x128xbf16>
    %c0_102 = arith.constant 0 : index
    %c0_103 = arith.constant 0 : index
    %394 = vector.load %arg8[%c0_102, %c0_103] : memref<128x384xbf16, #tpu.memory_space<vmem>>, vector<128x384xbf16>
    %cst_104 = arith.constant dense<0.000000e+00> : vector<8x384xf32>
    %395 = tpu.matmul %393, %394, %cst_104 {dimension_numbers = #tpu.dot_dimension_numbers<[1], [0], [0], [1], [0, 0, 1, 1], [], []>} : vector<8x128xbf16>, vector<128x384xbf16>, vector<8x384xf32> -> vector<8x384xf32>
    %396 = arith.index_cast %c6_i32 : i32 to index
    %c0_105 = arith.constant 0 : index
    %c0_106 = arith.constant 0 : index
    %397 = vector.load %arg20[%396, %c0_105, %c0_106] : memref<8x8x384xf32, #tpu.memory_space<vmem>>, vector<1x8x384xf32>
    %398 = vector.shape_cast %397 : vector<1x8x384xf32> to vector<8x384xf32>
    %399 = vector.extract_strided_slice %392 {offsets = [0, 0], sizes = [8, 256], strides = [1, 1]} : vector<8x768xf32> to vector<8x256xf32>
    %400 = vector.extract_strided_slice %392 {offsets = [0, 256], sizes = [8, 128], strides = [1, 1]} : vector<8x768xf32> to vector<8x128xf32>
    %401 = arith.addf %400, %20 : vector<8x128xf32>
    %402 = vector.extract_strided_slice %398 {offsets = [0, 0], sizes = [8, 128], strides = [1, 1]} : vector<8x384xf32> to vector<8x128xf32>
    %403 = vector.extract_strided_slice %399 {offsets = [0, 0], sizes = [8, 128], strides = [1, 1]} : vector<8x256xf32> to vector<8x128xf32>
    %404 = arith.addf %402, %403 : vector<8x128xf32>
    %405 = arith.negf %404 : vector<8x128xf32>
    %406 = math.exp %405 : vector<8x128xf32>
    %cst_107 = arith.constant 1.000000e+00 : f32
    %407 = vector.broadcast %cst_107 : f32 to vector<8x128xf32>
    %408 = arith.addf %407, %406 : vector<8x128xf32>
    %409 = arith.divf %407, %408 : vector<8x128xf32>
    %410 = vector.extract_strided_slice %398 {offsets = [0, 128], sizes = [8, 128], strides = [1, 1]} : vector<8x384xf32> to vector<8x128xf32>
    %411 = vector.extract_strided_slice %399 {offsets = [0, 128], sizes = [8, 128], strides = [1, 1]} : vector<8x256xf32> to vector<8x128xf32>
    %412 = arith.addf %410, %411 : vector<8x128xf32>
    %413 = arith.negf %412 : vector<8x128xf32>
    %414 = math.exp %413 : vector<8x128xf32>
    %cst_108 = arith.constant 1.000000e+00 : f32
    %415 = vector.broadcast %cst_108 : f32 to vector<8x128xf32>
    %416 = arith.addf %415, %414 : vector<8x128xf32>
    %417 = arith.divf %415, %416 : vector<8x128xf32>
    %418 = vector.extract_strided_slice %398 {offsets = [0, 256], sizes = [8, 128], strides = [1, 1]} : vector<8x384xf32> to vector<8x128xf32>
    %419 = arith.mulf %409, %401 : vector<8x128xf32>
    %420 = arith.addf %418, %419 : vector<8x128xf32>
    %421 = math.tanh %420 : vector<8x128xf32>
    %cst_109 = arith.constant 1.000000e+00 : f32
    %422 = vector.broadcast %cst_109 : f32 to vector<8x128xf32>
    %423 = arith.subf %422, %417 : vector<8x128xf32>
    %424 = arith.mulf %423, %421 : vector<8x128xf32>
    %425 = arith.mulf %417, %359 : vector<8x128xf32>
    %426 = arith.addf %424, %425 : vector<8x128xf32>
    %427 = vector.extract_strided_slice %392 {offsets = [0, 384], sizes = [8, 384], strides = [1, 1]} : vector<8x768xf32> to vector<8x384xf32>
    %428 = arith.addf %427, %23 : vector<8x384xf32>
    %429 = vector.extract_strided_slice %395 {offsets = [0, 0], sizes = [8, 256], strides = [1, 1]} : vector<8x384xf32> to vector<8x256xf32>
    %430 = vector.extract_strided_slice %395 {offsets = [0, 256], sizes = [8, 128], strides = [1, 1]} : vector<8x384xf32> to vector<8x128xf32>
    %431 = arith.addf %430, %26 : vector<8x128xf32>
    %432 = vector.extract_strided_slice %428 {offsets = [0, 0], sizes = [8, 128], strides = [1, 1]} : vector<8x384xf32> to vector<8x128xf32>
    %433 = vector.extract_strided_slice %429 {offsets = [0, 0], sizes = [8, 128], strides = [1, 1]} : vector<8x256xf32> to vector<8x128xf32>
    %434 = arith.addf %432, %433 : vector<8x128xf32>
    %435 = arith.negf %434 : vector<8x128xf32>
    %436 = math.exp %435 : vector<8x128xf32>
    %cst_110 = arith.constant 1.000000e+00 : f32
    %437 = vector.broadcast %cst_110 : f32 to vector<8x128xf32>
    %438 = arith.addf %437, %436 : vector<8x128xf32>
    %439 = arith.divf %437, %438 : vector<8x128xf32>
    %440 = vector.extract_strided_slice %428 {offsets = [0, 128], sizes = [8, 128], strides = [1, 1]} : vector<8x384xf32> to vector<8x128xf32>
    %441 = vector.extract_strided_slice %429 {offsets = [0, 128], sizes = [8, 128], strides = [1, 1]} : vector<8x256xf32> to vector<8x128xf32>
    %442 = arith.addf %440, %441 : vector<8x128xf32>
    %443 = arith.negf %442 : vector<8x128xf32>
    %444 = math.exp %443 : vector<8x128xf32>
    %cst_111 = arith.constant 1.000000e+00 : f32
    %445 = vector.broadcast %cst_111 : f32 to vector<8x128xf32>
    %446 = arith.addf %445, %444 : vector<8x128xf32>
    %447 = arith.divf %445, %446 : vector<8x128xf32>
    %448 = vector.extract_strided_slice %428 {offsets = [0, 256], sizes = [8, 128], strides = [1, 1]} : vector<8x384xf32> to vector<8x128xf32>
    %449 = arith.mulf %439, %431 : vector<8x128xf32>
    %450 = arith.addf %448, %449 : vector<8x128xf32>
    %451 = math.tanh %450 : vector<8x128xf32>
    %cst_112 = arith.constant 1.000000e+00 : f32
    %452 = vector.broadcast %cst_112 : f32 to vector<8x128xf32>
    %453 = arith.subf %452, %447 : vector<8x128xf32>
    %454 = arith.mulf %453, %451 : vector<8x128xf32>
    %455 = arith.mulf %447, %389 : vector<8x128xf32>
    %456 = arith.addf %454, %455 : vector<8x128xf32>
    %c7_i32 = arith.constant 7 : i32
    %457 = arith.truncf %426 : vector<8x128xf32> to vector<8x128xbf16>
    %c0_113 = arith.constant 0 : index
    %c0_114 = arith.constant 0 : index
    %458 = vector.load %arg5[%c0_113, %c0_114] : memref<128x768xbf16, #tpu.memory_space<vmem>>, vector<128x768xbf16>
    %cst_115 = arith.constant dense<0.000000e+00> : vector<8x768xf32>
    %459 = tpu.matmul %457, %458, %cst_115 {dimension_numbers = #tpu.dot_dimension_numbers<[1], [0], [0], [1], [0, 0, 1, 1], [], []>} : vector<8x128xbf16>, vector<128x768xbf16>, vector<8x768xf32> -> vector<8x768xf32>
    %460 = arith.truncf %456 : vector<8x128xf32> to vector<8x128xbf16>
    %c0_116 = arith.constant 0 : index
    %c0_117 = arith.constant 0 : index
    %461 = vector.load %arg8[%c0_116, %c0_117] : memref<128x384xbf16, #tpu.memory_space<vmem>>, vector<128x384xbf16>
    %cst_118 = arith.constant dense<0.000000e+00> : vector<8x384xf32>
    %462 = tpu.matmul %460, %461, %cst_118 {dimension_numbers = #tpu.dot_dimension_numbers<[1], [0], [0], [1], [0, 0, 1, 1], [], []>} : vector<8x128xbf16>, vector<128x384xbf16>, vector<8x384xf32> -> vector<8x384xf32>
    %463 = arith.index_cast %c7_i32 : i32 to index
    %c0_119 = arith.constant 0 : index
    %c0_120 = arith.constant 0 : index
    %464 = vector.load %arg20[%463, %c0_119, %c0_120] : memref<8x8x384xf32, #tpu.memory_space<vmem>>, vector<1x8x384xf32>
    %465 = vector.shape_cast %464 : vector<1x8x384xf32> to vector<8x384xf32>
    %466 = vector.extract_strided_slice %459 {offsets = [0, 0], sizes = [8, 256], strides = [1, 1]} : vector<8x768xf32> to vector<8x256xf32>
    %467 = vector.extract_strided_slice %459 {offsets = [0, 256], sizes = [8, 128], strides = [1, 1]} : vector<8x768xf32> to vector<8x128xf32>
    %468 = arith.addf %467, %20 : vector<8x128xf32>
    %469 = vector.extract_strided_slice %465 {offsets = [0, 0], sizes = [8, 128], strides = [1, 1]} : vector<8x384xf32> to vector<8x128xf32>
    %470 = vector.extract_strided_slice %466 {offsets = [0, 0], sizes = [8, 128], strides = [1, 1]} : vector<8x256xf32> to vector<8x128xf32>
    %471 = arith.addf %469, %470 : vector<8x128xf32>
    %472 = arith.negf %471 : vector<8x128xf32>
    %473 = math.exp %472 : vector<8x128xf32>
    %cst_121 = arith.constant 1.000000e+00 : f32
    %474 = vector.broadcast %cst_121 : f32 to vector<8x128xf32>
    %475 = arith.addf %474, %473 : vector<8x128xf32>
    %476 = arith.divf %474, %475 : vector<8x128xf32>
    %477 = vector.extract_strided_slice %465 {offsets = [0, 128], sizes = [8, 128], strides = [1, 1]} : vector<8x384xf32> to vector<8x128xf32>
    %478 = vector.extract_strided_slice %466 {offsets = [0, 128], sizes = [8, 128], strides = [1, 1]} : vector<8x256xf32> to vector<8x128xf32>
    %479 = arith.addf %477, %478 : vector<8x128xf32>
    %480 = arith.negf %479 : vector<8x128xf32>
    %481 = math.exp %480 : vector<8x128xf32>
    %cst_122 = arith.constant 1.000000e+00 : f32
    %482 = vector.broadcast %cst_122 : f32 to vector<8x128xf32>
    %483 = arith.addf %482, %481 : vector<8x128xf32>
    %484 = arith.divf %482, %483 : vector<8x128xf32>
    %485 = vector.extract_strided_slice %465 {offsets = [0, 256], sizes = [8, 128], strides = [1, 1]} : vector<8x384xf32> to vector<8x128xf32>
    %486 = arith.mulf %476, %468 : vector<8x128xf32>
    %487 = arith.addf %485, %486 : vector<8x128xf32>
    %488 = math.tanh %487 : vector<8x128xf32>
    %cst_123 = arith.constant 1.000000e+00 : f32
    %489 = vector.broadcast %cst_123 : f32 to vector<8x128xf32>
    %490 = arith.subf %489, %484 : vector<8x128xf32>
    %491 = arith.mulf %490, %488 : vector<8x128xf32>
    %492 = arith.mulf %484, %426 : vector<8x128xf32>
    %493 = arith.addf %491, %492 : vector<8x128xf32>
    %494 = vector.extract_strided_slice %459 {offsets = [0, 384], sizes = [8, 384], strides = [1, 1]} : vector<8x768xf32> to vector<8x384xf32>
    %495 = arith.addf %494, %23 : vector<8x384xf32>
    %496 = vector.extract_strided_slice %462 {offsets = [0, 0], sizes = [8, 256], strides = [1, 1]} : vector<8x384xf32> to vector<8x256xf32>
    %497 = vector.extract_strided_slice %462 {offsets = [0, 256], sizes = [8, 128], strides = [1, 1]} : vector<8x384xf32> to vector<8x128xf32>
    %498 = arith.addf %497, %26 : vector<8x128xf32>
    %499 = vector.extract_strided_slice %495 {offsets = [0, 0], sizes = [8, 128], strides = [1, 1]} : vector<8x384xf32> to vector<8x128xf32>
    %500 = vector.extract_strided_slice %496 {offsets = [0, 0], sizes = [8, 128], strides = [1, 1]} : vector<8x256xf32> to vector<8x128xf32>
    %501 = arith.addf %499, %500 : vector<8x128xf32>
    %502 = arith.negf %501 : vector<8x128xf32>
    %503 = math.exp %502 : vector<8x128xf32>
    %cst_124 = arith.constant 1.000000e+00 : f32
    %504 = vector.broadcast %cst_124 : f32 to vector<8x128xf32>
    %505 = arith.addf %504, %503 : vector<8x128xf32>
    %506 = arith.divf %504, %505 : vector<8x128xf32>
    %507 = vector.extract_strided_slice %495 {offsets = [0, 128], sizes = [8, 128], strides = [1, 1]} : vector<8x384xf32> to vector<8x128xf32>
    %508 = vector.extract_strided_slice %496 {offsets = [0, 128], sizes = [8, 128], strides = [1, 1]} : vector<8x256xf32> to vector<8x128xf32>
    %509 = arith.addf %507, %508 : vector<8x128xf32>
    %510 = arith.negf %509 : vector<8x128xf32>
    %511 = math.exp %510 : vector<8x128xf32>
    %cst_125 = arith.constant 1.000000e+00 : f32
    %512 = vector.broadcast %cst_125 : f32 to vector<8x128xf32>
    %513 = arith.addf %512, %511 : vector<8x128xf32>
    %514 = arith.divf %512, %513 : vector<8x128xf32>
    %515 = vector.extract_strided_slice %495 {offsets = [0, 256], sizes = [8, 128], strides = [1, 1]} : vector<8x384xf32> to vector<8x128xf32>
    %516 = arith.mulf %506, %498 : vector<8x128xf32>
    %517 = arith.addf %515, %516 : vector<8x128xf32>
    %518 = math.tanh %517 : vector<8x128xf32>
    %cst_126 = arith.constant 1.000000e+00 : f32
    %519 = vector.broadcast %cst_126 : f32 to vector<8x128xf32>
    %520 = arith.subf %519, %514 : vector<8x128xf32>
    %521 = arith.mulf %520, %518 : vector<8x128xf32>
    %522 = arith.mulf %514, %456 : vector<8x128xf32>
    %523 = arith.addf %521, %522 : vector<8x128xf32>
    %c7_i32_127 = arith.constant 7 : i32
    %524 = arith.truncf %493 : vector<8x128xf32> to vector<8x128xbf16>
    %c0_128 = arith.constant 0 : index
    %c384 = arith.constant 384 : index
    %525 = vector.load %arg5[%c0_128, %c384] : memref<128x768xbf16, #tpu.memory_space<vmem>>, vector<128x384xbf16>
    %cst_129 = arith.constant dense<0.000000e+00> : vector<8x384xf32>
    %526 = tpu.matmul %524, %525, %cst_129 {dimension_numbers = #tpu.dot_dimension_numbers<[1], [0], [0], [1], [0, 0, 1, 1], [], []>} : vector<8x128xbf16>, vector<128x384xbf16>, vector<8x384xf32> -> vector<8x384xf32>
    %527 = arith.addf %526, %23 : vector<8x384xf32>
    %528 = arith.truncf %523 : vector<8x128xf32> to vector<8x128xbf16>
    %c0_130 = arith.constant 0 : index
    %c0_131 = arith.constant 0 : index
    %529 = vector.load %arg8[%c0_130, %c0_131] : memref<128x384xbf16, #tpu.memory_space<vmem>>, vector<128x384xbf16>
    %cst_132 = arith.constant dense<0.000000e+00> : vector<8x384xf32>
    %530 = tpu.matmul %528, %529, %cst_132 {dimension_numbers = #tpu.dot_dimension_numbers<[1], [0], [0], [1], [0, 0, 1, 1], [], []>} : vector<8x128xbf16>, vector<128x384xbf16>, vector<8x384xf32> -> vector<8x384xf32>
    %531 = vector.extract_strided_slice %530 {offsets = [0, 0], sizes = [8, 256], strides = [1, 1]} : vector<8x384xf32> to vector<8x256xf32>
    %532 = vector.extract_strided_slice %530 {offsets = [0, 256], sizes = [8, 128], strides = [1, 1]} : vector<8x384xf32> to vector<8x128xf32>
    %533 = arith.addf %532, %26 : vector<8x128xf32>
    %534 = vector.extract_strided_slice %527 {offsets = [0, 0], sizes = [8, 128], strides = [1, 1]} : vector<8x384xf32> to vector<8x128xf32>
    %535 = vector.extract_strided_slice %531 {offsets = [0, 0], sizes = [8, 128], strides = [1, 1]} : vector<8x256xf32> to vector<8x128xf32>
    %536 = arith.addf %534, %535 : vector<8x128xf32>
    %537 = arith.negf %536 : vector<8x128xf32>
    %538 = math.exp %537 : vector<8x128xf32>
    %cst_133 = arith.constant 1.000000e+00 : f32
    %539 = vector.broadcast %cst_133 : f32 to vector<8x128xf32>
    %540 = arith.addf %539, %538 : vector<8x128xf32>
    %541 = arith.divf %539, %540 : vector<8x128xf32>
    %542 = vector.extract_strided_slice %527 {offsets = [0, 128], sizes = [8, 128], strides = [1, 1]} : vector<8x384xf32> to vector<8x128xf32>
    %543 = vector.extract_strided_slice %531 {offsets = [0, 128], sizes = [8, 128], strides = [1, 1]} : vector<8x256xf32> to vector<8x128xf32>
    %544 = arith.addf %542, %543 : vector<8x128xf32>
    %545 = arith.negf %544 : vector<8x128xf32>
    %546 = math.exp %545 : vector<8x128xf32>
    %cst_134 = arith.constant 1.000000e+00 : f32
    %547 = vector.broadcast %cst_134 : f32 to vector<8x128xf32>
    %548 = arith.addf %547, %546 : vector<8x128xf32>
    %549 = arith.divf %547, %548 : vector<8x128xf32>
    %550 = vector.extract_strided_slice %527 {offsets = [0, 256], sizes = [8, 128], strides = [1, 1]} : vector<8x384xf32> to vector<8x128xf32>
    %551 = arith.mulf %541, %533 : vector<8x128xf32>
    %552 = arith.addf %550, %551 : vector<8x128xf32>
    %553 = math.tanh %552 : vector<8x128xf32>
    %cst_135 = arith.constant 1.000000e+00 : f32
    %554 = vector.broadcast %cst_135 : f32 to vector<8x128xf32>
    %555 = arith.subf %554, %549 : vector<8x128xf32>
    %556 = arith.mulf %555, %553 : vector<8x128xf32>
    %557 = arith.mulf %549, %523 : vector<8x128xf32>
    %558 = arith.addf %556, %557 : vector<8x128xf32>
    %559 = arith.truncf %558 : vector<8x128xf32> to vector<8x128xbf16>
    %c0_136 = arith.constant 0 : index
    %c0_137 = arith.constant 0 : index
    %560 = vector.load %arg10[%c0_136, %c0_137] : memref<128x128xbf16, #tpu.memory_space<vmem>>, vector<128x128xbf16>
    %cst_138 = arith.constant dense<0.000000e+00> : vector<8x128xf32>
    %561 = tpu.matmul %559, %560, %cst_138 {dimension_numbers = #tpu.dot_dimension_numbers<[1], [0], [0], [1], [0, 0, 1, 1], [], []>} : vector<8x128xbf16>, vector<128x128xbf16>, vector<8x128xf32> -> vector<8x128xf32>
    %c0_139 = arith.constant 0 : index
    %c0_140 = arith.constant 0 : index
    %562 = vector.load %arg11[%c0_139, %c0_140] : memref<1x128xf32, #tpu.memory_space<vmem>>, vector<1x128xf32>
    %563 = vector.broadcast %562 : vector<1x128xf32> to vector<8x128xf32>
    %564 = arith.addf %561, %563 : vector<8x128xf32>
    %cst_141 = arith.constant 0.000000e+00 : f32
    %565 = vector.broadcast %cst_141 : f32 to vector<8x128xf32>
    %566 = arith.maximumf %564, %565 : vector<8x128xf32>
    %567 = arith.truncf %566 : vector<8x128xf32> to vector<8x128xbf16>
    %c0_142 = arith.constant 0 : index
    %c0_143 = arith.constant 0 : index
    %568 = vector.load %arg12[%c0_142, %c0_143] : memref<128x256xbf16, #tpu.memory_space<vmem>>, vector<128x256xbf16>
    %cst_144 = arith.constant dense<0.000000e+00> : vector<8x256xf32>
    %569 = tpu.matmul %567, %568, %cst_144 {dimension_numbers = #tpu.dot_dimension_numbers<[1], [0], [0], [1], [0, 0, 1, 1], [], []>} : vector<8x128xbf16>, vector<128x256xbf16>, vector<8x256xf32> -> vector<8x256xf32>
    %c0_145 = arith.constant 0 : index
    %c0_146 = arith.constant 0 : index
    %570 = vector.load %arg13[%c0_145, %c0_146] : memref<1x256xf32, #tpu.memory_space<vmem>>, vector<1x256xf32>
    %571 = vector.broadcast %570 : vector<1x256xf32> to vector<8x256xf32>
    %572 = arith.addf %569, %571 : vector<8x256xf32>
    %cst_147 = arith.constant 0.000000e+00 : f32
    %573 = vector.broadcast %cst_147 : f32 to vector<8x256xf32>
    %574 = arith.maximumf %572, %573 : vector<8x256xf32>
    %575 = arith.truncf %574 : vector<8x256xf32> to vector<8x256xbf16>
    %c0_148 = arith.constant 0 : index
    %c0_149 = arith.constant 0 : index
    %576 = vector.load %arg14[%c0_148, %c0_149] : memref<256x128xbf16, #tpu.memory_space<vmem>>, vector<256x128xbf16>
    %cst_150 = arith.constant dense<0.000000e+00> : vector<8x128xf32>
    %577 = tpu.matmul %575, %576, %cst_150 {dimension_numbers = #tpu.dot_dimension_numbers<[1], [0], [0], [1], [0, 0, 1, 1], [], []>} : vector<8x256xbf16>, vector<256x128xbf16>, vector<8x128xf32> -> vector<8x128xf32>
    %c0_151 = arith.constant 0 : index
    %c0_152 = arith.constant 0 : index
    %578 = memref.load %arg18[%c0_151, %c0_152] : memref<1x1xf32, #tpu.memory_space<smem>>
    %c0_153 = arith.constant 0 : index
    %c0_154 = arith.constant 0 : index
    %579 = vector.load %arg17[%c0_153, %c0_154] : memref<1x128xf32, #tpu.memory_space<vmem>>, vector<1x128xf32>
    %580 = vector.shape_cast %579 : vector<1x128xf32> to vector<1x128xf32>
    %581 = vector.broadcast %580 : vector<1x128xf32> to vector<128x128xf32>
    %c0_155 = arith.constant 0 : index
    %c0_156 = arith.constant 0 : index
    %582 = vector.load %arg21[%c0_155, %c0_156] : memref<128x128xf32, #tpu.memory_space<vmem>>, vector<128x128xf32>
    %583 = vector.extract_strided_slice %577 {offsets = [0, 0], sizes = [1, 128], strides = [1, 1]} : vector<8x128xf32> to vector<1x128xf32>
    %584 = vector.broadcast %583 : vector<1x128xf32> to vector<128x128xf32>
    %585 = arith.addf %582, %584 : vector<128x128xf32>
    %cst_157 = arith.constant 0.000000e+00 : f32
    %586 = vector.broadcast %cst_157 : f32 to vector<128x128xf32>
    %587 = arith.maximumf %585, %586 : vector<128x128xf32>
    %588 = arith.mulf %587, %581 : vector<128x128xf32>
    %cst_158 = arith.constant dense<0.000000e+00> : vector<128xf32>
    %589 = vector.multi_reduction <add>, %588, %cst_158 [1] : vector<128x128xf32> to vector<128xf32>
    %590 = vector.broadcast %578 : f32 to vector<128xf32>
    %591 = arith.addf %589, %590 : vector<128xf32>
    %c0_159 = arith.constant 0 : index
    %c0_160 = arith.constant 0 : index
    %592 = vector.load %arg19[%c0_159, %c0_160] : memref<8x128xf32, #tpu.memory_space<vmem>>, vector<1x128xf32>
    %593 = vector.shape_cast %592 : vector<1x128xf32> to vector<128xf32>
    %594 = vector.shape_cast %591 : vector<128xf32> to vector<1x128xf32>
    tpu.vector_store %arg19[%c0_159, %c0_160], %594 {strides = array<i32>} : memref<8x128xf32, #tpu.memory_space<vmem>>, vector<1x128xf32>,
    %595 = vector.extract_strided_slice %577 {offsets = [1, 0], sizes = [1, 128], strides = [1, 1]} : vector<8x128xf32> to vector<1x128xf32>
    %596 = vector.broadcast %595 : vector<1x128xf32> to vector<128x128xf32>
    %597 = arith.addf %582, %596 : vector<128x128xf32>
    %cst_161 = arith.constant 0.000000e+00 : f32
    %598 = vector.broadcast %cst_161 : f32 to vector<128x128xf32>
    %599 = arith.maximumf %597, %598 : vector<128x128xf32>
    %600 = arith.mulf %599, %581 : vector<128x128xf32>
    %cst_162 = arith.constant dense<0.000000e+00> : vector<128xf32>
    %601 = vector.multi_reduction <add>, %600, %cst_162 [1] : vector<128x128xf32> to vector<128xf32>
    %602 = vector.broadcast %578 : f32 to vector<128xf32>
    %603 = arith.addf %601, %602 : vector<128xf32>
    %c1 = arith.constant 1 : index
    %c0_163 = arith.constant 0 : index
    %604 = vector.load %arg19[%c1, %c0_163] : memref<8x128xf32, #tpu.memory_space<vmem>>, vector<1x128xf32>
    %605 = vector.shape_cast %604 : vector<1x128xf32> to vector<128xf32>
    %606 = vector.shape_cast %603 : vector<128xf32> to vector<1x128xf32>
    tpu.vector_store %arg19[%c1, %c0_163], %606 {strides = array<i32>} : memref<8x128xf32, #tpu.memory_space<vmem>>, vector<1x128xf32>,
    %607 = vector.extract_strided_slice %577 {offsets = [2, 0], sizes = [1, 128], strides = [1, 1]} : vector<8x128xf32> to vector<1x128xf32>
    %608 = vector.broadcast %607 : vector<1x128xf32> to vector<128x128xf32>
    %609 = arith.addf %582, %608 : vector<128x128xf32>
    %cst_164 = arith.constant 0.000000e+00 : f32
    %610 = vector.broadcast %cst_164 : f32 to vector<128x128xf32>
    %611 = arith.maximumf %609, %610 : vector<128x128xf32>
    %612 = arith.mulf %611, %581 : vector<128x128xf32>
    %cst_165 = arith.constant dense<0.000000e+00> : vector<128xf32>
    %613 = vector.multi_reduction <add>, %612, %cst_165 [1] : vector<128x128xf32> to vector<128xf32>
    %614 = vector.broadcast %578 : f32 to vector<128xf32>
    %615 = arith.addf %613, %614 : vector<128xf32>
    %c2 = arith.constant 2 : index
    %c0_166 = arith.constant 0 : index
    %616 = vector.load %arg19[%c2, %c0_166] : memref<8x128xf32, #tpu.memory_space<vmem>>, vector<1x128xf32>
    %617 = vector.shape_cast %616 : vector<1x128xf32> to vector<128xf32>
    %618 = vector.shape_cast %615 : vector<128xf32> to vector<1x128xf32>
    tpu.vector_store %arg19[%c2, %c0_166], %618 {strides = array<i32>} : memref<8x128xf32, #tpu.memory_space<vmem>>, vector<1x128xf32>,
    %619 = vector.extract_strided_slice %577 {offsets = [3, 0], sizes = [1, 128], strides = [1, 1]} : vector<8x128xf32> to vector<1x128xf32>
    %620 = vector.broadcast %619 : vector<1x128xf32> to vector<128x128xf32>
    %621 = arith.addf %582, %620 : vector<128x128xf32>
    %cst_167 = arith.constant 0.000000e+00 : f32
    %622 = vector.broadcast %cst_167 : f32 to vector<128x128xf32>
    %623 = arith.maximumf %621, %622 : vector<128x128xf32>
    %624 = arith.mulf %623, %581 : vector<128x128xf32>
    %cst_168 = arith.constant dense<0.000000e+00> : vector<128xf32>
    %625 = vector.multi_reduction <add>, %624, %cst_168 [1] : vector<128x128xf32> to vector<128xf32>
    %626 = vector.broadcast %578 : f32 to vector<128xf32>
    %627 = arith.addf %625, %626 : vector<128xf32>
    %c3 = arith.constant 3 : index
    %c0_169 = arith.constant 0 : index
    %628 = vector.load %arg19[%c3, %c0_169] : memref<8x128xf32, #tpu.memory_space<vmem>>, vector<1x128xf32>
    %629 = vector.shape_cast %628 : vector<1x128xf32> to vector<128xf32>
    %630 = vector.shape_cast %627 : vector<128xf32> to vector<1x128xf32>
    tpu.vector_store %arg19[%c3, %c0_169], %630 {strides = array<i32>} : memref<8x128xf32, #tpu.memory_space<vmem>>, vector<1x128xf32>,
    %631 = vector.extract_strided_slice %577 {offsets = [4, 0], sizes = [1, 128], strides = [1, 1]} : vector<8x128xf32> to vector<1x128xf32>
    %632 = vector.broadcast %631 : vector<1x128xf32> to vector<128x128xf32>
    %633 = arith.addf %582, %632 : vector<128x128xf32>
    %cst_170 = arith.constant 0.000000e+00 : f32
    %634 = vector.broadcast %cst_170 : f32 to vector<128x128xf32>
    %635 = arith.maximumf %633, %634 : vector<128x128xf32>
    %636 = arith.mulf %635, %581 : vector<128x128xf32>
    %cst_171 = arith.constant dense<0.000000e+00> : vector<128xf32>
    %637 = vector.multi_reduction <add>, %636, %cst_171 [1] : vector<128x128xf32> to vector<128xf32>
    %638 = vector.broadcast %578 : f32 to vector<128xf32>
    %639 = arith.addf %637, %638 : vector<128xf32>
    %c4 = arith.constant 4 : index
    %c0_172 = arith.constant 0 : index
    %640 = vector.load %arg19[%c4, %c0_172] : memref<8x128xf32, #tpu.memory_space<vmem>>, vector<1x128xf32>
    %641 = vector.shape_cast %640 : vector<1x128xf32> to vector<128xf32>
    %642 = vector.shape_cast %639 : vector<128xf32> to vector<1x128xf32>
    tpu.vector_store %arg19[%c4, %c0_172], %642 {strides = array<i32>} : memref<8x128xf32, #tpu.memory_space<vmem>>, vector<1x128xf32>,
    %643 = vector.extract_strided_slice %577 {offsets = [5, 0], sizes = [1, 128], strides = [1, 1]} : vector<8x128xf32> to vector<1x128xf32>
    %644 = vector.broadcast %643 : vector<1x128xf32> to vector<128x128xf32>
    %645 = arith.addf %582, %644 : vector<128x128xf32>
    %cst_173 = arith.constant 0.000000e+00 : f32
    %646 = vector.broadcast %cst_173 : f32 to vector<128x128xf32>
    %647 = arith.maximumf %645, %646 : vector<128x128xf32>
    %648 = arith.mulf %647, %581 : vector<128x128xf32>
    %cst_174 = arith.constant dense<0.000000e+00> : vector<128xf32>
    %649 = vector.multi_reduction <add>, %648, %cst_174 [1] : vector<128x128xf32> to vector<128xf32>
    %650 = vector.broadcast %578 : f32 to vector<128xf32>
    %651 = arith.addf %649, %650 : vector<128xf32>
    %c5 = arith.constant 5 : index
    %c0_175 = arith.constant 0 : index
    %652 = vector.load %arg19[%c5, %c0_175] : memref<8x128xf32, #tpu.memory_space<vmem>>, vector<1x128xf32>
    %653 = vector.shape_cast %652 : vector<1x128xf32> to vector<128xf32>
    %654 = vector.shape_cast %651 : vector<128xf32> to vector<1x128xf32>
    tpu.vector_store %arg19[%c5, %c0_175], %654 {strides = array<i32>} : memref<8x128xf32, #tpu.memory_space<vmem>>, vector<1x128xf32>,
    %655 = vector.extract_strided_slice %577 {offsets = [6, 0], sizes = [1, 128], strides = [1, 1]} : vector<8x128xf32> to vector<1x128xf32>
    %656 = vector.broadcast %655 : vector<1x128xf32> to vector<128x128xf32>
    %657 = arith.addf %582, %656 : vector<128x128xf32>
    %cst_176 = arith.constant 0.000000e+00 : f32
    %658 = vector.broadcast %cst_176 : f32 to vector<128x128xf32>
    %659 = arith.maximumf %657, %658 : vector<128x128xf32>
    %660 = arith.mulf %659, %581 : vector<128x128xf32>
    %cst_177 = arith.constant dense<0.000000e+00> : vector<128xf32>
    %661 = vector.multi_reduction <add>, %660, %cst_177 [1] : vector<128x128xf32> to vector<128xf32>
    %662 = vector.broadcast %578 : f32 to vector<128xf32>
    %663 = arith.addf %661, %662 : vector<128xf32>
    %c6 = arith.constant 6 : index
    %c0_178 = arith.constant 0 : index
    %664 = vector.load %arg19[%c6, %c0_178] : memref<8x128xf32, #tpu.memory_space<vmem>>, vector<1x128xf32>
    %665 = vector.shape_cast %664 : vector<1x128xf32> to vector<128xf32>
    %666 = vector.shape_cast %663 : vector<128xf32> to vector<1x128xf32>
    tpu.vector_store %arg19[%c6, %c0_178], %666 {strides = array<i32>} : memref<8x128xf32, #tpu.memory_space<vmem>>, vector<1x128xf32>,
    %667 = vector.extract_strided_slice %577 {offsets = [7, 0], sizes = [1, 128], strides = [1, 1]} : vector<8x128xf32> to vector<1x128xf32>
    %668 = vector.broadcast %667 : vector<1x128xf32> to vector<128x128xf32>
    %669 = arith.addf %582, %668 : vector<128x128xf32>
    %cst_179 = arith.constant 0.000000e+00 : f32
    %670 = vector.broadcast %cst_179 : f32 to vector<128x128xf32>
    %671 = arith.maximumf %669, %670 : vector<128x128xf32>
    %672 = arith.mulf %671, %581 : vector<128x128xf32>
    %cst_180 = arith.constant dense<0.000000e+00> : vector<128xf32>
    %673 = vector.multi_reduction <add>, %672, %cst_180 [1] : vector<128x128xf32> to vector<128xf32>
    %674 = vector.broadcast %578 : f32 to vector<128xf32>
    %675 = arith.addf %673, %674 : vector<128xf32>
    %c7 = arith.constant 7 : index
    %c0_181 = arith.constant 0 : index
    %676 = vector.load %arg19[%c7, %c0_181] : memref<8x128xf32, #tpu.memory_space<vmem>>, vector<1x128xf32>
    %677 = vector.shape_cast %676 : vector<1x128xf32> to vector<128xf32>
    %678 = vector.shape_cast %675 : vector<128xf32> to vector<1x128xf32>
    tpu.vector_store %arg19[%c7, %c0_181], %678 {strides = array<i32>} : memref<8x128xf32, #tpu.memory_space<vmem>>, vector<1x128xf32>,
    return
  }
  func.func @transform_0(%arg0: i32) -> (i32, i32, i32) {
    %c0_i32 = arith.constant 0 : i32
    %c0_i32_0 = arith.constant 0 : i32
    %c0_i32_1 = arith.constant 0 : i32
    return %arg0, %c0_i32, %c0_i32_0 : i32, i32, i32
  }
  func.func @transform_1(%arg0: i32) -> (i32, i32) {
    %c0_i32 = arith.constant 0 : i32
    %c0_i32_0 = arith.constant 0 : i32
    %c0_i32_1 = arith.constant 0 : i32
    return %c0_i32, %c0_i32_0 : i32, i32
  }
  func.func @transform_2(%arg0: i32) -> (i32, i32) {
    %c0_i32 = arith.constant 0 : i32
    %c0_i32_0 = arith.constant 0 : i32
    %c0_i32_1 = arith.constant 0 : i32
    return %c0_i32, %c0_i32_0 : i32, i32
  }
  func.func @transform_3(%arg0: i32) -> (i32, i32) {
    %c0_i32 = arith.constant 0 : i32
    %c0_i32_0 = arith.constant 0 : i32
    %c0_i32_1 = arith.constant 0 : i32
    return %c0_i32, %c0_i32_0 : i32, i32
  }
  func.func @transform_4(%arg0: i32) -> (i32, i32) {
    %c0_i32 = arith.constant 0 : i32
    %c0_i32_0 = arith.constant 0 : i32
    %c0_i32_1 = arith.constant 0 : i32
    return %c0_i32, %c0_i32_0 : i32, i32
  }
  func.func @transform_5(%arg0: i32) -> (i32, i32) {
    %c0_i32 = arith.constant 0 : i32
    %c0_i32_0 = arith.constant 0 : i32
    %c0_i32_1 = arith.constant 0 : i32
    return %c0_i32, %c0_i32_0 : i32, i32
  }
  func.func @transform_6(%arg0: i32) -> (i32, i32) {
    %c0_i32 = arith.constant 0 : i32
    %c0_i32_0 = arith.constant 0 : i32
    %c0_i32_1 = arith.constant 0 : i32
    return %c0_i32, %c0_i32_0 : i32, i32
  }
  func.func @transform_7(%arg0: i32) -> (i32, i32) {
    %c0_i32 = arith.constant 0 : i32
    %c0_i32_0 = arith.constant 0 : i32
    %c0_i32_1 = arith.constant 0 : i32
    return %c0_i32, %c0_i32_0 : i32, i32
  }
  func.func @transform_8(%arg0: i32) -> (i32, i32) {
    %c0_i32 = arith.constant 0 : i32
    %c0_i32_0 = arith.constant 0 : i32
    %c0_i32_1 = arith.constant 0 : i32
    return %c0_i32, %c0_i32_0 : i32, i32
  }
  func.func @transform_9(%arg0: i32) -> (i32, i32) {
    %c0_i32 = arith.constant 0 : i32
    %c0_i32_0 = arith.constant 0 : i32
    %c0_i32_1 = arith.constant 0 : i32
    return %c0_i32, %c0_i32_0 : i32, i32
  }
  func.func @transform_10(%arg0: i32) -> (i32, i32) {
    %c0_i32 = arith.constant 0 : i32
    %c0_i32_0 = arith.constant 0 : i32
    %c0_i32_1 = arith.constant 0 : i32
    return %c0_i32, %c0_i32_0 : i32, i32
  }
  func.func @transform_11(%arg0: i32) -> (i32, i32) {
    %c0_i32 = arith.constant 0 : i32
    %c0_i32_0 = arith.constant 0 : i32
    %c0_i32_1 = arith.constant 0 : i32
    return %c0_i32, %c0_i32_0 : i32, i32
  }
  func.func @transform_12(%arg0: i32) -> (i32, i32) {
    %c0_i32 = arith.constant 0 : i32
    %c0_i32_0 = arith.constant 0 : i32
    %c0_i32_1 = arith.constant 0 : i32
    return %c0_i32, %c0_i32_0 : i32, i32
  }
  func.func @transform_13(%arg0: i32) -> (i32, i32) {
    %c0_i32 = arith.constant 0 : i32
    %c0_i32_0 = arith.constant 0 : i32
    %c0_i32_1 = arith.constant 0 : i32
    return %c0_i32, %c0_i32_0 : i32, i32
  }
  func.func @transform_14(%arg0: i32) -> (i32, i32) {
    %c0_i32 = arith.constant 0 : i32
    %c0_i32_0 = arith.constant 0 : i32
    %c0_i32_1 = arith.constant 0 : i32
    return %c0_i32, %c0_i32_0 : i32, i32
  }
  func.func @transform_15(%arg0: i32) -> (i32, i32) {
    %c0_i32 = arith.constant 0 : i32
    %c0_i32_0 = arith.constant 0 : i32
    %c0_i32_1 = arith.constant 0 : i32
    return %c0_i32, %c0_i32_0 : i32, i32
  }
  func.func @transform_16(%arg0: i32) -> (i32, i32) {
    %c0_i32 = arith.constant 0 : i32
    %c0_i32_0 = arith.constant 0 : i32
    %c0_i32_1 = arith.constant 0 : i32
    return %c0_i32, %c0_i32_0 : i32, i32
  }
  func.func @transform_17(%arg0: i32) -> (i32, i32) {
    %c0_i32 = arith.constant 0 : i32
    %c0_i32_0 = arith.constant 0 : i32
    %c0_i32_1 = arith.constant 0 : i32
    return %c0_i32, %c0_i32_0 : i32, i32
  }
  func.func @transform_18(%arg0: i32) -> (i32, i32) {
    %c0_i32 = arith.constant 0 : i32
    %c0_i32_0 = arith.constant 0 : i32
    return %arg0, %c0_i32 : i32, i32
  }
}

</mosaic_0001>

<bundles_post_ra>
// kernel: tpu_custom_call.1
= control target key start
LH: loop header
LB: loop body
LE: loop exit
PB: predicated region body
PF: predicated region fallthrough
CT: control target
= control target key end

     0   :  { %s9010_s0 = inlined_call_operand.vmem [shape: bf16[1,64,32], index: 0, kind: input, shape index: {}]   ;;  %s9011_s1 = inlined_call_operand.vmem [shape: bf16[128,32], index: 1, kind: input, shape index: {}]   ;;  %s9012_s2 = inlined_call_operand.hbm [shape: bf16[32,384], index: 2, kind: input, shape index: {}]   ;;  %s9013_s3 = inlined_call_operand.vmem [shape: f32[1,384], index: 3, kind: input, shape index: {}]   ;;  %s9014_s4 = inlined_call_operand.hbm [shape: bf16[128,768], index: 4, kind: input, shape index: {}]   ;;  %s9015_s5 = inlined_call_operand.vmem [shape: f32[1,128], index: 5, kind: input, shape index: {}]   ;;  %s9016_s6 = inlined_call_operand.vmem [shape: f32[1,384], index: 6, kind: input, shape index: {}]   ;;  %s9017_s7 = inlined_call_operand.hbm [shape: bf16[128,384], index: 7, kind: input, shape index: {}]   ;;  %s9018_s8 = inlined_call_operand.vmem [shape: f32[1,128], index: 8, kind: input, shape index: {}]   ;;  %s9019_s9 = inlined_call_operand.hbm [shape: bf16[128,128], index: 9, kind: input, shape index: {}]   ;;  %s9020_s10 = inlined_call_operand.vmem [shape: f32[1,128], index: 10, kind: input, shape index: {}]   ;;  %s9021_s11 = inlined_call_operand.vmem [shape: bf16[128,256], index: 11, kind: input, shape index: {}]   ;;  %s9022_s12 = inlined_call_operand.vmem [shape: f32[1,256], index: 12, kind: input, shape index: {}]   ;;  %s9023_s13 = inlined_call_operand.hbm [shape: bf16[256,128], index: 13, kind: input, shape index: {}]   ;;  %s9024_s14 = inlined_call_operand.vmem [shape: bf16[32,128], index: 14, kind: input, shape index: {}]   ;;  %s9025_s15 = inlined_call_operand.vmem [shape: f32[1,128], index: 15, kind: input, shape index: {}]   ;;  %s9026_s16 = inlined_call_operand.vmem [shape: f32[1,128], index: 16, kind: input, shape index: {}]   ;;  %s9027_s17 = inlined_call_operand.<no memory space> [shape: f32[1,1], index: 17, kind: input, shape index: {}]   ;;  %s9028_s18 = inlined_call_operand.hbm [shape: f32[8,128], index: 18, kind: output, shape index: {}]  }
   0x1   :  { %9204 = sst [smem:[#allocation104_spill]] %s9010_s0 }
   0x2   :  { %9205 = sst [smem:[#allocation105_spill]] %s9011_s1 }
   0x3   :  { %9206 = sst [smem:[#allocation106_spill]] %s9012_s2 }
   0x4   :  { %24 = vsyncpa [#allocation6], 0 }
   0x5   :  { %25 = vsyncpa [#allocation9], 0 }
   0x6   :  { %26 = vsyncpa [#allocation12], 0 }
   0x7   :  { %27 = vsyncpa [#allocation7], 0  ;;  %s6530_s27 = smov [#allocation8]   ;;  %s6390_s0 = scalar_lea.hbm %s9014_s4, 6144 }
   0x8   :  { %s51_s28 = sshll.u32 %s6530_s27, 4  ;;  %p6391_p0 = scmp.ne.s32.totalorder %s9014_s4, %s6390_s0  ;;  %s52_s28 = int_to_ptr.vmem [resolvable:$true] %s51_s28 }
   0x9   :  { %p6394_p1 = scmp.lt.u32.totalorder %s6390_s0, %s9014_s4 }
   0xb   :  { %p6396_p2 = pnand %p6394_p1, %p6391_p0 }
   0xd   :  { %6399 = shalt.err (!%p6396_p2)
}
   0xe   :  { %s6400_s22 = scalar_lea.vmem %s52_s28, 6144  ;;  %p6405_p4 = scmp.lt.s32.totalorder %s52_s28, %s52_s28 }
   0xf   :  { %p6401_p3 = scmp.ne.s32.totalorder %s52_s28, %s6400_s22  ;;  %p6406_p5 = scmp.lt.s32.totalorder %s6400_s22, %s6400_s22 }
  0x11   :  { %p6407_p6 = por %p6406_p5, %p6405_p4 }
  0x13   :  { %p6408_p7 = pnand %p6407_p6, %p6401_p3 }
  0x15   :  { %6411 = shalt.err (!%p6408_p7)
}
  0x16   :  { %s6531_s2 = smov 384   ;;  %s6532_s23 = smov 24  }
  0x17   :  { %57 = dma.hbm_to_vmem [thread:$0]  %s9014_s4, 6144, %s52_s28, [#allocation9], %s6531_s2, %s6531_s2, %s6532_s23  }
  0x18   :  { %s6533_s26 = smov [#allocation11]   ;;  %s6412_s0 = scalar_lea.hbm %s9019_s9, 1024 }
  0x19   :  { %s81_s27 = sshll.u32 %s6533_s26, 4  ;;  %p6413_p8 = scmp.ne.s32.totalorder %s9019_s9, %s6412_s0  ;;  %s82_s27 = int_to_ptr.vmem [resolvable:$true] %s81_s27 }
  0x1a   :  { %p6416_p9 = scmp.lt.u32.totalorder %s6412_s0, %s9019_s9 }
  0x1c   :  { %p6418_p10 = pnand %p6416_p9, %p6413_p8 }
  0x1e   :  { %6421 = shalt.err (!%p6418_p10)
}
  0x1f   :  { %s6422_s22 = scalar_lea.vmem %s82_s27, 1024  ;;  %p6427_p12 = scmp.lt.s32.totalorder %s82_s27, %s82_s27 }
  0x20   :  { %p6423_p11 = scmp.ne.s32.totalorder %s82_s27, %s6422_s22  ;;  %p6428_p13 = scmp.lt.s32.totalorder %s6422_s22, %s6422_s22 }
  0x22   :  { %p6429_p0 = por %p6428_p13, %p6427_p12 }
  0x24   :  { %p6430_p1 = pnand %p6429_p0, %p6423_p11 }
  0x26   :  { %6433 = shalt.err (!%p6430_p1)
}
  0x27   :  { %s9032_s4 = smov 64   ;;  %s9033_s28 = smov 4  }
  0x28   :  { %87 = dma.hbm_to_vmem [thread:$0]  %s9019_s9, 1024, %s82_s27, [#allocation12], %s9032_s4, %s9032_s4, %s9033_s28  }
  0x29   :  { %s6536_s24 = smov [#allocation5]   ;;  %s9207_s30 = sld [smem:[#allocation106_spill]] }
  0x2a   :  { %s37_s25 = sshll.u32 %s6536_s24, 4  ;;  %s38_s25 = int_to_ptr.vmem [resolvable:$true] %s37_s25 }
  0x2f   :  { %s6434_s0 = scalar_lea.hbm %s9207_s30, 768 }
  0x30   :  { %p6435_p2 = scmp.ne.s32.totalorder %s9207_s30, %s6434_s0  ;;  %p6438_p3 = scmp.lt.u32.totalorder %s6434_s0, %s9207_s30 }
  0x32   :  { %p6440_p4 = pnand %p6438_p3, %p6435_p2 }
  0x34   :  { %6443 = shalt.err (!%p6440_p4)
}
  0x35   :  { %s6444_s22 = scalar_lea.vmem %s38_s25, 768  ;;  %p6449_p6 = scmp.lt.s32.totalorder %s38_s25, %s38_s25 }
  0x36   :  { %p6445_p5 = scmp.ne.s32.totalorder %s38_s25, %s6444_s22  ;;  %p6450_p7 = scmp.lt.s32.totalorder %s6444_s22, %s6444_s22 }
  0x38   :  { %p6451_p8 = por %p6450_p7, %p6449_p6 }
  0x3a   :  { %p6452_p9 = pnand %p6451_p8, %p6445_p5 }
  0x3c   :  { %6455 = shalt.err (!%p6452_p9)
}
  0x3d   :  { %s6537_s9 = smov 192   ;;  %s6538_s27 = smov 12  }
  0x3e   :  { %43 = dma.hbm_to_vmem [thread:$0]  %s9207_s30, 768, %s38_s25, [#allocation6], %s6537_s9, %s6537_s9, %s6538_s27  }
  0x3f   :  { %s6539_s24 = smov [#allocation10]   ;;  %s6540_s29 = smov [#allocation13]  }
  0x40   :  { %s67_s26 = sshll.u32 %s6539_s24, 4  ;;  %s99_s0 = sshll.u32 %s6540_s29, 4  ;;  %s68_s26 = int_to_ptr.vmem [resolvable:$true] %s67_s26  ;;  %s100_s0 = int_to_ptr.vmem [resolvable:$true] %s99_s0 }
  0x41   :  { %s6456_s20 = scalar_lea.hbm %s9017_s7, 3072 }
  0x42   :  { %p6457_p10 = scmp.ne.s32.totalorder %s9017_s7, %s6456_s20  ;;  %p6460_p11 = scmp.lt.u32.totalorder %s6456_s20, %s9017_s7 }
  0x44   :  { %p6462_p12 = pnand %p6460_p11, %p6457_p10 }
  0x46   :  { %6465 = shalt.err (!%p6462_p12)
}
  0x47   :  { %s6466_s25 = scalar_lea.vmem %s68_s26, 3072  ;;  %p6471_p0 = scmp.lt.s32.totalorder %s68_s26, %s68_s26 }
  0x48   :  { %p6467_p13 = scmp.ne.s32.totalorder %s68_s26, %s6466_s25  ;;  %p6472_p1 = scmp.lt.s32.totalorder %s6466_s25, %s6466_s25 }
  0x4a   :  { %p6473_p2 = por %p6472_p1, %p6471_p0 }
  0x4c   :  { %p6474_p3 = pnand %p6473_p2, %p6467_p13 }
  0x4e   :  { %6477 = shalt.err (!%p6474_p3)
}
  0x4f   :  { %73 = dma.hbm_to_vmem [thread:$0]  %s9017_s7, 3072, %s68_s26, [#allocation9], %s6537_s9, %s6537_s9, %s6538_s27  }
  0x50   :  { %s6478_s29 = scalar_lea.hbm %s9023_s13, 2048 }
  0x51   :  { %p6479_p4 = scmp.ne.s32.totalorder %s9023_s13, %s6478_s29  ;;  %p6482_p5 = scmp.lt.u32.totalorder %s6478_s29, %s9023_s13 }
  0x53   :  { %p6484_p6 = pnand %p6482_p5, %p6479_p4 }
  0x55   :  { %6487 = shalt.err (!%p6484_p6)
}
  0x56   :  { %s6488_s20 = scalar_lea.vmem %s100_s0, 2048  ;;  %p6493_p8 = scmp.lt.s32.totalorder %s100_s0, %s100_s0 }
  0x57   :  { %p6489_p7 = scmp.ne.s32.totalorder %s100_s0, %s6488_s20  ;;  %p6494_p9 = scmp.lt.s32.totalorder %s6488_s20, %s6488_s20 }
  0x59   :  { %p6495_p10 = por %p6494_p9, %p6493_p8 }
  0x5b   :  { %p6496_p11 = pnand %p6495_p10, %p6489_p7 }
  0x5d   :  { %6499 = shalt.err (!%p6496_p11)
}
  0x5e   :  { %s9208_s7 = smov 4   ;;  %s9209_s9 = smov 64  }
  0x5f   :  { %105 = dma.hbm_to_vmem [thread:$0]  %s9023_s13, 2048, %s100_s0, [#allocation12], %s9209_s9, %s9209_s9, %s9208_s7  }
  0x60   :  { %6522 = dma.done.wait [#allocation6], 768  }
  0x61   :  { %6523 = vsyncadd [#allocation6], 4294966528 }
  0x62   :  { %6524 = dma.done.wait [#allocation9], 9216  }
  0x63   :  { %6525 = vsyncadd [#allocation9], 4294958080 }
  0x64   :  { %6526 = dma.done.wait [#allocation12], 3072  }
  0x65   :  { %6527 = vsyncadd [#allocation12], 4294964224  ;;  %v9035_v0 = vmov 0   ;;  %v5925_v1 = vld [vmem:[#allocation5 + $0x4] ss:$12 sps:$4 sm:$0xff]   ;;  %s9210_s25 = sld [smem:[#allocation104_spill]]  ;;  %v9034_v55 = vlaneseq }
  0x66   :  { %260 = vmatprep.mubr.bf16.mxu0 %v9035_v0  ;;  %v5927_v2 = vld [vmem:[#allocation5] ss:$12 sps:$4 sm:$0xff]   ;;  %228 = vmatprep.subr.bf16.mxu0 %v5925_v1  ;;  %v5928_v3 = vld [vmem:[#allocation5 + $0x1c] ss:$12 sps:$4 sm:$0xff]   ;;  %v5930_v4 = vld [vmem:[#allocation5 + $0x18] ss:$12 sps:$4 sm:$0xff]  }
  0x67   :  { %229 = vmatpush1.bf16.msra.mxu0 %v5927_v2  ;;  %vm215_vm0 = vcmask 261120   ;;  %v5932_v6 = vld [vmem:[#allocation5 + $0x8] ss:$12 sps:$4 sm:$0xff]   ;;  %v5933_v7 = vld [vmem:[#allocation5 + $0x20] ss:$12 sps:$4 sm:$0xff]   ;;  %s9211_s7 = sld [smem:[#allocation105_spill]] }
  0x68   :  { %230 = vmatprep.subr.bf16.mxu0 %v5928_v3  ;;  %5672 = vmatprep.subr.bf16.mxu1 %v5932_v6  ;;  %v5935_v9 = vld [vmem:[%s9024_s14] sm:$0xff]   ;;  %v5938_v12 = vld [vmem:[%s9024_s14 + $0x8] sm:$0xff]   ;;  %v6740_v15 = vld [vmem:[#allocation8 + $0xc] ss:$24 sps:$4 sm:$0xff]   ;;  %v6873_v56 = vshrl.u32 %v9034_v55, 7  ;;  %vm6543_vm1 = vmmov 0  }
  0x69   :  { %5673 = vmatpush3.bf16.msra.mxu1 %v5932_v6  ;;  %v6738_v14 = vld [vmem:[#allocation8 + $0x4] ss:$24 sps:$4 sm:$0xff]   ;;  %v6745_v17 = vld [vmem:[#allocation8] ss:$24 sps:$4 sm:$0xff]   ;;  %v6754_v19 = vld [vmem:[#allocation8 + $0x34] ss:$24 sps:$4 sm:$0xff]  }
  0x6a   :  { %5674 = vmatprep.subr.bf16.mxu1 %v5933_v7  ;;  %9212 = vst [vmem:[#allocation19_spill] sm:$0xff] %v6738_v14  ;;  %9213 = vst [vmem:[#allocation20_spill] sm:$0xff] %v6745_v17  ;;  %v6747_v18 = vld [vmem:[#allocation8 + $0x8] ss:$24 sps:$4 sm:$0xff]   ;;  %v6756_v20 = vld [vmem:[#allocation8 + $0x3c] ss:$24 sps:$4 sm:$0xff]  }
  0x6b   :  { %v5931_v5 = vld [vmem:[%s9210_s25] sm:$0xff]   ;;  %231 = vmatpush1.bf16.msra.mxu0 %v5930_v4  ;;  %v5934_v8 = vld [vmem:[%s9210_s25 + $0x8] sm:$0xff]   ;;  %v5936_v10 = vld [vmem:[%s9210_s25 + $0x10] sm:$0xff]   ;;  %9214 = vst [vmem:[#allocation21_spill] sm:$0xff] %v6754_v19  ;;  %v6876_v57 = vsub.s32 0, %v6873_v56  ;;  %v6882_v59 = vsub.s32 1, %v6873_v56 }
  0x6c   :  { %5676 = vmatprep.mubr.msk.bf16.mxu1 %vm215_vm0, %v5931_v5  ;;  %v5937_v11 = vld [vmem:[%s9210_s25 + $0x18] sm:$0xff]   ;;  %947 = vmatprep.subr.bf16.mxu0 %v6738_v14  ;;  %v6762_v22 = vld [vmem:[#allocation8 + $0x38] ss:$24 sps:$4 sm:$0xff]   ;;  %v6771_v24 = vld [vmem:[#allocation8 + $0x64] ss:$24 sps:$4 sm:$0xff]   ;;  %9229 = vst [vmem:[#allocation36_spill] sm:$0xff] %v6873_v56 }
  0x6d   :  { %5675 = vmatpush3.bf16.msra.mxu1 %v5933_v7  ;;  %v5939_v13 = vld [vmem:[%s9211_s7] sm:$0xff]   ;;  %v5944_v16 = vld [vmem:[%s9211_s7 + $0x8] sm:$0xff]   ;;  %v5953_v23 = vld [vmem:[%s9211_s7 + $0x10] sm:$0xff]   ;;  %9216 = vst [vmem:[#allocation23_spill] sm:$0xff] %v6771_v24  ;;  %vm3837_vm2 = vcmask 130112   ;;  %vm3844_vm3 = vcmask 195712  }
  0x6e   :  { %5345 = vmatmul.mubr.msk.bf16.vlgmr.msra.gmra.mrb[0].mxu0 %vm215_vm0, %v5931_v5  ;;  %5684 = vmatprep.subr.bf16.mxu1 %v5935_v9  ;;  %v6760_v21 = vld [vmem:[#allocation8 + $0x30] ss:$24 sps:$4 sm:$0xff]   ;;  %v6773_v25 = vld [vmem:[#allocation8 + $0x6c] ss:$24 sps:$4 sm:$0xff]   ;;  %v6779_v27 = vld [vmem:[#allocation8 + $0x60] ss:$24 sps:$4 sm:$0xff]  }
  0x6f   :  { %270 = vmatprep.mubr.bf16.mxu0 %v9035_v0  ;;  %948 = vmatpush1.bf16.msra.mxu0 %v6745_v17  ;;  %9215 = vst [vmem:[#allocation22_spill] sm:$0xff] %v6760_v21  ;;  %v5958_v26 = vld [vmem:[%s9211_s7 + $0x18] sm:$0xff]   ;;  %9217 = vst [vmem:[#allocation24_spill] sm:$0xff] %v6779_v27  ;;  %v6790_v30 = vld [vmem:[#allocation8 + $0x9c] ss:$24 sps:$4 sm:$0xff]   ;;  %vm3851_vm4 = vcmask 261312  }
  0x70   :  { %5677 = vmatmul.mubr.msk.bf16.vlgmr.msra.gmra.mrb[0].mxu1 %vm215_vm0, %v5934_v8  ;;  %949 = vmatprep.subr.bf16.mxu0 %v6754_v19  ;;  %v6781_v28 = vld [vmem:[#allocation8 + $0x68] ss:$24 sps:$4 sm:$0xff]   ;;  %v6788_v29 = vld [vmem:[#allocation8 + $0x94] ss:$24 sps:$4 sm:$0xff]   ;;  %v6795_v32 = vld [vmem:[#allocation8 + $0x98] ss:$24 sps:$4 sm:$0xff]  }
  0x71   :  { %5680 = vmatprep.mubr.msk.bf16.mxu1 %vm215_vm0, %v5936_v10  ;;  %5685 = vmatpush3.bf16.msra.mxu1 %v5935_v9  ;;  %v6793_v31 = vld [vmem:[#allocation8 + $0x90] ss:$24 sps:$4 sm:$0xff]   ;;  %v6803_v34 = vld [vmem:[#allocation8 + $0xc4] ss:$24 sps:$4 sm:$0xff]   ;;  %v6811_v37 = vld [vmem:[#allocation8 + $0xc0] ss:$24 sps:$4 sm:$0xff]  }
  0x72   :  { %5686 = vmatprep.subr.bf16.mxu1 %v5938_v12  ;;  %v5967_v33 = vld [vmem:[%s9211_s7 + $0x20] sm:$0xff]   ;;  %9218 = vst [vmem:[#allocation25_spill] sm:$0xff] %v6803_v34  ;;  %v6805_v35 = vld [vmem:[#allocation8 + $0xcc] ss:$24 sps:$4 sm:$0xff]   ;;  %v5972_v36 = vld [vmem:[%s9211_s7 + $0x28] sm:$0xff]   ;;  %vm3858_vm5 = vcmask 326912  }
  0x73   :  { %950 = vmatpush1.bf16.msra.mxu0 %v6760_v21  ;;  %9219 = vst [vmem:[#allocation26_spill] sm:$0xff] %v6805_v35  ;;  %v6813_v38 = vld [vmem:[#allocation8 + $0xc8] ss:$24 sps:$4 sm:$0xff]   ;;  %v6820_v39 = vld [vmem:[#allocation8 + $0xf4] ss:$24 sps:$4 sm:$0xff]   ;;  %9230 = vst [vmem:[#allocation37_spill] sm:$0xff] %v6876_v57 }
  0x74   :  { %951 = vmatprep.subr.bf16.mxu0 %v6771_v24  ;;  %9220 = vst [vmem:[#allocation27_spill] sm:$0xff] %v6813_v38  ;;  %9221 = vst [vmem:[#allocation28_spill] sm:$0xff] %v6820_v39  ;;  %v6822_v40 = vld [vmem:[#allocation8 + $0xfc] ss:$24 sps:$4 sm:$0xff]   ;;  %v6825_v41 = vld [vmem:[#allocation8 + $0xf0] ss:$24 sps:$4 sm:$0xff]  }
  0x75   :  { %5687 = vmatpush3.bf16.msra.mxu1 %v5938_v12  ;;  %9222 = vst [vmem:[#allocation29_spill] sm:$0xff] %v6822_v40  ;;  %v6827_v42 = vld [vmem:[#allocation8 + $0xf8] ss:$24 sps:$4 sm:$0xff]   ;;  %v5981_v43 = vld [vmem:[%s9211_s7 + $0x30] sm:$0xff]   ;;  %v5986_v46 = vld [vmem:[%s9211_s7 + $0x38] sm:$0xff]   ;;  %vm3865_vm6 = vcmask 392512  }
  0x76   :  { %5346 = vmatmul.mubr.msk.bf16.gmra.mrb[4].mxu0 %vm215_vm0, %v5934_v8  ;;  %988 = vmatprep.subr.bf16.mxu1 %v6740_v15  ;;  %9223 = vst [vmem:[#allocation30_spill] sm:$0xff] %v6827_v42  ;;  %v6835_v44 = vld [vmem:[#allocation8 + $0x124] ss:$24 sps:$4 sm:$0xff]   ;;  %v6843_v47 = vld [vmem:[#allocation8 + $0x120] ss:$24 sps:$4 sm:$0xff]   ;;  %9231 = vst [vmem:[#allocation38_spill] sm:$0xff] %v6882_v59 }
  0x77   :  { %280 = vmatprep.mubr.bf16.mxu0 %v9035_v0  ;;  %952 = vmatpush1.bf16.msra.mxu0 %v6779_v27  ;;  %v6837_v45 = vld [vmem:[#allocation8 + $0x12c] ss:$24 sps:$4 sm:$0xff]   ;;  %v6845_v48 = vld [vmem:[#allocation8 + $0x128] ss:$24 sps:$4 sm:$0xff]   ;;  %v6854_v50 = vld [vmem:[#allocation8 + $0x15c] ss:$24 sps:$4 sm:$0xff]  }
  0x78   :  { %5681 = vmatmul.mubr.msk.bf16.gmra.mrb[4].mxu1 %vm215_vm0, %v5937_v11  ;;  %953 = vmatprep.subr.bf16.mxu0 %v6788_v29  ;;  %9224 = vst [vmem:[#allocation31_spill] sm:$0xff] %v6837_v45  ;;  %9225 = vst [vmem:[#allocation32_spill] sm:$0xff] %v6845_v48  ;;  %v6852_v49 = vld [vmem:[#allocation8 + $0x154] ss:$24 sps:$4 sm:$0xff]   ;;  %v6857_v51 = vld [vmem:[#allocation8 + $0x150] ss:$24 sps:$4 sm:$0xff]  }
  0x79   :  { %5688 = vmatprep.mubr.msk.bf16.mxu1 %vm215_vm0, %v5939_v13  ;;  %9226 = vst [vmem:[#allocation33_spill] sm:$0xff] %v6854_v50  ;;  %v6859_v52 = vld [vmem:[#allocation8 + $0x158] ss:$24 sps:$4 sm:$0xff]   ;;  %v6862_v53 = vld [vmem:[#allocation8 + $0x14] ss:$24 sps:$4 sm:$0xff]   ;;  %vm3872_vm7 = vcmask 458112  }
  0x7a   :  { %9227 = vst [vmem:[#allocation34_spill] sm:$0xff] %v6859_v52  ;;  %v6866_v54 = vld [vmem:[#allocation10 + $0x4] ss:$12 sps:$4 sm:$0xff]   ;;  %vm3879_vm8 = vcmask 523712   ;;  %vm3886_vm9 = vcmask 589312   ;;  %vm3893_vm10 = vcmask 654912  }
  0x7b   :  { %954 = vmatpush1.bf16.msra.mxu0 %v6793_v31  ;;  %9228 = vst [vmem:[#allocation35_spill] sm:$0xff] %v6866_v54  ;;  %v146_v58 = vld [vmem:[%s9013_s3] sm:$0x7]  ;;  %vm3900_vm11 = vcmask 720512   ;;  %vm3907_vm12 = vcmask 786112   ;;  %vm3914_vm13 = vcmask 851712  }
  0x7c   :  { %955 = vmatprep.subr.bf16.mxu0 %v6803_v34  ;;  %v6885_v60 = vrot.slane %v146_v58, %v6876_v57  ;;  %v6888_v62 = vrot.slane %v146_v58, %v6882_v59  ;;  %vm3921_vm14 = vcmask 917312   ;;  %vm3928_vm15 = vcmask 982912  }
  0x7e   :  { %5347 = vmatmul.mubr.msk.bf16.gmra.mrb[8].mxu0 %vm215_vm0, %v5936_v10  ;;  %9232 = vst [vmem:[#allocation39_spill] sm:$0xff] %v6885_v60  ;;  %9233 = vst [vmem:[#allocation40_spill] sm:$0xff] %v6888_v62 }
  0x7f   :  { %290 = vmatprep.mubr.bf16.mxu0 %v9035_v0  ;;  %956 = vmatpush1.bf16.msra.mxu0 %v6811_v37 }
  0x80   :  { %5689 = vmatmul.mubr.msk.bf16.vlgmr.msra.gmra.mrb[8].mxu1 %vm215_vm0, %v5944_v16  ;;  %957 = vmatprep.subr.bf16.mxu0 %v6820_v39 }
  0x81   :  { %989 = vmatpush1.bf16.msra.mxu1 %v6747_v18  ;;  %5692 = vmatprep.mubr.msk.bf16.mxu1 %vm215_vm0, %v5953_v23 }
  0x82   :  { %990 = vmatprep.subr.bf16.mxu1 %v6756_v20 }
  0x83   :  { %958 = vmatpush1.bf16.msra.mxu0 %v6825_v41 }
  0x84   :  { %959 = vmatprep.subr.bf16.mxu0 %v6835_v44 }
  0x85   :  { %991 = vmatpush1.bf16.msra.mxu1 %v6762_v22 }
  0x86   :  { %5348 = vmatmul.mubr.msk.bf16.gmra.mrb[12].mxu0 %vm215_vm0, %v5937_v11  ;;  %992 = vmatprep.subr.bf16.mxu1 %v6773_v25 }
  0x87   :  { %979 = vmatprep.mubr.bf16.mxu0 %v9035_v0  ;;  %960 = vmatpush1.bf16.msra.mxu0 %v6843_v47 }
  0x88   :  { %5693 = vmatmul.mubr.msk.bf16.gmra.mrb[12].mxu1 %vm215_vm0, %v5958_v26  ;;  %961 = vmatprep.subr.bf16.mxu0 %v6852_v49 }
  0x89   :  { %993 = vmatpush1.bf16.msra.mxu1 %v6781_v28  ;;  %5696 = vmatprep.mubr.msk.bf16.mxu1 %vm215_vm0, %v5967_v33  ;;  %v6911_v33 = vsub.s32 2, %v6873_v56  ;;  %v6927_v56 = vld [vmem:[#allocation10] ss:$12 sps:$4 sm:$0xff]  }
  0x8a   :  { %994 = vmatprep.subr.bf16.mxu1 %v6790_v30 }
  0x8b   :  { %962 = vmatpush1.bf16.msra.mxu0 %v6857_v51  ;;  %9240 = vst [vmem:[#allocation47_spill] sm:$0xff] %v6911_v33 }
  0x8c   :  { %1029 = vmatprep.subr.bf16.mxu0 %v6862_v53 }
  0x8d   :  { %995 = vmatpush1.bf16.msra.mxu1 %v6795_v32 }
  0x8e   :  { %996 = vmatprep.subr.bf16.mxu1 %v6805_v35 }
  0x90   :  { %5697 = vmatmul.mubr.msk.bf16.gmra.mrb[16].mxu1 %vm215_vm0, %v5972_v36 }
  0x91   :  { %997 = vmatpush1.bf16.msra.mxu1 %v6813_v38  ;;  %5700 = vmatprep.mubr.msk.bf16.mxu1 %vm215_vm0, %v5981_v43  ;;  %v6914_v43 = vrot.slane %v146_v58, %v6911_v33  ;;  %v6981_v33 = vld [vmem:[#allocation10 + $0x60] ss:$12 sps:$4 sm:$0xff]  }
  0x92   :  { %998 = vmatprep.subr.bf16.mxu1 %v6822_v40  ;;  %9251 = vst [vmem:[#allocation57_spill] sm:$0xff] %v6981_v33 }
  0x95   :  { %999 = vmatpush1.bf16.msra.mxu1 %v6827_v42 }
  0x96   :  { %1000 = vmatprep.subr.bf16.mxu1 %v6837_v45 }
  0x98   :  { %5701 = vmatmul.mubr.msk.bf16.gmra.mrb[20].mxu1 %vm215_vm0, %v5986_v46  ;;  %vm3935_vm0 = vcmask 1048512  }
  0x99   :  { %1001 = vmatpush1.bf16.msra.mxu1 %v6845_v48  ;;  %1020 = vmatprep.mubr.bf16.mxu1 %v9035_v0 }
  0x9a   :  { %1002 = vmatprep.subr.bf16.mxu1 %v6854_v50 }
  0x9d   :  { %1003 = vmatpush1.bf16.msra.mxu1 %v6859_v52 }
  0x9e   :  { %1230 = vmatprep.subr.bf16.mxu1 %v6866_v54 }
 0x141   :  { %v262_v61 = vpop.f32.mrb[0].mxu0 }
 0x142   :  { %v263_v63 = vadd.f32 %v262_v61, %v6885_v60  ;;  %v264_v1 = vpop.f32.mrb[1].mxu0  ;;  %v6919_v61 = vld [vmem:[%s9015_s5] ss:$0 sm:$0xff] }
 0x143   :  { %v6891_v2 = vpop.f32.mrb[2].mxu0  ;;  %v265_v5 = vadd.f32 %v264_v1, %v6888_v62  ;;  %v6896_v6 = vpop.f32.mrb[0].mxu1  ;;  %9241 = vst [vmem:[#allocation48_spill] sm:$0xff] %v6919_v61 }
 0x144   :  { %v5374_v3 = vmul.f32 -1.442695, %v263_v63  ;;  %v6893_v4 = vpop.f32.mrb[3].mxu0  ;;  %9234 = vst [vmem:[#allocation41_spill] sm:$0xff] %v6896_v6  ;;  %v335_v7 = vpop.f32.mrb[1].mxu1 }
 0x145   :  { %v6898_v8 = vpop.f32.mrb[2].mxu1  ;;  %v5375_v10 = vmul.f32 -1.442695, %v265_v5  ;;  %v336_v63 = vadd.f32 %v335_v7, %v6914_v43  ;;  %v6973_v6 = vld [vmem:[#allocation8 + $0xd4] ss:$24 sps:$4 sm:$0xff]  }
 0x146   :  { %6131 = vpow2.f32 %v5374_v3  ;;  %9235 = vst [vmem:[#allocation42_spill] sm:$0xff] %v6898_v8  ;;  %v6900_v9 = vpop.f32.mrb[3].mxu1  ;;  %v6963_v8 = vld [vmem:[#allocation10 + $0x4c] ss:$12 sps:$4 sm:$0xff]   ;;  %9248 = vst [vmem:[#allocation54_spill] sm:$0xff] %v6973_v6 }
 0x147   :  { %6133 = vpow2.f32 %v5375_v10  ;;  %9245 = vst [vmem:[#allocation51_spill] sm:$0xff] %v6963_v8 }
 0x149   :  { %v6902_v11 = vpop.f32.mrb[4].mxu0 }
 0x14a   :  { %9236 = vst [vmem:[#allocation43_spill] sm:$0xff] %v6902_v11  ;;  %v6904_v12 = vpop.f32.mrb[5].mxu0  ;;  %v6979_v11 = vld [vmem:[#allocation8 + $0xd0] ss:$24 sps:$4 sm:$0xff]  }
 0x14b   :  { %9237 = vst [vmem:[#allocation44_spill] sm:$0xff] %v6904_v12  ;;  %v6906_v13 = vpop.f32.mrb[6].mxu0  ;;  %v6975_v12 = vld [vmem:[#allocation10 + $0x64] ss:$12 sps:$4 sm:$0xff]   ;;  %9250 = vst [vmem:[#allocation56_spill] sm:$0xff] %v6979_v11 }
 0x14c   :  { %9238 = vst [vmem:[#allocation45_spill] sm:$0xff] %v6906_v13  ;;  %v6908_v16 = vpop.f32.mrb[7].mxu0  ;;  %v6969_v13 = vld [vmem:[#allocation10 + $0x48] ss:$12 sps:$4 sm:$0xff]   ;;  %9249 = vst [vmem:[#allocation55_spill] sm:$0xff] %v6975_v12 }
 0x14d   :  { %9239 = vst [vmem:[#allocation46_spill] sm:$0xff] %v6908_v16  ;;  %v6967_v16 = vld [vmem:[#allocation8 + $0xa0] ss:$24 sps:$4 sm:$0xff]   ;;  %9247 = vst [vmem:[#allocation53_spill] sm:$0xff] %v6969_v13 }
 0x14e   :  { %9246 = vst [vmem:[#allocation52_spill] sm:$0xff] %v6967_v16 }
 0x150   :  { %v6132_v23 = vpop.eup %6131 }
 0x151   :  { %v641_v26 = vadd.f32 1.0, %v6132_v23  ;;  %v6134_v36 = vpop.eup %6133 }
 0x152   :  { %v648_v46 = vadd.f32 1.0, %v6134_v36  ;;  %v6925_v36 = vld [vmem:[#allocation8 + $0x10] ss:$24 sps:$4 sm:$0xff]  }
 0x153   :  { %6135 = vrcp.f32 %v641_v26 }
 0x154   :  { %6137 = vrcp.f32 %v648_v46  ;;  %v6933_v46 = vld [vmem:[#allocation8 + $0x44] ss:$24 sps:$4 sm:$0xff]  }
 0x15d   :  { %v6136_v1 = vpop.eup %6135 }
 0x15e   :  { %v651_v3 = vmul.f32 %v6136_v1, %v6919_v61  ;;  %v6138_v10 = vpop.eup %6137  ;;  %v6935_v1 = vld [vmem:[#allocation10 + $0x1c] ss:$12 sps:$4 sm:$0xff]  }
 0x15f   :  { %v654_v23 = vsub.f32 1.0, %v6138_v10  ;;  %v656_v55 = vmul.f32 0.0, %v6138_v10  ;;  %v9242_v10 = vmov 0  }
 0x160   :  { %v652_v5 = vadd.f32 %v651_v3, %v336_v63  ;;  %v6943_v63 = vld [vmem:[#allocation10 + $0x18] ss:$12 sps:$4 sm:$0xff]   ;;  %v6947_v3 = vld [vmem:[#allocation8 + $0x74] ss:$24 sps:$4 sm:$0xff]  }
 0x162   :  { %6139 = vtanh.f32 %v652_v5  ;;  %v6949_v5 = vld [vmem:[#allocation10 + $0x34] ss:$12 sps:$4 sm:$0xff]  }
 0x16c   :  { %v6140_v26 = vpop.eup %6139 }
 0x16d   :  { %v655_v58 = vmul.f32 %v6140_v26, %v654_v23  ;;  %v6955_v23 = vld [vmem:[#allocation8 + $0x70] ss:$24 sps:$4 sm:$0xff]  }
 0x16e   :  { %v6957_v26 = vld [vmem:[#allocation10 + $0x30] ss:$12 sps:$4 sm:$0xff]  }
 0x16f   :  { %v6923_v0 = vadd.f32 %v656_v55, %v655_v58  ;;  %v6941_v55 = vld [vmem:[#allocation8 + $0x40] ss:$24 sps:$4 sm:$0xff]   ;;  %9243 = vst [vmem:[#allocation49_spill] sm:$0xff] %v6957_v26  ;;  %v6961_v58 = vld [vmem:[#allocation8 + $0xa4] ss:$24 sps:$4 sm:$0xff]  }
 0x170   :  { %9244 = vst [vmem:[#allocation50_spill] sm:$0xff] %v6961_v58 }
 0x171   :  { %v6931_v7 = vpack.c.bf16 %v6923_v0, %v6923_v0 }
 0x173   :  { %980 = vmatmul.mubr.bf16.vlgmr.msra.gmra.mrb[16].mxu0 %v6931_v7  ;;  %1021 = vmatmul.mubr.bf16.vlgmr.msra.gmra.mrb[24].mxu1 %v6931_v7 }
 0x174   :  { %1030 = vmatpush1.bf16.msra.mxu0 %v6925_v36  ;;  %1231 = vmatpush1.bf16.msra.mxu1 %v6927_v56 }
 0x175   :  { %1031 = vmatprep.subr.bf16.mxu0 %v6933_v46  ;;  %1232 = vmatprep.subr.bf16.mxu1 %v6935_v1 }
 0x176   :  { %1061 = vmatprep.mubr.bf16.mxu0 %v9242_v10  ;;  %1262 = vmatprep.mubr.bf16.mxu1 %v9242_v10 }
 0x178   :  { %1032 = vmatpush1.bf16.msra.mxu0 %v6941_v55  ;;  %1233 = vmatpush1.bf16.msra.mxu1 %v6943_v63 }
 0x179   :  { %1033 = vmatprep.subr.bf16.mxu0 %v6947_v3  ;;  %1234 = vmatprep.subr.bf16.mxu1 %v6949_v5 }
 0x17c   :  { %1034 = vmatpush1.bf16.msra.mxu0 %v6955_v23  ;;  %1235 = vmatpush1.bf16.msra.mxu1 %v6957_v26  ;;  %v6985_v26 = vld [vmem:[#allocation8 + $0x104] ss:$24 sps:$4 sm:$0xff]  }
 0x17d   :  { %1035 = vmatprep.subr.bf16.mxu0 %v6961_v58  ;;  %1236 = vmatprep.subr.bf16.mxu1 %v6963_v8  ;;  %9252 = vst [vmem:[#allocation58_spill] sm:$0xff] %v6985_v26  ;;  %v6987_v58 = vld [vmem:[#allocation10 + $0x7c] ss:$12 sps:$4 sm:$0xff]   ;;  %v6991_v8 = vld [vmem:[#allocation8 + $0x100] ss:$24 sps:$4 sm:$0xff]  }
 0x17e   :  { %9253 = vst [vmem:[#allocation59_spill] sm:$0xff] %v6987_v58  ;;  %9254 = vst [vmem:[#allocation60_spill] sm:$0xff] %v6991_v8 }
 0x180   :  { %1036 = vmatpush1.bf16.msra.mxu0 %v6967_v16  ;;  %1237 = vmatpush1.bf16.msra.mxu1 %v6969_v13  ;;  %v6993_v16 = vld [vmem:[#allocation10 + $0x78] ss:$12 sps:$4 sm:$0xff]   ;;  %v6997_v13 = vld [vmem:[#allocation8 + $0x134] ss:$24 sps:$4 sm:$0xff]  }
 0x181   :  { %1037 = vmatprep.subr.bf16.mxu0 %v6973_v6  ;;  %1238 = vmatprep.subr.bf16.mxu1 %v6975_v12  ;;  %9255 = vst [vmem:[#allocation61_spill] sm:$0xff] %v6997_v13  ;;  %v6999_v6 = vld [vmem:[#allocation10 + $0x94] ss:$12 sps:$4 sm:$0xff]   ;;  %v7003_v12 = vld [vmem:[#allocation8 + $0x130] ss:$24 sps:$4 sm:$0xff]  }
 0x182   :  { %9256 = vst [vmem:[#allocation62_spill] sm:$0xff] %v6999_v6 }
 0x184   :  { %1038 = vmatpush1.bf16.msra.mxu0 %v6979_v11  ;;  %1239 = vmatpush1.bf16.msra.mxu1 %v6981_v33  ;;  %v7005_v11 = vld [vmem:[#allocation10 + $0x90] ss:$12 sps:$4 sm:$0xff]  }
 0x185   :  { %1039 = vmatprep.subr.bf16.mxu0 %v6985_v26  ;;  %1240 = vmatprep.subr.bf16.mxu1 %v6987_v58  ;;  %v7009_v33 = vld [vmem:[#allocation8 + $0x164] ss:$24 sps:$4 sm:$0xff]   ;;  %v7011_v26 = vld [vmem:[#allocation10 + $0xac] ss:$12 sps:$4 sm:$0xff]  }
 0x186   :  { %9257 = vst [vmem:[#allocation63_spill] sm:$0xff] %v7009_v33  ;;  %9258 = vst [vmem:[#allocation64_spill] sm:$0xff] %v7011_v26  ;;  %v7015_v58 = vld [vmem:[#allocation8 + $0x160] ss:$24 sps:$4 sm:$0xff]  }
 0x187   :  { %9259 = vst [vmem:[#allocation65_spill] sm:$0xff] %v7015_v58 }
 0x188   :  { %1040 = vmatpush1.bf16.msra.mxu0 %v6991_v8  ;;  %1241 = vmatpush1.bf16.msra.mxu1 %v6993_v16  ;;  %v7017_v8 = vld [vmem:[#allocation10 + $0xa8] ss:$12 sps:$4 sm:$0xff]  }
 0x189   :  { %1041 = vmatprep.subr.bf16.mxu0 %v6997_v13  ;;  %1242 = vmatprep.subr.bf16.mxu1 %v6999_v6  ;;  %9260 = vst [vmem:[#allocation66_spill] sm:$0xff] %v7017_v8  ;;  %v7023_v6 = vld [vmem:[#allocation10 + $0x8] ss:$12 sps:$4 sm:$0xff]   ;;  %v9085_v13 = vmov 0.0  }
 0x18a   :  { %9261 = vst [vmem:[#allocation67_spill] sm:$0xff] %v7023_v6 }
 0x18c   :  { %1042 = vmatpush1.bf16.msra.mxu0 %v7003_v12  ;;  %1243 = vmatpush1.bf16.msra.mxu1 %v7005_v11 }
 0x18d   :  { %1043 = vmatprep.subr.bf16.mxu0 %v7009_v33  ;;  %1244 = vmatprep.subr.bf16.mxu1 %v7011_v26  ;;  %v7030_v33 = vld [vmem:[#allocation10 + $0x20] ss:$12 sps:$4 sm:$0xff]  }
 0x18e   :  { %9262 = vst [vmem:[#allocation68_spill] sm:$0xff] %v7030_v33 }
 0x190   :  { %1044 = vmatpush1.bf16.msra.mxu0 %v7015_v58  ;;  %1245 = vmatpush1.bf16.msra.mxu1 %v7017_v8 }
 0x191   :  { %5704 = vmatprep.subr.bf16.mxu0 %v9085_v13  ;;  %1363 = vmatprep.subr.bf16.mxu1 %v6738_v14 }
 0x193   :  { %1062 = vmatmul.mubr.bf16.vlgmr.msra.gmra.mrb[20].mxu0 %v6931_v7  ;;  %1263 = vmatmul.mubr.bf16.vlgmr.msra.gmra.mrb[28].mxu1 %v9242_v10  ;;  %v7039_v7 = vld [vmem:[#allocation10 + $0x38] ss:$12 sps:$4 sm:$0xff]  }
 0x194   :  { %5705 = vmatpush3.bf16.msra.mxu0 %v7023_v6  ;;  %5720 = vmatprep.mubr.msk.bf16.mxu0 %vm6543_vm1, %v9085_v13  ;;  %9263 = vst [vmem:[#allocation69_spill] sm:$0xff] %v7039_v7  ;;  %v7045_v6 = vld [vmem:[#allocation10 + $0x50] ss:$12 sps:$4 sm:$0xff]  }
 0x195   :  { %5706 = vmatprep.subr.bf16.mxu0 %v9085_v13  ;;  %1364 = vmatpush1.bf16.msra.mxu1 %v6745_v17  ;;  %v7052_v17 = vpop.f32.mrb[4].mxu1 }
 0x196   :  { %1365 = vmatprep.subr.bf16.mxu1 %v6754_v19  ;;  %1395 = vmatprep.mubr.bf16.mxu1 %v9242_v10  ;;  %v7049_v19 = vpop.f32.mrb[8].mxu0  ;;  %9265 = vst [vmem:[#allocation71_spill] sm:$0xff] %v7052_v17  ;;  %v7073_v17 = vld [vmem:[#allocation10 + $0x80] ss:$12 sps:$4 sm:$0xff]  }
 0x197   :  { %9264 = vst [vmem:[#allocation70_spill] sm:$0xff] %v7049_v19 }
 0x198   :  { %5707 = vmatpush3.bf16.msra.mxu0 %v7030_v33  ;;  %v7054_v33 = vpop.f32.mrb[9].mxu0 }
 0x199   :  { %5708 = vmatprep.subr.bf16.mxu0 %v9085_v13  ;;  %1366 = vmatpush1.bf16.msra.mxu1 %v6760_v21  ;;  %9266 = vst [vmem:[#allocation72_spill] sm:$0xff] %v7054_v33  ;;  %v7057_v21 = vld [vmem:[#allocation10 + $0x68] ss:$12 sps:$4 sm:$0xff]  }
 0x19a   :  { %1367 = vmatprep.subr.bf16.mxu1 %v6771_v24  ;;  %v7059_v24 = vpop.f32.mrb[5].mxu1 }
 0x19b   :  { %9267 = vst [vmem:[#allocation73_spill] sm:$0xff] %v7059_v24  ;;  %v7064_v14 = vpop.f32.mrb[6].mxu1 }
 0x19c   :  { %5709 = vmatpush3.bf16.msra.mxu0 %v7039_v7  ;;  %v7061_v7 = vpop.f32.mrb[10].mxu0  ;;  %9269 = vst [vmem:[#allocation75_spill] sm:$0xff] %v7064_v14  ;;  %v7069_v19 = vpop.f32.mrb[7].mxu1 }
 0x19d   :  { %5710 = vmatprep.subr.bf16.mxu0 %v9085_v13  ;;  %1368 = vmatpush1.bf16.msra.mxu1 %v6779_v27  ;;  %9268 = vst [vmem:[#allocation74_spill] sm:$0xff] %v7061_v7  ;;  %v7066_v27 = vpop.f32.mrb[11].mxu0  ;;  %9271 = vst [vmem:[#allocation77_spill] sm:$0xff] %v7069_v19  ;;  %v7078_v7 = vpop.f32.mrb[8].mxu1 }
 0x19e   :  { %1369 = vmatprep.subr.bf16.mxu1 %v6788_v29  ;;  %9270 = vst [vmem:[#allocation76_spill] sm:$0xff] %v7066_v27  ;;  %9272 = vst [vmem:[#allocation78_spill] sm:$0xff] %v7078_v7  ;;  %v7080_v14 = vpop.f32.mrb[12].mxu0  ;;  %v7083_v27 = vld [vmem:[#allocation10 + $0x98] ss:$12 sps:$4 sm:$0xff]   ;;  %v7085_v19 = vpop.f32.mrb[9].mxu1 }
 0x19f   :  { %9273 = vst [vmem:[#allocation79_spill] sm:$0xff] %v7080_v14  ;;  %9274 = vst [vmem:[#allocation80_spill] sm:$0xff] %v7085_v19  ;;  %v7087_v24 = vpop.f32.mrb[13].mxu0  ;;  %v7090_v33 = vpop.f32.mrb[10].mxu1  ;;  %v7101_v14 = vld [vmem:[#allocation10 + $0xb0] ss:$12 sps:$4 sm:$0xff]  }
 0x1a0   :  { %5711 = vmatpush3.bf16.msra.mxu0 %v7045_v6  ;;  %9275 = vst [vmem:[#allocation81_spill] sm:$0xff] %v7087_v24  ;;  %9276 = vst [vmem:[#allocation82_spill] sm:$0xff] %v7090_v33 }
 0x1a1   :  { %5712 = vmatprep.subr.bf16.mxu0 %v9085_v13  ;;  %1370 = vmatpush1.bf16.msra.mxu1 %v6793_v31 }
 0x1a2   :  { %1371 = vmatprep.subr.bf16.mxu1 %v6803_v34  ;;  %v7092_v34 = vpop.f32.mrb[14].mxu0 }
 0x1a3   :  { %9277 = vst [vmem:[#allocation83_spill] sm:$0xff] %v7092_v34  ;;  %v7097_v7 = vpop.f32.mrb[15].mxu0 }
 0x1a4   :  { %5713 = vmatpush3.bf16.msra.mxu0 %v7057_v21  ;;  %9279 = vst [vmem:[#allocation85_spill] sm:$0xff] %v7097_v7 }
 0x1a5   :  { %5714 = vmatprep.subr.bf16.mxu0 %v9085_v13  ;;  %1372 = vmatpush1.bf16.msra.mxu1 %v6811_v37 }
 0x1a6   :  { %1373 = vmatprep.subr.bf16.mxu1 %v6820_v39  ;;  %v7095_v39 = vpop.f32.mrb[11].mxu1 }
 0x1a7   :  { %9278 = vst [vmem:[#allocation84_spill] sm:$0xff] %v7095_v39  ;;  %v7106_v33 = vpop.f32.mrb[12].mxu1 }
 0x1a8   :  { %5715 = vmatpush3.bf16.msra.mxu0 %v7073_v17  ;;  %9280 = vst [vmem:[#allocation86_spill] sm:$0xff] %v7106_v33  ;;  %v7109_v19 = vpop.f32.mrb[13].mxu1 }
 0x1a9   :  { %5716 = vmatprep.subr.bf16.mxu0 %v9085_v13  ;;  %1374 = vmatpush1.bf16.msra.mxu1 %v6825_v41  ;;  %9281 = vst [vmem:[#allocation87_spill] sm:$0xff] %v7109_v19  ;;  %v7111_v39 = vpop.f32.mrb[14].mxu1 }
 0x1aa   :  { %1375 = vmatprep.subr.bf16.mxu1 %v6835_v44  ;;  %9282 = vst [vmem:[#allocation88_spill] sm:$0xff] %v7111_v39  ;;  %v7115_v7 = vpop.f32.mrb[15].mxu1 }
 0x1ab   :  { %9283 = vst [vmem:[#allocation89_spill] sm:$0xff] %v7115_v7 }
 0x1ac   :  { %5717 = vmatpush3.bf16.msra.mxu0 %v7083_v27 }
 0x1ad   :  { %5718 = vmatprep.subr.bf16.mxu0 %v9085_v13  ;;  %1376 = vmatpush1.bf16.msra.mxu1 %v6843_v47  ;;  %v7122_v13 = vpop.f32.mrb[16].mxu1 }
 0x1ae   :  { %1377 = vmatprep.subr.bf16.mxu1 %v6852_v49  ;;  %9284 = vst [vmem:[#allocation90_spill] sm:$0xff] %v7122_v13  ;;  %v7124_v33 = vpop.f32.mrb[17].mxu1 }
 0x1af   :  { %9285 = vst [vmem:[#allocation91_spill] sm:$0xff] %v7124_v33  ;;  %v7127_v39 = vpop.f32.mrb[18].mxu1 }
 0x1b0   :  { %5719 = vmatpush3.bf16.msra.mxu0 %v7101_v14  ;;  %9286 = vst [vmem:[#allocation92_spill] sm:$0xff] %v7127_v39  ;;  %v7130_v7 = vpop.f32.mrb[19].mxu1 }
 0x1b1   :  { %1404 = vmatprep.subr.bf16.mxu0 %v6740_v15  ;;  %1378 = vmatpush1.bf16.msra.mxu1 %v6857_v51  ;;  %9287 = vst [vmem:[#allocation93_spill] sm:$0xff] %v7130_v7  ;;  %v7134_v19 = vpop.f32.mrb[20].mxu1 }
 0x1b2   :  { %1445 = vmatprep.subr.bf16.mxu1 %v6862_v53  ;;  %9288 = vst [vmem:[#allocation94_spill] sm:$0xff] %v7134_v19  ;;  %v7136_v34 = vpop.f32.mrb[21].mxu1  ;;  %v269_v19 = vadd.f32 %v6893_v4, %v6888_v62  ;;  %v613_v4 = vld [vmem:[%s9016_s6] sm:$0x7] }
 0x1b3   :  { %5721 = vmatmul.mubr.bf16.vlgmr.msra.gmra.mrb[24].mxu0 %v9242_v10  ;;  %9289 = vst [vmem:[#allocation95_spill] sm:$0xff] %v7136_v34  ;;  %v7139_v13 = vpop.f32.mrb[22].mxu1 }
 0x1b4   :  { %1405 = vmatpush1.bf16.msra.mxu0 %v6747_v18  ;;  %1436 = vmatprep.mubr.bf16.mxu0 %v9242_v10  ;;  %9290 = vst [vmem:[#allocation96_spill] sm:$0xff] %v7139_v13  ;;  %v7142_v33 = vpop.f32.mrb[23].mxu1  ;;  %v267_v13 = vadd.f32 %v6891_v2, %v6885_v60 }
 0x1b5   :  { %1406 = vmatprep.subr.bf16.mxu0 %v6756_v20  ;;  %9291 = vst [vmem:[#allocation97_spill] sm:$0xff] %v7142_v33 }
 0x1b8   :  { %1407 = vmatpush1.bf16.msra.mxu0 %v6762_v22 }
 0x1b9   :  { %1408 = vmatprep.subr.bf16.mxu0 %v6773_v25 }
 0x1bc   :  { %1409 = vmatpush1.bf16.msra.mxu0 %v6781_v28 }
 0x1bd   :  { %1410 = vmatprep.subr.bf16.mxu0 %v6790_v30 }
 0x1c0   :  { %1411 = vmatpush1.bf16.msra.mxu0 %v6795_v32 }
 0x1c1   :  { %1412 = vmatprep.subr.bf16.mxu0 %v6805_v35 }
 0x1c4   :  { %1413 = vmatpush1.bf16.msra.mxu0 %v6813_v38 }
 0x1c5   :  { %1414 = vmatprep.subr.bf16.mxu0 %v6822_v40 }
 0x1c8   :  { %1415 = vmatpush1.bf16.msra.mxu0 %v6827_v42 }
 0x1c9   :  { %1416 = vmatprep.subr.bf16.mxu0 %v6837_v45 }
 0x1cc   :  { %1417 = vmatpush1.bf16.msra.mxu0 %v6845_v48 }
 0x1cd   :  { %1418 = vmatprep.subr.bf16.mxu0 %v6854_v50 }
 0x1d0   :  { %1419 = vmatpush1.bf16.msra.mxu0 %v6859_v52 }
 0x1d1   :  { %1487 = vmatprep.subr.bf16.mxu0 %v6866_v54 }
 0x246   :  { %v981_v33 = vpop.f32.mrb[16].mxu0  ;;  %v1022_v34 = vpop.f32.mrb[24].mxu1 }
 0x247   :  { %v1316_v39 = vadd.f32 %v981_v33, %v267_v13  ;;  %v983_v7 = vpop.f32.mrb[17].mxu0  ;;  %v1024_v24 = vpop.f32.mrb[25].mxu1  ;;  %v1315_v33 = vadd.f32 %v6919_v61, %v1022_v34 }
 0x248   :  { %v1323_v45 = vadd.f32 %v983_v7, %v269_v19  ;;  %v985_v42 = vpop.f32.mrb[18].mxu0  ;;  %v1026_v48 = vpop.f32.mrb[26].mxu1  ;;  %v7161_v19 = vrot.slane %v613_v4, %v6876_v57 }
 0x249   :  { %v5448_v40 = vmul.f32 -1.442695, %v1316_v39  ;;  %v986_v50 = vpop.f32.mrb[19].mxu0  ;;  %v1027_v38 = vpop.f32.mrb[27].mxu1  ;;  %v7166_v42 = vrot.slane %v613_v4, %v6882_v59 }
 0x24a   :  { %v5449_v52 = vmul.f32 -1.442695, %v1323_v45  ;;  %9292 = vst [vmem:[#allocation98_spill] sm:$0xff] %v7161_v19  ;;  %v339_v38 = vadd.f32 %v6900_v9, %v6914_v43  ;;  %v1337_v45 = vadd.f32 %v1024_v24, %v7161_v19 }
 0x24b   :  { %6141 = vpow2.f32 %v5448_v40 }
 0x24c   :  { %6143 = vpow2.f32 %v5449_v52 }
 0x255   :  { %v6142_v54 = vpop.eup %6141 }
 0x256   :  { %v1320_v35 = vadd.f32 1.0, %v6142_v54  ;;  %v6144_v2 = vpop.eup %6143 }
 0x257   :  { %v1327_v13 = vadd.f32 1.0, %v6144_v2 }
 0x258   :  { %6145 = vrcp.f32 %v1320_v35 }
 0x259   :  { %6147 = vrcp.f32 %v1327_v13 }
 0x262   :  { %v6146_v39 = vpop.eup %6145 }
 0x263   :  { %v1330_v40 = vmul.f32 %v6146_v39, %v1315_v33  ;;  %v6148_v39 = vpop.eup %6147 }
 0x264   :  { %v1333_v59 = vsub.f32 1.0, %v6148_v39  ;;  %v1335_v24 = vmul.f32 %v6148_v39, %v6923_v0  ;;  %v9293_v0 = vld [vmem:[#allocation49_spill] sm:$0xff]  ;;  %v9300_v39 = vld [vmem:[#allocation55_spill] sm:$0xff] }
 0x265   :  { %v1331_v35 = vadd.f32 %v1330_v40, %v339_v38 }
 0x266   :  { %v1063_v48 = vpop.f32.mrb[20].mxu0  ;;  %v1264_v50 = vpop.f32.mrb[28].mxu1 }
 0x267   :  { %6149 = vtanh.f32 %v1331_v35  ;;  %v1338_v34 = vadd.f32 %v1063_v48, %v7166_v42  ;;  %v1341_v52 = vadd.f32 %v1337_v45, %v1264_v50  ;;  %v1065_v54 = vpop.f32.mrb[21].mxu0  ;;  %v1266_v7 = vpop.f32.mrb[29].mxu1  ;;  %v7192_v50 = vld [vmem:[%s9018_s8] ss:$0 sm:$0xff] }
 0x268   :  { %v1067_v2 = vpop.f32.mrb[22].mxu0  ;;  %v1268_v57 = vpop.f32.mrb[30].mxu1 }
 0x269   :  { %v5450_v61 = vmul.f32 -1.442695, %v1341_v52  ;;  %v1348_v9 = vadd.f32 %v1338_v34, %v1266_v7  ;;  %v1068_v33 = vpop.f32.mrb[23].mxu0  ;;  %v1269_v13 = vpop.f32.mrb[31].mxu1  ;;  %v9296_v34 = vld [vmem:[#allocation47_spill] sm:$0xff]  ;;  %v9297_v2 = vld [vmem:[#allocation52_spill] sm:$0xff] }
 0x26a   :  { %v7195_v52 = vrot.slane %v613_v4, %v9296_v34  ;;  %v9299_v13 = vld [vmem:[#allocation54_spill] sm:$0xff] }
 0x26b   :  { %6151 = vpow2.f32 %v5450_v61  ;;  %v5451_v19 = vmul.f32 -1.442695, %v1348_v9  ;;  %v9294_v61 = vld [vmem:[#allocation50_spill] sm:$0xff]  ;;  %v9298_v9 = vld [vmem:[#allocation53_spill] sm:$0xff] }
 0x26d   :  { %6153 = vpow2.f32 %v5451_v19  ;;  %v9295_v19 = vld [vmem:[#allocation51_spill] sm:$0xff] }
 0x271   :  { %v6150_v38 = vpop.eup %6149 }
 0x272   :  { %v1334_v40 = vmul.f32 %v6150_v38, %v1333_v59 }
 0x274   :  { %v7171_v35 = vadd.f32 %v1335_v24, %v1334_v40 }
 0x275   :  { %v6152_v48 = vpop.eup %6151 }
 0x276   :  { %v1362_v45 = vpack.c.bf16 %v7171_v35, %v7171_v35  ;;  %v1345_v57 = vadd.f32 1.0, %v6152_v48 }
 0x277   :  { %v6154_v59 = vpop.eup %6153 }
 0x278   :  { %1396 = vmatmul.mubr.bf16.vlgmr.msra.gmra.mrb[32].mxu1 %v1362_v45  ;;  %1437 = vmatmul.mubr.bf16.vlgmr.msra.gmra.mrb[28].mxu0 %v1362_v45  ;;  %6155 = vrcp.f32 %v1345_v57  ;;  %v1352_v7 = vadd.f32 1.0, %v6154_v59  ;;  %v1339_v57 = vadd.f32 %v1065_v54, %v7195_v52  ;;  %v9301_v59 = vld [vmem:[#allocation56_spill] sm:$0xff]  ;;  %v9307_v54 = vld [vmem:[#allocation62_spill] sm:$0xff] }
 0x279   :  { %1446 = vmatpush1.bf16.msra.mxu1 %v6925_v36  ;;  %1488 = vmatpush1.bf16.msra.mxu0 %v6927_v56 }
 0x27a   :  { %1447 = vmatprep.subr.bf16.mxu1 %v6933_v46  ;;  %1489 = vmatprep.subr.bf16.mxu0 %v6935_v1  ;;  %6157 = vrcp.f32 %v1352_v7 }
 0x27b   :  { %1477 = vmatprep.mubr.bf16.mxu1 %v9242_v10  ;;  %1519 = vmatprep.mubr.bf16.mxu0 %v9242_v10 }
 0x27d   :  { %1448 = vmatpush1.bf16.msra.mxu1 %v6941_v55  ;;  %1490 = vmatpush1.bf16.msra.mxu0 %v6943_v63 }
 0x27e   :  { %1449 = vmatprep.subr.bf16.mxu1 %v6947_v3  ;;  %1491 = vmatprep.subr.bf16.mxu0 %v6949_v5 }
 0x281   :  { %1450 = vmatpush1.bf16.msra.mxu1 %v6955_v23  ;;  %1492 = vmatpush1.bf16.msra.mxu0 %v9293_v0 }
 0x282   :  { %1451 = vmatprep.subr.bf16.mxu1 %v9294_v61  ;;  %1493 = vmatprep.subr.bf16.mxu0 %v9295_v19  ;;  %v6156_v24 = vpop.eup %6155  ;;  %v9304_v19 = vld [vmem:[#allocation59_spill] sm:$0xff] }
 0x284   :  { %v6158_v7 = vpop.eup %6157 }
 0x285   :  { %1452 = vmatpush1.bf16.msra.mxu1 %v9297_v2  ;;  %1494 = vmatpush1.bf16.msra.mxu0 %v9298_v9  ;;  %v9302_v2 = vld [vmem:[#allocation57_spill] sm:$0xff]  ;;  %v9303_v9 = vld [vmem:[#allocation58_spill] sm:$0xff] }
 0x286   :  { %v1305_v33 = vpop.f32.mrb[24].mxu0  ;;  %1453 = vmatprep.subr.bf16.mxu1 %v9299_v13  ;;  %1495 = vmatprep.subr.bf16.mxu0 %v9300_v39  ;;  %v9305_v39 = vld [vmem:[#allocation60_spill] sm:$0xff] }
 0x287   :  { %v1340_v38 = vadd.f32 %v7192_v50, %v1305_v33  ;;  %v5722_v40 = vpop.f32.mrb[25].mxu0  ;;  %v9306_v33 = vld [vmem:[#allocation61_spill] sm:$0xff] }
 0x288   :  { %v1308_v48 = vpop.f32.mrb[26].mxu0  ;;  %v9310_v40 = vld [vmem:[#allocation19_spill] sm:$0xff] }
 0x289   :  { %v1355_v4 = vmul.f32 %v6156_v24, %v1340_v38  ;;  %v5723_v34 = vpop.f32.mrb[27].mxu0  ;;  %1454 = vmatpush1.bf16.msra.mxu1 %v9301_v59  ;;  %1496 = vmatpush1.bf16.msra.mxu0 %v9302_v2  ;;  %v1358_v38 = vsub.f32 1.0, %v6158_v7 }
 0x28a   :  { %1455 = vmatprep.subr.bf16.mxu1 %v9303_v9  ;;  %1497 = vmatprep.subr.bf16.mxu0 %v9304_v19  ;;  %v9308_v34 = vld [vmem:[#allocation63_spill] sm:$0xff] }
 0x28b   :  { %v1356_v13 = vadd.f32 %v1355_v4, %v1339_v57  ;;  %v1360_v57 = vmul.f32 0.0, %v6158_v7  ;;  %v9311_v4 = vld [vmem:[#allocation67_spill] sm:$0xff]  ;;  %v9314_v7 = vld [vmem:[#allocation21_spill] sm:$0xff] }
 0x28d   :  { %6159 = vtanh.f32 %v1356_v13  ;;  %1456 = vmatpush1.bf16.msra.mxu1 %v9305_v39  ;;  %1498 = vmatpush1.bf16.msra.mxu0 %v6993_v16  ;;  %v9309_v13 = vmov 0.0  }
 0x28e   :  { %1457 = vmatprep.subr.bf16.mxu1 %v9306_v33  ;;  %1499 = vmatprep.subr.bf16.mxu0 %v9307_v54 }
 0x291   :  { %1458 = vmatpush1.bf16.msra.mxu1 %v7003_v12  ;;  %1500 = vmatpush1.bf16.msra.mxu0 %v7005_v11 }
 0x292   :  { %1459 = vmatprep.subr.bf16.mxu1 %v9308_v34  ;;  %1501 = vmatprep.subr.bf16.mxu0 %v7011_v26 }
 0x295   :  { %1460 = vmatpush1.bf16.msra.mxu1 %v7015_v58  ;;  %1502 = vmatpush1.bf16.msra.mxu0 %v7017_v8  ;;  %v9312_v58 = vld [vmem:[#allocation68_spill] sm:$0xff] }
 0x296   :  { %5724 = vmatprep.subr.bf16.mxu1 %v9309_v13  ;;  %1620 = vmatprep.subr.bf16.mxu0 %v9310_v40  ;;  %v9316_v40 = vld [vmem:[#allocation22_spill] sm:$0xff] }
 0x297   :  { %v6160_v24 = vpop.eup %6159 }
 0x298   :  { %1478 = vmatmul.mubr.bf16.vlgmr.msra.gmra.mrb[36].mxu1 %v1362_v45  ;;  %v1359_v48 = vmul.f32 %v6160_v24, %v1358_v38  ;;  %v9313_v45 = vld [vmem:[#allocation20_spill] sm:$0xff]  ;;  %v9315_v38 = vld [vmem:[#allocation69_spill] sm:$0xff]  ;;  %v9317_v24 = vld [vmem:[#allocation23_spill] sm:$0xff] }
 0x299   :  { %5725 = vmatpush3.bf16.msra.mxu1 %v9311_v4  ;;  %5740 = vmatprep.mubr.msk.bf16.mxu1 %vm6543_vm1, %v9309_v13 }
 0x29a   :  { %5726 = vmatprep.subr.bf16.mxu1 %v9309_v13  ;;  %v7223_v26 = vadd.f32 %v1360_v57, %v1359_v48  ;;  %v9318_v48 = vld [vmem:[#allocation24_spill] sm:$0xff]  ;;  %v9319_v57 = vld [vmem:[#allocation25_spill] sm:$0xff] }
 0x29c   :  { %v1486_v8 = vpack.c.bf16 %v7223_v26, %v7223_v26 }
 0x29d   :  { %5727 = vmatpush3.bf16.msra.mxu1 %v9312_v58 }
 0x29e   :  { %1520 = vmatmul.mubr.bf16.vlgmr.msra.gmra.mrb[32].mxu0 %v1486_v8  ;;  %5728 = vmatprep.subr.bf16.mxu1 %v9309_v13 }
 0x29f   :  { %1621 = vmatpush1.bf16.msra.mxu0 %v9313_v45  ;;  %1652 = vmatprep.mubr.bf16.mxu0 %v9242_v10  ;;  %v9320_v45 = vld [vmem:[#allocation28_spill] sm:$0xff] }
 0x2a0   :  { %1622 = vmatprep.subr.bf16.mxu0 %v9314_v7 }
 0x2a1   :  { %5729 = vmatpush3.bf16.msra.mxu1 %v9315_v38 }
 0x2a2   :  { %5730 = vmatprep.subr.bf16.mxu1 %v9309_v13 }
 0x2a3   :  { %1623 = vmatpush1.bf16.msra.mxu0 %v9316_v40 }
 0x2a4   :  { %1624 = vmatprep.subr.bf16.mxu0 %v9317_v24 }
 0x2a5   :  { %5731 = vmatpush3.bf16.msra.mxu1 %v7045_v6 }
 0x2a6   :  { %5732 = vmatprep.subr.bf16.mxu1 %v9309_v13 }
 0x2a7   :  { %1625 = vmatpush1.bf16.msra.mxu0 %v9318_v48 }
 0x2a8   :  { %1626 = vmatprep.subr.bf16.mxu0 %v6788_v29  ;;  %v9323_v29 = vld [vmem:[#allocation29_spill] sm:$0xff] }
 0x2a9   :  { %5733 = vmatpush3.bf16.msra.mxu1 %v7057_v21 }
 0x2aa   :  { %5734 = vmatprep.subr.bf16.mxu1 %v9309_v13 }
 0x2ab   :  { %1627 = vmatpush1.bf16.msra.mxu0 %v6793_v31  ;;  %v9325_v31 = vld [vmem:[#allocation31_spill] sm:$0xff] }
 0x2ac   :  { %1628 = vmatprep.subr.bf16.mxu0 %v9319_v57 }
 0x2ad   :  { %5735 = vmatpush3.bf16.msra.mxu1 %v7073_v17 }
 0x2ae   :  { %5736 = vmatprep.subr.bf16.mxu1 %v9309_v13 }
 0x2af   :  { %1629 = vmatpush1.bf16.msra.mxu0 %v6811_v37  ;;  %v9326_v37 = vld [vmem:[#allocation32_spill] sm:$0xff] }
 0x2b0   :  { %1630 = vmatprep.subr.bf16.mxu0 %v9320_v45 }
 0x2b1   :  { %5737 = vmatpush3.bf16.msra.mxu1 %v7083_v27 }
 0x2b2   :  { %5738 = vmatprep.subr.bf16.mxu1 %v9309_v13 }
 0x2b3   :  { %1631 = vmatpush1.bf16.msra.mxu0 %v6825_v41  ;;  %v9331_v41 = vld [vmem:[#allocation44_spill] sm:$0xff] }
 0x2b4   :  { %1632 = vmatprep.subr.bf16.mxu0 %v6835_v44  ;;  %v275_v44 = vadd.f32 %v9331_v41, %v6888_v62 }
 0x2b5   :  { %5739 = vmatpush3.bf16.msra.mxu1 %v7101_v14 }
 0x2b6   :  { %1661 = vmatprep.subr.bf16.mxu1 %v6740_v15  ;;  %v9321_v15 = vld [vmem:[#allocation26_spill] sm:$0xff] }
 0x2b7   :  { %1633 = vmatpush1.bf16.msra.mxu0 %v6843_v47 }
 0x2b8   :  { %5741 = vmatmul.mubr.bf16.vlgmr.msra.gmra.mrb[40].mxu1 %v1486_v8  ;;  %1634 = vmatprep.subr.bf16.mxu0 %v6852_v49 }
 0x2b9   :  { %1662 = vmatpush1.bf16.msra.mxu1 %v6747_v18  ;;  %1693 = vmatprep.mubr.bf16.mxu1 %v9242_v10  ;;  %v9322_v18 = vld [vmem:[#allocation27_spill] sm:$0xff] }
 0x2ba   :  { %1663 = vmatprep.subr.bf16.mxu1 %v6756_v20  ;;  %v9324_v20 = vld [vmem:[#allocation30_spill] sm:$0xff] }
 0x2bb   :  { %1635 = vmatpush1.bf16.msra.mxu0 %v6857_v51 }
 0x2bc   :  { %1702 = vmatprep.subr.bf16.mxu0 %v6862_v53 }
 0x2bd   :  { %1664 = vmatpush1.bf16.msra.mxu1 %v6762_v22  ;;  %v9327_v22 = vld [vmem:[#allocation33_spill] sm:$0xff] }
 0x2be   :  { %1665 = vmatprep.subr.bf16.mxu1 %v6773_v25  ;;  %v9328_v25 = vld [vmem:[#allocation34_spill] sm:$0xff] }
 0x2c1   :  { %1666 = vmatpush1.bf16.msra.mxu1 %v6781_v28  ;;  %v9329_v28 = vld [vmem:[#allocation35_spill] sm:$0xff] }
 0x2c2   :  { %1667 = vmatprep.subr.bf16.mxu1 %v6790_v30  ;;  %v9330_v30 = vld [vmem:[#allocation43_spill] sm:$0xff] }
 0x2c5   :  { %1668 = vmatpush1.bf16.msra.mxu1 %v6795_v32  ;;  %v273_v32 = vadd.f32 %v9330_v30, %v6885_v60 }
 0x2c6   :  { %1669 = vmatprep.subr.bf16.mxu1 %v9321_v15 }
 0x2c9   :  { %1670 = vmatpush1.bf16.msra.mxu1 %v9322_v18 }
 0x2ca   :  { %1671 = vmatprep.subr.bf16.mxu1 %v9323_v29 }
 0x2cd   :  { %1672 = vmatpush1.bf16.msra.mxu1 %v9324_v20 }
 0x2ce   :  { %1673 = vmatprep.subr.bf16.mxu1 %v9325_v31 }
 0x2d1   :  { %1674 = vmatpush1.bf16.msra.mxu1 %v9326_v37  ;;  %v9332_v37 = vld [vmem:[#allocation48_spill] sm:$0xff] }
 0x2d2   :  { %1675 = vmatprep.subr.bf16.mxu1 %v9327_v22 }
 0x2d5   :  { %1676 = vmatpush1.bf16.msra.mxu1 %v9328_v25 }
 0x2d6   :  { %1744 = vmatprep.subr.bf16.mxu1 %v9329_v28  ;;  %v9333_v28 = vld [vmem:[#allocation41_spill] sm:$0xff] }
 0x2d7   :  { %v344_v30 = vadd.f32 %v9333_v28, %v6914_v43 }
 0x34b   :  { %v1397_v47 = vpop.f32.mrb[32].mxu1  ;;  %v1438_v49 = vpop.f32.mrb[28].mxu0 }
 0x34c   :  { %v1573_v51 = vadd.f32 %v1397_v47, %v273_v32  ;;  %v1399_v53 = vpop.f32.mrb[33].mxu1  ;;  %v1440_v8 = vpop.f32.mrb[29].mxu0  ;;  %v1572_v22 = vadd.f32 %v9332_v37, %v1438_v49 }
 0x34d   :  { %v1580_v7 = vadd.f32 %v1399_v53, %v275_v44  ;;  %v1401_v40 = vpop.f32.mrb[34].mxu1  ;;  %v1442_v24 = vpop.f32.mrb[30].mxu0 }
 0x34e   :  { %v5452_v48 = vmul.f32 -1.442695, %v1573_v51  ;;  %v1402_v57 = vpop.f32.mrb[35].mxu1  ;;  %v1443_v45 = vpop.f32.mrb[31].mxu0 }
 0x34f   :  { %v5453_v15 = vmul.f32 -1.442695, %v1580_v7  ;;  %v9334_v7 = vld [vmem:[#allocation98_spill] sm:$0xff] }
 0x350   :  { %6161 = vpow2.f32 %v5452_v48  ;;  %v1594_v40 = vadd.f32 %v1440_v8, %v9334_v7 }
 0x351   :  { %6163 = vpow2.f32 %v5453_v15 }
 0x35a   :  { %v6162_v18 = vpop.eup %6161 }
 0x35b   :  { %v1577_v29 = vadd.f32 1.0, %v6162_v18  ;;  %v6164_v20 = vpop.eup %6163 }
 0x35c   :  { %v1584_v31 = vadd.f32 1.0, %v6164_v20 }
 0x35d   :  { %6165 = vrcp.f32 %v1577_v29 }
 0x35e   :  { %6167 = vrcp.f32 %v1584_v31 }
 0x367   :  { %v6166_v25 = vpop.eup %6165 }
 0x368   :  { %v1587_v32 = vmul.f32 %v6166_v25, %v1572_v22  ;;  %v6168_v57 = vpop.eup %6167 }
 0x369   :  { %v1590_v37 = vsub.f32 1.0, %v6168_v57  ;;  %v1592_v25 = vmul.f32 %v6168_v57, %v7171_v35  ;;  %v7366_v57 = vld [vmem:[#allocation8 + $0xc4] ss:$24 sps:$4 sm:$0xff]  }
 0x36a   :  { %v1588_v41 = vadd.f32 %v1587_v32, %v344_v30  ;;  %9345 = vst [vmem:[#allocation56_spill] sm:$0xff] %v7366_v57 }
 0x36b   :  { %v1479_v44 = vpop.f32.mrb[36].mxu1 }
 0x36c   :  { %6169 = vtanh.f32 %v1588_v41  ;;  %v1481_v47 = vpop.f32.mrb[37].mxu1  ;;  %v1595_v24 = vadd.f32 %v1479_v44, %v7166_v42  ;;  %v9338_v41 = vld [vmem:[#allocation54_spill] sm:$0xff] }
 0x36d   :  { %v1483_v51 = vpop.f32.mrb[38].mxu1 }
 0x36e   :  { %v1484_v53 = vpop.f32.mrb[39].mxu1  ;;  %v1596_v51 = vadd.f32 %v1481_v47, %v7195_v52  ;;  %v7338_v47 = vld [vmem:[#allocation8] ss:$24 sps:$4 sm:$0xff]  }
 0x371   :  { %v1521_v48 = vpop.f32.mrb[32].mxu0 }
 0x372   :  { %v1598_v45 = vadd.f32 %v1594_v40, %v1521_v48  ;;  %v1523_v49 = vpop.f32.mrb[33].mxu0  ;;  %v7358_v48 = vld [vmem:[#allocation8 + $0x94] ss:$24 sps:$4 sm:$0xff]  }
 0x373   :  { %v1605_v15 = vadd.f32 %v1595_v24, %v1523_v49  ;;  %v1525_v18 = vpop.f32.mrb[34].mxu0  ;;  %v7355_v24 = vld [vmem:[#allocation8 + $0x60] ss:$24 sps:$4 sm:$0xff]   ;;  %v7382_v49 = vld [vmem:[#allocation8 + $0x124] ss:$24 sps:$4 sm:$0xff]  }
 0x374   :  { %v5454_v29 = vmul.f32 -1.442695, %v1598_v45  ;;  %v1526_v20 = vpop.f32.mrb[35].mxu0  ;;  %v7374_v45 = vld [vmem:[#allocation8 + $0xf4] ss:$24 sps:$4 sm:$0xff]   ;;  %9349 = vst [vmem:[#allocation60_spill] sm:$0xff] %v7382_v49 }
 0x375   :  { %v5455_v28 = vmul.f32 -1.442695, %v1605_v15  ;;  %9347 = vst [vmem:[#allocation58_spill] sm:$0xff] %v7374_v45  ;;  %v7389_v15 = vld [vmem:[#allocation8 + $0x120] ss:$24 sps:$4 sm:$0xff]  }
 0x376   :  { %v6170_v31 = vpop.eup %6169  ;;  %6171 = vpow2.f32 %v5454_v29  ;;  %9351 = vst [vmem:[#allocation62_spill] sm:$0xff] %v7389_v15  ;;  %v7395_v18 = vld [vmem:[#allocation8 + $0x8] ss:$24 sps:$4 sm:$0xff]   ;;  %v7399_v29 = vld [vmem:[#allocation8 + $0x3c] ss:$24 sps:$4 sm:$0xff]  }
 0x377   :  { %v1591_v22 = vmul.f32 %v6170_v31, %v1590_v37  ;;  %6173 = vpow2.f32 %v5455_v28  ;;  %9353 = vst [vmem:[#allocation19_spill] sm:$0xff] %v7395_v18  ;;  %9354 = vst [vmem:[#allocation67_spill] sm:$0xff] %v7399_v29  ;;  %v7402_v20 = vld [vmem:[#allocation8 + $0x150] ss:$24 sps:$4 sm:$0xff]   ;;  %v7405_v37 = vld [vmem:[#allocation8 + $0x14] ss:$24 sps:$4 sm:$0xff]  }
 0x378   :  { %9355 = vst [vmem:[#allocation68_spill] sm:$0xff] %v7402_v20  ;;  %9356 = vst [vmem:[#allocation20_spill] sm:$0xff] %v7405_v37  ;;  %v7408_v31 = vld [vmem:[#allocation8 + $0x38] ss:$24 sps:$4 sm:$0xff]   ;;  %v7417_v28 = vld [vmem:[#allocation8 + $0x9c] ss:$24 sps:$4 sm:$0xff]  }
 0x379   :  { %v7285_v30 = vadd.f32 %v1592_v25, %v1591_v22  ;;  %9357 = vst [vmem:[#allocation21_spill] sm:$0xff] %v7408_v31  ;;  %v7411_v22 = vld [vmem:[#allocation8 + $0x6c] ss:$24 sps:$4 sm:$0xff]   ;;  %v7414_v25 = vld [vmem:[#allocation8 + $0x68] ss:$24 sps:$4 sm:$0xff]   ;;  %9360 = vst [vmem:[#allocation23_spill] sm:$0xff] %v7417_v28 }
 0x37a   :  { %9358 = vst [vmem:[#allocation69_spill] sm:$0xff] %v7411_v22  ;;  %9359 = vst [vmem:[#allocation22_spill] sm:$0xff] %v7414_v25 }
 0x37b   :  { %v1619_v8 = vpack.c.bf16 %v7285_v30, %v7285_v30 }
 0x37d   :  { %1653 = vmatmul.mubr.bf16.vlgmr.msra.gmra.mrb[36].mxu0 %v1619_v8  ;;  %1694 = vmatmul.mubr.bf16.vlgmr.msra.gmra.mrb[44].mxu1 %v1619_v8 }
 0x37e   :  { %1703 = vmatpush1.bf16.msra.mxu0 %v6925_v36  ;;  %1745 = vmatpush1.bf16.msra.mxu1 %v6927_v56  ;;  %v9335_v36 = vld [vmem:[#allocation51_spill] sm:$0xff] }
 0x37f   :  { %1704 = vmatprep.subr.bf16.mxu0 %v6933_v46  ;;  %1746 = vmatprep.subr.bf16.mxu1 %v6935_v1  ;;  %v9336_v1 = vld [vmem:[#allocation52_spill] sm:$0xff] }
 0x380   :  { %v6172_v32 = vpop.eup %6171  ;;  %1734 = vmatprep.mubr.bf16.mxu0 %v9242_v10  ;;  %1776 = vmatprep.mubr.bf16.mxu1 %v9242_v10 }
 0x381   :  { %v1602_v35 = vadd.f32 1.0, %v6172_v32  ;;  %v6174_v56 = vpop.eup %6173  ;;  %v7423_v32 = vld [vmem:[#allocation8 + $0xcc] ss:$24 sps:$4 sm:$0xff]  }
 0x382   :  { %1705 = vmatpush1.bf16.msra.mxu0 %v6941_v55  ;;  %1747 = vmatpush1.bf16.msra.mxu1 %v6943_v63  ;;  %v1609_v46 = vadd.f32 1.0, %v6174_v56  ;;  %v9337_v55 = vld [vmem:[#allocation53_spill] sm:$0xff]  ;;  %9362 = vst [vmem:[#allocation25_spill] sm:$0xff] %v7423_v32 }
 0x383   :  { %6175 = vrcp.f32 %v1602_v35  ;;  %1706 = vmatprep.subr.bf16.mxu0 %v6947_v3  ;;  %1748 = vmatprep.subr.bf16.mxu1 %v6949_v5  ;;  %v9339_v3 = vld [vmem:[#allocation55_spill] sm:$0xff]  ;;  %v7429_v56 = vld [vmem:[#allocation8 + $0xfc] ss:$24 sps:$4 sm:$0xff]  }
 0x384   :  { %6177 = vrcp.f32 %v1609_v46  ;;  %v7426_v35 = vld [vmem:[#allocation8 + $0xc8] ss:$24 sps:$4 sm:$0xff]   ;;  %9364 = vst [vmem:[#allocation26_spill] sm:$0xff] %v7429_v56  ;;  %v7435_v46 = vld [vmem:[#allocation8 + $0x12c] ss:$24 sps:$4 sm:$0xff]  }
 0x385   :  { %9363 = vst [vmem:[#allocation28_spill] sm:$0xff] %v7426_v35  ;;  %9366 = vst [vmem:[#allocation29_spill] sm:$0xff] %v7435_v46 }
 0x386   :  { %1707 = vmatpush1.bf16.msra.mxu0 %v6955_v23  ;;  %1749 = vmatpush1.bf16.msra.mxu1 %v9293_v0 }
 0x387   :  { %1708 = vmatprep.subr.bf16.mxu0 %v9294_v61  ;;  %1750 = vmatprep.subr.bf16.mxu1 %v9335_v36  ;;  %v7432_v36 = vld [vmem:[#allocation8 + $0xf8] ss:$24 sps:$4 sm:$0xff]  }
 0x388   :  { %9365 = vst [vmem:[#allocation27_spill] sm:$0xff] %v7432_v36 }
 0x38a   :  { %1709 = vmatpush1.bf16.msra.mxu0 %v9336_v1  ;;  %1751 = vmatpush1.bf16.msra.mxu1 %v9337_v55  ;;  %v7438_v1 = vld [vmem:[#allocation8 + $0x128] ss:$24 sps:$4 sm:$0xff]   ;;  %v7441_v55 = vld [vmem:[#allocation8 + $0x15c] ss:$24 sps:$4 sm:$0xff]  }
 0x38b   :  { %v1562_v63 = vpop.f32.mrb[40].mxu1  ;;  %1710 = vmatprep.subr.bf16.mxu0 %v9338_v41  ;;  %1752 = vmatprep.subr.bf16.mxu1 %v9339_v3  ;;  %9367 = vst [vmem:[#allocation30_spill] sm:$0xff] %v7438_v1  ;;  %9368 = vst [vmem:[#allocation31_spill] sm:$0xff] %v7441_v55  ;;  %v7447_v41 = vld [vmem:[#allocation10 + $0x4] ss:$12 sps:$4 sm:$0xff]   ;;  %v9371_v3 = vld [vmem:[#allocation45_spill] sm:$0xff] }
 0x38c   :  { %v1597_v5 = vadd.f32 %v7192_v50, %v1562_v63  ;;  %v5742_v23 = vpop.f32.mrb[41].mxu1  ;;  %v7444_v63 = vld [vmem:[#allocation8 + $0x158] ss:$24 sps:$4 sm:$0xff]   ;;  %9370 = vst [vmem:[#allocation33_spill] sm:$0xff] %v7447_v41 }
 0x38d   :  { %v6176_v44 = vpop.eup %6175  ;;  %v1565_v0 = vpop.f32.mrb[42].mxu1  ;;  %9369 = vst [vmem:[#allocation32_spill] sm:$0xff] %v7444_v63  ;;  %v9372_v23 = vld [vmem:[#allocation46_spill] sm:$0xff] }
 0x38e   :  { %v1612_v61 = vmul.f32 %v6176_v44, %v1597_v5  ;;  %v5743_v53 = vpop.f32.mrb[43].mxu1  ;;  %1711 = vmatpush1.bf16.msra.mxu0 %v9301_v59  ;;  %1753 = vmatpush1.bf16.msra.mxu1 %v9302_v2  ;;  %v9340_v2 = vld [vmem:[#allocation64_spill] sm:$0xff]  ;;  %v9342_v59 = vld [vmem:[#allocation66_spill] sm:$0xff]  ;;  %v277_v5 = vadd.f32 %v9371_v3, %v6885_v60  ;;  %v279_v44 = vadd.f32 %v9372_v23, %v6888_v62 }
 0x38f   :  { %1712 = vmatprep.subr.bf16.mxu0 %v9303_v9  ;;  %1754 = vmatprep.subr.bf16.mxu1 %v9304_v19  ;;  %v6178_v9 = vpop.eup %6177  ;;  %v9341_v19 = vld [vmem:[#allocation65_spill] sm:$0xff] }
 0x390   :  { %v1613_v40 = vadd.f32 %v1612_v61, %v1596_v51 }
 0x392   :  { %6179 = vtanh.f32 %v1613_v40  ;;  %1713 = vmatpush1.bf16.msra.mxu0 %v9305_v39  ;;  %1755 = vmatpush1.bf16.msra.mxu1 %v6993_v16  ;;  %v1615_v16 = vsub.f32 1.0, %v6178_v9  ;;  %v7324_v39 = vld [vmem:[#allocation8 + $0x4] ss:$24 sps:$4 sm:$0xff]  }
 0x393   :  { %1714 = vmatprep.subr.bf16.mxu0 %v9306_v33  ;;  %1756 = vmatprep.subr.bf16.mxu1 %v9307_v54  ;;  %9343 = vst [vmem:[#allocation49_spill] sm:$0xff] %v7324_v39 }
 0x396   :  { %1715 = vmatpush1.bf16.msra.mxu0 %v7003_v12  ;;  %1757 = vmatpush1.bf16.msra.mxu1 %v7005_v11  ;;  %v1617_v11 = vmul.f32 %v6178_v9, %v7223_v26  ;;  %v7342_v26 = vld [vmem:[#allocation8 + $0x34] ss:$24 sps:$4 sm:$0xff]  }
 0x397   :  { %1716 = vmatprep.subr.bf16.mxu0 %v9308_v34  ;;  %1758 = vmatprep.subr.bf16.mxu1 %v9340_v2 }
 0x39a   :  { %1717 = vmatpush1.bf16.msra.mxu0 %v9341_v19  ;;  %1759 = vmatpush1.bf16.msra.mxu1 %v9342_v59 }
 0x39b   :  { %5744 = vmatprep.subr.bf16.mxu0 %v9309_v13  ;;  %1877 = vmatprep.subr.bf16.mxu1 %v7324_v39 }
 0x39c   :  { %v6180_v33 = vpop.eup %6179 }
 0x39d   :  { %1735 = vmatmul.mubr.bf16.vlgmr.msra.gmra.mrb[40].mxu0 %v1619_v8  ;;  %v1616_v12 = vmul.f32 %v6180_v33, %v1615_v16  ;;  %v7420_v8 = vld [vmem:[#allocation8 + $0x98] ss:$24 sps:$4 sm:$0xff]  }
 0x39e   :  { %5745 = vmatpush3.bf16.msra.mxu0 %v9311_v4  ;;  %5760 = vmatprep.mubr.msk.bf16.mxu0 %vm6543_vm1, %v9309_v13  ;;  %v7347_v4 = vld [vmem:[#allocation8 + $0x30] ss:$24 sps:$4 sm:$0xff]   ;;  %9361 = vst [vmem:[#allocation24_spill] sm:$0xff] %v7420_v8 }
 0x39f   :  { %5746 = vmatprep.subr.bf16.mxu0 %v9309_v13  ;;  %v7332_v54 = vadd.f32 %v1617_v11, %v1616_v12 }
 0x3a1   :  { %v1743_v34 = vpack.c.bf16 %v7332_v54, %v7332_v54 }
 0x3a2   :  { %5747 = vmatpush3.bf16.msra.mxu0 %v9312_v58  ;;  %v7350_v58 = vld [vmem:[#allocation8 + $0x64] ss:$24 sps:$4 sm:$0xff]  }
 0x3a3   :  { %1777 = vmatmul.mubr.bf16.vlgmr.msra.gmra.mrb[48].mxu1 %v1743_v34  ;;  %5748 = vmatprep.subr.bf16.mxu0 %v9309_v13 }
 0x3a4   :  { %1878 = vmatpush1.bf16.msra.mxu1 %v7338_v47  ;;  %1909 = vmatprep.mubr.bf16.mxu1 %v9242_v10 }
 0x3a5   :  { %1879 = vmatprep.subr.bf16.mxu1 %v7342_v26 }
 0x3a6   :  { %5749 = vmatpush3.bf16.msra.mxu0 %v9315_v38  ;;  %v7363_v38 = vld [vmem:[#allocation8 + $0x90] ss:$24 sps:$4 sm:$0xff]  }
 0x3a7   :  { %5750 = vmatprep.subr.bf16.mxu0 %v9309_v13  ;;  %9344 = vst [vmem:[#allocation50_spill] sm:$0xff] %v7363_v38 }
 0x3a8   :  { %1880 = vmatpush1.bf16.msra.mxu1 %v7347_v4 }
 0x3a9   :  { %1881 = vmatprep.subr.bf16.mxu1 %v7350_v58 }
 0x3aa   :  { %5751 = vmatpush3.bf16.msra.mxu0 %v7045_v6  ;;  %v7371_v6 = vld [vmem:[#allocation8 + $0xc0] ss:$24 sps:$4 sm:$0xff]  }
 0x3ab   :  { %5752 = vmatprep.subr.bf16.mxu0 %v9309_v13  ;;  %9346 = vst [vmem:[#allocation57_spill] sm:$0xff] %v7371_v6 }
 0x3ac   :  { %1882 = vmatpush1.bf16.msra.mxu1 %v7355_v24 }
 0x3ad   :  { %1883 = vmatprep.subr.bf16.mxu1 %v7358_v48 }
 0x3ae   :  { %5753 = vmatpush3.bf16.msra.mxu0 %v7057_v21  ;;  %v7379_v21 = vld [vmem:[#allocation8 + $0xf0] ss:$24 sps:$4 sm:$0xff]  }
 0x3af   :  { %5754 = vmatprep.subr.bf16.mxu0 %v9309_v13  ;;  %9348 = vst [vmem:[#allocation59_spill] sm:$0xff] %v7379_v21 }
 0x3b0   :  { %1884 = vmatpush1.bf16.msra.mxu1 %v7363_v38 }
 0x3b1   :  { %1885 = vmatprep.subr.bf16.mxu1 %v7366_v57 }
 0x3b2   :  { %5755 = vmatpush3.bf16.msra.mxu0 %v7073_v17  ;;  %v7386_v17 = vld [vmem:[#allocation8 + $0xc] ss:$24 sps:$4 sm:$0xff]  }
 0x3b3   :  { %5756 = vmatprep.subr.bf16.mxu0 %v9309_v13  ;;  %9350 = vst [vmem:[#allocation61_spill] sm:$0xff] %v7386_v17 }
 0x3b4   :  { %1886 = vmatpush1.bf16.msra.mxu1 %v7371_v6 }
 0x3b5   :  { %1887 = vmatprep.subr.bf16.mxu1 %v7374_v45 }
 0x3b6   :  { %5757 = vmatpush3.bf16.msra.mxu0 %v7083_v27  ;;  %v7392_v27 = vld [vmem:[#allocation8 + $0x154] ss:$24 sps:$4 sm:$0xff]  }
 0x3b7   :  { %5758 = vmatprep.subr.bf16.mxu0 %v9309_v13  ;;  %9352 = vst [vmem:[#allocation63_spill] sm:$0xff] %v7392_v27 }
 0x3b8   :  { %1888 = vmatpush1.bf16.msra.mxu1 %v7379_v21 }
 0x3b9   :  { %1889 = vmatprep.subr.bf16.mxu1 %v7382_v49 }
 0x3ba   :  { %5759 = vmatpush3.bf16.msra.mxu0 %v7101_v14 }
 0x3bb   :  { %1918 = vmatprep.subr.bf16.mxu0 %v7386_v17 }
 0x3bc   :  { %1890 = vmatpush1.bf16.msra.mxu1 %v7389_v15 }
 0x3bd   :  { %5761 = vmatmul.mubr.bf16.vlgmr.msra.gmra.mrb[44].mxu0 %v1743_v34  ;;  %1891 = vmatprep.subr.bf16.mxu1 %v7392_v27 }
 0x3be   :  { %1919 = vmatpush1.bf16.msra.mxu0 %v7395_v18  ;;  %1950 = vmatprep.mubr.bf16.mxu0 %v9242_v10 }
 0x3bf   :  { %1920 = vmatprep.subr.bf16.mxu0 %v7399_v29 }
 0x3c0   :  { %1892 = vmatpush1.bf16.msra.mxu1 %v7402_v20 }
 0x3c1   :  { %1959 = vmatprep.subr.bf16.mxu1 %v7405_v37 }
 0x3c2   :  { %1921 = vmatpush1.bf16.msra.mxu0 %v7408_v31 }
 0x3c3   :  { %1922 = vmatprep.subr.bf16.mxu0 %v7411_v22 }
 0x3c6   :  { %1923 = vmatpush1.bf16.msra.mxu0 %v7414_v25 }
 0x3c7   :  { %1924 = vmatprep.subr.bf16.mxu0 %v7417_v28 }
 0x3ca   :  { %1925 = vmatpush1.bf16.msra.mxu0 %v7420_v8 }
 0x3cb   :  { %1926 = vmatprep.subr.bf16.mxu0 %v7423_v32 }
 0x3ce   :  { %1927 = vmatpush1.bf16.msra.mxu0 %v7426_v35 }
 0x3cf   :  { %1928 = vmatprep.subr.bf16.mxu0 %v7429_v56 }
 0x3d2   :  { %1929 = vmatpush1.bf16.msra.mxu0 %v7432_v36 }
 0x3d3   :  { %1930 = vmatprep.subr.bf16.mxu0 %v7435_v46 }
 0x3d6   :  { %1931 = vmatpush1.bf16.msra.mxu0 %v7438_v1 }
 0x3d7   :  { %1932 = vmatprep.subr.bf16.mxu0 %v7441_v55 }
 0x3da   :  { %1933 = vmatpush1.bf16.msra.mxu0 %v7444_v63 }
 0x3db   :  { %2001 = vmatprep.subr.bf16.mxu0 %v7447_v41 }
 0x450   :  { %v1654_v0 = vpop.f32.mrb[36].mxu0  ;;  %v1695_v51 = vpop.f32.mrb[44].mxu1 }
 0x451   :  { %v1830_v61 = vadd.f32 %v1654_v0, %v277_v5  ;;  %v1656_v53 = vpop.f32.mrb[37].mxu0  ;;  %v1697_v40 = vpop.f32.mrb[45].mxu1  ;;  %v7457_v5 = vld [vmem:[%s9015_s5] ss:$0 sm:$0xff]  ;;  %v9374_v0 = vld [vmem:[#allocation42_spill] sm:$0xff] }
 0x452   :  { %v1837_v2 = vadd.f32 %v1656_v53, %v279_v44  ;;  %v1658_v9 = vpop.f32.mrb[38].mxu0  ;;  %v1699_v19 = vpop.f32.mrb[46].mxu1  ;;  %9373 = vst [vmem:[#allocation34_spill] sm:$0xff] %v7457_v5  ;;  %v1829_v23 = vadd.f32 %v7457_v5, %v1695_v51 }
 0x453   :  { %v5456_v59 = vmul.f32 -1.442695, %v1830_v61  ;;  %v1659_v16 = vpop.f32.mrb[39].mxu0  ;;  %v1700_v33 = vpop.f32.mrb[47].mxu1  ;;  %v347_v61 = vadd.f32 %v9374_v0, %v6914_v43 }
 0x454   :  { %v5457_v12 = vmul.f32 -1.442695, %v1837_v2  ;;  %v1851_v33 = vadd.f32 %v1697_v40, %v9334_v7 }
 0x455   :  { %6181 = vpow2.f32 %v5456_v59 }
 0x456   :  { %6183 = vpow2.f32 %v5457_v12 }
 0x45f   :  { %v6182_v11 = vpop.eup %6181 }
 0x460   :  { %v1834_v34 = vadd.f32 1.0, %v6182_v11  ;;  %v6184_v3 = vpop.eup %6183 }
 0x461   :  { %v1841_v60 = vadd.f32 1.0, %v6184_v3 }
 0x462   :  { %6185 = vrcp.f32 %v1834_v34 }
 0x463   :  { %6187 = vrcp.f32 %v1841_v60 }
 0x46c   :  { %v6186_v44 = vpop.eup %6185 }
 0x46d   :  { %v1844_v53 = vmul.f32 %v6186_v44, %v1829_v23  ;;  %v6188_v34 = vpop.eup %6187 }
 0x46e   :  { %v1847_v60 = vsub.f32 1.0, %v6188_v34 }
 0x46f   :  { %v1845_v2 = vadd.f32 %v1844_v53, %v347_v61  ;;  %v1849_v53 = vmul.f32 %v6188_v34, %v7285_v30  ;;  %v7481_v30 = vld [vmem:[#allocation8 + $0x44] ss:$24 sps:$4 sm:$0xff]   ;;  %v7495_v34 = vld [vmem:[#allocation8 + $0x74] ss:$24 sps:$4 sm:$0xff]  }
 0x470   :  { %v1736_v9 = vpop.f32.mrb[40].mxu0  ;;  %9375 = vst [vmem:[#allocation35_spill] sm:$0xff] %v7495_v34 }
 0x471   :  { %6189 = vtanh.f32 %v1845_v2  ;;  %v7462_v19 = vpop.f32.mrb[41].mxu0  ;;  %v1852_v12 = vadd.f32 %v1736_v9, %v7166_v42  ;;  %v7478_v9 = vld [vmem:[#allocation10] ss:$12 sps:$4 sm:$0xff]  }
 0x472   :  { %v1740_v59 = vpop.f32.mrb[42].mxu0 }
 0x473   :  { %v1741_v16 = vpop.f32.mrb[43].mxu0 }
 0x476   :  { %v1778_v11 = vpop.f32.mrb[48].mxu1 }
 0x477   :  { %v1855_v51 = vadd.f32 %v1851_v33, %v1778_v11  ;;  %v1780_v3 = vpop.f32.mrb[49].mxu1  ;;  %v7492_v11 = vld [vmem:[#allocation10 + $0x18] ss:$12 sps:$4 sm:$0xff]  }
 0x478   :  { %v1862_v5 = vadd.f32 %v1852_v12, %v1780_v3  ;;  %v1782_v62 = vpop.f32.mrb[50].mxu1  ;;  %v7489_v12 = vld [vmem:[#allocation8 + $0x40] ss:$24 sps:$4 sm:$0xff]   ;;  %v7501_v3 = vld [vmem:[#allocation8 + $0x70] ss:$24 sps:$4 sm:$0xff]  }
 0x479   :  { %v5458_v0 = vmul.f32 -1.442695, %v1855_v51  ;;  %v1783_v23 = vpop.f32.mrb[51].mxu1  ;;  %v7475_v62 = vld [vmem:[#allocation8 + $0x10] ss:$24 sps:$4 sm:$0xff]   ;;  %9377 = vst [vmem:[#allocation44_spill] sm:$0xff] %v7501_v3 }
 0x47a   :  { %v5459_v2 = vmul.f32 -1.442695, %v1862_v5  ;;  %v7484_v5 = vld [vmem:[#allocation10 + $0x1c] ss:$12 sps:$4 sm:$0xff]   ;;  %v7498_v51 = vld [vmem:[#allocation10 + $0x34] ss:$12 sps:$4 sm:$0xff]  }
 0x47b   :  { %v6190_v44 = vpop.eup %6189  ;;  %6191 = vpow2.f32 %v5458_v0  ;;  %9376 = vst [vmem:[#allocation43_spill] sm:$0xff] %v7498_v51  ;;  %v7504_v0 = vld [vmem:[#allocation10 + $0x30] ss:$12 sps:$4 sm:$0xff]  }
 0x47c   :  { %v1848_v61 = vmul.f32 %v6190_v44, %v1847_v60  ;;  %6193 = vpow2.f32 %v5459_v2  ;;  %9378 = vst [vmem:[#allocation48_spill] sm:$0xff] %v7504_v0  ;;  %v7507_v60 = vld [vmem:[#allocation8 + $0xa4] ss:$24 sps:$4 sm:$0xff]   ;;  %v7510_v44 = vld [vmem:[#allocation10 + $0x4c] ss:$12 sps:$4 sm:$0xff]  }
 0x47d   :  { %9379 = vst [vmem:[#allocation41_spill] sm:$0xff] %v7507_v60  ;;  %9380 = vst [vmem:[#allocation98_spill] sm:$0xff] %v7510_v44  ;;  %v7516_v2 = vld [vmem:[#allocation10 + $0x48] ss:$12 sps:$4 sm:$0xff]  }
 0x47e   :  { %v7467_v59 = vadd.f32 %v1849_v53, %v1848_v61  ;;  %v7513_v53 = vld [vmem:[#allocation8 + $0xa0] ss:$24 sps:$4 sm:$0xff]   ;;  %9382 = vst [vmem:[#allocation52_spill] sm:$0xff] %v7516_v2 }
 0x47f   :  { %9381 = vst [vmem:[#allocation51_spill] sm:$0xff] %v7513_v53 }
 0x480   :  { %v7471_v40 = vpack.c.bf16 %v7467_v59, %v7467_v59 }
 0x482   :  { %1910 = vmatmul.mubr.bf16.vlgmr.msra.gmra.mrb[52].mxu1 %v7471_v40  ;;  %1951 = vmatmul.mubr.bf16.vlgmr.msra.gmra.mrb[48].mxu0 %v7471_v40 }
 0x483   :  { %1960 = vmatpush1.bf16.msra.mxu1 %v7475_v62  ;;  %2002 = vmatpush1.bf16.msra.mxu0 %v7478_v9 }
 0x484   :  { %1961 = vmatprep.subr.bf16.mxu1 %v7481_v30  ;;  %2003 = vmatprep.subr.bf16.mxu0 %v7484_v5 }
 0x485   :  { %v6192_v16 = vpop.eup %6191  ;;  %1991 = vmatprep.mubr.bf16.mxu1 %v9242_v10  ;;  %2033 = vmatprep.mubr.bf16.mxu0 %v9242_v10 }
 0x486   :  { %v1859_v33 = vadd.f32 1.0, %v6192_v16  ;;  %v6194_v23 = vpop.eup %6193 }
 0x487   :  { %1962 = vmatpush1.bf16.msra.mxu1 %v7489_v12  ;;  %2004 = vmatpush1.bf16.msra.mxu0 %v7492_v11  ;;  %v1866_v61 = vadd.f32 1.0, %v6194_v23 }
 0x488   :  { %6195 = vrcp.f32 %v1859_v33  ;;  %1963 = vmatprep.subr.bf16.mxu1 %v7495_v34  ;;  %2005 = vmatprep.subr.bf16.mxu0 %v7498_v51  ;;  %v7519_v33 = vld [vmem:[#allocation8 + $0xd4] ss:$24 sps:$4 sm:$0xff]   ;;  %v7528_v34 = vld [vmem:[#allocation8 + $0xd0] ss:$24 sps:$4 sm:$0xff]  }
 0x489   :  { %9383 = vst [vmem:[#allocation53_spill] sm:$0xff] %v7519_v33  ;;  %6197 = vrcp.f32 %v1866_v61  ;;  %v7549_v61 = vld [vmem:[#allocation10 + $0x94] ss:$12 sps:$4 sm:$0xff]  }
 0x48a   :  { %9387 = vst [vmem:[#allocation65_spill] sm:$0xff] %v7549_v61 }
 0x48b   :  { %1964 = vmatpush1.bf16.msra.mxu1 %v7501_v3  ;;  %2006 = vmatpush1.bf16.msra.mxu0 %v7504_v0  ;;  %v7522_v0 = vld [vmem:[#allocation10 + $0x64] ss:$12 sps:$4 sm:$0xff]  }
 0x48c   :  { %1965 = vmatprep.subr.bf16.mxu1 %v7507_v60  ;;  %2007 = vmatprep.subr.bf16.mxu0 %v7510_v44  ;;  %9384 = vst [vmem:[#allocation54_spill] sm:$0xff] %v7522_v0 }
 0x48f   :  { %1966 = vmatpush1.bf16.msra.mxu1 %v7513_v53  ;;  %2008 = vmatpush1.bf16.msra.mxu0 %v7516_v2  ;;  %v1853_v53 = vadd.f32 %v7462_v19, %v7195_v52 }
 0x490   :  { %v1819_v16 = vpop.f32.mrb[44].mxu0  ;;  %1967 = vmatprep.subr.bf16.mxu1 %v7519_v33  ;;  %2009 = vmatprep.subr.bf16.mxu0 %v7522_v0  ;;  %v7531_v33 = vld [vmem:[#allocation10 + $0x60] ss:$12 sps:$4 sm:$0xff]   ;;  %v7534_v0 = vld [vmem:[#allocation8 + $0x104] ss:$24 sps:$4 sm:$0xff]  }
 0x491   :  { %v1854_v44 = vadd.f32 %v7192_v50, %v1819_v16  ;;  %v5762_v23 = vpop.f32.mrb[45].mxu0  ;;  %v7537_v16 = vld [vmem:[#allocation10 + $0x7c] ss:$12 sps:$4 sm:$0xff]  }
 0x492   :  { %v6196_v60 = vpop.eup %6195  ;;  %v1822_v3 = vpop.f32.mrb[46].mxu0  ;;  %v7561_v23 = vld [vmem:[#allocation10 + $0xac] ss:$12 sps:$4 sm:$0xff]  }
 0x493   :  { %v1869_v51 = vmul.f32 %v6196_v60, %v1854_v44  ;;  %v5763_v2 = vpop.f32.mrb[47].mxu0  ;;  %1968 = vmatpush1.bf16.msra.mxu1 %v7528_v34  ;;  %2010 = vmatpush1.bf16.msra.mxu0 %v7531_v33  ;;  %v7540_v3 = vld [vmem:[#allocation8 + $0x100] ss:$24 sps:$4 sm:$0xff]   ;;  %v7546_v44 = vld [vmem:[#allocation8 + $0x134] ss:$24 sps:$4 sm:$0xff]   ;;  %9391 = vst [vmem:[#allocation42_spill] sm:$0xff] %v7561_v23 }
 0x494   :  { %1969 = vmatprep.subr.bf16.mxu1 %v7534_v0  ;;  %2011 = vmatprep.subr.bf16.mxu0 %v7537_v16  ;;  %v7543_v60 = vld [vmem:[#allocation10 + $0x78] ss:$12 sps:$4 sm:$0xff]   ;;  %9386 = vst [vmem:[#allocation64_spill] sm:$0xff] %v7546_v44  ;;  %v7552_v2 = vld [vmem:[#allocation8 + $0x130] ss:$24 sps:$4 sm:$0xff]  }
 0x495   :  { %v1870_v19 = vadd.f32 %v1869_v51, %v1853_v53  ;;  %9385 = vst [vmem:[#allocation55_spill] sm:$0xff] %v7543_v60  ;;  %9388 = vst [vmem:[#allocation66_spill] sm:$0xff] %v7552_v2  ;;  %v7555_v51 = vld [vmem:[#allocation10 + $0x90] ss:$12 sps:$4 sm:$0xff]  }
 0x496   :  { %9389 = vst [vmem:[#allocation45_spill] sm:$0xff] %v7555_v51  ;;  %v7558_v53 = vld [vmem:[#allocation8 + $0x164] ss:$24 sps:$4 sm:$0xff]  }
 0x497   :  { %6199 = vtanh.f32 %v1870_v19  ;;  %1970 = vmatpush1.bf16.msra.mxu1 %v7540_v3  ;;  %2012 = vmatpush1.bf16.msra.mxu0 %v7543_v60  ;;  %9390 = vst [vmem:[#allocation46_spill] sm:$0xff] %v7558_v53  ;;  %v6198_v19 = vpop.eup %6197  ;;  %v7574_v60 = vld [vmem:[#allocation10 + $0x8] ss:$12 sps:$4 sm:$0xff]  }
 0x498   :  { %1971 = vmatprep.subr.bf16.mxu1 %v7546_v44  ;;  %2013 = vmatprep.subr.bf16.mxu0 %v7549_v61  ;;  %v7564_v44 = vld [vmem:[#allocation8 + $0x160] ss:$24 sps:$4 sm:$0xff]   ;;  %v7567_v61 = vld [vmem:[#allocation10 + $0xa8] ss:$12 sps:$4 sm:$0xff]  }
 0x499   :  { %9392 = vst [vmem:[#allocation99_spill] sm:$0xff] %v7564_v44  ;;  %9393 = vst [vmem:[#allocation100_spill] sm:$0xff] %v7567_v61 }
 0x49b   :  { %1972 = vmatpush1.bf16.msra.mxu1 %v7552_v2  ;;  %2014 = vmatpush1.bf16.msra.mxu0 %v7555_v51  ;;  %v1872_v51 = vsub.f32 1.0, %v6198_v19 }
 0x49c   :  { %1973 = vmatprep.subr.bf16.mxu1 %v7558_v53  ;;  %2015 = vmatprep.subr.bf16.mxu0 %v7561_v23  ;;  %v1874_v23 = vmul.f32 %v6198_v19, %v7332_v54  ;;  %v7591_v54 = vld [vmem:[#allocation10 + $0x38] ss:$12 sps:$4 sm:$0xff]   ;;  %v9399_v19 = vld [vmem:[#allocation40_spill] sm:$0xff] }
 0x49f   :  { %1974 = vmatpush1.bf16.msra.mxu1 %v7564_v44  ;;  %2016 = vmatpush1.bf16.msra.mxu0 %v7567_v61  ;;  %v7584_v44 = vld [vmem:[#allocation10 + $0x20] ss:$12 sps:$4 sm:$0xff]  }
 0x4a0   :  { %5764 = vmatprep.subr.bf16.mxu1 %v9309_v13  ;;  %2134 = vmatprep.subr.bf16.mxu0 %v7324_v39 }
 0x4a1   :  { %v6200_v2 = vpop.eup %6199 }
 0x4a2   :  { %1992 = vmatmul.mubr.bf16.vlgmr.msra.gmra.mrb[56].mxu1 %v7471_v40  ;;  %v1873_v53 = vmul.f32 %v6200_v2, %v1872_v51  ;;  %v7597_v40 = vld [vmem:[#allocation10 + $0x50] ss:$12 sps:$4 sm:$0xff]   ;;  %v7603_v2 = vld [vmem:[#allocation10 + $0x68] ss:$12 sps:$4 sm:$0xff]   ;;  %v7609_v51 = vld [vmem:[#allocation10 + $0x80] ss:$12 sps:$4 sm:$0xff]  }
 0x4a3   :  { %5765 = vmatpush3.bf16.msra.mxu1 %v7574_v60  ;;  %5780 = vmatprep.mubr.msk.bf16.mxu1 %vm6543_vm1, %v9309_v13  ;;  %9394 = vst [vmem:[#allocation101_spill] sm:$0xff] %v7603_v2  ;;  %9395 = vst [vmem:[#allocation102_spill] sm:$0xff] %v7609_v51 }
 0x4a4   :  { %5766 = vmatprep.subr.bf16.mxu1 %v9309_v13  ;;  %v7580_v61 = vadd.f32 %v1874_v23, %v1873_v53  ;;  %v7615_v53 = vld [vmem:[#allocation10 + $0x98] ss:$12 sps:$4 sm:$0xff]  }
 0x4a5   :  { %9396 = vst [vmem:[#allocation103_spill] sm:$0xff] %v7615_v53 }
 0x4a6   :  { %v2000_v39 = vpack.c.bf16 %v7580_v61, %v7580_v61 }
 0x4a7   :  { %5767 = vmatpush3.bf16.msra.mxu1 %v7584_v44 }
 0x4a8   :  { %2034 = vmatmul.mubr.bf16.vlgmr.msra.gmra.mrb[52].mxu0 %v2000_v39  ;;  %5768 = vmatprep.subr.bf16.mxu1 %v9309_v13 }
 0x4a9   :  { %2135 = vmatpush1.bf16.msra.mxu0 %v7338_v47  ;;  %2166 = vmatprep.mubr.bf16.mxu0 %v9242_v10 }
 0x4aa   :  { %2136 = vmatprep.subr.bf16.mxu0 %v7342_v26 }
 0x4ab   :  { %5769 = vmatpush3.bf16.msra.mxu1 %v7591_v54 }
 0x4ac   :  { %5770 = vmatprep.subr.bf16.mxu1 %v9309_v13 }
 0x4ad   :  { %2137 = vmatpush1.bf16.msra.mxu0 %v7347_v4 }
 0x4ae   :  { %2138 = vmatprep.subr.bf16.mxu0 %v7350_v58 }
 0x4af   :  { %5771 = vmatpush3.bf16.msra.mxu1 %v7597_v40 }
 0x4b0   :  { %5772 = vmatprep.subr.bf16.mxu1 %v9309_v13 }
 0x4b1   :  { %2139 = vmatpush1.bf16.msra.mxu0 %v7355_v24 }
 0x4b2   :  { %2140 = vmatprep.subr.bf16.mxu0 %v7358_v48 }
 0x4b3   :  { %5773 = vmatpush3.bf16.msra.mxu1 %v7603_v2 }
 0x4b4   :  { %5774 = vmatprep.subr.bf16.mxu1 %v9309_v13 }
 0x4b5   :  { %2141 = vmatpush1.bf16.msra.mxu0 %v7363_v38 }
 0x4b6   :  { %2142 = vmatprep.subr.bf16.mxu0 %v7366_v57 }
 0x4b7   :  { %5775 = vmatpush3.bf16.msra.mxu1 %v7609_v51 }
 0x4b8   :  { %5776 = vmatprep.subr.bf16.mxu1 %v9309_v13 }
 0x4b9   :  { %2143 = vmatpush1.bf16.msra.mxu0 %v7371_v6 }
 0x4ba   :  { %2144 = vmatprep.subr.bf16.mxu0 %v7374_v45 }
 0x4bb   :  { %5777 = vmatpush3.bf16.msra.mxu1 %v7615_v53 }
 0x4bc   :  { %5778 = vmatprep.subr.bf16.mxu1 %v9309_v13 }
 0x4bd   :  { %2145 = vmatpush1.bf16.msra.mxu0 %v7379_v21 }
 0x4be   :  { %2146 = vmatprep.subr.bf16.mxu0 %v7382_v49 }
 0x4bf   :  { %5779 = vmatpush3.bf16.msra.mxu1 %v7101_v14  ;;  %v9397_v14 = vld [vmem:[#allocation39_spill] sm:$0xff] }
 0x4c0   :  { %2175 = vmatprep.subr.bf16.mxu1 %v7386_v17 }
 0x4c1   :  { %2147 = vmatpush1.bf16.msra.mxu0 %v7389_v15 }
 0x4c2   :  { %5781 = vmatmul.mubr.bf16.vlgmr.msra.gmra.mrb[60].mxu1 %v2000_v39  ;;  %2148 = vmatprep.subr.bf16.mxu0 %v7392_v27  ;;  %v9398_v39 = vld [vmem:[#allocation70_spill] sm:$0xff] }
 0x4c3   :  { %2176 = vmatpush1.bf16.msra.mxu1 %v7395_v18  ;;  %2207 = vmatprep.mubr.bf16.mxu1 %v9242_v10  ;;  %v283_v23 = vadd.f32 %v9398_v39, %v9397_v14 }
 0x4c4   :  { %2177 = vmatprep.subr.bf16.mxu1 %v7399_v29 }
 0x4c5   :  { %2149 = vmatpush1.bf16.msra.mxu0 %v7402_v20 }
 0x4c6   :  { %2216 = vmatprep.subr.bf16.mxu0 %v7405_v37 }
 0x4c7   :  { %2178 = vmatpush1.bf16.msra.mxu1 %v7408_v31 }
 0x4c8   :  { %2179 = vmatprep.subr.bf16.mxu1 %v7411_v22 }
 0x4cb   :  { %2180 = vmatpush1.bf16.msra.mxu1 %v7414_v25 }
 0x4cc   :  { %2181 = vmatprep.subr.bf16.mxu1 %v7417_v28 }
 0x4cf   :  { %2182 = vmatpush1.bf16.msra.mxu1 %v7420_v8 }
 0x4d0   :  { %2183 = vmatprep.subr.bf16.mxu1 %v7423_v32  ;;  %v9400_v32 = vld [vmem:[#allocation72_spill] sm:$0xff] }
 0x4d3   :  { %2184 = vmatpush1.bf16.msra.mxu1 %v7426_v35  ;;  %v285_v35 = vadd.f32 %v9400_v32, %v9399_v19  ;;  %v9401_v32 = vld [vmem:[#allocation34_spill] sm:$0xff] }
 0x4d4   :  { %2185 = vmatprep.subr.bf16.mxu1 %v7429_v56 }
 0x4d7   :  { %2186 = vmatpush1.bf16.msra.mxu1 %v7432_v36 }
 0x4d8   :  { %2187 = vmatprep.subr.bf16.mxu1 %v7435_v46 }
 0x4db   :  { %2188 = vmatpush1.bf16.msra.mxu1 %v7438_v1 }
 0x4dc   :  { %2189 = vmatprep.subr.bf16.mxu1 %v7441_v55 }
 0x4df   :  { %2190 = vmatpush1.bf16.msra.mxu1 %v7444_v63 }
 0x4e0   :  { %2258 = vmatprep.subr.bf16.mxu1 %v7447_v41 }
 0x555   :  { %v1911_v8 = vpop.f32.mrb[52].mxu1  ;;  %v1952_v56 = vpop.f32.mrb[48].mxu0 }
 0x556   :  { %v2087_v28 = vadd.f32 %v1911_v8, %v283_v23  ;;  %v1913_v36 = vpop.f32.mrb[53].mxu1  ;;  %v1954_v25 = vpop.f32.mrb[49].mxu0  ;;  %v2086_v19 = vadd.f32 %v9401_v32, %v1952_v56  ;;  %v9402_v8 = vld [vmem:[#allocation73_spill] sm:$0xff] }
 0x557   :  { %v2094_v46 = vadd.f32 %v1913_v36, %v285_v35  ;;  %v1915_v22 = vpop.f32.mrb[54].mxu1  ;;  %v1956_v1 = vpop.f32.mrb[50].mxu0  ;;  %v352_v23 = vadd.f32 %v9402_v8, %v6914_v43 }
 0x558   :  { %v5460_v31 = vmul.f32 -1.442695, %v2087_v28  ;;  %v1916_v55 = vpop.f32.mrb[55].mxu1  ;;  %v1957_v37 = vpop.f32.mrb[51].mxu0 }
 0x559   :  { %v5461_v63 = vmul.f32 -1.442695, %v2094_v46  ;;  %v2108_v46 = vadd.f32 %v1954_v25, %v9334_v7 }
 0x55a   :  { %6201 = vpow2.f32 %v5460_v31 }
 0x55b   :  { %6203 = vpow2.f32 %v5461_v63 }
 0x564   :  { %v6202_v41 = vpop.eup %6201 }
 0x565   :  { %v2091_v20 = vadd.f32 1.0, %v6202_v41  ;;  %v6204_v39 = vpop.eup %6203 }
 0x566   :  { %v2098_v14 = vadd.f32 1.0, %v6204_v39 }
 0x567   :  { %6205 = vrcp.f32 %v2091_v20 }
 0x568   :  { %6207 = vrcp.f32 %v2098_v14 }
 0x571   :  { %v6206_v29 = vpop.eup %6205 }
 0x572   :  { %v2101_v35 = vmul.f32 %v6206_v29, %v2086_v19  ;;  %v6208_v55 = vpop.eup %6207 }
 0x573   :  { %v2104_v29 = vsub.f32 1.0, %v6208_v55 }
 0x574   :  { %v2102_v22 = vadd.f32 %v2101_v35, %v352_v23  ;;  %v2106_v23 = vmul.f32 %v6208_v55, %v7467_v59  ;;  %v9408_v55 = vld [vmem:[#allocation98_spill] sm:$0xff] }
 0x575   :  { %v1993_v28 = vpop.f32.mrb[56].mxu1 }
 0x576   :  { %6209 = vtanh.f32 %v2102_v22  ;;  %v1995_v37 = vpop.f32.mrb[57].mxu1  ;;  %v2109_v20 = vadd.f32 %v1993_v28, %v7166_v42  ;;  %v9403_v28 = vld [vmem:[#allocation35_spill] sm:$0xff] }
 0x577   :  { %v1997_v31 = vpop.f32.mrb[58].mxu1 }
 0x578   :  { %v1998_v36 = vpop.f32.mrb[59].mxu1  ;;  %v9404_v31 = vld [vmem:[#allocation43_spill] sm:$0xff] }
 0x579   :  { %v9405_v36 = vld [vmem:[#allocation44_spill] sm:$0xff] }
 0x57b   :  { %v2035_v1 = vpop.f32.mrb[52].mxu0 }
 0x57c   :  { %v2112_v63 = vadd.f32 %v2108_v46, %v2035_v1  ;;  %v2037_v56 = vpop.f32.mrb[53].mxu0  ;;  %v9406_v46 = vld [vmem:[#allocation48_spill] sm:$0xff]  ;;  %v9407_v1 = vld [vmem:[#allocation41_spill] sm:$0xff] }
 0x57d   :  { %v2119_v41 = vadd.f32 %v2109_v20, %v2037_v56  ;;  %v2039_v39 = vpop.f32.mrb[54].mxu0  ;;  %v9409_v56 = vld [vmem:[#allocation51_spill] sm:$0xff] }
 0x57e   :  { %v5462_v32 = vmul.f32 -1.442695, %v2112_v63  ;;  %v2040_v8 = vpop.f32.mrb[55].mxu0 }
 0x57f   :  { %v5463_v35 = vmul.f32 -1.442695, %v2119_v41  ;;  %v9410_v41 = vld [vmem:[#allocation52_spill] sm:$0xff]  ;;  %v9411_v8 = vld [vmem:[#allocation53_spill] sm:$0xff] }
 0x580   :  { %v6210_v14 = vpop.eup %6209  ;;  %6211 = vpow2.f32 %v5462_v32 }
 0x581   :  { %v2105_v19 = vmul.f32 %v6210_v14, %v2104_v29  ;;  %6213 = vpow2.f32 %v5463_v35  ;;  %v9412_v29 = vld [vmem:[#allocation54_spill] sm:$0xff] }
 0x583   :  { %v7654_v22 = vadd.f32 %v2106_v23, %v2105_v19 }
 0x585   :  { %v2133_v25 = vpack.c.bf16 %v7654_v22, %v7654_v22 }
 0x587   :  { %2167 = vmatmul.mubr.bf16.vlgmr.msra.gmra.mrb[56].mxu0 %v2133_v25  ;;  %2208 = vmatmul.mubr.bf16.vlgmr.msra.gmra.mrb[64].mxu1 %v2133_v25 }
 0x588   :  { %2217 = vmatpush1.bf16.msra.mxu0 %v7475_v62  ;;  %2259 = vmatpush1.bf16.msra.mxu1 %v7478_v9 }
 0x589   :  { %2218 = vmatprep.subr.bf16.mxu0 %v7481_v30  ;;  %2260 = vmatprep.subr.bf16.mxu1 %v7484_v5 }
 0x58a   :  { %v6212_v32 = vpop.eup %6211  ;;  %2248 = vmatprep.mubr.bf16.mxu0 %v9242_v10  ;;  %2290 = vmatprep.mubr.bf16.mxu1 %v9242_v10 }
 0x58b   :  { %v2116_v59 = vadd.f32 1.0, %v6212_v32  ;;  %v6214_v20 = vpop.eup %6213  ;;  %v2110_v32 = vadd.f32 %v1995_v37, %v7195_v52  ;;  %v9415_v37 = vld [vmem:[#allocation65_spill] sm:$0xff] }
 0x58c   :  { %2219 = vmatpush1.bf16.msra.mxu0 %v7489_v12  ;;  %2261 = vmatpush1.bf16.msra.mxu1 %v7492_v11  ;;  %v2123_v63 = vadd.f32 1.0, %v6214_v20 }
 0x58d   :  { %6215 = vrcp.f32 %v2116_v59  ;;  %2220 = vmatprep.subr.bf16.mxu0 %v9403_v28  ;;  %2262 = vmatprep.subr.bf16.mxu1 %v9404_v31 }
 0x58e   :  { %6217 = vrcp.f32 %v2123_v63  ;;  %v9416_v63 = vld [vmem:[#allocation66_spill] sm:$0xff] }
 0x590   :  { %2221 = vmatpush1.bf16.msra.mxu0 %v9405_v36  ;;  %2263 = vmatpush1.bf16.msra.mxu1 %v9406_v46 }
 0x591   :  { %2222 = vmatprep.subr.bf16.mxu0 %v9407_v1  ;;  %2264 = vmatprep.subr.bf16.mxu1 %v9408_v55 }
 0x594   :  { %2223 = vmatpush1.bf16.msra.mxu0 %v9409_v56  ;;  %2265 = vmatpush1.bf16.msra.mxu1 %v9410_v41 }
 0x595   :  { %v2076_v39 = vpop.f32.mrb[60].mxu1  ;;  %2224 = vmatprep.subr.bf16.mxu0 %v9411_v8  ;;  %2266 = vmatprep.subr.bf16.mxu1 %v9412_v29 }
 0x596   :  { %v2111_v14 = vadd.f32 %v7192_v50, %v2076_v39  ;;  %v5782_v19 = vpop.f32.mrb[61].mxu1  ;;  %v9413_v50 = vld [vmem:[#allocation55_spill] sm:$0xff]  ;;  %v9414_v39 = vld [vmem:[#allocation64_spill] sm:$0xff] }
 0x597   :  { %v6216_v23 = vpop.eup %6215  ;;  %v2079_v35 = vpop.f32.mrb[62].mxu1  ;;  %v9419_v19 = vld [vmem:[#allocation42_spill] sm:$0xff] }
 0x598   :  { %v2126_v59 = vmul.f32 %v6216_v23, %v2111_v14  ;;  %v5783_v55 = vpop.f32.mrb[63].mxu1  ;;  %2225 = vmatpush1.bf16.msra.mxu0 %v7528_v34  ;;  %2267 = vmatpush1.bf16.msra.mxu1 %v7531_v33  ;;  %v9418_v14 = vld [vmem:[#allocation46_spill] sm:$0xff]  ;;  %v6218_v23 = vpop.eup %6217  ;;  %v9420_v35 = vld [vmem:[#allocation99_spill] sm:$0xff] }
 0x599   :  { %2226 = vmatprep.subr.bf16.mxu0 %v7534_v0  ;;  %2268 = vmatprep.subr.bf16.mxu1 %v7537_v16  ;;  %v9417_v55 = vld [vmem:[#allocation45_spill] sm:$0xff] }
 0x59a   :  { %v2127_v20 = vadd.f32 %v2126_v59, %v2110_v32  ;;  %v9421_v32 = vld [vmem:[#allocation100_spill] sm:$0xff]  ;;  %v2129_v59 = vsub.f32 1.0, %v6218_v23 }
 0x59c   :  { %6219 = vtanh.f32 %v2127_v20  ;;  %2227 = vmatpush1.bf16.msra.mxu0 %v7540_v3  ;;  %2269 = vmatpush1.bf16.msra.mxu1 %v9413_v50  ;;  %v9422_v20 = vld [vmem:[#allocation49_spill] sm:$0xff] }
 0x59d   :  { %2228 = vmatprep.subr.bf16.mxu0 %v9414_v39  ;;  %2270 = vmatprep.subr.bf16.mxu1 %v9415_v37 }
 0x5a0   :  { %2229 = vmatpush1.bf16.msra.mxu0 %v9416_v63  ;;  %2271 = vmatpush1.bf16.msra.mxu1 %v9417_v55  ;;  %v2131_v63 = vmul.f32 %v6218_v23, %v7580_v61  ;;  %v7728_v61 = vld [vmem:[#allocation10 + $0xb0] ss:$12 sps:$4 sm:$0xff]  }
 0x5a1   :  { %2230 = vmatprep.subr.bf16.mxu0 %v9418_v14  ;;  %2272 = vmatprep.subr.bf16.mxu1 %v9419_v19  ;;  %9423 = vst [vmem:[#allocation70_spill] sm:$0xff] %v7728_v61  ;;  %v9428_v23 = vld [vmem:[#allocation69_spill] sm:$0xff] }
 0x5a4   :  { %2231 = vmatpush1.bf16.msra.mxu0 %v9420_v35  ;;  %2273 = vmatpush1.bf16.msra.mxu1 %v9421_v32 }
 0x5a5   :  { %5784 = vmatprep.subr.bf16.mxu0 %v9309_v13  ;;  %2391 = vmatprep.subr.bf16.mxu1 %v9422_v20 }
 0x5a6   :  { %v6220_v39 = vpop.eup %6219 }
 0x5a7   :  { %2249 = vmatmul.mubr.bf16.vlgmr.msra.gmra.mrb[60].mxu0 %v2133_v25  ;;  %v2130_v37 = vmul.f32 %v6220_v39, %v2129_v59  ;;  %v9424_v25 = vld [vmem:[#allocation67_spill] sm:$0xff]  ;;  %v9425_v39 = vld [vmem:[#allocation68_spill] sm:$0xff]  ;;  %v9429_v59 = vld [vmem:[#allocation22_spill] sm:$0xff] }
 0x5a8   :  { %5785 = vmatpush3.bf16.msra.mxu0 %v7574_v60  ;;  %5800 = vmatprep.mubr.msk.bf16.mxu0 %vm6543_vm1, %v9309_v13 }
 0x5a9   :  { %5786 = vmatprep.subr.bf16.mxu0 %v9309_v13  ;;  %v7699_v35 = vadd.f32 %v2131_v63, %v2130_v37  ;;  %v9426_v37 = vld [vmem:[#allocation20_spill] sm:$0xff]  ;;  %v9427_v63 = vld [vmem:[#allocation21_spill] sm:$0xff] }
 0x5ab   :  { %v2257_v32 = vpack.c.bf16 %v7699_v35, %v7699_v35 }
 0x5ac   :  { %5787 = vmatpush3.bf16.msra.mxu0 %v7584_v44 }
 0x5ad   :  { %2291 = vmatmul.mubr.bf16.vlgmr.msra.gmra.mrb[68].mxu1 %v2257_v32  ;;  %5788 = vmatprep.subr.bf16.mxu0 %v9309_v13 }
 0x5ae   :  { %2392 = vmatpush1.bf16.msra.mxu1 %v7338_v47  ;;  %2423 = vmatprep.mubr.bf16.mxu1 %v9242_v10 }
 0x5af   :  { %2393 = vmatprep.subr.bf16.mxu1 %v7342_v26 }
 0x5b0   :  { %5789 = vmatpush3.bf16.msra.mxu0 %v7591_v54 }
 0x5b1   :  { %5790 = vmatprep.subr.bf16.mxu0 %v9309_v13 }
 0x5b2   :  { %2394 = vmatpush1.bf16.msra.mxu1 %v7347_v4 }
 0x5b3   :  { %2395 = vmatprep.subr.bf16.mxu1 %v7350_v58 }
 0x5b4   :  { %5791 = vmatpush3.bf16.msra.mxu0 %v7597_v40 }
 0x5b5   :  { %5792 = vmatprep.subr.bf16.mxu0 %v9309_v13 }
 0x5b6   :  { %2396 = vmatpush1.bf16.msra.mxu1 %v7355_v24 }
 0x5b7   :  { %2397 = vmatprep.subr.bf16.mxu1 %v7358_v48 }
 0x5b8   :  { %5793 = vmatpush3.bf16.msra.mxu0 %v7603_v2 }
 0x5b9   :  { %5794 = vmatprep.subr.bf16.mxu0 %v9309_v13 }
 0x5ba   :  { %2398 = vmatpush1.bf16.msra.mxu1 %v7363_v38 }
 0x5bb   :  { %2399 = vmatprep.subr.bf16.mxu1 %v7366_v57 }
 0x5bc   :  { %5795 = vmatpush3.bf16.msra.mxu0 %v7609_v51 }
 0x5bd   :  { %5796 = vmatprep.subr.bf16.mxu0 %v9309_v13 }
 0x5be   :  { %2400 = vmatpush1.bf16.msra.mxu1 %v7371_v6 }
 0x5bf   :  { %2401 = vmatprep.subr.bf16.mxu1 %v7374_v45 }
 0x5c0   :  { %5797 = vmatpush3.bf16.msra.mxu0 %v7615_v53 }
 0x5c1   :  { %5798 = vmatprep.subr.bf16.mxu0 %v9309_v13 }
 0x5c2   :  { %2402 = vmatpush1.bf16.msra.mxu1 %v7379_v21 }
 0x5c3   :  { %2403 = vmatprep.subr.bf16.mxu1 %v7382_v49  ;;  %v9444_v49 = vld [vmem:[#allocation76_spill] sm:$0xff] }
 0x5c4   :  { %5799 = vmatpush3.bf16.msra.mxu0 %v7728_v61 }
 0x5c5   :  { %2432 = vmatprep.subr.bf16.mxu0 %v7386_v17  ;;  %v9434_v17 = vld [vmem:[#allocation26_spill] sm:$0xff] }
 0x5c6   :  { %2404 = vmatpush1.bf16.msra.mxu1 %v7389_v15  ;;  %v9430_v15 = vld [vmem:[#allocation23_spill] sm:$0xff] }
 0x5c7   :  { %5801 = vmatmul.mubr.bf16.vlgmr.msra.gmra.mrb[64].mxu0 %v2257_v32  ;;  %2405 = vmatprep.subr.bf16.mxu1 %v7392_v27  ;;  %v9431_v32 = vld [vmem:[#allocation24_spill] sm:$0xff]  ;;  %v9432_v27 = vld [vmem:[#allocation25_spill] sm:$0xff] }
 0x5c8   :  { %2433 = vmatpush1.bf16.msra.mxu0 %v7395_v18  ;;  %2464 = vmatprep.mubr.bf16.mxu0 %v9242_v10  ;;  %v9433_v18 = vld [vmem:[#allocation28_spill] sm:$0xff] }
 0x5c9   :  { %2434 = vmatprep.subr.bf16.mxu0 %v9424_v25  ;;  %v9435_v25 = vld [vmem:[#allocation27_spill] sm:$0xff] }
 0x5ca   :  { %2406 = vmatpush1.bf16.msra.mxu1 %v9425_v39  ;;  %v9436_v39 = vld [vmem:[#allocation29_spill] sm:$0xff] }
 0x5cb   :  { %2473 = vmatprep.subr.bf16.mxu1 %v9426_v37  ;;  %v9437_v37 = vld [vmem:[#allocation30_spill] sm:$0xff] }
 0x5cc   :  { %2435 = vmatpush1.bf16.msra.mxu0 %v9427_v63  ;;  %v9438_v63 = vld [vmem:[#allocation31_spill] sm:$0xff] }
 0x5cd   :  { %2436 = vmatprep.subr.bf16.mxu0 %v9428_v23  ;;  %v9439_v23 = vld [vmem:[#allocation32_spill] sm:$0xff] }
 0x5d0   :  { %2437 = vmatpush1.bf16.msra.mxu0 %v9429_v59  ;;  %v9440_v59 = vld [vmem:[#allocation33_spill] sm:$0xff] }
 0x5d1   :  { %2438 = vmatprep.subr.bf16.mxu0 %v9430_v15  ;;  %v9441_v15 = vld [vmem:[#allocation39_spill] sm:$0xff] }
 0x5d4   :  { %2439 = vmatpush1.bf16.msra.mxu0 %v9431_v32  ;;  %v9442_v32 = vld [vmem:[#allocation74_spill] sm:$0xff] }
 0x5d5   :  { %2440 = vmatprep.subr.bf16.mxu0 %v9432_v27  ;;  %v287_v61 = vadd.f32 %v9442_v32, %v9441_v15  ;;  %v9443_v27 = vld [vmem:[#allocation40_spill] sm:$0xff] }
 0x5d8   :  { %2441 = vmatpush1.bf16.msra.mxu0 %v9433_v18  ;;  %v289_v18 = vadd.f32 %v9444_v49, %v9443_v27  ;;  %v9445_v49 = vld [vmem:[#allocation34_spill] sm:$0xff] }
 0x5d9   :  { %2442 = vmatprep.subr.bf16.mxu0 %v9434_v17 }
 0x5dc   :  { %2443 = vmatpush1.bf16.msra.mxu0 %v9435_v25 }
 0x5dd   :  { %2444 = vmatprep.subr.bf16.mxu0 %v9436_v39 }
 0x5e0   :  { %2445 = vmatpush1.bf16.msra.mxu0 %v9437_v37 }
 0x5e1   :  { %2446 = vmatprep.subr.bf16.mxu0 %v9438_v63 }
 0x5e4   :  { %2447 = vmatpush1.bf16.msra.mxu0 %v9439_v23 }
 0x5e5   :  { %2515 = vmatprep.subr.bf16.mxu0 %v9440_v59 }
 0x65a   :  { %v2168_v21 = vpop.f32.mrb[56].mxu0  ;;  %v2209_v17 = vpop.f32.mrb[64].mxu1 }
 0x65b   :  { %v2344_v53 = vadd.f32 %v2168_v21, %v287_v61  ;;  %v2170_v25 = vpop.f32.mrb[57].mxu0  ;;  %v2211_v45 = vpop.f32.mrb[65].mxu1  ;;  %v2343_v27 = vadd.f32 %v9445_v49, %v2209_v17  ;;  %v9446_v21 = vld [vmem:[#allocation77_spill] sm:$0xff] }
 0x65c   :  { %v2351_v39 = vadd.f32 %v2170_v25, %v289_v18  ;;  %v2172_v6 = vpop.f32.mrb[58].mxu0  ;;  %v2213_v37 = vpop.f32.mrb[66].mxu1  ;;  %v355_v61 = vadd.f32 %v9446_v21, %v6914_v43 }
 0x65d   :  { %v5464_v51 = vmul.f32 -1.442695, %v2344_v53  ;;  %v2173_v63 = vpop.f32.mrb[59].mxu0  ;;  %v2214_v57 = vpop.f32.mrb[67].mxu1 }
 0x65e   :  { %v5465_v23 = vmul.f32 -1.442695, %v2351_v39  ;;  %v2365_v39 = vadd.f32 %v2211_v45, %v9334_v7 }
 0x65f   :  { %6221 = vpow2.f32 %v5464_v51 }
 0x660   :  { %6223 = vpow2.f32 %v5465_v23 }
 0x669   :  { %v6222_v59 = vpop.eup %6221 }
 0x66a   :  { %v2348_v38 = vadd.f32 1.0, %v6222_v59  ;;  %v6224_v32 = vpop.eup %6223 }
 0x66b   :  { %v2355_v15 = vadd.f32 1.0, %v6224_v32 }
 0x66c   :  { %6225 = vrcp.f32 %v2348_v38 }
 0x66d   :  { %6227 = vrcp.f32 %v2355_v15 }
 0x676   :  { %v6226_v2 = vpop.eup %6225 }
 0x677   :  { %v2358_v18 = vmul.f32 %v6226_v2, %v2343_v27  ;;  %v6228_v63 = vpop.eup %6227 }
 0x678   :  { %v2361_v27 = vsub.f32 1.0, %v6228_v63 }
 0x679   :  { %v2359_v6 = vadd.f32 %v2358_v18, %v355_v61  ;;  %v2363_v61 = vmul.f32 %v6228_v63, %v7654_v22 }
 0x67a   :  { %v2250_v53 = vpop.f32.mrb[60].mxu0 }
 0x67b   :  { %6229 = vtanh.f32 %v2359_v6  ;;  %v2252_v57 = vpop.f32.mrb[61].mxu0  ;;  %v2366_v38 = vadd.f32 %v2250_v53, %v7166_v42 }
 0x67c   :  { %v2254_v51 = vpop.f32.mrb[62].mxu0 }
 0x67d   :  { %v2255_v25 = vpop.f32.mrb[63].mxu0  ;;  %v9447_v51 = vld [vmem:[#allocation98_spill] sm:$0xff] }
 0x680   :  { %v2292_v37 = vpop.f32.mrb[68].mxu1 }
 0x681   :  { %v2369_v23 = vadd.f32 %v2365_v39, %v2292_v37  ;;  %v2294_v17 = vpop.f32.mrb[69].mxu1 }
 0x682   :  { %v2376_v59 = vadd.f32 %v2366_v38, %v2294_v17  ;;  %v2296_v32 = vpop.f32.mrb[70].mxu1  ;;  %v7788_v38 = vld [vmem:[%s9018_s8] ss:$0 sm:$0xff] }
 0x683   :  { %v5466_v49 = vmul.f32 -1.442695, %v2369_v23  ;;  %v2297_v21 = vpop.f32.mrb[71].mxu1 }
 0x684   :  { %v5467_v18 = vmul.f32 -1.442695, %v2376_v59  ;;  %v2367_v59 = vadd.f32 %v2252_v57, %v7195_v52  ;;  %v9449_v57 = vld [vmem:[#allocation65_spill] sm:$0xff] }
 0x685   :  { %v6230_v15 = vpop.eup %6229  ;;  %6231 = vpow2.f32 %v5466_v49 }
 0x686   :  { %v2362_v2 = vmul.f32 %v6230_v15, %v2361_v27  ;;  %6233 = vpow2.f32 %v5467_v18  ;;  %v9448_v15 = vld [vmem:[#allocation64_spill] sm:$0xff]  ;;  %v9451_v18 = vld [vmem:[#allocation99_spill] sm:$0xff] }
 0x688   :  { %v7763_v6 = vadd.f32 %v2363_v61, %v2362_v2  ;;  %v9450_v2 = vld [vmem:[#allocation66_spill] sm:$0xff] }
 0x68a   :  { %v2390_v45 = vpack.c.bf16 %v7763_v6, %v7763_v6 }
 0x68c   :  { %2424 = vmatmul.mubr.bf16.vlgmr.msra.gmra.mrb[72].mxu1 %v2390_v45  ;;  %2465 = vmatmul.mubr.bf16.vlgmr.msra.gmra.mrb[68].mxu0 %v2390_v45 }
 0x68d   :  { %2474 = vmatpush1.bf16.msra.mxu1 %v7475_v62  ;;  %2516 = vmatpush1.bf16.msra.mxu0 %v7478_v9 }
 0x68e   :  { %2475 = vmatprep.subr.bf16.mxu1 %v7481_v30  ;;  %2517 = vmatprep.subr.bf16.mxu0 %v7484_v5 }
 0x68f   :  { %v6232_v49 = vpop.eup %6231  ;;  %2505 = vmatprep.mubr.bf16.mxu1 %v9242_v10  ;;  %2547 = vmatprep.mubr.bf16.mxu0 %v9242_v10 }
 0x690   :  { %v2373_v22 = vadd.f32 1.0, %v6232_v49  ;;  %v6234_v53 = vpop.eup %6233  ;;  %v9452_v49 = vld [vmem:[#allocation100_spill] sm:$0xff] }
 0x691   :  { %2476 = vmatpush1.bf16.msra.mxu1 %v7489_v12  ;;  %2518 = vmatpush1.bf16.msra.mxu0 %v7492_v11  ;;  %v2380_v25 = vadd.f32 1.0, %v6234_v53 }
 0x692   :  { %6235 = vrcp.f32 %v2373_v22  ;;  %2477 = vmatprep.subr.bf16.mxu1 %v9403_v28  ;;  %2519 = vmatprep.subr.bf16.mxu0 %v9404_v31 }
 0x693   :  { %6237 = vrcp.f32 %v2380_v25 }
 0x695   :  { %2478 = vmatpush1.bf16.msra.mxu1 %v9405_v36  ;;  %2520 = vmatpush1.bf16.msra.mxu0 %v9406_v46 }
 0x696   :  { %2479 = vmatprep.subr.bf16.mxu1 %v9407_v1  ;;  %2521 = vmatprep.subr.bf16.mxu0 %v9447_v51 }
 0x699   :  { %2480 = vmatpush1.bf16.msra.mxu1 %v9409_v56  ;;  %2522 = vmatpush1.bf16.msra.mxu0 %v9410_v41 }
 0x69a   :  { %v2333_v39 = vpop.f32.mrb[64].mxu0  ;;  %2481 = vmatprep.subr.bf16.mxu1 %v9411_v8  ;;  %2523 = vmatprep.subr.bf16.mxu0 %v9412_v29 }
 0x69b   :  { %v2368_v37 = vadd.f32 %v7788_v38, %v2333_v39  ;;  %v5802_v63 = vpop.f32.mrb[65].mxu0 }
 0x69c   :  { %v6236_v23 = vpop.eup %6235  ;;  %v2336_v17 = vpop.f32.mrb[66].mxu0 }
 0x69d   :  { %v2383_v32 = vmul.f32 %v6236_v23, %v2368_v37  ;;  %v5803_v21 = vpop.f32.mrb[67].mxu0  ;;  %2482 = vmatpush1.bf16.msra.mxu1 %v7528_v34  ;;  %2524 = vmatpush1.bf16.msra.mxu0 %v7531_v33  ;;  %v6238_v61 = vpop.eup %6237  ;;  %v9462_v23 = vld [vmem:[#allocation70_spill] sm:$0xff]  ;;  %v9463_v17 = vld [vmem:[#allocation61_spill] sm:$0xff] }
 0x69e   :  { %2483 = vmatprep.subr.bf16.mxu1 %v7534_v0  ;;  %2525 = vmatprep.subr.bf16.mxu0 %v7537_v16  ;;  %v2386_v22 = vsub.f32 1.0, %v6238_v61  ;;  %v2388_v39 = vmul.f32 %v6238_v61, %v7699_v35  ;;  %v9455_v35 = vld [vmem:[#allocation56_spill] sm:$0xff]  ;;  %v9466_v21 = vld [vmem:[#allocation19_spill] sm:$0xff] }
 0x69f   :  { %v2384_v27 = vadd.f32 %v2383_v32, %v2367_v59  ;;  %v9464_v59 = vld [vmem:[#allocation62_spill] sm:$0xff]  ;;  %v9465_v32 = vld [vmem:[#allocation63_spill] sm:$0xff]  ;;  %v9468_v61 = vld [vmem:[#allocation68_spill] sm:$0xff] }
 0x6a1   :  { %6239 = vtanh.f32 %v2384_v27  ;;  %2484 = vmatpush1.bf16.msra.mxu1 %v7540_v3  ;;  %2526 = vmatpush1.bf16.msra.mxu0 %v9413_v50  ;;  %v9467_v27 = vld [vmem:[#allocation67_spill] sm:$0xff] }
 0x6a2   :  { %2485 = vmatprep.subr.bf16.mxu1 %v9448_v15  ;;  %2527 = vmatprep.subr.bf16.mxu0 %v9449_v57 }
 0x6a5   :  { %2486 = vmatpush1.bf16.msra.mxu1 %v9450_v2  ;;  %2528 = vmatpush1.bf16.msra.mxu0 %v9417_v55 }
 0x6a6   :  { %2487 = vmatprep.subr.bf16.mxu1 %v9418_v14  ;;  %2529 = vmatprep.subr.bf16.mxu0 %v9419_v19 }
 0x6a9   :  { %2488 = vmatpush1.bf16.msra.mxu1 %v9451_v18  ;;  %2530 = vmatpush1.bf16.msra.mxu0 %v9452_v49 }
 0x6aa   :  { %5804 = vmatprep.subr.bf16.mxu1 %v9309_v13  ;;  %2648 = vmatprep.subr.bf16.mxu0 %v9422_v20  ;;  %v9456_v20 = vld [vmem:[#allocation102_spill] sm:$0xff] }
 0x6ab   :  { %v6240_v53 = vpop.eup %6239 }
 0x6ac   :  { %2506 = vmatmul.mubr.bf16.vlgmr.msra.gmra.mrb[76].mxu1 %v2390_v45  ;;  %v2387_v25 = vmul.f32 %v6240_v53, %v2386_v22  ;;  %v9459_v45 = vld [vmem:[#allocation103_spill] sm:$0xff]  ;;  %v9469_v22 = vld [vmem:[#allocation20_spill] sm:$0xff]  ;;  %v9470_v53 = vld [vmem:[#allocation21_spill] sm:$0xff] }
 0x6ad   :  { %5805 = vmatpush3.bf16.msra.mxu1 %v7574_v60  ;;  %5820 = vmatprep.mubr.msk.bf16.mxu1 %vm6543_vm1, %v9309_v13 }
 0x6ae   :  { %5806 = vmatprep.subr.bf16.mxu1 %v9309_v13  ;;  %v7813_v37 = vadd.f32 %v2388_v39, %v2387_v25  ;;  %v9471_v25 = vld [vmem:[#allocation69_spill] sm:$0xff]  ;;  %v9472_v39 = vld [vmem:[#allocation22_spill] sm:$0xff] }
 0x6b0   :  { %v2514_v63 = vpack.c.bf16 %v7813_v37, %v7813_v37 }
 0x6b1   :  { %5807 = vmatpush3.bf16.msra.mxu1 %v7584_v44 }
 0x6b2   :  { %2548 = vmatmul.mubr.bf16.vlgmr.msra.gmra.mrb[72].mxu0 %v2514_v63  ;;  %5808 = vmatprep.subr.bf16.mxu1 %v9309_v13 }
 0x6b3   :  { %2649 = vmatpush1.bf16.msra.mxu0 %v7338_v47  ;;  %2680 = vmatprep.mubr.bf16.mxu0 %v9242_v10  ;;  %v9453_v47 = vld [vmem:[#allocation101_spill] sm:$0xff] }
 0x6b4   :  { %2650 = vmatprep.subr.bf16.mxu0 %v7342_v26  ;;  %v9454_v26 = vld [vmem:[#allocation50_spill] sm:$0xff] }
 0x6b5   :  { %5809 = vmatpush3.bf16.msra.mxu1 %v7591_v54 }
 0x6b6   :  { %5810 = vmatprep.subr.bf16.mxu1 %v9309_v13 }
 0x6b7   :  { %2651 = vmatpush1.bf16.msra.mxu0 %v7347_v4  ;;  %v9457_v4 = vld [vmem:[#allocation57_spill] sm:$0xff] }
 0x6b8   :  { %2652 = vmatprep.subr.bf16.mxu0 %v7350_v58  ;;  %v9458_v58 = vld [vmem:[#allocation58_spill] sm:$0xff] }
 0x6b9   :  { %5811 = vmatpush3.bf16.msra.mxu1 %v7597_v40 }
 0x6ba   :  { %5812 = vmatprep.subr.bf16.mxu1 %v9309_v13 }
 0x6bb   :  { %2653 = vmatpush1.bf16.msra.mxu0 %v7355_v24  ;;  %v9460_v24 = vld [vmem:[#allocation59_spill] sm:$0xff] }
 0x6bc   :  { %2654 = vmatprep.subr.bf16.mxu0 %v7358_v48  ;;  %v9461_v48 = vld [vmem:[#allocation60_spill] sm:$0xff] }
 0x6bd   :  { %5813 = vmatpush3.bf16.msra.mxu1 %v9453_v47 }
 0x6be   :  { %5814 = vmatprep.subr.bf16.mxu1 %v9309_v13 }
 0x6bf   :  { %2655 = vmatpush1.bf16.msra.mxu0 %v9454_v26  ;;  %v9473_v26 = vld [vmem:[#allocation23_spill] sm:$0xff] }
 0x6c0   :  { %2656 = vmatprep.subr.bf16.mxu0 %v9455_v35  ;;  %v9475_v35 = vld [vmem:[#allocation25_spill] sm:$0xff] }
 0x6c1   :  { %5815 = vmatpush3.bf16.msra.mxu1 %v9456_v20 }
 0x6c2   :  { %5816 = vmatprep.subr.bf16.mxu1 %v9309_v13 }
 0x6c3   :  { %2657 = vmatpush1.bf16.msra.mxu0 %v9457_v4  ;;  %v9476_v4 = vld [vmem:[#allocation28_spill] sm:$0xff] }
 0x6c4   :  { %2658 = vmatprep.subr.bf16.mxu0 %v9458_v58  ;;  %v9477_v58 = vld [vmem:[#allocation26_spill] sm:$0xff] }
 0x6c5   :  { %5817 = vmatpush3.bf16.msra.mxu1 %v9459_v45 }
 0x6c6   :  { %5818 = vmatprep.subr.bf16.mxu1 %v9309_v13 }
 0x6c7   :  { %2659 = vmatpush1.bf16.msra.mxu0 %v9460_v24  ;;  %v9478_v24 = vld [vmem:[#allocation27_spill] sm:$0xff] }
 0x6c8   :  { %2660 = vmatprep.subr.bf16.mxu0 %v9461_v48  ;;  %v9479_v48 = vld [vmem:[#allocation29_spill] sm:$0xff] }
 0x6c9   :  { %5819 = vmatpush3.bf16.msra.mxu1 %v9462_v23 }
 0x6ca   :  { %2689 = vmatprep.subr.bf16.mxu1 %v9463_v17  ;;  %v9480_v17 = vld [vmem:[#allocation30_spill] sm:$0xff] }
 0x6cb   :  { %2661 = vmatpush1.bf16.msra.mxu0 %v9464_v59  ;;  %v9481_v59 = vld [vmem:[#allocation31_spill] sm:$0xff] }
 0x6cc   :  { %5821 = vmatmul.mubr.bf16.vlgmr.msra.gmra.mrb[80].mxu1 %v2514_v63  ;;  %2662 = vmatprep.subr.bf16.mxu0 %v9465_v32  ;;  %v9474_v63 = vld [vmem:[#allocation24_spill] sm:$0xff] }
 0x6cd   :  { %2690 = vmatpush1.bf16.msra.mxu1 %v9466_v21  ;;  %2721 = vmatprep.mubr.bf16.mxu1 %v9242_v10  ;;  %v9482_v32 = vld [vmem:[#allocation32_spill] sm:$0xff]  ;;  %v9483_v21 = vld [vmem:[#allocation33_spill] sm:$0xff] }
 0x6ce   :  { %2691 = vmatprep.subr.bf16.mxu1 %v9467_v27  ;;  %v9484_v27 = vld [vmem:[#allocation39_spill] sm:$0xff] }
 0x6cf   :  { %2663 = vmatpush1.bf16.msra.mxu0 %v9468_v61  ;;  %v9485_v61 = vld [vmem:[#allocation79_spill] sm:$0xff] }
 0x6d0   :  { %2730 = vmatprep.subr.bf16.mxu0 %v9469_v22  ;;  %v293_v22 = vadd.f32 %v9485_v61, %v9484_v27 }
 0x6d1   :  { %2692 = vmatpush1.bf16.msra.mxu1 %v9470_v53  ;;  %v9486_v53 = vld [vmem:[#allocation40_spill] sm:$0xff] }
 0x6d2   :  { %2693 = vmatprep.subr.bf16.mxu1 %v9471_v25  ;;  %v9487_v25 = vld [vmem:[#allocation81_spill] sm:$0xff] }
 0x6d5   :  { %2694 = vmatpush1.bf16.msra.mxu1 %v9472_v39  ;;  %v295_v39 = vadd.f32 %v9487_v25, %v9486_v53  ;;  %v9488_v25 = vld [vmem:[#allocation34_spill] sm:$0xff] }
 0x6d6   :  { %2695 = vmatprep.subr.bf16.mxu1 %v9473_v26 }
 0x6d9   :  { %2696 = vmatpush1.bf16.msra.mxu1 %v9474_v63 }
 0x6da   :  { %2697 = vmatprep.subr.bf16.mxu1 %v9475_v35 }
 0x6dd   :  { %2698 = vmatpush1.bf16.msra.mxu1 %v9476_v4 }
 0x6de   :  { %2699 = vmatprep.subr.bf16.mxu1 %v9477_v58 }
 0x6e1   :  { %2700 = vmatpush1.bf16.msra.mxu1 %v9478_v24 }
 0x6e2   :  { %2701 = vmatprep.subr.bf16.mxu1 %v9479_v48 }
 0x6e5   :  { %2702 = vmatpush1.bf16.msra.mxu1 %v9480_v17 }
 0x6e6   :  { %2703 = vmatprep.subr.bf16.mxu1 %v9481_v59 }
 0x6e9   :  { %2704 = vmatpush1.bf16.msra.mxu1 %v9482_v32 }
 0x6ea   :  { %2772 = vmatprep.subr.bf16.mxu1 %v9483_v21 }
 0x75f   :  { %v2425_v26 = vpop.f32.mrb[72].mxu1  ;;  %v2466_v63 = vpop.f32.mrb[68].mxu0 }
 0x760   :  { %v2601_v35 = vadd.f32 %v2425_v26, %v293_v22  ;;  %v2427_v4 = vpop.f32.mrb[73].mxu1  ;;  %v2468_v58 = vpop.f32.mrb[69].mxu0  ;;  %v2600_v53 = vadd.f32 %v9488_v25, %v2466_v63  ;;  %v9489_v22 = vld [vmem:[#allocation71_spill] sm:$0xff] }
 0x761   :  { %v2608_v24 = vadd.f32 %v2427_v4, %v295_v39  ;;  %v2429_v48 = vpop.f32.mrb[74].mxu1  ;;  %v2470_v17 = vpop.f32.mrb[70].mxu0  ;;  %v360_v26 = vadd.f32 %v9489_v22, %v6914_v43 }
 0x762   :  { %v5468_v23 = vmul.f32 -1.442695, %v2601_v35  ;;  %v2430_v59 = vpop.f32.mrb[75].mxu1  ;;  %v2471_v45 = vpop.f32.mrb[71].mxu0  ;;  %v2622_v48 = vadd.f32 %v2468_v58, %v9334_v7 }
 0x763   :  { %v5469_v32 = vmul.f32 -1.442695, %v2608_v24 }
 0x764   :  { %6241 = vpow2.f32 %v5468_v23 }
 0x765   :  { %6243 = vpow2.f32 %v5469_v32 }
 0x76e   :  { %v6242_v21 = vpop.eup %6241 }
 0x76f   :  { %v2605_v20 = vadd.f32 1.0, %v6242_v21  ;;  %v6244_v61 = vpop.eup %6243 }
 0x770   :  { %v2612_v27 = vadd.f32 1.0, %v6244_v61 }
 0x771   :  { %6245 = vrcp.f32 %v2605_v20 }
 0x772   :  { %6247 = vrcp.f32 %v2612_v27 }
 0x77b   :  { %v6246_v47 = vpop.eup %6245 }
 0x77c   :  { %v2615_v39 = vmul.f32 %v6246_v47, %v2600_v53  ;;  %v6248_v59 = vpop.eup %6247 }
 0x77d   :  { %v2618_v47 = vsub.f32 1.0, %v6248_v59 }
 0x77e   :  { %v2616_v4 = vadd.f32 %v2615_v39, %v360_v26  ;;  %v2620_v26 = vmul.f32 %v6248_v59, %v7763_v6  ;;  %v6075_v59 = vld [vmem:[#allocation8 + $0x12c] ss:$24 sps:$4 sm:$0xff]  }
 0x77f   :  { %v2507_v35 = vpop.f32.mrb[76].mxu1 }
 0x780   :  { %6249 = vtanh.f32 %v2616_v4  ;;  %v2509_v45 = vpop.f32.mrb[77].mxu1  ;;  %v2623_v20 = vadd.f32 %v2507_v35, %v7166_v42 }
 0x781   :  { %v2511_v23 = vpop.f32.mrb[78].mxu1 }
 0x782   :  { %v2512_v24 = vpop.f32.mrb[79].mxu1  ;;  %v6070_v23 = vld [vmem:[#allocation8 + $0xd4] ss:$24 sps:$4 sm:$0xff]  }
 0x783   :  { %v6073_v24 = vld [vmem:[#allocation8 + $0x100] ss:$24 sps:$4 sm:$0xff]  }
 0x785   :  { %v2549_v17 = vpop.f32.mrb[72].mxu0 }
 0x786   :  { %v2626_v32 = vadd.f32 %v2622_v48, %v2549_v17  ;;  %v2551_v63 = vpop.f32.mrb[73].mxu0  ;;  %v6071_v48 = vld [vmem:[#allocation8 + $0xfc] ss:$24 sps:$4 sm:$0xff]   ;;  %v6077_v17 = vld [vmem:[#allocation8 + $0x130] ss:$24 sps:$4 sm:$0xff]  }
 0x787   :  { %v2633_v21 = vadd.f32 %v2623_v20, %v2551_v63  ;;  %v2553_v61 = vpop.f32.mrb[74].mxu0  ;;  %v6074_v20 = vld [vmem:[#allocation8 + $0x104] ss:$24 sps:$4 sm:$0xff]   ;;  %v6081_v63 = vld [vmem:[#allocation8 + $0x160] ss:$24 sps:$4 sm:$0xff]  }
 0x788   :  { %v5470_v25 = vmul.f32 -1.442695, %v2626_v32  ;;  %v2554_v22 = vpop.f32.mrb[75].mxu0  ;;  %v6078_v32 = vld [vmem:[#allocation8 + $0x134] ss:$24 sps:$4 sm:$0xff]  }
 0x789   :  { %v5471_v39 = vmul.f32 -1.442695, %v2633_v21  ;;  %v6079_v21 = vld [vmem:[#allocation8 + $0x15c] ss:$24 sps:$4 sm:$0xff]   ;;  %v9494_v22 = vld [vmem:[#allocation39_spill] sm:$0xff] }
 0x78a   :  { %v6250_v27 = vpop.eup %6249  ;;  %6251 = vpow2.f32 %v5470_v25  ;;  %v6082_v61 = vld [vmem:[#allocation8 + $0x164] ss:$24 sps:$4 sm:$0xff]  }
 0x78b   :  { %v2619_v53 = vmul.f32 %v6250_v27, %v2618_v47  ;;  %6253 = vpow2.f32 %v5471_v39  ;;  %v6365_v25 = vld [vmem:[#allocation10 + $0x4] ss:$12 sps:$4 sm:$0xff]   ;;  %v9495_v47 = vld [vmem:[#allocation83_spill] sm:$0xff] }
 0x78c   :  { %v297_v27 = vadd.f32 %v9495_v47, %v9494_v22  ;;  %v6371_v22 = vld [vmem:[#allocation10 + $0x20] ss:$12 sps:$4 sm:$0xff]  }
 0x78d   :  { %v7875_v4 = vadd.f32 %v2620_v26, %v2619_v53  ;;  %v9496_v53 = vld [vmem:[#allocation40_spill] sm:$0xff]  ;;  %v9497_v26 = vld [vmem:[#allocation85_spill] sm:$0xff] }
 0x78e   :  { %v299_v39 = vadd.f32 %v9497_v26, %v9496_v53  ;;  %v6372_v47 = vld [vmem:[#allocation10 + $0x34] ss:$12 sps:$4 sm:$0xff]   ;;  %v6374_v53 = vld [vmem:[#allocation10 + $0x38] ss:$12 sps:$4 sm:$0xff]  }
 0x78f   :  { %v2647_v58 = vpack.c.bf16 %v7875_v4, %v7875_v4 }
 0x791   :  { %2681 = vmatmul.mubr.bf16.vlgmr.msra.gmra.mrb[76].mxu0 %v2647_v58  ;;  %2722 = vmatmul.mubr.bf16.vlgmr.msra.gmra.mrb[84].mxu1 %v2647_v58 }
 0x792   :  { %2731 = vmatpush1.bf16.msra.mxu0 %v7475_v62  ;;  %2773 = vmatpush1.bf16.msra.mxu1 %v7478_v9 }
 0x793   :  { %2732 = vmatprep.subr.bf16.mxu0 %v7481_v30  ;;  %2774 = vmatprep.subr.bf16.mxu1 %v7484_v5 }
 0x794   :  { %v6252_v35 = vpop.eup %6251  ;;  %2762 = vmatprep.mubr.bf16.mxu0 %v9242_v10  ;;  %2804 = vmatprep.mubr.bf16.mxu1 %v9242_v10 }
 0x795   :  { %v2630_v6 = vadd.f32 1.0, %v6252_v35  ;;  %v6254_v62 = vpop.eup %6253 }
 0x796   :  { %2733 = vmatpush1.bf16.msra.mxu0 %v7489_v12  ;;  %2775 = vmatpush1.bf16.msra.mxu1 %v7492_v11  ;;  %v2637_v9 = vadd.f32 1.0, %v6254_v62 }
 0x797   :  { %6255 = vrcp.f32 %v2630_v6  ;;  %2734 = vmatprep.subr.bf16.mxu0 %v9403_v28  ;;  %2776 = vmatprep.subr.bf16.mxu1 %v9404_v31  ;;  %v2624_v31 = vadd.f32 %v2509_v45, %v7195_v52  ;;  %v6067_v45 = vld [vmem:[#allocation8 + $0xcc] ss:$24 sps:$4 sm:$0xff]  }
 0x798   :  { %6257 = vrcp.f32 %v2637_v9 }
 0x79a   :  { %2735 = vmatpush1.bf16.msra.mxu0 %v9405_v36  ;;  %2777 = vmatpush1.bf16.msra.mxu1 %v9406_v46 }
 0x79b   :  { %2736 = vmatprep.subr.bf16.mxu0 %v9407_v1  ;;  %2778 = vmatprep.subr.bf16.mxu1 %v9447_v51  ;;  %v6061_v51 = vld [vmem:[#allocation8 + $0x70] ss:$24 sps:$4 sm:$0xff]  }
 0x79e   :  { %2737 = vmatpush1.bf16.msra.mxu0 %v9409_v56  ;;  %2779 = vmatpush1.bf16.msra.mxu1 %v9410_v41 }
 0x79f   :  { %v2590_v30 = vpop.f32.mrb[80].mxu1  ;;  %2738 = vmatprep.subr.bf16.mxu0 %v9411_v8  ;;  %2780 = vmatprep.subr.bf16.mxu1 %v9412_v29  ;;  %v9491_v8 = vld [vmem:[#allocation102_spill] sm:$0xff] }
 0x7a0   :  { %v2625_v5 = vadd.f32 %v7788_v38, %v2590_v30  ;;  %v5822_v12 = vpop.f32.mrb[81].mxu1  ;;  %v9493_v29 = vld [vmem:[#allocation70_spill] sm:$0xff] }
 0x7a1   :  { %v6256_v11 = vpop.eup %6255  ;;  %v2593_v28 = vpop.f32.mrb[82].mxu1 }
 0x7a2   :  { %v2640_v36 = vmul.f32 %v6256_v11, %v2625_v5  ;;  %v5823_v46 = vpop.f32.mrb[83].mxu1  ;;  %2739 = vmatpush1.bf16.msra.mxu0 %v7528_v34  ;;  %2781 = vmatpush1.bf16.msra.mxu1 %v7531_v33  ;;  %v6258_v34 = vpop.eup %6257 }
 0x7a3   :  { %2740 = vmatprep.subr.bf16.mxu0 %v7534_v0  ;;  %2782 = vmatprep.subr.bf16.mxu1 %v7537_v16  ;;  %v2643_v0 = vsub.f32 1.0, %v6258_v34 }
 0x7a4   :  { %v2641_v1 = vadd.f32 %v2640_v36, %v2624_v31 }
 0x7a6   :  { %6259 = vtanh.f32 %v2641_v1  ;;  %2741 = vmatpush1.bf16.msra.mxu0 %v7540_v3  ;;  %2783 = vmatpush1.bf16.msra.mxu1 %v9413_v50  ;;  %v2645_v3 = vmul.f32 %v6258_v34, %v7813_v37  ;;  %v6054_v50 = vld [vmem:[#allocation8 + $0x14] ss:$24 sps:$4 sm:$0xff]   ;;  %v6069_v37 = vld [vmem:[#allocation8 + $0xd0] ss:$24 sps:$4 sm:$0xff]  }
 0x7a7   :  { %2742 = vmatprep.subr.bf16.mxu0 %v9448_v15  ;;  %2784 = vmatprep.subr.bf16.mxu1 %v9449_v57  ;;  %v6059_v15 = vld [vmem:[#allocation8 + $0x6c] ss:$24 sps:$4 sm:$0xff]  }
 0x7a8   :  { %v6062_v57 = vld [vmem:[#allocation8 + $0x74] ss:$24 sps:$4 sm:$0xff]  }
 0x7aa   :  { %2743 = vmatpush1.bf16.msra.mxu0 %v9450_v2  ;;  %2785 = vmatpush1.bf16.msra.mxu1 %v9417_v55  ;;  %v6057_v55 = vld [vmem:[#allocation8 + $0x40] ss:$24 sps:$4 sm:$0xff]  }
 0x7ab   :  { %2744 = vmatprep.subr.bf16.mxu0 %v9418_v14  ;;  %2786 = vmatprep.subr.bf16.mxu1 %v9419_v19  ;;  %v6055_v14 = vld [vmem:[#allocation8 + $0x3c] ss:$24 sps:$4 sm:$0xff]   ;;  %v6065_v2 = vld [vmem:[#allocation8 + $0xa0] ss:$24 sps:$4 sm:$0xff]  }
 0x7ac   :  { %v6058_v19 = vld [vmem:[#allocation8 + $0x44] ss:$24 sps:$4 sm:$0xff]  }
 0x7ae   :  { %2745 = vmatpush1.bf16.msra.mxu0 %v9451_v18  ;;  %2787 = vmatpush1.bf16.msra.mxu1 %v9452_v49  ;;  %v6063_v18 = vld [vmem:[#allocation8 + $0x9c] ss:$24 sps:$4 sm:$0xff]  }
 0x7af   :  { %5824 = vmatprep.subr.bf16.mxu0 %v9309_v13  ;;  %v6066_v49 = vld [vmem:[#allocation8 + $0xa4] ss:$24 sps:$4 sm:$0xff]  }
 0x7b0   :  { %v6260_v33 = vpop.eup %6259 }
 0x7b1   :  { %2763 = vmatmul.mubr.bf16.vlgmr.msra.gmra.mrb[80].mxu0 %v2647_v58  ;;  %v2644_v16 = vmul.f32 %v6260_v33, %v2643_v0  ;;  %v6366_v33 = vld [vmem:[%s9015_s5] ss:$0 sm:$0xff] }
 0x7b2   :  { %5825 = vmatpush3.bf16.msra.mxu0 %v7574_v60  ;;  %5840 = vmatprep.mubr.msk.bf16.mxu0 %vm6543_vm1, %v9309_v13  ;;  %v9490_v60 = vld [vmem:[#allocation101_spill] sm:$0xff] }
 0x7b3   :  { %5826 = vmatprep.subr.bf16.mxu0 %v9309_v13  ;;  %v7919_v56 = vadd.f32 %v2645_v3, %v2644_v16 }
 0x7b5   :  { %v2771_v41 = vpack.c.bf16 %v7919_v56, %v7919_v56 }
 0x7b6   :  { %5827 = vmatpush3.bf16.msra.mxu0 %v7584_v44  ;;  %v9492_v44 = vld [vmem:[#allocation103_spill] sm:$0xff] }
 0x7b7   :  { %2805 = vmatmul.mubr.bf16.vlgmr.msra.gmra.mrb[88].mxu1 %v2771_v41  ;;  %5828 = vmatprep.subr.bf16.mxu0 %v9309_v13 }
 0x7b8   :  { %3097 = vmatprep.mubr.bf16.mxu1 %v9242_v10 }
 0x7ba   :  { %5829 = vmatpush3.bf16.msra.mxu0 %v7591_v54  ;;  %v6053_v54 = vld [vmem:[#allocation8 + $0x10] ss:$24 sps:$4 sm:$0xff]  }
 0x7bb   :  { %5830 = vmatprep.subr.bf16.mxu0 %v9309_v13  ;;  %3065 = vmatprep.subr.bf16.mxu1 %v6053_v54 }
 0x7be   :  { %5831 = vmatpush3.bf16.msra.mxu0 %v7597_v40  ;;  %v6051_v40 = vld [vmem:[#allocation8 + $0xc] ss:$24 sps:$4 sm:$0xff]  }
 0x7bf   :  { %5832 = vmatprep.subr.bf16.mxu0 %v9309_v13  ;;  %3066 = vmatpush1.bf16.msra.mxu1 %v6051_v40 }
 0x7c0   :  { %3067 = vmatprep.subr.bf16.mxu1 %v6057_v55 }
 0x7c2   :  { %5833 = vmatpush3.bf16.msra.mxu0 %v9490_v60 }
 0x7c3   :  { %5834 = vmatprep.subr.bf16.mxu0 %v9309_v13  ;;  %3068 = vmatpush1.bf16.msra.mxu1 %v6055_v14 }
 0x7c4   :  { %3069 = vmatprep.subr.bf16.mxu1 %v6061_v51 }
 0x7c6   :  { %5835 = vmatpush3.bf16.msra.mxu0 %v9491_v8 }
 0x7c7   :  { %5836 = vmatprep.subr.bf16.mxu0 %v9309_v13  ;;  %3070 = vmatpush1.bf16.msra.mxu1 %v6059_v15 }
 0x7c8   :  { %3071 = vmatprep.subr.bf16.mxu1 %v6065_v2 }
 0x7ca   :  { %5837 = vmatpush3.bf16.msra.mxu0 %v9492_v44 }
 0x7cb   :  { %5838 = vmatprep.subr.bf16.mxu0 %v9309_v13  ;;  %3072 = vmatpush1.bf16.msra.mxu1 %v6063_v18 }
 0x7cc   :  { %3073 = vmatprep.subr.bf16.mxu1 %v6069_v37 }
 0x7ce   :  { %5839 = vmatpush3.bf16.msra.mxu0 %v9493_v29 }
 0x7cf   :  { %5844 = vmatprep.subr.bf16.mxu0 %v9309_v13  ;;  %3074 = vmatpush1.bf16.msra.mxu1 %v6067_v45 }
 0x7d0   :  { %3075 = vmatprep.subr.bf16.mxu1 %v6073_v24 }
 0x7d1   :  { %5841 = vmatmul.mubr.bf16.vlgmr.msra.gmra.mrb[84].mxu0 %v2771_v41  ;;  %v9498_v41 = vld [vmem:[#allocation75_spill] sm:$0xff] }
 0x7d2   :  { %5860 = vmatprep.mubr.msk.bf16.mxu0 %vm6543_vm1, %v9309_v13  ;;  %5845 = vmatpush3.bf16.msra.mxu0 %v6054_v50  ;;  %v363_v60 = vadd.f32 %v9498_v41, %v6914_v43  ;;  %v6385_v41 = vld [vmem:[#allocation10 + $0x90] ss:$12 sps:$4 sm:$0xff]  }
 0x7d3   :  { %5846 = vmatprep.subr.bf16.mxu0 %v9309_v13  ;;  %3076 = vmatpush1.bf16.msra.mxu1 %v6071_v48 }
 0x7d4   :  { %3077 = vmatprep.subr.bf16.mxu1 %v6077_v17 }
 0x7d6   :  { %5847 = vmatpush3.bf16.msra.mxu0 %v6058_v19 }
 0x7d7   :  { %5848 = vmatprep.subr.bf16.mxu0 %v9309_v13  ;;  %3078 = vmatpush1.bf16.msra.mxu1 %v6075_v59 }
 0x7d8   :  { %3079 = vmatprep.subr.bf16.mxu1 %v6081_v63  ;;  %v6368_v63 = vld [vmem:[#allocation10 + $0x8] ss:$12 sps:$4 sm:$0xff]  }
 0x7da   :  { %5849 = vmatpush3.bf16.msra.mxu0 %v6062_v57 }
 0x7db   :  { %5850 = vmatprep.subr.bf16.mxu0 %v9309_v13  ;;  %3080 = vmatpush1.bf16.msra.mxu1 %v6079_v21  ;;  %v6369_v21 = vld [vmem:[#allocation10 + $0x1c] ss:$12 sps:$4 sm:$0xff]  }
 0x7dc   :  { %3147 = vmatprep.subr.bf16.mxu1 %v6365_v25  ;;  %v6370_v25 = vld [vmem:[#allocation10 + $0x18] ss:$12 sps:$4 sm:$0xff]  }
 0x7de   :  { %5851 = vmatpush3.bf16.msra.mxu0 %v6066_v49 }
 0x7df   :  { %5852 = vmatprep.subr.bf16.mxu0 %v9309_v13 }
 0x7e2   :  { %5853 = vmatpush3.bf16.msra.mxu0 %v6070_v23 }
 0x7e3   :  { %5854 = vmatprep.subr.bf16.mxu0 %v9309_v13 }
 0x7e6   :  { %5855 = vmatpush3.bf16.msra.mxu0 %v6074_v20 }
 0x7e7   :  { %5856 = vmatprep.subr.bf16.mxu0 %v9309_v13 }
 0x7ea   :  { %5857 = vmatpush3.bf16.msra.mxu0 %v6078_v32  ;;  %v6367_v32 = vld [vmem:[#allocation10] ss:$12 sps:$4 sm:$0xff]  }
 0x7eb   :  { %5858 = vmatprep.subr.bf16.mxu0 %v9309_v13 }
 0x7ee   :  { %5859 = vmatpush3.bf16.msra.mxu0 %v6082_v61 }
 0x7ef   :  { %5864 = vmatprep.subr.bf16.mxu0 %v9309_v13 }
 0x864   :  { %v2682_v58 = vpop.f32.mrb[76].mxu0  ;;  %v2723_v35 = vpop.f32.mrb[84].mxu1 }
 0x865   :  { %v2858_v6 = vadd.f32 %v2682_v58, %v297_v27  ;;  %v2684_v62 = vpop.f32.mrb[77].mxu0  ;;  %v2725_v9 = vpop.f32.mrb[85].mxu1  ;;  %v2857_v16 = vadd.f32 %v6366_v33, %v2723_v35  ;;  %v6373_v27 = vld [vmem:[#allocation10 + $0x30] ss:$12 sps:$4 sm:$0xff]   ;;  %v6376_v35 = vld [vmem:[#allocation10 + $0x48] ss:$12 sps:$4 sm:$0xff]  }
 0x866   :  { %v2865_v30 = vadd.f32 %v2684_v62, %v299_v39  ;;  %v2686_v5 = vpop.f32.mrb[78].mxu0  ;;  %v2727_v12 = vpop.f32.mrb[86].mxu1  ;;  %v2879_v14 = vadd.f32 %v2725_v9, %v9334_v7  ;;  %v6375_v39 = vld [vmem:[#allocation10 + $0x4c] ss:$12 sps:$4 sm:$0xff]   ;;  %v6378_v9 = vld [vmem:[#allocation10 + $0x64] ss:$12 sps:$4 sm:$0xff]  }
 0x867   :  { %v5472_v11 = vmul.f32 -1.442695, %v2858_v6  ;;  %v2687_v28 = vpop.f32.mrb[79].mxu0  ;;  %v2728_v31 = vpop.f32.mrb[87].mxu1  ;;  %v6377_v6 = vld [vmem:[#allocation10 + $0x50] ss:$12 sps:$4 sm:$0xff]  }
 0x868   :  { %v5473_v36 = vmul.f32 -1.442695, %v2865_v30  ;;  %v6382_v33 = vld [vmem:[#allocation10 + $0x78] ss:$12 sps:$4 sm:$0xff]  }
 0x869   :  { %6261 = vpow2.f32 %v5472_v11 }
 0x86a   :  { %6263 = vpow2.f32 %v5473_v36 }
 0x873   :  { %v6262_v46 = vpop.eup %6261 }
 0x874   :  { %v2862_v1 = vadd.f32 1.0, %v6262_v46  ;;  %v6264_v34 = vpop.eup %6263  ;;  %v6379_v46 = vld [vmem:[#allocation10 + $0x60] ss:$12 sps:$4 sm:$0xff]  }
 0x875   :  { %v2869_v0 = vadd.f32 1.0, %v6264_v34  ;;  %v6381_v34 = vld [vmem:[#allocation10 + $0x7c] ss:$12 sps:$4 sm:$0xff]  }
 0x876   :  { %6265 = vrcp.f32 %v2862_v1  ;;  %v6380_v1 = vld [vmem:[#allocation10 + $0x68] ss:$12 sps:$4 sm:$0xff]  }
 0x877   :  { %6267 = vrcp.f32 %v2869_v0 }
 0x880   :  { %v6266_v3 = vpop.eup %6265 }
 0x881   :  { %v2872_v8 = vmul.f32 %v6266_v3, %v2857_v16  ;;  %v6268_v15 = vpop.eup %6267  ;;  %v6383_v16 = vld [vmem:[#allocation10 + $0x80] ss:$12 sps:$4 sm:$0xff]  }
 0x882   :  { %v2875_v45 = vsub.f32 1.0, %v6268_v15  ;;  %v2877_v48 = vmul.f32 %v6268_v15, %v7875_v4  ;;  %v6384_v3 = vld [vmem:[#allocation10 + $0x94] ss:$12 sps:$4 sm:$0xff]   ;;  %v6084_v15 = vld [vmem:[#allocation11 + $0x8] sm:$0xff]  }
 0x883   :  { %v2873_v44 = vadd.f32 %v2872_v8, %v363_v60  ;;  %v6386_v60 = vld [vmem:[#allocation10 + $0x98] ss:$12 sps:$4 sm:$0xff]  }
 0x884   :  { %v2764_v54 = vpop.f32.mrb[80].mxu0  ;;  %v6387_v8 = vld [vmem:[#allocation10 + $0xac] ss:$12 sps:$4 sm:$0xff]  }
 0x885   :  { %6269 = vtanh.f32 %v2873_v44  ;;  %v7957_v40 = vpop.f32.mrb[81].mxu0  ;;  %v2880_v19 = vadd.f32 %v2764_v54, %v7166_v42  ;;  %v6388_v54 = vld [vmem:[#allocation10 + $0xa8] ss:$12 sps:$4 sm:$0xff]  }
 0x886   :  { %v2768_v50 = vpop.f32.mrb[82].mxu0  ;;  %v2881_v28 = vadd.f32 %v7957_v40, %v7195_v52 }
 0x887   :  { %v2769_v55 = vpop.f32.mrb[83].mxu0 }
 0x88a   :  { %v2806_v51 = vpop.f32.mrb[88].mxu1 }
 0x88b   :  { %v2883_v57 = vadd.f32 %v2879_v14, %v2806_v51  ;;  %v2808_v2 = vpop.f32.mrb[89].mxu1 }
 0x88c   :  { %v2890_v18 = vadd.f32 %v2880_v19, %v2808_v2  ;;  %v2810_v49 = vpop.f32.mrb[90].mxu1  ;;  %v6087_v2 = vld [vmem:[#allocation11 + $0x20] sm:$0xff]  }
 0x88d   :  { %v5474_v43 = vmul.f32 -1.442695, %v2883_v57  ;;  %v2811_v37 = vpop.f32.mrb[91].mxu1  ;;  %v6086_v57 = vld [vmem:[#allocation11 + $0x18] sm:$0xff]  }
 0x88e   :  { %v5475_v20 = vmul.f32 -1.442695, %v2890_v18  ;;  %v6088_v18 = vld [vmem:[#allocation11 + $0x28] sm:$0xff]   ;;  %v6090_v49 = vld [vmem:[#allocation11 + $0x38] sm:$0xff]  }
 0x88f   :  { %v6270_v23 = vpop.eup %6269  ;;  %6271 = vpow2.f32 %v5474_v43  ;;  %v6091_v43 = vld [vmem:[%s9021_s11] ss:$8 sps:$4 sm:$0xff]   ;;  %v6093_v37 = vld [vmem:[%s9021_s11 + $0x4] ss:$8 sps:$4 sm:$0xff]  }
 0x890   :  { %v2876_v24 = vmul.f32 %v6270_v23, %v2875_v45  ;;  %6273 = vpow2.f32 %v5475_v20  ;;  %v6096_v45 = vld [vmem:[%s9021_s11 + $0x14] ss:$8 sps:$4 sm:$0xff]   ;;  %v6094_v23 = vld [vmem:[%s9021_s11 + $0x10] ss:$8 sps:$4 sm:$0xff]  }
 0x891   :  { %v6100_v20 = vld [vmem:[%s9021_s11 + $0x30] ss:$8 sps:$4 sm:$0xff]  }
 0x892   :  { %v2878_v17 = vadd.f32 %v2877_v48, %v2876_v24  ;;  %v6097_v24 = vld [vmem:[%s9021_s11 + $0x20] ss:$8 sps:$4 sm:$0xff]   ;;  %v6102_v48 = vld [vmem:[%s9021_s11 + $0x34] ss:$8 sps:$4 sm:$0xff]  }
 0x894   :  { %v2904_v59 = vpack.c.bf16 %v2878_v17, %v2878_v17  ;;  %v6105_v17 = vld [vmem:[%s9021_s11 + $0x44] ss:$8 sps:$4 sm:$0xff]  }
 0x896   :  { %3098 = vmatmul.mubr.bf16.vlgmr.msra.gmra.mrb[92].mxu1 %v2904_v59  ;;  %5861 = vmatmul.mubr.bf16.vlgmr.msra.gmra.mrb[88].mxu0 %v2904_v59  ;;  %v6103_v59 = vld [vmem:[%s9021_s11 + $0x40] ss:$8 sps:$4 sm:$0xff]  }
 0x897   :  { %3148 = vmatpush1.bf16.msra.mxu1 %v6367_v32  ;;  %5865 = vmatpush3.bf16.msra.mxu0 %v6368_v63  ;;  %v6108_v32 = vld [vmem:[%s9021_s11 + $0x54] ss:$8 sps:$4 sm:$0xff]   ;;  %v6106_v63 = vld [vmem:[%s9021_s11 + $0x50] ss:$8 sps:$4 sm:$0xff]  }
 0x898   :  { %3149 = vmatprep.subr.bf16.mxu1 %v6369_v21  ;;  %5866 = vmatprep.subr.bf16.mxu0 %v9309_v13  ;;  %v6111_v21 = vld [vmem:[%s9021_s11 + $0x64] ss:$8 sps:$4 sm:$0xff]  }
 0x899   :  { %v6272_v61 = vpop.eup %6271  ;;  %3179 = vmatprep.mubr.bf16.mxu1 %v9242_v10  ;;  %5880 = vmatprep.mubr.msk.bf16.mxu0 %vm6543_vm1, %v9309_v13 }
 0x89a   :  { %v2887_v4 = vadd.f32 1.0, %v6272_v61  ;;  %v6274_v26 = vpop.eup %6273  ;;  %v6109_v61 = vld [vmem:[%s9021_s11 + $0x60] ss:$8 sps:$4 sm:$0xff]  }
 0x89b   :  { %3150 = vmatpush1.bf16.msra.mxu1 %v6370_v25  ;;  %5867 = vmatpush3.bf16.msra.mxu0 %v6371_v22  ;;  %v2894_v58 = vadd.f32 1.0, %v6274_v26 }
 0x89c   :  { %6275 = vrcp.f32 %v2887_v4  ;;  %3151 = vmatprep.subr.bf16.mxu1 %v6372_v47  ;;  %5868 = vmatprep.subr.bf16.mxu0 %v9309_v13 }
 0x89d   :  { %6277 = vrcp.f32 %v2894_v58 }
 0x89f   :  { %3152 = vmatpush1.bf16.msra.mxu1 %v6373_v27  ;;  %5869 = vmatpush3.bf16.msra.mxu0 %v6374_v53 }
 0x8a0   :  { %3153 = vmatprep.subr.bf16.mxu1 %v6375_v39  ;;  %5870 = vmatprep.subr.bf16.mxu0 %v9309_v13 }
 0x8a3   :  { %3154 = vmatpush1.bf16.msra.mxu1 %v6376_v35  ;;  %5871 = vmatpush3.bf16.msra.mxu0 %v6377_v6 }
 0x8a4   :  { %v2847_v62 = vpop.f32.mrb[84].mxu0  ;;  %3155 = vmatprep.subr.bf16.mxu1 %v6378_v9  ;;  %5872 = vmatprep.subr.bf16.mxu0 %v9309_v13 }
 0x8a5   :  { %v2882_v30 = vadd.f32 %v7788_v38, %v2847_v62  ;;  %v5842_v5 = vpop.f32.mrb[85].mxu0 }
 0x8a6   :  { %v6276_v12 = vpop.eup %6275  ;;  %v2850_v11 = vpop.f32.mrb[86].mxu0 }
 0x8a7   :  { %v2897_v31 = vmul.f32 %v6276_v12, %v2882_v30  ;;  %v5843_v36 = vpop.f32.mrb[87].mxu0  ;;  %3156 = vmatpush1.bf16.msra.mxu1 %v6379_v46  ;;  %5873 = vmatpush3.bf16.msra.mxu0 %v6380_v1  ;;  %v6278_v44 = vpop.eup %6277 }
 0x8a8   :  { %3157 = vmatprep.subr.bf16.mxu1 %v6381_v34  ;;  %5874 = vmatprep.subr.bf16.mxu0 %v9309_v13  ;;  %v2900_v40 = vsub.f32 1.0, %v6278_v44  ;;  %v2902_v14 = vmul.f32 %v6278_v44, %v7919_v56  ;;  %v6085_v56 = vld [vmem:[#allocation11 + $0x10] sm:$0xff]   ;;  %v6115_v44 = vld [vmem:[#allocation13 + $0x40] sm:$0xff]  }
 0x8a9   :  { %v2898_v0 = vadd.f32 %v2897_v31, %v2881_v28 }
 0x8ab   :  { %6279 = vtanh.f32 %v2898_v0  ;;  %3158 = vmatpush1.bf16.msra.mxu1 %v6382_v33  ;;  %5875 = vmatpush3.bf16.msra.mxu0 %v6383_v16 }
 0x8ac   :  { %3159 = vmatprep.subr.bf16.mxu1 %v6384_v3  ;;  %5876 = vmatprep.subr.bf16.mxu0 %v9309_v13 }
 0x8af   :  { %3160 = vmatpush1.bf16.msra.mxu1 %v6385_v41  ;;  %5877 = vmatpush3.bf16.msra.mxu0 %v6386_v60 }
 0x8b0   :  { %3161 = vmatprep.subr.bf16.mxu1 %v6387_v8  ;;  %5878 = vmatprep.subr.bf16.mxu0 %v9309_v13 }
 0x8b3   :  { %3162 = vmatpush1.bf16.msra.mxu1 %v6388_v54  ;;  %5879 = vmatpush3.bf16.msra.mxu0 %v9493_v29  ;;  %v6083_v29 = vld [vmem:[#allocation11] sm:$0xff]  }
 0x8b4   :  { %5884 = vmatprep.subr.bf16.mxu1 %v9309_v13  ;;  %3472 = vmatprep.subr.bf16.mxu0 %v6093_v37  ;;  %v6116_v54 = vld [vmem:[#allocation13] sm:$0xff]  }
 0x8b5   :  { %v6280_v50 = vpop.eup %6279 }
 0x8b6   :  { %v2901_v55 = vmul.f32 %v6280_v50, %v2900_v40  ;;  %v6117_v40 = vld [vmem:[#allocation13 + $0x48] sm:$0xff]  }
 0x8b7   :  { %v6118_v50 = vld [vmem:[#allocation13 + $0x8] sm:$0xff]  }
 0x8b8   :  { %v7978_v19 = vadd.f32 %v2902_v14, %v2901_v55  ;;  %v6119_v55 = vld [vmem:[#allocation13 + $0x50] sm:$0xff]  }
 0x8b9   :  { %v6120_v14 = vld [vmem:[#allocation13 + $0x10] sm:$0xff]  }
 0x8ba   :  { %v3146_v51 = vpack.c.bf16 %v7978_v19, %v7978_v19 }
 0x8bc   :  { %3180 = vmatmul.mubr.bf16.vlgmr.msra.gmra.mrb[92].mxu1 %v3146_v51  ;;  %5881 = vmatmul.mubr.bf16.vlgmr.msra.gmra.mrb[92].mxu0 %v3146_v51  ;;  %v6122_v51 = vld [vmem:[#allocation13 + $0x18] sm:$0xff]  }
 0x8bd   :  { %5900 = vmatprep.mubr.msk.bf16.mxu1 %vm6543_vm1, %v9309_v13  ;;  %3504 = vmatprep.mubr.bf16.mxu0 %v9242_v10  ;;  %v6089_v10 = vld [vmem:[#allocation11 + $0x30] sm:$0xff]  }
 0x8be   :  { %5885 = vmatpush3.bf16.msra.mxu1 %v6083_v29  ;;  %3473 = vmatpush1.bf16.msra.mxu0 %v6091_v43  ;;  %v6123_v29 = vld [vmem:[#allocation13 + $0x60] sm:$0xff]  }
 0x8bf   :  { %5886 = vmatprep.subr.bf16.mxu1 %v9309_v13  ;;  %3474 = vmatprep.subr.bf16.mxu0 %v6096_v45 }
 0x8c2   :  { %5887 = vmatpush3.bf16.msra.mxu1 %v6084_v15  ;;  %3475 = vmatpush1.bf16.msra.mxu0 %v6094_v23  ;;  %v6124_v15 = vld [vmem:[#allocation13 + $0x20] sm:$0xff]  }
 0x8c3   :  { %5888 = vmatprep.subr.bf16.mxu1 %v9309_v13 }
 0x8c6   :  { %5889 = vmatpush3.bf16.msra.mxu1 %v6085_v56  ;;  %v6125_v56 = vld [vmem:[#allocation13 + $0x68] sm:$0xff]  }
 0x8c7   :  { %5890 = vmatprep.subr.bf16.mxu1 %v9309_v13 }
 0x8ca   :  { %5891 = vmatpush3.bf16.msra.mxu1 %v6086_v57  ;;  %v6126_v57 = vld [vmem:[#allocation13 + $0x28] sm:$0xff]  }
 0x8cb   :  { %5892 = vmatprep.subr.bf16.mxu1 %v9309_v13 }
 0x8ce   :  { %5893 = vmatpush3.bf16.msra.mxu1 %v6087_v2  ;;  %v5502_v2 = vld [vmem:[%s9020_s10] ss:$0 sm:$0xff] }
 0x8cf   :  { %5894 = vmatprep.subr.bf16.mxu1 %v9309_v13 }
 0x8d2   :  { %5895 = vmatpush3.bf16.msra.mxu1 %v6088_v18 }
 0x8d3   :  { %5896 = vmatprep.subr.bf16.mxu1 %v9309_v13 }
 0x8d6   :  { %5897 = vmatpush3.bf16.msra.mxu1 %v6089_v10 }
 0x8d7   :  { %5898 = vmatprep.subr.bf16.mxu1 %v9309_v13  ;;  %v6099_v13 = vld [vmem:[%s9021_s11 + $0x24] ss:$8 sps:$4 sm:$0xff]  }
 0x8d8   :  { %3476 = vmatprep.subr.bf16.mxu0 %v6099_v13  ;;  %v6127_v13 = vld [vmem:[#allocation13 + $0x70] sm:$0xff]  }
 0x8d9   :  { %3477 = vmatpush1.bf16.msra.mxu0 %v6097_v24  ;;  %v6128_v24 = vld [vmem:[#allocation13 + $0x30] sm:$0xff]  }
 0x8da   :  { %5899 = vmatpush3.bf16.msra.mxu1 %v6090_v49  ;;  %3478 = vmatprep.subr.bf16.mxu0 %v6102_v48  ;;  %v6129_v48 = vld [vmem:[#allocation13 + $0x78] sm:$0xff]  }
 0x8db   :  { %5650 = vmatprep.subr.bf16.mxu1 %v6115_v44 }
 0x8dd   :  { %3479 = vmatpush1.bf16.msra.mxu0 %v6100_v20  ;;  %v6130_v20 = vld [vmem:[#allocation13 + $0x38] sm:$0xff]  }
 0x8de   :  { %3480 = vmatprep.subr.bf16.mxu0 %v6105_v17  ;;  %v3380_v17 = vld [vmem:[%s9022_s12] sm:$0x3] }
 0x8e1   :  { %3481 = vmatpush1.bf16.msra.mxu0 %v6103_v59  ;;  %v9499_v59 = vld [vmem:[#allocation37_spill] sm:$0xff] }
 0x8e2   :  { %3482 = vmatprep.subr.bf16.mxu0 %v6108_v32  ;;  %v3385_v32 = vrot.slane %v3380_v17, %v9499_v59 }
 0x8e5   :  { %3483 = vmatpush1.bf16.msra.mxu0 %v6106_v63  ;;  %v9500_v63 = vld [vmem:[#allocation38_spill] sm:$0xff] }
 0x8e6   :  { %3484 = vmatprep.subr.bf16.mxu0 %v6111_v21  ;;  %v3389_v21 = vrot.slane %v3380_v17, %v9500_v63 }
 0x8e9   :  { %3485 = vmatpush1.bf16.msra.mxu0 %v6109_v61 }
 0x969   :  { %v3140_v4 = vpop.f32.mrb[88].mxu0 }
 0x96a   :  { %v5862_v25 = vpop.f32.mrb[89].mxu0  ;;  %v3141_v1 = vadd.f32 %v3140_v4, %v7195_v52  ;;  %v6112_v52 = vld [vmem:[%s9021_s11 + $0x70] ss:$8 sps:$4 sm:$0xff]  }
 0x96b   :  { %v3143_v22 = vpop.f32.mrb[90].mxu0 }
 0x96c   :  { %v5863_v47 = vpop.f32.mrb[91].mxu0 }
 0x98f   :  { %v3181_v27 = vpop.f32.mrb[92].mxu1  ;;  %v3222_v53 = vpop.f32.mrb[92].mxu0 }
 0x990   :  { %v5904_v26 = vadd.f32 %v3181_v27, %v9334_v7  ;;  %v3183_v39 = vpop.f32.mrb[93].mxu1  ;;  %v5882_v58 = vpop.f32.mrb[93].mxu0  ;;  %v3228_v46 = vadd.f32 %v7788_v38, %v3222_v53  ;;  %v6114_v38 = vld [vmem:[%s9021_s11 + $0x74] ss:$8 sps:$4 sm:$0xff]  }
 0x991   :  { %v3185_v35 = vpop.f32.mrb[94].mxu1  ;;  %v3225_v6 = vpop.f32.mrb[94].mxu0  ;;  %v5905_v5 = vadd.f32 %v3183_v39, %v7166_v42  ;;  %3486 = vmatprep.subr.bf16.mxu0 %v6114_v38  ;;  %v8093_v38 = vld [vmem:[%s9026_s16] ss:$0 sm:$0xff] }
 0x992   :  { %v5500_v62 = vmul.f32 -1.442695, %v5904_v26  ;;  %v3186_v9 = vpop.f32.mrb[95].mxu1  ;;  %v5883_v30 = vpop.f32.mrb[95].mxu0  ;;  %3487 = vmatpush1.bf16.msra.mxu0 %v6112_v52  ;;  %v8056_v35 = vld [vmem:[%s9025_s15] ss:$0 sm:$0xff] }
 0x993   :  { %v5501_v12 = vmul.f32 -1.442695, %v5905_v5  ;;  %v9501_v5 = vld [vmem:[#allocation78_spill] sm:$0xff] }
 0x994   :  { %6281 = vpow2.f32 %v5500_v62 }
 0x995   :  { %6283 = vpow2.f32 %v5501_v12  ;;  %v8062_v12 = vadd.f32 %v9501_v5, %v8056_v35 }
 0x99e   :  { %v6282_v11 = vpop.eup %6281 }
 0x99f   :  { %v3233_v28 = vadd.f32 1.0, %v6282_v11  ;;  %v6284_v31 = vpop.eup %6283 }
 0x9a0   :  { %v3240_v36 = vadd.f32 1.0, %v6284_v31 }
 0x9a1   :  { %6285 = vrcp.f32 %v3233_v28  ;;  %v9502_v28 = vld [vmem:[#allocation80_spill] sm:$0xff] }
 0x9a2   :  { %6287 = vrcp.f32 %v3240_v36  ;;  %v8066_v31 = vadd.f32 %v8056_v35, %v9502_v28  ;;  %v9503_v36 = vld [vmem:[#allocation82_spill] sm:$0xff] }
 0x9ab   :  { %v6286_v7 = vpop.eup %6285 }
 0x9ac   :  { %v3243_v34 = vmul.f32 %v6286_v7, %v3228_v46  ;;  %v6288_v33 = vpop.eup %6287  ;;  %v8070_v46 = vadd.f32 %v9503_v36, %v8056_v35  ;;  %v9504_v7 = vld [vmem:[#allocation84_spill] sm:$0xff] }
 0x9ad   :  { %v3246_v16 = vsub.f32 1.0, %v6288_v33  ;;  %v3248_v41 = vmul.f32 %v6288_v33, %v7978_v19  ;;  %v6121_v19 = vld [vmem:[#allocation13 + $0x58] sm:$0xff]  }
 0x9ae   :  { %v3244_v0 = vadd.f32 %v3243_v34, %v3141_v1  ;;  %v8074_v1 = vadd.f32 %v8056_v35, %v9504_v7 }
 0x9b0   :  { %6289 = vtanh.f32 %v3244_v0 }
 0x9ba   :  { %v6290_v42 = vpop.eup %6289 }
 0x9bb   :  { %v3247_v3 = vmul.f32 %v6290_v42, %v3246_v16 }
 0x9bd   :  { %v3249_v60 = vadd.f32 %v3248_v41, %v3247_v3  ;;  %v9505_v3 = vld [vmem:[#allocation87_spill] sm:$0xff] }
 0x9be   :  { %v8084_v41 = vadd.f32 %v8056_v35, %v9505_v3 }
 0x9bf   :  { %v3250_v8 = vpack.c.bf16 %v3249_v60, %v3249_v60  ;;  %v9506_v60 = vld [vmem:[#allocation89_spill] sm:$0xff] }
 0x9c1   :  { %5901 = vmatmul.mubr.bf16.vlgmr.msra.gmra.mrb[96].mxu1 %v3250_v8  ;;  %v8088_v8 = vadd.f32 %v8056_v35, %v9506_v60 }
 0x9c2   :  { %5651 = vmatpush3.bf16.msra.mxu1 %v6116_v54 }
 0x9c3   :  { %5652 = vmatprep.subr.bf16.mxu1 %v6117_v40 }
 0x9c6   :  { %5653 = vmatpush3.bf16.msra.mxu1 %v6118_v50 }
 0x9c7   :  { %5654 = vmatprep.subr.bf16.mxu1 %v6119_v55 }
 0x9ca   :  { %5655 = vmatpush3.bf16.msra.mxu1 %v6120_v14 }
 0x9cb   :  { %5656 = vmatprep.subr.bf16.mxu1 %v6121_v19 }
 0x9ce   :  { %5657 = vmatpush3.bf16.msra.mxu1 %v6122_v51  ;;  %v9507_v51 = vld [vmem:[#allocation86_spill] sm:$0xff] }
 0x9cf   :  { %5658 = vmatprep.subr.bf16.mxu1 %v6123_v29  ;;  %v8101_v29 = vadd.f32 %v9507_v51, %v8056_v35 }
 0x9d2   :  { %5659 = vmatpush3.bf16.msra.mxu1 %v6124_v15  ;;  %v9508_v15 = vld [vmem:[#allocation88_spill] sm:$0xff] }
 0x9d3   :  { %5660 = vmatprep.subr.bf16.mxu1 %v6125_v56  ;;  %v8105_v56 = vadd.f32 %v9508_v15, %v8056_v35 }
 0x9d6   :  { %5661 = vmatpush3.bf16.msra.mxu1 %v6126_v57 }
 0x9d7   :  { %5662 = vmatprep.subr.bf16.mxu1 %v6127_v13 }
 0x9da   :  { %5663 = vmatpush3.bf16.msra.mxu1 %v6128_v24 }
 0x9db   :  { %5664 = vmatprep.subr.bf16.mxu1 %v6129_v48 }
 0x9de   :  { %5665 = vmatpush3.bf16.msra.mxu1 %v6130_v20 }
 0xa94   :  { %v3356_v18 = vpop.f32.mrb[96].mxu1 }
 0xa95   :  { %v3357_v10 = vadd.f32 %v5502_v2, %v3356_v18  ;;  %v5902_v49 = vpop.f32.mrb[97].mxu1 }
 0xa96   :  { %v3359_v43 = vpop.f32.mrb[98].mxu1 }
 0xa97   :  { %v3362_v37 = vmax.f32 %v3357_v10, 0.0  ;;  %v5903_v45 = vpop.f32.mrb[99].mxu1 }
 0xa99   :  { %v3363_v23 = vpack.c.bf16 %v3362_v37, %v3362_v37  ;;  %v9509_v37 = vld [vmem:[#allocation91_spill] sm:$0xff] }
 0xa9a   :  { %v8113_v45 = vadd.f32 %v8056_v35, %v9509_v37 }
 0xa9b   :  { %3505 = vmatmul.mubr.bf16.vlgmr.msra.gmra.mrb[96].mxu0 %v3363_v23  ;;  %v9510_v23 = vld [vmem:[#allocation93_spill] sm:$0xff] }
 0xa9c   :  { %v8117_v13 = vadd.f32 %v8056_v35, %v9510_v23 }
 0xb6e   :  { %v3506_v61 = vpop.f32.mrb[96].mxu0 }
 0xb6f   :  { %v3507_v4 = vadd.f32 %v3506_v61, %v3385_v32  ;;  %v3508_v25 = vpop.f32.mrb[97].mxu0 }
 0xb70   :  { %v3509_v22 = vadd.f32 %v3508_v25, %v3389_v21  ;;  %v3510_v47 = vpop.f32.mrb[98].mxu0  ;;  %v9511_v21 = vld [vmem:[#allocation90_spill] sm:$0xff] }
 0xb71   :  { %v3513_v27 = vmax.f32 %v3507_v4, 0.0  ;;  %v3511_v53 = vpop.f32.mrb[99].mxu0  ;;  %v8125_v61 = vadd.f32 %v9511_v21, %v8056_v35  ;;  %v9512_v4 = vld [vmem:[#allocation92_spill] sm:$0xff] }
 0xb72   :  { %v3514_v26 = vmax.f32 %v3509_v22, 0.0  ;;  %v8129_v25 = vadd.f32 %v9512_v4, %v8056_v35 }
 0xb73   :  { %v3515_v58 = vpack.c.bf16 %v3513_v27, %v3513_v27 }
 0xb74   :  { %v3516_v39 = vpack.c.bf16 %v3514_v26, %v3514_v26 }
 0xb76   :  { %3677 = vmatprep.mubr.bf16.mxu1 %v3516_v39 }
 0xb77   :  { %3678 = vmatmul.mubr.bf16.vlgmr.msra.gmra.mrb[100].mxu1 %v3515_v58  ;;  %v9513_v58 = vld [vmem:[#allocation95_spill] sm:$0xff] }
 0xc4a   :  { %v5666_v6 = vpop.f32.mrb[100].mxu1 }
 0xc4b   :  { %v5667_v62 = vpop.f32.mrb[101].mxu1 }
 0xc4c   :  { %v8058_v9 = vadd.f32 %v5667_v62, %v5666_v6  ;;  %v5669_v30 = vpop.f32.mrb[102].mxu1  ;;  %v8137_v6 = vadd.f32 %v8056_v35, %v9513_v58  ;;  %v9514_v62 = vld [vmem:[#allocation97_spill] sm:$0xff] }
 0xc4d   :  { %v5670_v11 = vpop.f32.mrb[103].mxu1  ;;  %v8141_v30 = vadd.f32 %v8056_v35, %v9514_v62 }
 0xc4e   :  { %v3712_v34 = vrot.slane %v8058_v9, %v9499_v59  ;;  %v8157_v60 = vrot.slane %v8058_v9, %v9500_v63 }
 0xc50   :  { %v3715_v0 = vadd.f32 %v3712_v34, %v8062_v12  ;;  %v3713_v33 = vadd.f32 %v3712_v34, %v8066_v31  ;;  %v3716_v16 = vadd.f32 %v3712_v34, %v8070_v46  ;;  %v3714_v42 = vadd.f32 %v3712_v34, %v8074_v1 }
 0xc51   :  { %v3718_v54 = vadd.f32 %v3712_v34, %v8088_v8  ;;  %v3717_v40 = vadd.f32 %v3712_v34, %v8084_v41  ;;  %v3720_v57 = vadd.f32 %v3712_v34, %v8105_v56  ;;  %v3719_v2 = vadd.f32 %v3712_v34, %v8101_v29 }
 0xc52   :  { %v3731_v52 = vmax.f32 %v3715_v0, 0.0  ;;  %v3729_v44 = vmax.f32 %v3713_v33, 0.0  ;;  %v3732_v14 = vmax.f32 %v3716_v16, 0.0  ;;  %v3730_v19 = vmax.f32 %v3714_v42, 0.0  ;;  %v9515_v33 = vld [vmem:[#allocation94_spill] sm:$0xff]  ;;  %v9516_v42 = vld [vmem:[#allocation96_spill] sm:$0xff] }
 0xc53   :  { %v3734_v49 = vmax.f32 %v3718_v54, 0.0  ;;  %v3733_v43 = vmax.f32 %v3717_v40, 0.0  ;;  %v3736_v24 = vmax.f32 %v3720_v57, 0.0  ;;  %v3735_v48 = vmax.f32 %v3719_v2, 0.0 }
 0xc54   :  { %v3747_v50 = vmul.f32 %v8093_v38, %v3731_v52  ;;  %v3745_v55 = vmul.f32 %v8093_v38, %v3729_v44  ;;  %v3748_v18 = vmul.f32 %v8093_v38, %v3732_v14  ;;  %v3746_v10 = vmul.f32 %v8093_v38, %v3730_v19 }
 0xc55   :  { %v3750_v20 = vmul.f32 %v8093_v38, %v3734_v49  ;;  %v3749_v17 = vmul.f32 %v8093_v38, %v3733_v43  ;;  %v3722_v59 = vadd.f32 %v3712_v34, %v8117_v13  ;;  %v3721_v32 = vadd.f32 %v3712_v34, %v8113_v45 }
 0xc56   :  { %3765 = vadd.xlane.f32.xlu1 %v3747_v50  ;;  %3761 = vadd.xlane.f32.xlu0 %v3745_v55  ;;  %v3752_v22 = vmul.f32 %v8093_v38, %v3736_v24  ;;  %v3751_v47 = vmul.f32 %v8093_v38, %v3735_v48  ;;  %v3724_v26 = vadd.f32 %v3712_v34, %v8129_v25 }
 0xc57   :  { %v3738_v27 = vmax.f32 %v3722_v59, 0.0  ;;  %v3737_v53 = vmax.f32 %v3721_v32, 0.0  ;;  %v3723_v39 = vadd.f32 %v3712_v34, %v8125_v61  ;;  %v3726_v5 = vadd.f32 %v3712_v34, %v8141_v30 }
 0xc58   :  { %v3725_v11 = vadd.f32 %v3712_v34, %v8137_v6  ;;  %v3740_v7 = vmax.f32 %v3724_v26, 0.0  ;;  %v8149_v16 = vadd.f32 %v9515_v33, %v8056_v35  ;;  %v8153_v3 = vadd.f32 %v9516_v42, %v8056_v35 }
 0xc59   :  { %v3754_v28 = vmul.f32 %v8093_v38, %v3738_v27  ;;  %v3753_v36 = vmul.f32 %v8093_v38, %v3737_v53  ;;  %v3739_v0 = vmax.f32 %v3723_v39, 0.0  ;;  %v3742_v50 = vmax.f32 %v3726_v5, 0.0 }
 0xc5a   :  { %3767 = vadd.xlane.f32.xlu1 %v3748_v18  ;;  %3763 = vadd.xlane.f32.xlu0 %v3746_v10  ;;  %v3728_v52 = vadd.f32 %v3712_v34, %v8153_v3  ;;  %v3727_v44 = vadd.f32 %v3712_v34, %v8149_v16  ;;  %v3756_v54 = vmul.f32 %v8093_v38, %v3740_v7  ;;  %v3741_v55 = vmax.f32 %v3725_v11, 0.0 }
 0xc5b   :  { %v3755_v40 = vmul.f32 %v8093_v38, %v3739_v0  ;;  %v3758_v19 = vmul.f32 %v8093_v38, %v3742_v50  ;;  %v3944_v63 = vadd.f32 %v8157_v60, %v8074_v1  ;;  %v3943_v34 = vadd.f32 %v8157_v60, %v8066_v31 }
 0xc5c   :  { %v3744_v35 = vmax.f32 %v3728_v52, 0.0  ;;  %v3743_v14 = vmax.f32 %v3727_v44, 0.0  ;;  %v3757_v51 = vmul.f32 %v8093_v38, %v3741_v55  ;;  %v3946_v10 = vadd.f32 %v8157_v60, %v8070_v46 }
 0xc5d   :  { %v3960_v2 = vmax.f32 %v3944_v63, 0.0  ;;  %v3959_v18 = vmax.f32 %v3943_v34, 0.0  ;;  %v3945_v49 = vadd.f32 %v8157_v60, %v8062_v12  ;;  %v3948_v43 = vadd.f32 %v8157_v60, %v8088_v8 }
 0xc5e   :  { %3771 = vadd.xlane.f32.xlu1 %v3750_v20  ;;  %3769 = vadd.xlane.f32.xlu0 %v3749_v17  ;;  %v3760_v15 = vmul.f32 %v8093_v38, %v3744_v35  ;;  %v3759_v57 = vmul.f32 %v8093_v38, %v3743_v14  ;;  %v3947_v37 = vadd.f32 %v8157_v60, %v8084_v41  ;;  %v3962_v48 = vmax.f32 %v3946_v10, 0.0 }
 0xc5f   :  { %v3976_v23 = vmul.f32 %v8093_v38, %v3960_v2  ;;  %v3975_v24 = vmul.f32 %v8093_v38, %v3959_v18  ;;  %v3961_v20 = vmax.f32 %v3945_v49, 0.0  ;;  %v3950_v17 = vadd.f32 %v8157_v60, %v8105_v56 }
 0xc60   :  { %v3949_v59 = vadd.f32 %v8157_v60, %v8101_v29  ;;  %v3978_v32 = vmul.f32 %v8093_v38, %v3962_v48  ;;  %v3964_v4 = vmax.f32 %v3948_v43, 0.0  ;;  %v3952_v39 = vadd.f32 %v8157_v60, %v8117_v13 }
 0xc61   :  { %v3977_v21 = vmul.f32 %v8093_v38, %v3961_v20  ;;  %v3951_v58 = vadd.f32 %v8157_v60, %v8113_v45  ;;  %v3953_v7 = vadd.f32 %v8157_v60, %v8125_v61  ;;  %v3956_v0 = vadd.f32 %v8157_v60, %v8141_v30 }
 0xc62   :  { %3775 = vadd.xlane.f32.xlu1 %v3752_v22  ;;  %3773 = vadd.xlane.f32.xlu0 %v3751_v47  ;;  %v3963_v22 = vmax.f32 %v3947_v37, 0.0  ;;  %v3966_v47 = vmax.f32 %v3950_v17, 0.0  ;;  %v3965_v27 = vmax.f32 %v3949_v59, 0.0  ;;  %v3980_v53 = vmul.f32 %v8093_v38, %v3964_v4 }
 0xc63   :  { %v3968_v11 = vmax.f32 %v3952_v39, 0.0  ;;  %v3955_v33 = vadd.f32 %v8157_v60, %v8137_v6  ;;  %v3958_v55 = vadd.f32 %v8157_v60, %v8153_v3  ;;  %v3957_v35 = vadd.f32 %v8157_v60, %v8149_v16 }
 0xc64   :  { %v3979_v26 = vmul.f32 %v8093_v38, %v3963_v22  ;;  %v3982_v62 = vmul.f32 %v8093_v38, %v3966_v47  ;;  %v3981_v5 = vmul.f32 %v8093_v38, %v3965_v27 }
 0xc65   :  { %v3984_v42 = vmul.f32 %v8093_v38, %v3968_v11  ;;  %v3971_v63 = vmax.f32 %v3955_v33, 0.0  ;;  %v3974_v34 = vmax.f32 %v3958_v55, 0.0 }
 0xc66   :  { %3779 = vadd.xlane.f32.xlu1 %v3754_v28  ;;  %3777 = vadd.xlane.f32.xlu0 %v3753_v36  ;;  %v3967_v28 = vmax.f32 %v3951_v58, 0.0  ;;  %v3954_v36 = vadd.f32 %v8157_v60, %v8129_v25 }
 0xc67   :  { %v3987_v2 = vmul.f32 %v8093_v38, %v3971_v63  ;;  %v3990_v10 = vmul.f32 %v8093_v38, %v3974_v34 }
 0xc68   :  { %v3983_v52 = vmul.f32 %v8093_v38, %v3967_v28  ;;  %v3970_v44 = vmax.f32 %v3954_v36, 0.0 }
 0xc6a   :  { %3783 = vadd.xlane.f32.xlu1 %v3756_v54  ;;  %3781 = vadd.xlane.f32.xlu0 %v3755_v40  ;;  %v3969_v54 = vmax.f32 %v3953_v7, 0.0  ;;  %v9517_v40 = vld [vmem:[#allocation47_spill] sm:$0xff]  ;;  %v3986_v14 = vmul.f32 %v8093_v38, %v3970_v44  ;;  %v9518_v44 = vld [vmem:[#allocation36_spill] sm:$0xff] }
 0xc6b   :  { %v8207_v50 = vrot.slane %v8058_v9, %v9517_v40 }
 0xc6d   :  { %v4141_v18 = vadd.f32 %v8207_v50, %v8074_v1  ;;  %v4140_v60 = vadd.f32 %v8207_v50, %v8066_v31  ;;  %v4145_v48 = vadd.f32 %v8207_v50, %v8088_v8  ;;  %v4144_v20 = vadd.f32 %v8207_v50, %v8084_v41 }
 0xc6e   :  { %3787 = vadd.xlane.f32.xlu1 %v3758_v19  ;;  %3785 = vadd.xlane.f32.xlu0 %v3757_v51  ;;  %v3985_v19 = vmul.f32 %v8093_v38, %v3969_v54  ;;  %v3972_v51 = vmax.f32 %v3956_v0, 0.0  ;;  %v4147_v4 = vadd.f32 %v8207_v50, %v8105_v56  ;;  %v4146_v22 = vadd.f32 %v8207_v50, %v8101_v29 }
 0xc6f   :  { %v4157_v43 = vmax.f32 %v4141_v18, 0.0  ;;  %v4156_v37 = vmax.f32 %v4140_v60, 0.0  ;;  %v4149_v11 = vadd.f32 %v8207_v50, %v8117_v13  ;;  %v4148_v28 = vadd.f32 %v8207_v50, %v8113_v45 }
 0xc70   :  { %v4163_v39 = vmax.f32 %v4147_v4, 0.0  ;;  %v4162_v58 = vmax.f32 %v4146_v22, 0.0  ;;  %v4335_v54 = vsub.s32 3, %v9518_v44  ;;  %v4153_v40 = vadd.f32 %v8207_v50, %v8141_v30 }
 0xc71   :  { %v4173_v17 = vmul.f32 %v8093_v38, %v4157_v43  ;;  %v4172_v59 = vmul.f32 %v8093_v38, %v4156_v37  ;;  %v4165_v0 = vmax.f32 %v4149_v11, 0.0  ;;  %v4164_v33 = vmax.f32 %v4148_v28, 0.0 }
 0xc72   :  { %3791 = vadd.xlane.f32.xlu1 %v3760_v15  ;;  %3789 = vadd.xlane.f32.xlu0 %v3759_v57  ;;  %v3973_v15 = vmax.f32 %v3957_v35, 0.0  ;;  %v3988_v57 = vmul.f32 %v8093_v38, %v3972_v51  ;;  %v4179_v36 = vmul.f32 %v8093_v38, %v4163_v39  ;;  %v4178_v7 = vmul.f32 %v8093_v38, %v4162_v58 }
 0xc73   :  { %v4152_v55 = vadd.f32 %v8207_v50, %v8137_v6  ;;  %v4181_v35 = vmul.f32 %v8093_v38, %v4165_v0  ;;  %v8259_v63 = vrot.slane %v8058_v9, %v4335_v54  ;;  %v4155_v34 = vadd.f32 %v8207_v50, %v8153_v3 }
 0xc74   :  { %v3989_v49 = vmul.f32 %v8093_v38, %v3973_v15  ;;  %v4154_v15 = vadd.f32 %v8207_v50, %v8149_v16  ;;  %v4169_v18 = vmax.f32 %v4153_v40, 0.0 }
 0xc75   :  { %v4168_v60 = vmax.f32 %v4152_v55, 0.0  ;;  %v4341_v4 = vadd.f32 %v8259_v63, %v8084_v41  ;;  %v4343_v39 = vadd.f32 %v8259_v63, %v8101_v29 }
 0xc76   :  { %3993 = vadd.xlane.f32.xlu1 %v3976_v23  ;;  %3991 = vadd.xlane.f32.xlu0 %v3975_v24  ;;  %v4143_v23 = vadd.f32 %v8207_v50, %v8070_v46  ;;  %v4142_v24 = vadd.f32 %v8207_v50, %v8062_v12  ;;  %v4185_v43 = vmul.f32 %v8093_v38, %v4169_v18 }
 0xc77   :  { %v4184_v37 = vmul.f32 %v8093_v38, %v4168_v60  ;;  %v4357_v11 = vmax.f32 %v4341_v4, 0.0 }
 0xc79   :  { %v4373_v0 = vmul.f32 %v8093_v38, %v4357_v11 }
 0xc7a   :  { %3997 = vadd.xlane.f32.xlu1 %v3978_v32  ;;  %3995 = vadd.xlane.f32.xlu0 %v3977_v21  ;;  %v4159_v32 = vmax.f32 %v4143_v23, 0.0  ;;  %v4158_v21 = vmax.f32 %v4142_v24, 0.0  ;;  %v4338_v23 = vadd.f32 %v8259_v63, %v8074_v1 }
 0xc7c   :  { %v4175_v47 = vmul.f32 %v8093_v38, %v4159_v32  ;;  %v4174_v27 = vmul.f32 %v8093_v38, %v4158_v21  ;;  %v4339_v32 = vadd.f32 %v8259_v63, %v8062_v12  ;;  %v4342_v21 = vadd.f32 %v8259_v63, %v8088_v8 }
 0xc7e   :  { %4001 = vadd.xlane.f32.xlu1 %v3980_v53  ;;  %3999 = vadd.xlane.f32.xlu0 %v3979_v26  ;;  %v4161_v53 = vmax.f32 %v4145_v48, 0.0  ;;  %v4160_v26 = vmax.f32 %v4144_v20, 0.0  ;;  %v4354_v20 = vmax.f32 %v4338_v23, 0.0 }
 0xc80   :  { %v4370_v22 = vmul.f32 %v8093_v38, %v4354_v20 }
 0xc82   :  { %4005 = vadd.xlane.f32.xlu1 %v3982_v62  ;;  %4003 = vadd.xlane.f32.xlu0 %v3981_v5  ;;  %v4177_v62 = vmul.f32 %v8093_v38, %v4161_v53  ;;  %v4176_v5 = vmul.f32 %v8093_v38, %v4160_v26  ;;  %v4355_v53 = vmax.f32 %v4339_v32, 0.0  ;;  %v4344_v26 = vadd.f32 %v8259_v63, %v8105_v56 }
 0xc84   :  { %v4360_v28 = vmax.f32 %v4344_v26, 0.0 }
 0xc86   :  { %4009 = vadd.xlane.f32.xlu1 %v3984_v42  ;;  %4007 = vadd.xlane.f32.xlu0 %v3983_v52  ;;  %v4151_v42 = vadd.f32 %v8207_v50, %v8129_v25  ;;  %v4150_v52 = vadd.f32 %v8207_v50, %v8125_v61  ;;  %v4337_v50 = vadd.f32 %v8259_v63, %v8066_v31 }
 0xc88   :  { %v4166_v51 = vmax.f32 %v4150_v52, 0.0  ;;  %v4376_v52 = vmul.f32 %v8093_v38, %v4360_v28 }
 0xc8a   :  { %4013 = vadd.xlane.f32.xlu1 %v3986_v14  ;;  %4011 = vadd.xlane.f32.xlu0 %v3985_v19  ;;  %v4180_v14 = vmul.f32 %v8093_v38, %v4164_v33  ;;  %v4167_v19 = vmax.f32 %v4151_v42, 0.0  ;;  %v4346_v33 = vadd.f32 %v8259_v63, %v8117_v13  ;;  %v4345_v42 = vadd.f32 %v8259_v63, %v8113_v45 }
 0xc8c   :  { %v4362_v40 = vmax.f32 %v4346_v33, 0.0  ;;  %v4361_v55 = vmax.f32 %v4345_v42, 0.0  ;;  %v4729_v42 = vsub.s32 5, %v9518_v44 }
 0xc8e   :  { %4017 = vadd.xlane.f32.xlu1 %v3988_v57  ;;  %4015 = vadd.xlane.f32.xlu0 %v3987_v2  ;;  %v4183_v57 = vmul.f32 %v8093_v38, %v4167_v19  ;;  %v4182_v2 = vmul.f32 %v8093_v38, %v4166_v51  ;;  %v4532_v19 = vsub.s32 4, %v9518_v44  ;;  %v4350_v51 = vadd.f32 %v8259_v63, %v8141_v30 }
 0xc90   :  { %v8311_v60 = vrot.slane %v8058_v9, %v4532_v19  ;;  %v4366_v23 = vmax.f32 %v4350_v51, 0.0 }
 0xc92   :  { %4021 = vadd.xlane.f32.xlu1 %v3990_v10  ;;  %4019 = vadd.xlane.f32.xlu0 %v3989_v49  ;;  %v4171_v10 = vmax.f32 %v4155_v34, 0.0  ;;  %v4170_v49 = vmax.f32 %v4154_v15, 0.0  ;;  %v4349_v34 = vadd.f32 %v8259_v63, %v8137_v6  ;;  %v4378_v15 = vmul.f32 %v8093_v38, %v4362_v40 }
 0xc93   :  { %v4382_v20 = vmul.f32 %v8093_v38, %v4366_v23  ;;  %v4538_v26 = vadd.f32 %v8311_v60, %v8084_v41  ;;  %v4541_v28 = vadd.f32 %v8311_v60, %v8105_v56  ;;  %v4540_v33 = vadd.f32 %v8311_v60, %v8101_v29 }
 0xc94   :  { %v4187_v24 = vmul.f32 %v8093_v38, %v4171_v10  ;;  %v4186_v48 = vmul.f32 %v8093_v38, %v4170_v49  ;;  %v4352_v10 = vadd.f32 %v8259_v63, %v8153_v3  ;;  %v4351_v49 = vadd.f32 %v8259_v63, %v8149_v16 }
 0xc95   :  { %v4926_v40 = vsub.s32 6, %v9518_v44  ;;  %v4556_v51 = vmax.f32 %v4540_v33, 0.0  ;;  %v8372_v23 = vstv %s9027_s17 }
 0xc96   :  { %4190 = vadd.xlane.f32.xlu1 %v4173_v17  ;;  %4188 = vadd.xlane.f32.xlu0 %v4172_v59  ;;  %v4353_v17 = vmax.f32 %v4337_v50, 0.0  ;;  %v4340_v59 = vadd.f32 %v8259_v63, %v8070_v46  ;;  %v4365_v50 = vmax.f32 %v4349_v34, 0.0  ;;  %v4543_v34 = vadd.f32 %v8311_v60, %v8117_v13 }
 0xc9a   :  { %4194 = vadd.xlane.f32.xlu1 %v4175_v47  ;;  %4192 = vadd.xlane.f32.xlu0 %v4174_v27  ;;  %v4369_v47 = vmul.f32 %v8093_v38, %v4353_v17  ;;  %v4356_v27 = vmax.f32 %v4340_v59, 0.0  ;;  %v4381_v17 = vmul.f32 %v8093_v38, %v4365_v50  ;;  %v4535_v59 = vadd.f32 %v8311_v60, %v8074_v1 }
 0xc9c   :  { %v4372_v58 = vmul.f32 %v8093_v38, %v4356_v27  ;;  %v4551_v4 = vmax.f32 %v4535_v59, 0.0  ;;  %v4536_v27 = vadd.f32 %v8311_v60, %v8062_v12 }
 0xc9e   :  { %4198 = vadd.xlane.f32.xlu1 %v4177_v62  ;;  %4196 = vadd.xlane.f32.xlu0 %v4176_v5  ;;  %v4371_v62 = vmul.f32 %v8093_v38, %v4355_v53  ;;  %v4358_v5 = vmax.f32 %v4342_v21, 0.0  ;;  %v4539_v53 = vadd.f32 %v8311_v60, %v8088_v8 }
 0xca0   :  { %v4555_v11 = vmax.f32 %v4539_v53, 0.0 }
 0xca2   :  { %4202 = vadd.xlane.f32.xlu1 %v4179_v36  ;;  %4200 = vadd.xlane.f32.xlu0 %v4178_v7  ;;  %v4359_v36 = vmax.f32 %v4343_v39, 0.0  ;;  %v4374_v7 = vmul.f32 %v8093_v38, %v4358_v5  ;;  %v4567_v39 = vmul.f32 %v8093_v38, %v4551_v4  ;;  %v4552_v5 = vmax.f32 %v4536_v27, 0.0 }
 0xca4   :  { %v4375_v54 = vmul.f32 %v8093_v38, %v4359_v36 }
 0xca6   :  { %4206 = vadd.xlane.f32.xlu1 %v4181_v35  ;;  %4204 = vadd.xlane.f32.xlu0 %v4180_v14  ;;  %v4348_v35 = vadd.f32 %v8259_v63, %v8129_v25  ;;  %v4347_v14 = vadd.f32 %v8259_v63, %v8125_v61  ;;  %v4534_v63 = vadd.f32 %v8311_v60, %v8066_v31 }
 0xca8   :  { %v4363_v18 = vmax.f32 %v4347_v14, 0.0  ;;  %v4557_v14 = vmax.f32 %v4541_v28, 0.0 }
 0xcaa   :  { %4210 = vadd.xlane.f32.xlu1 %v4183_v57  ;;  %4208 = vadd.xlane.f32.xlu0 %v4182_v2  ;;  %v4377_v57 = vmul.f32 %v8093_v38, %v4361_v55  ;;  %v4364_v2 = vmax.f32 %v4348_v35, 0.0  ;;  %v5123_v55 = vsub.s32 7, %v9518_v44  ;;  %v4571_v35 = vmul.f32 %v8093_v38, %v4555_v11 }
 0xcae   :  { %4214 = vadd.xlane.f32.xlu1 %v4185_v43  ;;  %4212 = vadd.xlane.f32.xlu0 %v4184_v37  ;;  %v4380_v43 = vmul.f32 %v8093_v38, %v4364_v2  ;;  %v4379_v37 = vmul.f32 %v8093_v38, %v4363_v18 }
 0xcb2   :  { %4218 = vadd.xlane.f32.xlu1 %v4187_v24  ;;  %4216 = vadd.xlane.f32.xlu0 %v4186_v48  ;;  %v4368_v24 = vmax.f32 %v4352_v10, 0.0  ;;  %v4367_v48 = vmax.f32 %v4351_v49, 0.0  ;;  %v8361_v10 = vrot.slane %v8058_v9, %v4926_v40  ;;  %v8364_v49 = vrot.slane %v8058_v9, %v5123_v55 }
 0xcb4   :  { %v4384_v32 = vmul.f32 %v8093_v38, %v4368_v24  ;;  %v4383_v21 = vmul.f32 %v8093_v38, %v4367_v48  ;;  %v4544_v24 = vadd.f32 %v8311_v60, %v8125_v61  ;;  %v4559_v48 = vmax.f32 %v4543_v34, 0.0 }
 0xcb6   :  { %4387 = vadd.xlane.f32.xlu1 %v4370_v22  ;;  %4385 = vadd.xlane.f32.xlu0 %v4369_v47  ;;  %v4550_v22 = vmax.f32 %v4534_v63, 0.0  ;;  %v4537_v47 = vadd.f32 %v8311_v60, %v8070_v46 }
 0xcba   :  { %4391 = vadd.xlane.f32.xlu1 %v4372_v58  ;;  %4389 = vadd.xlane.f32.xlu0 %v4371_v62  ;;  %v4566_v58 = vmul.f32 %v8093_v38, %v4550_v22  ;;  %v4553_v62 = vmax.f32 %v4537_v47, 0.0  ;;  %v4546_v22 = vadd.f32 %v8311_v60, %v8137_v6 }
 0xcbc   :  { %v4569_v36 = vmul.f32 %v8093_v38, %v4553_v62 }
 0xcbe   :  { %4395 = vadd.xlane.f32.xlu1 %v4374_v7  ;;  %4393 = vadd.xlane.f32.xlu0 %v4373_v0  ;;  %v4568_v7 = vmul.f32 %v8093_v38, %v4552_v5  ;;  %v4554_v0 = vmax.f32 %v4538_v26, 0.0  ;;  %v4560_v26 = vmax.f32 %v4544_v24, 0.0 }
 0xcc0   :  { %v4570_v19 = vmul.f32 %v8093_v38, %v4554_v0 }
 0xcc2   :  { %4399 = vadd.xlane.f32.xlu1 %v4376_v52  ;;  %4397 = vadd.xlane.f32.xlu0 %v4375_v54  ;;  %v9519_v52 = vlaneseq }
 0xcc4   :  { %v8345_v54 = vand.u32 127, %v9519_v52  ;;  %v4548_v52 = vadd.f32 %v8311_v60, %v8149_v16 }
 0xcc6   :  { %4403 = vadd.xlane.f32.xlu1 %v4378_v15  ;;  %4401 = vadd.xlane.f32.xlu0 %v4377_v57  ;;  %v4542_v15 = vadd.f32 %v8311_v60, %v8113_v45  ;;  %v8356_v57 = vrot.slane %v8058_v9, %v4729_v42  ;;  %v3839_v2 = vadd.s32 4294967280, %v8345_v54  ;;  %v3846_v18 = vadd.s32 4294967272, %v8345_v54 }
 0xcc7   :  { %v3832_v50 = vadd.s32 4294967288, %v8345_v54  ;;  %v4572_v9 = vmul.f32 %v8093_v38, %v4556_v51  ;;  %v8384_v63 = vsub.s32 %v8345_v54, %v9518_v44  ;;  %v3874_v11 = vadd.s32 4294967240, %v8345_v54 }
 0xcc8   :  { %v8380_v59 = vsub.s32 %v3839_v2, %v9518_v44  ;;  %v4562_v42 = vmax.f32 %v4546_v22, 0.0  ;;  %v3888_v51 = vadd.s32 4294967224, %v8345_v54  ;;  %v4732_v22 = vadd.f32 %v8356_v57, %v8074_v1 }
 0xcc9   :  { %v8394_v53 = vsub.s32 %v3832_v50, %v9518_v44  ;;  %v8419_v2 = vsub.s32 %v3874_v11, %v9518_v44 }
 0xcca   :  { %4407 = vadd.xlane.f32.xlu1 %v4380_v43  ;;  %4405 = vadd.xlane.f32.xlu0 %v4379_v37  ;;  %v4545_v43 = vadd.f32 %v8311_v60, %v8129_v25  ;;  %v4573_v37 = vmul.f32 %v8093_v38, %v4557_v14  ;;  %v4576_v14 = vmul.f32 %v8093_v38, %v4560_v26 }
 0xccc   :  { %v4561_v4 = vmax.f32 %v4545_v43, 0.0 }
 0xcce   :  { %4411 = vadd.xlane.f32.xlu1 %v4382_v20  ;;  %4409 = vadd.xlane.f32.xlu0 %v4381_v17  ;;  %v4558_v20 = vmax.f32 %v4542_v15, 0.0  ;;  %v3860_v17 = vadd.s32 4294967256, %v8345_v54  ;;  %v4577_v33 = vmul.f32 %v8093_v38, %v4561_v4  ;;  %v8431_v4 = vsub.s32 %v3888_v51, %v9518_v44 }
 0xcd0   :  { %v4574_v62 = vmul.f32 %v8093_v38, %v4558_v20  ;;  %v8400_v5 = vsub.s32 %v3860_v17, %v9518_v44 }
 0xcd2   :  { %4415 = vadd.xlane.f32.xlu1 %v4384_v32  ;;  %4413 = vadd.xlane.f32.xlu0 %v4383_v21  ;;  %v8387_v32 = vsub.s32 %v3846_v18, %v9518_v44  ;;  %v4547_v21 = vadd.f32 %v8311_v60, %v8141_v30 }
 0xcd4   :  { %v4563_v28 = vmax.f32 %v4547_v21, 0.0 }
 0xcd6   :  { %4584 = vadd.xlane.f32.xlu1 %v4567_v39  ;;  %4582 = vadd.xlane.f32.xlu0 %v4566_v58  ;;  %v3853_v39 = vadd.s32 4294967264, %v8345_v54  ;;  %v4575_v58 = vmul.f32 %v8093_v38, %v4559_v48  ;;  %v4564_v48 = vmax.f32 %v4548_v52, 0.0 }
 0xcda   :  { %4588 = vadd.xlane.f32.xlu1 %v4569_v36  ;;  %4586 = vadd.xlane.f32.xlu0 %v4568_v7  ;;  %v3867_v36 = vadd.s32 4294967248, %v8345_v54  ;;  %v4549_v7 = vadd.f32 %v8311_v60, %v8153_v3  ;;  %v4579_v60 = vmul.f32 %v8093_v38, %v4563_v28 }
 0xcdc   :  { %v8423_v18 = vsub.s32 %v3867_v36, %v9518_v44  ;;  %v4565_v43 = vmax.f32 %v4549_v7, 0.0  ;;  %v3902_v36 = vadd.s32 4294967208, %v8345_v54 }
 0xcde   :  { %4592 = vadd.xlane.f32.xlu1 %v4571_v35  ;;  %4590 = vadd.xlane.f32.xlu0 %v4570_v19  ;;  %v8413_v19 = vsub.s32 %v3853_v39, %v9518_v44  ;;  %v4581_v11 = vmul.f32 %v8093_v38, %v4565_v43  ;;  %v8459_v43 = vsub.s32 %v3902_v36, %v9518_v44 }
 0xce2   :  { %4596 = vadd.xlane.f32.xlu1 %v4573_v37  ;;  %4594 = vadd.xlane.f32.xlu0 %v4572_v9  ;;  %v3881_v37 = vadd.s32 4294967232, %v8345_v54  ;;  %v4578_v9 = vmul.f32 %v8093_v38, %v4562_v42 }
 0xce3   :  { %v3766_v47 = vpop.xlane.xlu1 %3765  ;;  %v3762_v27 = vpop.xlane.xlu0 %3761 }
 0xce4   :  { %v3794_v0 = vadd.f32 %v8372_v23, %v3762_v27  ;;  %v3796_v40 = vadd.f32 %v8372_v23, %v3766_v47  ;;  %v4731_v47 = vadd.f32 %v8356_v57, %v8066_v31  ;;  %v8444_v28 = vsub.s32 %v3881_v37, %v9518_v44 }
 0xce5   :  { %v3895_v37 = vadd.s32 4294967216, %v8345_v54 }
 0xce6   :  { %4600 = vadd.xlane.f32.xlu1 %v4575_v58  ;;  %4598 = vadd.xlane.f32.xlu0 %v4574_v62  ;;  %v3831_v50 = vrot.slane %v3794_v0, %v8384_v63  ;;  %v3843_v20 = vrot.slane %v3796_v40, %v8380_v59 }
 0xce7   :  { %v3768_v55 = vpop.xlane.xlu1 %3767  ;;  %v3764_v35 = vpop.xlane.xlu0 %3763 }
 0xce8   :  { %v3797_v34 = vadd.f32 %v8372_v23, %v3768_v55  ;;  %v3795_v15 = vadd.f32 %v8372_v23, %v3764_v35  ;;  %v4580_v55 = vmul.f32 %v8093_v38, %v4564_v48  ;;  %v4748_v35 = vmax.f32 %v4732_v22, 0.0 }
 0xce9   :  { %v3916_v48 = vadd.s32 4294967192, %v8345_v54 }
 0xcea   :  { %v3836_v24 = vrot.slane %v3795_v15, %v8394_v53  ;;  %4604 = vadd.xlane.f32.xlu1 %v4577_v33  ;;  %4602 = vadd.xlane.f32.xlu0 %v4576_v14  ;;  %v3850_v27 = vrot.slane %v3797_v34, %v8387_v32  ;;  %v4929_v33 = vadd.f32 %v8361_v10, %v8074_v1 }
 0xceb   :  { %v3772_v17 = vpop.xlane.xlu1 %3771  ;;  %v3770_v21 = vpop.xlane.xlu0 %3769  ;;  %v4928_v14 = vadd.f32 %v8361_v10, %v8066_v31 }
 0xcec   :  { %v3838_v26 = vsel %vm3837_vm2, %v3836_v24, %v3831_v50  ;;  %v3799_v39 = vadd.f32 %v8372_v23, %v3772_v17  ;;  %v3798_v58 = vadd.f32 %v8372_v23, %v3770_v21  ;;  %v5126_v50 = vadd.f32 %v8364_v49, %v8074_v1 }
 0xced   :  { %v3845_v62 = vsel %vm3844_vm3, %v3843_v20, %v3838_v26  ;;  %v5125_v20 = vadd.f32 %v8364_v49, %v8066_v31  ;;  %v4944_v26 = vmax.f32 %v4928_v14, 0.0  ;;  %v3909_v31 = vadd.s32 4294967200, %v8345_v54 }
 0xcee   :  { %v3852_v7 = vsel %vm3851_vm4, %v3850_v27, %v3845_v62  ;;  %v3857_v0 = vrot.slane %v3798_v58, %v8413_v19  ;;  %4608 = vadd.xlane.f32.xlu1 %v4579_v60  ;;  %4606 = vadd.xlane.f32.xlu0 %v4578_v9  ;;  %v3864_v42 = vrot.slane %v3799_v39, %v8400_v5  ;;  %v4747_v60 = vmax.f32 %v4731_v47, 0.0 }
 0xcef   :  { %v3776_v52 = vpop.xlane.xlu1 %3775  ;;  %v3774_v40 = vpop.xlane.xlu0 %3773  ;;  %v4945_v9 = vmax.f32 %v4929_v33, 0.0  ;;  %v4764_v27 = vmul.f32 %v8093_v38, %v4748_v35  ;;  %v5142_v36 = vmax.f32 %v5126_v50, 0.0  ;;  %v8482_v33 = vsub.s32 %v3916_v48, %v9518_v44 }
 0xcf0   :  { %v3859_v51 = vsel %vm3858_vm5, %v3857_v0, %v3852_v7  ;;  %v3801_v34 = vadd.f32 %v8372_v23, %v3776_v52  ;;  %v3800_v15 = vadd.f32 %v8372_v23, %v3774_v40  ;;  %v4763_v62 = vmul.f32 %v8093_v38, %v4747_v60 }
 0xcf1   :  { %v3866_v21 = vsel %vm3865_vm6, %v3864_v42, %v3859_v51  ;;  %v4961_v0 = vmul.f32 %v8093_v38, %v4945_v9  ;;  %v5141_v42 = vmax.f32 %v5125_v20, 0.0  ;;  %v4960_v14 = vmul.f32 %v8093_v38, %v4944_v26 }
 0xcf2   :  { %v3871_v24 = vrot.slane %v3800_v15, %v8423_v18  ;;  %4612 = vadd.xlane.f32.xlu1 %v4581_v11  ;;  %4610 = vadd.xlane.f32.xlu0 %v4580_v55  ;;  %v3878_v17 = vrot.slane %v3801_v34, %v8419_v2  ;;  %v8476_v11 = vsub.s32 %v3895_v37, %v9518_v44  ;;  %v3930_v9 = vadd.s32 4294967176, %v8345_v54 }
 0xcf3   :  { %v3780_v22 = vpop.xlane.xlu1 %3779  ;;  %v3778_v47 = vpop.xlane.xlu0 %3777  ;;  %v4930_v51 = vadd.f32 %v8361_v10, %v8062_v12  ;;  %v4733_v37 = vadd.f32 %v8356_v57, %v8062_v12  ;;  %v8495_v50 = vsub.s32 %v3909_v31, %v9518_v44  ;;  %v3923_v48 = vadd.s32 4294967184, %v8345_v54 }
 0xcf4   :  { %v3873_v1 = vsel %vm3872_vm7, %v3871_v24, %v3866_v21  ;;  %v3803_v39 = vadd.f32 %v8372_v23, %v3780_v22  ;;  %v3802_v58 = vadd.f32 %v8372_v23, %v3778_v47  ;;  %v5158_v24 = vmul.f32 %v8093_v38, %v5142_v36 }
 0xcf5   :  { %v3880_v40 = vsel %vm3879_vm8, %v3878_v17, %v3873_v1  ;;  %v5157_v17 = vmul.f32 %v8093_v38, %v5141_v42  ;;  %v4734_v21 = vadd.f32 %v8356_v57, %v8070_v46  ;;  %v4946_v1 = vmax.f32 %v4930_v51, 0.0 }
 0xcf6   :  { %v3885_v7 = vrot.slane %v3802_v58, %v8444_v28  ;;  %4781 = vadd.xlane.f32.xlu1 %v4764_v27  ;;  %4779 = vadd.xlane.f32.xlu0 %v4763_v62  ;;  %v3892_v52 = vrot.slane %v3803_v39, %v8431_v4  ;;  %v5127_v54 = vadd.f32 %v8364_v49, %v8062_v12  ;;  %v4749_v31 = vmax.f32 %v4733_v37, 0.0 }
 0xcf7   :  { %v3784_v55 = vpop.xlane.xlu1 %3783  ;;  %v3782_v35 = vpop.xlane.xlu0 %3781  ;;  %v8512_v36 = vsub.s32 %v3930_v9, %v9518_v44  ;;  %v4750_v12 = vmax.f32 %v4734_v21, 0.0  ;;  %v5128_v42 = vadd.f32 %v8364_v49, %v8070_v46 }
 0xcf8   :  { %v3887_v34 = vsel %vm3886_vm9, %v3885_v7, %v3880_v40  ;;  %v3805_v15 = vadd.f32 %v8372_v23, %v3784_v55  ;;  %v3804_v60 = vadd.f32 %v8372_v23, %v3782_v35  ;;  %v8515_v7 = vsub.s32 %v3923_v48, %v9518_v44 }
 0xcf9   :  { %v3894_v47 = vsel %vm3893_vm10, %v3892_v52, %v3887_v34  ;;  %v4931_v52 = vadd.f32 %v8361_v10, %v8070_v46  ;;  %v4962_v44 = vmul.f32 %v8093_v38, %v4946_v1  ;;  %v5143_v51 = vmax.f32 %v5127_v54, 0.0 }
 0xcfa   :  { %v3899_v20 = vrot.slane %v3804_v60, %v8476_v11  ;;  %4978 = vadd.xlane.f32.xlu1 %v4961_v0  ;;  %4976 = vadd.xlane.f32.xlu0 %v4960_v14  ;;  %v3906_v22 = vrot.slane %v3805_v15, %v8459_v43  ;;  %v4765_v37 = vmul.f32 %v8093_v38, %v4749_v31 }
 0xcfb   :  { %v3788_v27 = vpop.xlane.xlu1 %3787  ;;  %v3786_v26 = vpop.xlane.xlu0 %3785  ;;  %v4932_v46 = vadd.f32 %v8361_v10, %v8084_v41  ;;  %v4735_v48 = vadd.f32 %v8356_v57, %v8084_v41 }
 0xcfc   :  { %v3901_v39 = vsel %vm3900_vm11, %v3899_v20, %v3894_v47  ;;  %v3807_v58 = vadd.f32 %v8372_v23, %v3788_v27  ;;  %v3806_v62 = vadd.f32 %v8372_v23, %v3786_v26  ;;  %v5144_v47 = vmax.f32 %v5128_v42, 0.0 }
 0xcfd   :  { %v3908_v55 = vsel %vm3907_vm12, %v3906_v22, %v3901_v39  ;;  %v4766_v22 = vmul.f32 %v8093_v38, %v4750_v12  ;;  %v4947_v27 = vmax.f32 %v4931_v52, 0.0  ;;  %v5159_v39 = vmul.f32 %v8093_v38, %v5143_v51 }
 0xcfe   :  { %v3913_v0 = vrot.slane %v3806_v62, %v8495_v50  ;;  %5175 = vadd.xlane.f32.xlu1 %v5158_v24  ;;  %5173 = vadd.xlane.f32.xlu0 %v5157_v17  ;;  %v3920_v40 = vrot.slane %v3807_v58, %v8482_v33  ;;  %v4948_v62 = vmax.f32 %v4932_v46, 0.0  ;;  %v4751_v31 = vmax.f32 %v4735_v48, 0.0 }
 0xcff   :  { %v3792_v35 = vpop.xlane.xlu1 %3791  ;;  %v3790_v14 = vpop.xlane.xlu0 %3789  ;;  %v5129_v51 = vadd.f32 %v8364_v49, %v8084_v41  ;;  %v5130_v46 = vadd.f32 %v8364_v49, %v8088_v8 }
 0xd00   :  { %v3915_v34 = vsel %vm3914_vm13, %v3913_v0, %v3908_v55  ;;  %v3809_v15 = vadd.f32 %v8372_v23, %v3792_v35  ;;  %v3808_v60 = vadd.f32 %v8372_v23, %v3790_v14  ;;  %v4736_v55 = vadd.f32 %v8356_v57, %v8088_v8 }
 0xd01   :  { %v3922_v20 = vsel %vm3921_vm14, %v3920_v40, %v3915_v34  ;;  %v5160_v40 = vmul.f32 %v8093_v38, %v5144_v47  ;;  %v8555_v34 = vld [vmem:[%s9026_s16] ss:$0 sm:$0xff]  ;;  %v5145_v47 = vmax.f32 %v5129_v51, 0.0  ;;  %s6544_s16 = smov [#allocation14]  }
 0xd02   :  { %v3934_v24 = vrot.slane %v3809_v15, %v8512_v36  ;;  %v3927_v9 = vrot.slane %v3808_v60, %v8515_v7  ;;  %4980 = vadd.xlane.f32.xlu1 %v4962_v44  ;;  %4783 = vadd.xlane.f32.xlu0 %v4765_v37  ;;  %v4963_v44 = vmul.f32 %v8093_v38, %v4947_v27  ;;  %v4752_v48 = vmax.f32 %v4736_v55, 0.0  ;;  %s5324_s20 = sshll.u32 %s6544_s16, 4  ;;  %s5325_s20 = int_to_ptr.vmem [resolvable:$true] %s5324_s20 }
 0xd03   :  { %v3994_v17 = vpop.xlane.xlu1 %3993  ;;  %v3992_v21 = vpop.xlane.xlu0 %3991  ;;  %v4964_v15 = vmul.f32 %v8555_v34, %v4948_v62  ;;  %v4767_v37 = vmul.f32 %v8555_v34, %v4751_v31  ;;  %v4738_v55 = vadd.f32 %v8356_v57, %v8105_v56  ;;  %s6500_s6 = scalar_lea.vmem %s5325_s20, 128  ;;  %p6505_p13 = scmp.lt.s32.totalorder %s5325_s20, %s5325_s20 }
 0xd04   :  { %v3929_v26 = vsel %vm3928_vm15, %v3927_v9, %v3922_v20  ;;  %v4024_v1 = vadd.f32 %v3994_v17, %v8372_v23  ;;  %v4023_v54 = vadd.f32 %v3992_v21, %v8372_v23  ;;  %v4933_v20 = vadd.f32 %v8361_v10, %v8088_v8  ;;  %p6501_p12 = scmp.ne.s32.totalorder %s5325_s20, %s6500_s6  ;;  %p6506_p0 = scmp.lt.s32.totalorder %s6500_s6, %s6500_s6 }
 0xd05   :  { %v3936_v58 = vsel %vm3935_vm0, %v3934_v24, %v3929_v26  ;;  %v5146_v26 = vmax.f32 %v5130_v46, 0.0  ;;  %v4768_v31 = vmul.f32 %v8555_v34, %v4752_v48 }
 0xd06   :  { %3938 = vst [vmem:[#allocation14] sm:$0x1] %v3936_v58  ;;  %4785 = vadd.xlane.f32.xlu1 %v4766_v22  ;;  %5177 = vadd.xlane.f32.xlu0 %v5159_v39  ;;  %v4062_v0 = vrot.slane %v4024_v1, %v8394_v53  ;;  %v4058_v12 = vrot.slane %v4023_v54, %v8384_v63  ;;  %p6507_p1 = por %p6506_p0, %p6505_p13 }
 0xd07   :  { %v3998_v42 = vpop.xlane.xlu1 %3997  ;;  %v3996_v52 = vpop.xlane.xlu0 %3995  ;;  %v4934_v1 = vadd.f32 %v8361_v10, %v8101_v29  ;;  %v4737_v54 = vadd.f32 %v8356_v57, %v8101_v29  ;;  %v5162_v46 = vmul.f32 %v8555_v34, %v5146_v26 }
 0xd08   :  { %v4026_v35 = vadd.f32 %v3998_v42, %v8372_v23  ;;  %v4025_v14 = vadd.f32 %v3996_v52, %v8372_v23  ;;  %v4063_v38 = vsel %vm3837_vm2, %v4062_v0, %v4058_v12  ;;  %v4949_v0 = vmax.f32 %v4933_v20, 0.0  ;;  %p6508_p2 = pnand %p6507_p1, %p6501_p12 }
 0xd09   :  { %v4754_v20 = vmax.f32 %v4738_v55, 0.0 }
 0xd0a   :  { %v4067_v60 = vrot.slane %v4025_v14, %v8380_v59  ;;  %5179 = vadd.xlane.f32.xlu1 %v5160_v40  ;;  %4982 = vadd.xlane.f32.xlu0 %v4963_v44  ;;  %v4072_v41 = vrot.slane %v4026_v35, %v8387_v32  ;;  %v5161_v40 = vmul.f32 %v8555_v34, %v5145_v47  ;;  %v4950_v14 = vmax.f32 %v4934_v1, 0.0 }
 0xd0b   :  { %v4002_v24 = vpop.xlane.xlu1 %4001  ;;  %v4000_v9 = vpop.xlane.xlu0 %3999  ;;  %v5131_v44 = vadd.f32 %v8364_v49, %v8101_v29  ;;  %v4965_v48 = vmul.f32 %v8555_v34, %v4949_v0 }
 0xd0c   :  { %v4068_v17 = vsel %vm3844_vm3, %v4067_v60, %v4063_v38  ;;  %v4028_v21 = vadd.f32 %v4002_v24, %v8372_v23  ;;  %v4027_v22 = vadd.f32 %v4000_v9, %v8372_v23  ;;  %v4753_v38 = vmax.f32 %v4737_v54, 0.0 }
 0xd0d   :  { %v4073_v39 = vsel %vm3851_vm4, %v4072_v41, %v4068_v17  ;;  %v4966_v17 = vmul.f32 %v8555_v34, %v4950_v14  ;;  %v5132_v54 = vadd.f32 %v8364_v49, %v8105_v56 }
 0xd0e   :  { %v4077_v27 = vrot.slane %v4027_v22, %v8413_v19  ;;  %4984 = vadd.xlane.f32.xlu1 %v4964_v15  ;;  %4787 = vadd.xlane.f32.xlu0 %v4767_v37  ;;  %v4082_v8 = vrot.slane %v4028_v21, %v8400_v5  ;;  %v5147_v21 = vmax.f32 %v5131_v44, 0.0  ;;  %v4769_v1 = vmul.f32 %v8555_v34, %v4753_v38 }
 0xd0f   :  { %v4006_v58 = vpop.xlane.xlu1 %4005  ;;  %v4004_v62 = vpop.xlane.xlu0 %4003  ;;  %v5148_v14 = vmax.f32 %v5132_v54, 0.0  ;;  %v4740_v38 = vadd.f32 %v8356_v57, %v8117_v13  ;;  %v4937_v54 = vadd.f32 %v8361_v10, %v8117_v13 }
 0xd10   :  { %v4078_v12 = vsel %vm3858_vm5, %v4077_v27, %v4073_v39  ;;  %v4030_v42 = vadd.f32 %v4006_v58, %v8372_v23  ;;  %v4029_v52 = vadd.f32 %v4004_v62, %v8372_v23  ;;  %v4935_v62 = vadd.f32 %v8361_v10, %v8105_v56 }
 0xd11   :  { %v4083_v15 = vsel %vm3865_vm6, %v4082_v8, %v4078_v12  ;;  %v5163_v12 = vmul.f32 %v8555_v34, %v5147_v21  ;;  %v4739_v56 = vadd.f32 %v8356_v57, %v8113_v45 }
 0xd12   :  { %v4087_v35 = vrot.slane %v4029_v52, %v8423_v18  ;;  %4789 = vadd.xlane.f32.xlu1 %v4768_v31  ;;  %5181 = vadd.xlane.f32.xlu0 %v5161_v40  ;;  %v4092_v51 = vrot.slane %v4030_v42, %v8419_v2  ;;  %v4770_v31 = vmul.f32 %v8555_v34, %v4754_v20 }
 0xd13   :  { %v4010_v60 = vpop.xlane.xlu1 %4009  ;;  %v4008_v37 = vpop.xlane.xlu0 %4007  ;;  %v4936_v42 = vadd.f32 %v8361_v10, %v8113_v45 }
 0xd14   :  { %v4088_v41 = vsel %vm3872_vm7, %v4087_v35, %v4083_v15  ;;  %v4032_v24 = vadd.f32 %v4010_v60, %v8372_v23  ;;  %v4031_v9 = vadd.f32 %v4008_v37, %v8372_v23  ;;  %v4951_v60 = vmax.f32 %v4935_v62, 0.0 }
 0xd15   :  { %v4093_v47 = vsel %vm3879_vm8, %v4092_v51, %v4088_v41  ;;  %v5133_v41 = vadd.f32 %v8364_v49, %v8113_v45  ;;  %v5134_v45 = vadd.f32 %v8364_v49, %v8117_v13  ;;  %v4953_v13 = vmax.f32 %v4937_v54, 0.0 }
 0xd16   :  { %v4097_v29 = vrot.slane %v4031_v9, %v8444_v28  ;;  %5183 = vadd.xlane.f32.xlu1 %v5162_v46  ;;  %4986 = vadd.xlane.f32.xlu0 %v4965_v48  ;;  %v4102_v22 = vrot.slane %v4032_v24, %v8431_v4  ;;  %v4952_v46 = vmax.f32 %v4936_v42, 0.0 }
 0xd17   :  { %v4014_v27 = vpop.xlane.xlu1 %4013  ;;  %v4012_v26 = vpop.xlane.xlu0 %4011 }
 0xd18   :  { %v4098_v8 = vsel %vm3886_vm9, %v4097_v29, %v4093_v47  ;;  %v4034_v39 = vadd.f32 %v4014_v27, %v8372_v23  ;;  %v4033_v58 = vadd.f32 %v4012_v26, %v8372_v23  ;;  %v5164_v29 = vmul.f32 %v8555_v34, %v5148_v14 }
 0xd19   :  { %v4103_v40 = vsel %vm3893_vm10, %v4102_v22, %v4098_v8  ;;  %v4967_v27 = vmul.f32 %v8555_v34, %v4951_v60  ;;  %v4968_v62 = vmul.f32 %v8555_v34, %v4952_v46  ;;  %v4938_v60 = vadd.f32 %v8361_v10, %v8125_v61 }
 0xd1a   :  { %v4107_v0 = vrot.slane %v4033_v58, %v8476_v11  ;;  %4988 = vadd.xlane.f32.xlu1 %v4966_v17  ;;  %4791 = vadd.xlane.f32.xlu0 %v4769_v1  ;;  %v4112_v52 = vrot.slane %v4034_v39, %v8459_v43  ;;  %v4755_v17 = vmax.f32 %v4739_v56, 0.0 }
 0xd1b   :  { %v4018_v55 = vpop.xlane.xlu1 %4017  ;;  %v4016_v35 = vpop.xlane.xlu0 %4015 }
 0xd1c   :  { %v4108_v44 = vsel %vm3900_vm11, %v4107_v0, %v4103_v40  ;;  %v4036_v51 = vadd.f32 %v4018_v55, %v8372_v23  ;;  %v4035_v15 = vadd.f32 %v4016_v35, %v8372_v23  ;;  %v5149_v0 = vmax.f32 %v5133_v41, 0.0 }
 0xd1d   :  { %v4113_v9 = vsel %vm3907_vm12, %v4112_v52, %v4108_v44  ;;  %v4771_v40 = vmul.f32 %v8555_v34, %v4755_v17  ;;  %v5150_v35 = vmax.f32 %v5134_v45, 0.0  ;;  %v4741_v41 = vadd.f32 %v8356_v57, %v8125_v61 }
 0xd1e   :  { %v4117_v37 = vrot.slane %v4035_v15, %v8495_v50  ;;  %4793 = vadd.xlane.f32.xlu1 %v4770_v31  ;;  %5185 = vadd.xlane.f32.xlu0 %v5163_v12  ;;  %v4122_v24 = vrot.slane %v4036_v51, %v8482_v33  ;;  %v4756_v31 = vmax.f32 %v4740_v38, 0.0  ;;  %v5165_v38 = vmul.f32 %v8555_v34, %v5149_v0 }
 0xd1f   :  { %v4022_v48 = vpop.xlane.xlu1 %4021  ;;  %v4020_v20 = vpop.xlane.xlu0 %4019  ;;  %v4757_v54 = vmax.f32 %v4741_v41, 0.0 }
 0xd20   :  { %v4118_v21 = vsel %vm3914_vm13, %v4117_v37, %v4113_v9  ;;  %v4038_v22 = vadd.f32 %v4022_v48, %v8372_v23  ;;  %v4037_v47 = vadd.f32 %v4020_v20, %v8372_v23  ;;  %v4772_v15 = vmul.f32 %v8555_v34, %v4756_v31 }
 0xd21   :  { %v4123_v8 = vsel %vm3921_vm14, %v4122_v24, %v4118_v21  ;;  %v5166_v24 = vmul.f32 %v8555_v34, %v5150_v35  ;;  %v4969_v48 = vmul.f32 %v8555_v34, %v4953_v13  ;;  %v4742_v20 = vadd.f32 %v8356_v57, %v8129_v25 }
 0xd22   :  { %v4132_v26 = vrot.slane %v4038_v22, %v8512_v36  ;;  %v4127_v1 = vrot.slane %v4037_v47, %v8515_v7  ;;  %5187 = vadd.xlane.f32.xlu1 %v5164_v29  ;;  %4990 = vadd.xlane.f32.xlu0 %v4967_v27  ;;  %v4954_v47 = vmax.f32 %v4938_v60, 0.0  ;;  %v5135_v27 = vadd.f32 %v8364_v49, %v8125_v61 }
 0xd23   :  { %v4191_v39 = vpop.xlane.xlu1 %4190  ;;  %v4189_v58 = vpop.xlane.xlu0 %4188  ;;  %v4773_v13 = vmul.f32 %v8555_v34, %v4757_v54 }
 0xd24   :  { %v4128_v12 = vsel %vm3928_vm15, %v4127_v1, %v4123_v8  ;;  %v4221_v42 = vadd.f32 %v4191_v39, %v8372_v23  ;;  %v4220_v52 = vadd.f32 %v4189_v58, %v8372_v23  ;;  %v4758_v39 = vmax.f32 %v4742_v20, 0.0 }
 0xd25   :  { %v4133_v55 = vsel %vm3935_vm0, %v4132_v26, %v4128_v12  ;;  %v5136_v58 = vadd.f32 %v8364_v49, %v8129_v25 }
 0xd26   :  { %4135 = vst [vmem:[#allocation14 + $0x1] sm:$0x1] %v4133_v55  ;;  %4992 = vadd.xlane.f32.xlu1 %v4968_v62  ;;  %4795 = vadd.xlane.f32.xlu0 %v4771_v40  ;;  %v4259_v14 = vrot.slane %v4221_v42, %v8394_v53  ;;  %v4255_v56 = vrot.slane %v4220_v52, %v8384_v63  ;;  %v5151_v52 = vmax.f32 %v5135_v27, 0.0 }
 0xd27   :  { %v4195_v44 = vpop.xlane.xlu1 %4194  ;;  %v4193_v51 = vpop.xlane.xlu0 %4192  ;;  %v4939_v62 = vadd.f32 %v8361_v10, %v8129_v25  ;;  %v4970_v42 = vmul.f32 %v8555_v34, %v4954_v47  ;;  %v4940_v25 = vadd.f32 %v8361_v10, %v8137_v6 }
 0xd28   :  { %v4223_v37 = vadd.f32 %v4195_v44, %v8372_v23  ;;  %v4222_v46 = vadd.f32 %v4193_v51, %v8372_v23  ;;  %v4260_v29 = vsel %vm3837_vm2, %v4259_v14, %v4255_v56  ;;  %v5152_v56 = vmax.f32 %v5136_v58, 0.0 }
 0xd29   :  { %v4743_v44 = vadd.f32 %v8356_v57, %v8137_v6  ;;  %v4956_v20 = vmax.f32 %v4940_v25, 0.0  ;;  %v5137_v58 = vadd.f32 %v8364_v49, %v8137_v6  ;;  %v4941_v6 = vadd.f32 %v8361_v10, %v8141_v30 }
 0xd2a   :  { %v4264_v9 = vrot.slane %v4222_v46, %v8380_v59  ;;  %4797 = vadd.xlane.f32.xlu1 %v4772_v15  ;;  %5189 = vadd.xlane.f32.xlu0 %v5165_v38  ;;  %v4269_v17 = vrot.slane %v4223_v37, %v8387_v32  ;;  %v4774_v46 = vmul.f32 %v8555_v34, %v4758_v39  ;;  %v4955_v38 = vmax.f32 %v4939_v62, 0.0 }
 0xd2b   :  { %v4199_v21 = vpop.xlane.xlu1 %4198  ;;  %v4197_v22 = vpop.xlane.xlu0 %4196  ;;  %v4972_v62 = vmul.f32 %v8555_v34, %v4956_v20 }
 0xd2c   :  { %v4265_v45 = vsel %vm3844_vm3, %v4264_v9, %v4260_v29  ;;  %v4225_v26 = vadd.f32 %v4199_v21, %v8372_v23  ;;  %v4224_v1 = vadd.f32 %v4197_v22, %v8372_v23  ;;  %v4759_v21 = vmax.f32 %v4743_v44, 0.0 }
 0xd2d   :  { %v4270_v31 = vsel %vm3851_vm4, %v4269_v17, %v4265_v45  ;;  %v5168_v17 = vmul.f32 %v8555_v34, %v5152_v56 }
 0xd2e   :  { %v4274_v8 = vrot.slane %v4224_v1, %v8413_v19  ;;  %5191 = vadd.xlane.f32.xlu1 %v5166_v24  ;;  %4994 = vadd.xlane.f32.xlu0 %v4969_v48  ;;  %v4279_v61 = vrot.slane %v4225_v26, %v8400_v5  ;;  %v5167_v48 = vmul.f32 %v8555_v34, %v5151_v52 }
 0xd2f   :  { %v4203_v0 = vpop.xlane.xlu1 %4202  ;;  %v4201_v12 = vpop.xlane.xlu0 %4200  ;;  %v4971_v26 = vmul.f32 %v8555_v34, %v4955_v38  ;;  %v4744_v1 = vadd.f32 %v8356_v57, %v8141_v30 }
 0xd30   :  { %v4275_v40 = vsel %vm3858_vm5, %v4274_v8, %v4270_v31  ;;  %v4227_v55 = vadd.f32 %v4203_v0, %v8372_v23  ;;  %v4226_v35 = vadd.f32 %v4201_v12, %v8372_v23  ;;  %v4775_v31 = vmul.f32 %v8555_v34, %v4759_v21 }
 0xd31   :  { %v4280_v15 = vsel %vm3865_vm6, %v4279_v61, %v4275_v40  ;;  %v5138_v0 = vadd.f32 %v8364_v49, %v8141_v30 }
 0xd32   :  { %v4284_v14 = vrot.slane %v4226_v35, %v8423_v18  ;;  %4996 = vadd.xlane.f32.xlu1 %v4970_v42  ;;  %4799 = vadd.xlane.f32.xlu0 %v4773_v13  ;;  %v4289_v51 = vrot.slane %v4227_v55, %v8419_v2  ;;  %v4760_v55 = vmax.f32 %v4744_v1, 0.0 }
 0xd33   :  { %v4207_v60 = vpop.xlane.xlu1 %4206  ;;  %v4205_v37 = vpop.xlane.xlu0 %4204  ;;  %v5154_v44 = vmax.f32 %v5138_v0, 0.0 }
 0xd34   :  { %v4285_v41 = vsel %vm3872_vm7, %v4284_v14, %v4280_v15  ;;  %v4229_v24 = vadd.f32 %v4207_v60, %v8372_v23  ;;  %v4228_v9 = vadd.f32 %v4205_v37, %v8372_v23  ;;  %v5153_v14 = vmax.f32 %v5137_v58, 0.0 }
 0xd35   :  { %v4290_v47 = vsel %vm3879_vm8, %v4289_v51, %v4285_v41  ;;  %v4942_v51 = vadd.f32 %v8361_v10, %v8149_v16  ;;  %v4745_v15 = vadd.f32 %v8356_v57, %v8149_v16  ;;  %v4776_v38 = vmul.f32 %v8555_v34, %v4760_v55 }
 0xd36   :  { %v4294_v29 = vrot.slane %v4228_v9, %v8444_v28  ;;  %4801 = vadd.xlane.f32.xlu1 %v4774_v46  ;;  %5193 = vadd.xlane.f32.xlu0 %v5167_v48  ;;  %v4299_v22 = vrot.slane %v4229_v24, %v8431_v4  ;;  %v4957_v41 = vmax.f32 %v4941_v6, 0.0  ;;  %v5169_v20 = vmul.f32 %v8555_v34, %v5153_v14 }
 0xd37   :  { %v4211_v27 = vpop.xlane.xlu1 %4210  ;;  %v4209_v45 = vpop.xlane.xlu0 %4208  ;;  %v4958_v21 = vmax.f32 %v4942_v51, 0.0  ;;  %v4761_v1 = vmax.f32 %v4745_v15, 0.0 }
 0xd38   :  { %v4295_v54 = vsel %vm3886_vm9, %v4294_v29, %v4290_v47  ;;  %v4231_v8 = vadd.f32 %v4211_v27, %v8372_v23  ;;  %v4230_v39 = vadd.f32 %v4209_v45, %v8372_v23 }
 0xd39   :  { %v4300_v42 = vsel %vm3893_vm10, %v4299_v22, %v4295_v54  ;;  %v4746_v22 = vadd.f32 %v8356_v57, %v8153_v3  ;;  %v5139_v54 = vadd.f32 %v8364_v49, %v8149_v16 }
 0xd3a   :  { %v4304_v61 = vrot.slane %v4230_v39, %v8476_v11  ;;  %5195 = vadd.xlane.f32.xlu1 %v5168_v17  ;;  %4998 = vadd.xlane.f32.xlu0 %v4971_v26  ;;  %v4309_v12 = vrot.slane %v4231_v8, %v8459_v43  ;;  %v5170_v26 = vmul.f32 %v8555_v34, %v5154_v44 }
 0xd3b   :  { %v4215_v52 = vpop.xlane.xlu1 %4214  ;;  %v4213_v40 = vpop.xlane.xlu0 %4212 }
 0xd3c   :  { %v4305_v35 = vsel %vm3900_vm11, %v4304_v61, %v4300_v42  ;;  %v4233_v13 = vadd.f32 %v4215_v52, %v8372_v23  ;;  %v4232_v25 = vadd.f32 %v4213_v40, %v8372_v23  ;;  %v4974_v61 = vmul.f32 %v8555_v34, %v4958_v21 }
 0xd3d   :  { %v4310_v60 = vsel %vm3907_vm12, %v4309_v12, %v4305_v35  ;;  %v5155_v52 = vmax.f32 %v5139_v54, 0.0  ;;  %v5140_v40 = vadd.f32 %v8364_v49, %v8153_v3  ;;  %v4777_v35 = vmul.f32 %v8555_v34, %v4761_v1 }
 0xd3e   :  { %v4314_v56 = vrot.slane %v4232_v25, %v8495_v50  ;;  %5000 = vadd.xlane.f32.xlu1 %v4972_v62  ;;  %4803 = vadd.xlane.f32.xlu0 %v4775_v31  ;;  %v4319_v30 = vrot.slane %v4233_v13, %v8482_v33  ;;  %v4973_v62 = vmul.f32 %v8555_v34, %v4957_v41  ;;  %v4762_v31 = vmax.f32 %v4746_v22, 0.0 }
 0xd3f   :  { %v4219_v37 = vpop.xlane.xlu1 %4218  ;;  %v4217_v46 = vpop.xlane.xlu0 %4216  ;;  %v4943_v13 = vadd.f32 %v8361_v10, %v8153_v3  ;;  %v5171_v15 = vmul.f32 %v8555_v34, %v5155_v52 }
 0xd40   :  { %v4315_v24 = vsel %vm3914_vm13, %v4314_v56, %v4310_v60  ;;  %v4235_v9 = vadd.f32 %v4219_v37, %v8372_v23  ;;  %v4234_v48 = vadd.f32 %v4217_v46, %v8372_v23  ;;  %v4778_v14 = vmul.f32 %v8555_v34, %v4762_v31 }
 0xd41   :  { %v4320_v47 = vsel %vm3921_vm14, %v4319_v30, %v4315_v24  ;;  %v5156_v30 = vmax.f32 %v5140_v40, 0.0  ;;  %v4959_v10 = vmax.f32 %v4943_v13, 0.0 }
 0xd42   :  { %v4329_v29 = vrot.slane %v4235_v9, %v8512_v36  ;;  %v4324_v17 = vrot.slane %v4234_v48, %v8515_v7  ;;  %4805 = vadd.xlane.f32.xlu1 %v4776_v38  ;;  %5197 = vadd.xlane.f32.xlu0 %v5169_v20 }
 0xd43   :  { %v4388_v27 = vpop.xlane.xlu1 %4387  ;;  %v4386_v45 = vpop.xlane.xlu0 %4385  ;;  %v5172_v48 = vmul.f32 %v8555_v34, %v5156_v30  ;;  %v4975_v21 = vmul.f32 %v8555_v34, %v4959_v10 }
 0xd44   :  { %v4325_v8 = vsel %vm3928_vm15, %v4324_v17, %v4320_v47  ;;  %v4418_v39 = vadd.f32 %v4388_v27, %v8372_v23  ;;  %v4417_v58 = vadd.f32 %v4386_v45, %v8372_v23 }
 0xd45   :  { %v4330_v57 = vsel %vm3935_vm0, %v4329_v29, %v4325_v8 }
 0xd46   :  { %4332 = vst [vmem:[#allocation14 + $0x2] sm:$0x1] %v4330_v57  ;;  %5199 = vadd.xlane.f32.xlu1 %v5170_v26  ;;  %5002 = vadd.xlane.f32.xlu0 %v4973_v62  ;;  %v4456_v0 = vrot.slane %v4418_v39, %v8394_v53  ;;  %v4452_v16 = vrot.slane %v4417_v58, %v8384_v63 }
 0xd47   :  { %v4392_v12 = vpop.xlane.xlu1 %4391  ;;  %v4390_v42 = vpop.xlane.xlu0 %4389 }
 0xd48   :  { %v4420_v55 = vadd.f32 %v4392_v12, %v8372_v23  ;;  %v4419_v6 = vadd.f32 %v4390_v42, %v8372_v23  ;;  %v4457_v56 = vsel %vm3837_vm2, %v4456_v0, %v4452_v16 }
 0xd4a   :  { %v4461_v25 = vrot.slane %v4419_v6, %v8380_v59  ;;  %5004 = vadd.xlane.f32.xlu1 %v4974_v61  ;;  %4807 = vadd.xlane.f32.xlu0 %v4777_v35  ;;  %v4466_v44 = vrot.slane %v4420_v55, %v8387_v32 }
 0xd4b   :  { %v4396_v49 = vpop.xlane.xlu1 %4395  ;;  %v4394_v51 = vpop.xlane.xlu0 %4393 }
 0xd4c   :  { %v4462_v60 = vsel %vm3844_vm3, %v4461_v25, %v4457_v56  ;;  %v4422_v37 = vadd.f32 %v4396_v49, %v8372_v23  ;;  %v4421_v3 = vadd.f32 %v4394_v51, %v8372_v23 }
 0xd4d   :  { %v4467_v41 = vsel %vm3851_vm4, %v4466_v44, %v4462_v60 }
 0xd4e   :  { %v4471_v46 = vrot.slane %v4421_v3, %v8413_v19  ;;  %4809 = vadd.xlane.f32.xlu1 %v4778_v14  ;;  %5201 = vadd.xlane.f32.xlu0 %v5171_v15  ;;  %v4476_v38 = vrot.slane %v4422_v37, %v8400_v5 }
 0xd4f   :  { %v4400_v24 = vpop.xlane.xlu1 %4399  ;;  %v4398_v9 = vpop.xlane.xlu0 %4397 }
 0xd50   :  { %v4472_v20 = vsel %vm3858_vm5, %v4471_v46, %v4467_v41  ;;  %v4424_v29 = vadd.f32 %v4400_v24, %v8372_v23  ;;  %v4423_v17 = vadd.f32 %v4398_v9, %v8372_v23 }
 0xd51   :  { %v4477_v27 = vsel %vm3865_vm6, %v4476_v38, %v4472_v20 }
 0xd52   :  { %v4481_v22 = vrot.slane %v4423_v17, %v8423_v18  ;;  %5203 = vadd.xlane.f32.xlu1 %v5172_v48  ;;  %5006 = vadd.xlane.f32.xlu0 %v4975_v21  ;;  %v4486_v47 = vrot.slane %v4424_v29, %v8419_v2 }
 0xd53   :  { %v4404_v45 = vpop.xlane.xlu1 %4403  ;;  %v4402_v26 = vpop.xlane.xlu0 %4401 }
 0xd54   :  { %v4482_v1 = vsel %vm3872_vm7, %v4481_v22, %v4477_v27  ;;  %v4426_v54 = vadd.f32 %v4404_v45, %v8372_v23  ;;  %v4425_v8 = vadd.f32 %v4402_v26, %v8372_v23 }
 0xd55   :  { %v4487_v58 = vsel %vm3879_vm8, %v4486_v47, %v4482_v1 }
 0xd56   :  { %v4491_v39 = vrot.slane %v4425_v8, %v8444_v28  ;;  %v4496_v34 = vrot.slane %v4426_v54, %v8431_v4 }
 0xd57   :  { %v4408_v62 = vpop.xlane.xlu1 %4407  ;;  %v4406_v57 = vpop.xlane.xlu0 %4405 }
 0xd58   :  { %v4492_v61 = vsel %vm3886_vm9, %v4491_v39, %v4487_v58  ;;  %v4428_v31 = vadd.f32 %v4408_v62, %v8372_v23  ;;  %v4427_v0 = vadd.f32 %v4406_v57, %v8372_v23 }
 0xd59   :  { %v4497_v42 = vsel %vm3893_vm10, %v4496_v34, %v4492_v61 }
 0xd5a   :  { %v4501_v16 = vrot.slane %v4427_v0, %v8476_v11  ;;  %v4506_v12 = vrot.slane %v4428_v31, %v8459_v43 }
 0xd5b   :  { %v4412_v52 = vpop.xlane.xlu1 %4411  ;;  %v4410_v40 = vpop.xlane.xlu0 %4409 }
 0xd5c   :  { %v4502_v55 = vsel %vm3900_vm11, %v4501_v16, %v4497_v42  ;;  %v4430_v6 = vadd.f32 %v4412_v52, %v8372_v23  ;;  %v4429_v35 = vadd.f32 %v4410_v40, %v8372_v23 }
 0xd5d   :  { %v4507_v14 = vsel %vm3907_vm12, %v4506_v12, %v4502_v55 }
 0xd5e   :  { %v4511_v13 = vrot.slane %v4429_v35, %v8495_v50  ;;  %v4516_v25 = vrot.slane %v4430_v6, %v8482_v33 }
 0xd5f   :  { %v4416_v56 = vpop.xlane.xlu1 %4415  ;;  %v4414_v44 = vpop.xlane.xlu0 %4413 }
 0xd60   :  { %v4512_v49 = vsel %vm3914_vm13, %v4511_v13, %v4507_v14  ;;  %v4432_v51 = vadd.f32 %v4416_v56, %v8372_v23  ;;  %v4431_v15 = vadd.f32 %v4414_v44, %v8372_v23 }
 0xd61   :  { %v4517_v37 = vsel %vm3921_vm14, %v4516_v25, %v4512_v49 }
 0xd62   :  { %v4526_v30 = vrot.slane %v4432_v51, %v8512_v36  ;;  %v4521_v60 = vrot.slane %v4431_v15, %v8515_v7 }
 0xd63   :  { %v4585_v3 = vpop.xlane.xlu1 %4584  ;;  %v4583_v10 = vpop.xlane.xlu0 %4582 }
 0xd64   :  { %v4522_v46 = vsel %vm3928_vm15, %v4521_v60, %v4517_v37  ;;  %v4615_v38 = vadd.f32 %v4585_v3, %v8372_v23  ;;  %v4614_v41 = vadd.f32 %v4583_v10, %v8372_v23 }
 0xd65   :  { %v4527_v24 = vsel %vm3935_vm0, %v4526_v30, %v4522_v46 }
 0xd66   :  { %4529 = vst [vmem:[#allocation14 + $0x3] sm:$0x1] %v4527_v24  ;;  %v4653_v9 = vrot.slane %v4615_v38, %v8394_v53  ;;  %v4649_v48 = vrot.slane %v4614_v41, %v8384_v63 }
 0xd67   :  { %v4589_v20 = vpop.xlane.xlu1 %4588  ;;  %v4587_v29 = vpop.xlane.xlu0 %4586 }
 0xd68   :  { %v4617_v17 = vadd.f32 %v4589_v20, %v8372_v23  ;;  %v4616_v21 = vadd.f32 %v4587_v29, %v8372_v23  ;;  %v4654_v47 = vsel %vm3837_vm2, %v4653_v9, %v4649_v48 }
 0xd6a   :  { %v4658_v22 = vrot.slane %v4616_v21, %v8380_v59  ;;  %v4663_v27 = vrot.slane %v4617_v17, %v8387_v32 }
 0xd6b   :  { %v4593_v45 = vpop.xlane.xlu1 %4592  ;;  %v4591_v26 = vpop.xlane.xlu0 %4590 }
 0xd6c   :  { %v4659_v1 = vsel %vm3844_vm3, %v4658_v22, %v4654_v47  ;;  %v4619_v54 = vadd.f32 %v4593_v45, %v8372_v23  ;;  %v4618_v8 = vadd.f32 %v4591_v26, %v8372_v23 }
 0xd6d   :  { %v4664_v58 = vsel %vm3851_vm4, %v4663_v27, %v4659_v1 }
 0xd6e   :  { %v4668_v39 = vrot.slane %v4618_v8, %v8413_v19  ;;  %v4673_v34 = vrot.slane %v4619_v54, %v8400_v5 }
 0xd6f   :  { %v4597_v62 = vpop.xlane.xlu1 %4596  ;;  %v4595_v57 = vpop.xlane.xlu0 %4594 }
 0xd70   :  { %v4669_v61 = vsel %vm3858_vm5, %v4668_v39, %v4664_v58  ;;  %v4621_v31 = vadd.f32 %v4597_v62, %v8372_v23  ;;  %v4620_v0 = vadd.f32 %v4595_v57, %v8372_v23 }
 0xd71   :  { %v4674_v42 = vsel %vm3865_vm6, %v4673_v34, %v4669_v61 }
 0xd72   :  { %v4678_v16 = vrot.slane %v4620_v0, %v8423_v18  ;;  %v4683_v12 = vrot.slane %v4621_v31, %v8419_v2 }
 0xd73   :  { %v4601_v52 = vpop.xlane.xlu1 %4600  ;;  %v4599_v40 = vpop.xlane.xlu0 %4598 }
 0xd74   :  { %v4679_v55 = vsel %vm3872_vm7, %v4678_v16, %v4674_v42  ;;  %v4623_v6 = vadd.f32 %v4601_v52, %v8372_v23  ;;  %v4622_v35 = vadd.f32 %v4599_v40, %v8372_v23 }
 0xd75   :  { %v4684_v14 = vsel %vm3879_vm8, %v4683_v12, %v4679_v55 }
 0xd76   :  { %v4688_v13 = vrot.slane %v4622_v35, %v8444_v28  ;;  %v4693_v25 = vrot.slane %v4623_v6, %v8431_v4 }
 0xd77   :  { %v4605_v56 = vpop.xlane.xlu1 %4604  ;;  %v4603_v44 = vpop.xlane.xlu0 %4602 }
 0xd78   :  { %v4689_v49 = vsel %vm3886_vm9, %v4688_v13, %v4684_v14  ;;  %v4625_v51 = vadd.f32 %v4605_v56, %v8372_v23  ;;  %v4624_v15 = vadd.f32 %v4603_v44, %v8372_v23 }
 0xd79   :  { %v4694_v37 = vsel %vm3893_vm10, %v4693_v25, %v4689_v49 }
 0xd7a   :  { %v4698_v30 = vrot.slane %v4624_v15, %v8476_v11  ;;  %v4703_v60 = vrot.slane %v4625_v51, %v8459_v43 }
 0xd7b   :  { %v4609_v3 = vpop.xlane.xlu1 %4608  ;;  %v4607_v10 = vpop.xlane.xlu0 %4606 }
 0xd7c   :  { %v4699_v46 = vsel %vm3900_vm11, %v4698_v30, %v4694_v37  ;;  %v4627_v38 = vadd.f32 %v4609_v3, %v8372_v23  ;;  %v4626_v41 = vadd.f32 %v4607_v10, %v8372_v23 }
 0xd7d   :  { %v4704_v48 = vsel %vm3907_vm12, %v4703_v60, %v4699_v46 }
 0xd7e   :  { %v4708_v24 = vrot.slane %v4626_v41, %v8495_v50  ;;  %v4713_v9 = vrot.slane %v4627_v38, %v8482_v33 }
 0xd7f   :  { %v4613_v20 = vpop.xlane.xlu1 %4612  ;;  %v4611_v29 = vpop.xlane.xlu0 %4610 }
 0xd80   :  { %v4709_v17 = vsel %vm3914_vm13, %v4708_v24, %v4704_v48  ;;  %v4629_v21 = vadd.f32 %v4613_v20, %v8372_v23  ;;  %v4628_v22 = vadd.f32 %v4611_v29, %v8372_v23 }
 0xd81   :  { %v4714_v45 = vsel %vm3921_vm14, %v4713_v9, %v4709_v17 }
 0xd82   :  { %v4723_v47 = vrot.slane %v4629_v21, %v8512_v36  ;;  %v4718_v27 = vrot.slane %v4628_v22, %v8515_v7 }
 0xd83   :  { %v4782_v26 = vpop.xlane.xlu1 %4781  ;;  %v4780_v1 = vpop.xlane.xlu0 %4779 }
 0xd84   :  { %v4719_v54 = vsel %vm3928_vm15, %v4718_v27, %v4714_v45  ;;  %v4812_v8 = vadd.f32 %v4782_v26, %v8372_v23  ;;  %v4811_v39 = vadd.f32 %v4780_v1, %v8372_v23 }
 0xd85   :  { %v4724_v34 = vsel %vm3935_vm0, %v4723_v47, %v4719_v54 }
 0xd86   :  { %4726 = vst [vmem:[#allocation14 + $0x4] sm:$0x1] %v4724_v34  ;;  %v4850_v58 = vrot.slane %v4812_v8, %v8394_v53  ;;  %v4846_v62 = vrot.slane %v4811_v39, %v8384_v63 }
 0xd87   :  { %v4979_v57 = vpop.xlane.xlu1 %4978  ;;  %v4977_v61 = vpop.xlane.xlu0 %4976 }
 0xd88   :  { %v4851_v31 = vsel %vm3837_vm2, %v4850_v58, %v4846_v62  ;;  %v5009_v0 = vadd.f32 %v4979_v57, %v8372_v23  ;;  %v5008_v16 = vadd.f32 %v4977_v61, %v8372_v23 }
 0xd8a   :  { %v5047_v12 = vrot.slane %v5009_v0, %v8394_v53  ;;  %v5043_v42 = vrot.slane %v5008_v16, %v8384_v63 }
 0xd8b   :  { %v5176_v52 = vpop.xlane.xlu1 %5175  ;;  %v5174_v40 = vpop.xlane.xlu0 %5173 }
 0xd8c   :  { %v5048_v55 = vsel %vm3837_vm2, %v5047_v12, %v5043_v42  ;;  %v5206_v6 = vadd.f32 %v5176_v52, %v8372_v23  ;;  %v5205_v35 = vadd.f32 %v5174_v40, %v8372_v23 }
 0xd8e   :  { %v5244_v13 = vrot.slane %v5206_v6, %v8394_v53  ;;  %v5240_v25 = vrot.slane %v5205_v35, %v8384_v63 }
 0xd8f   :  { %v4981_v14 = vpop.xlane.xlu1 %4980  ;;  %v4784_v56 = vpop.xlane.xlu0 %4783 }
 0xd90   :  { %v5245_v44 = vsel %vm3837_vm2, %v5244_v13, %v5240_v25  ;;  %v5010_v49 = vadd.f32 %v4981_v14, %v8372_v23  ;;  %v4813_v8 = vadd.f32 %v4784_v56, %v8372_v23 }
 0xd92   :  { %v5052_v51 = vrot.slane %v5010_v49, %v8380_v59  ;;  %v4855_v16 = vrot.slane %v4813_v8, %v8380_v59 }
 0xd93   :  { %v4786_v15 = vpop.xlane.xlu1 %4785  ;;  %v5178_v30 = vpop.xlane.xlu0 %5177 }
 0xd94   :  { %v5053_v60 = vsel %vm3844_vm3, %v5052_v51, %v5048_v55  ;;  %v4814_v39 = vadd.f32 %v4786_v15, %v8372_v23  ;;  %v5207_v34 = vadd.f32 %v5178_v30, %v8372_v23  ;;  %v4856_v56 = vsel %vm3844_vm3, %v4855_v16, %v4851_v31 }
 0xd96   :  { %v4860_v42 = vrot.slane %v4814_v39, %v8387_v32  ;;  %v5249_v52 = vrot.slane %v5207_v34, %v8380_v59 }
 0xd97   :  { %v5180_v37 = vpop.xlane.xlu1 %5179  ;;  %v4983_v3 = vpop.xlane.xlu0 %4982 }
 0xd98   :  { %v5011_v58 = vadd.f32 %v4983_v3, %v8372_v23  ;;  %v5208_v62 = vadd.f32 %v5180_v37, %v8372_v23  ;;  %v4861_v51 = vsel %vm3851_vm4, %v4860_v42, %v4856_v56  ;;  %v5250_v30 = vsel %vm3844_vm3, %v5249_v52, %v5245_v44 }
 0xd9a   :  { %v5057_v40 = vrot.slane %v5011_v58, %v8387_v32  ;;  %v5254_v6 = vrot.slane %v5208_v62, %v8387_v32 }
 0xd9b   :  { %v4985_v10 = vpop.xlane.xlu1 %4984  ;;  %v4788_v46 = vpop.xlane.xlu0 %4787 }
 0xd9c   :  { %v5012_v57 = vadd.f32 %v4985_v10, %v8372_v23  ;;  %v4815_v12 = vadd.f32 %v4788_v46, %v8372_v23  ;;  %v5058_v37 = vsel %vm3851_vm4, %v5057_v40, %v5053_v60  ;;  %v5255_v31 = vsel %vm3851_vm4, %v5254_v6, %v5250_v30 }
 0xd9e   :  { %v5062_v35 = vrot.slane %v5012_v57, %v8413_v19  ;;  %v4865_v49 = vrot.slane %v4815_v12, %v8413_v19 }
 0xd9f   :  { %v4790_v38 = vpop.xlane.xlu1 %4789  ;;  %v5182_v53 = vpop.xlane.xlu0 %5181 }
 0xda0   :  { %v4816_v55 = vadd.f32 %v4790_v38, %v8372_v23  ;;  %v5209_v13 = vadd.f32 %v5182_v53, %v8372_v23  ;;  %v5063_v46 = vsel %vm3858_vm5, %v5062_v35, %v5058_v37 }
 0xda2   :  { %v4870_v3 = vrot.slane %v4816_v55, %v8400_v5  ;;  %v5259_v38 = vrot.slane %v5209_v13, %v8413_v19 }
 0xda3   :  { %v5184_v41 = vpop.xlane.xlu1 %5183  ;;  %v4987_v63 = vpop.xlane.xlu0 %4986 }
 0xda4   :  { %v5013_v59 = vadd.f32 %v4987_v63, %v8372_v23  ;;  %v5210_v15 = vadd.f32 %v5184_v41, %v8372_v23 }
 0xda6   :  { %v5067_v44 = vrot.slane %v5013_v59, %v8400_v5 }
 0xda7   :  { %v4989_v24 = vpop.xlane.xlu1 %4988  ;;  %v4792_v9 = vpop.xlane.xlu0 %4791 }
 0xda8   :  { %v5014_v32 = vadd.f32 %v4989_v24, %v8372_v23  ;;  %v4817_v10 = vadd.f32 %v4792_v9, %v8372_v23  ;;  %v4866_v24 = vsel %vm3858_vm5, %v4865_v49, %v4861_v51  ;;  %v5264_v9 = vrot.slane %v5210_v15, %v8400_v5 }
 0xdaa   :  { %v5072_v39 = vrot.slane %v5014_v32, %v8423_v18  ;;  %v4875_v58 = vrot.slane %v4817_v10, %v8423_v18 }
 0xdab   :  { %v4794_v48 = vpop.xlane.xlu1 %4793  ;;  %v5186_v20 = vpop.xlane.xlu0 %5185 }
 0xdac   :  { %v4818_v53 = vadd.f32 %v4794_v48, %v8372_v23  ;;  %v5211_v60 = vadd.f32 %v5186_v20, %v8372_v23  ;;  %v4871_v48 = vsel %vm3865_vm6, %v4870_v3, %v4866_v24  ;;  %v5260_v20 = vsel %vm3858_vm5, %v5259_v38, %v5255_v31 }
 0xdae   :  { %v5269_v42 = vrot.slane %v5211_v60, %v8423_v18 }
 0xdaf   :  { %v5188_v29 = vpop.xlane.xlu1 %5187  ;;  %v4991_v17 = vpop.xlane.xlu0 %4990 }
 0xdb0   :  { %v5015_v8 = vadd.f32 %v4991_v17, %v8372_v23  ;;  %v5212_v34 = vadd.f32 %v5188_v29, %v8372_v23  ;;  %v4880_v17 = vrot.slane %v4818_v53, %v8419_v2 }
 0xdb2   :  { %v5077_v52 = vrot.slane %v5015_v8, %v8419_v2  ;;  %v5274_v55 = vrot.slane %v5212_v34, %v8419_v2 }
 0xdb3   :  { %v4993_v21 = vpop.xlane.xlu1 %4992  ;;  %v4796_v22 = vpop.xlane.xlu0 %4795 }
 0xdb4   :  { %v5016_v19 = vadd.f32 %v4993_v21, %v8372_v23  ;;  %v4819_v62 = vadd.f32 %v4796_v22, %v8372_v23  ;;  %v5068_v21 = vsel %vm3865_vm6, %v5067_v44, %v5063_v46 }
 0xdb5   :  { %v5073_v40 = vsel %vm3872_vm7, %v5072_v39, %v5068_v21 }
 0xdb6   :  { %v4885_v6 = vrot.slane %v4819_v62, %v8444_v28  ;;  %v5078_v15 = vsel %vm3879_vm8, %v5077_v52, %v5073_v40 }
 0xdb7   :  { %v4798_v47 = vpop.xlane.xlu1 %4797  ;;  %v5190_v27 = vpop.xlane.xlu0 %5189 }
 0xdb8   :  { %v5213_v57 = vadd.f32 %v5190_v27, %v8372_v23  ;;  %v4820_v5 = vadd.f32 %v4798_v47, %v8372_v23  ;;  %v5265_v27 = vsel %vm3865_vm6, %v5264_v9, %v5260_v20  ;;  %v5082_v47 = vrot.slane %v5016_v19, %v8444_v28 }
 0xdb9   :  { %v5270_v51 = vsel %vm3872_vm7, %v5269_v42, %v5265_v27 }
 0xdba   :  { %v5279_v35 = vrot.slane %v5213_v57, %v8444_v28  ;;  %v5275_v32 = vsel %vm3879_vm8, %v5274_v55, %v5270_v51  ;;  %v5083_v30 = vsel %vm3886_vm9, %v5082_v47, %v5078_v15 }
 0xdbb   :  { %v5192_v45 = vpop.xlane.xlu1 %5191  ;;  %v4995_v26 = vpop.xlane.xlu0 %4994 }
 0xdbc   :  { %v5214_v16 = vadd.f32 %v5192_v45, %v8372_v23  ;;  %v5017_v22 = vadd.f32 %v4995_v26, %v8372_v23  ;;  %v4876_v45 = vsel %vm3872_vm7, %v4875_v58, %v4871_v48  ;;  %v4890_v26 = vrot.slane %v4820_v5, %v8431_v4 }
 0xdbd   :  { %v4881_v13 = vsel %vm3879_vm8, %v4880_v17, %v4876_v45  ;;  %v5280_v10 = vsel %vm3886_vm9, %v5279_v35, %v5275_v32 }
 0xdbe   :  { %v5284_v56 = vrot.slane %v5214_v16, %v8431_v4  ;;  %v5087_v28 = vrot.slane %v5017_v22, %v8431_v4  ;;  %v4886_v3 = vsel %vm3886_vm9, %v4885_v6, %v4881_v13 }
 0xdbf   :  { %v8857_v1 = vpop.xlane.xlu1 %4996  ;;  %v8859_v54 = vpop.xlane.xlu0 %4799  ;;  %v4891_v46 = vsel %vm3893_vm10, %v4890_v26, %v4886_v3 }
 0xdc0   :  { %v5018_v18 = vadd.f32 %v8857_v1, %v8372_v23  ;;  %v4821_v2 = vadd.f32 %v8859_v54, %v8372_v23 }
 0xdc2   :  { %v5092_v31 = vrot.slane %v5018_v18, %v8476_v11  ;;  %v4895_v38 = vrot.slane %v4821_v2, %v8476_v11 }
 0xdc3   :  { %v8867_v61 = vpop.xlane.xlu1 %4801  ;;  %v8869_v0 = vpop.xlane.xlu0 %5193 }
 0xdc4   :  { %v4822_v1 = vadd.f32 %v8867_v61, %v8372_v23  ;;  %v5215_v37 = vadd.f32 %v8869_v0, %v8372_v23  ;;  %v5285_v61 = vsel %vm3893_vm10, %v5284_v56, %v5280_v10 }
 0xdc6   :  { %v4900_v44 = vrot.slane %v4822_v1, %v8459_v43  ;;  %v5289_v9 = vrot.slane %v5215_v37, %v8476_v11 }
 0xdc7   :  { %v8880_v25 = vpop.xlane.xlu1 %5195  ;;  %v8882_v14 = vpop.xlane.xlu0 %4998 }
 0xdc8   :  { %v5216_v53 = vadd.f32 %v8880_v25, %v8372_v23  ;;  %v5019_v60 = vadd.f32 %v8882_v14, %v8372_v23  ;;  %v4896_v14 = vsel %vm3900_vm11, %v4895_v38, %v4891_v46  ;;  %v5290_v21 = vsel %vm3900_vm11, %v5289_v9, %v5285_v61 }
 0xdc9   :  { %v4901_v5 = vsel %vm3907_vm12, %v4900_v44, %v4896_v14 }
 0xdca   :  { %v5294_v57 = vrot.slane %v5216_v53, %v8459_v43  ;;  %v5097_v16 = vrot.slane %v5019_v60, %v8459_v43 }
 0xdcb   :  { %v5001_v63 = vpop.xlane.xlu1 %5000  ;;  %v4804_v41 = vpop.xlane.xlu0 %4803 }
 0xdcc   :  { %v4823_v54 = vadd.f32 %v4804_v41, %v8372_v23  ;;  %v5088_v41 = vsel %vm3893_vm10, %v5087_v28, %v5083_v30  ;;  %v5020_v39 = vadd.f32 %v5001_v63, %v8372_v23  ;;  %v5295_v47 = vsel %vm3907_vm12, %v5294_v57, %v5290_v21 }
 0xdcd   :  { %v5093_v25 = vsel %vm3900_vm11, %v5092_v31, %v5088_v41 }
 0xdce   :  { %v4905_v34 = vrot.slane %v4823_v54, %v8495_v50  ;;  %v5102_v42 = vrot.slane %v5020_v39, %v8495_v50 }
 0xdcf   :  { %v4806_v12 = vpop.xlane.xlu1 %4805  ;;  %v5198_v29 = vpop.xlane.xlu0 %5197 }
 0xdd0   :  { %v4824_v4 = vadd.f32 %v4806_v12, %v8372_v23  ;;  %v5217_v19 = vadd.f32 %v5198_v29, %v8372_v23  ;;  %v4906_v52 = vsel %vm3914_vm13, %v4905_v34, %v4901_v5 }
 0xdd2   :  { %v4910_v48 = vrot.slane %v4824_v4, %v8482_v33  ;;  %v5299_v22 = vrot.slane %v5217_v19, %v8495_v50  ;;  %v5098_v50 = vsel %vm3907_vm12, %v5097_v16, %v5093_v25 }
 0xdd3   :  { %v5200_v49 = vpop.xlane.xlu1 %5199  ;;  %v5003_v59 = vpop.xlane.xlu0 %5002  ;;  %v5103_v2 = vsel %vm3914_vm13, %v5102_v42, %v5098_v50 }
 0xdd4   :  { %v5218_v58 = vadd.f32 %v5200_v49, %v8372_v23  ;;  %v5021_v62 = vadd.f32 %v5003_v59, %v8372_v23  ;;  %v4911_v27 = vsel %vm3921_vm14, %v4910_v48, %v4906_v52  ;;  %v5300_v49 = vsel %vm3914_vm13, %v5299_v22, %v5295_v47 }
 0xdd6   :  { %v5304_v40 = vrot.slane %v5218_v58, %v8482_v33  ;;  %v5107_v55 = vrot.slane %v5021_v62, %v8482_v33 }
 0xdd7   :  { %v5005_v0 = vpop.xlane.xlu1 %5004  ;;  %v4808_v24 = vpop.xlane.xlu0 %4807 }
 0xdd8   :  { %v4825_v8 = vadd.f32 %v4808_v24, %v8372_v23  ;;  %v5022_v11 = vadd.f32 %v5005_v0, %v8372_v23  ;;  %v5305_v59 = vsel %vm3921_vm14, %v5304_v40, %v5300_v49 }
 0xdda   :  { %v4915_v63 = vrot.slane %v4825_v8, %v8515_v7  ;;  %v5112_v45 = vrot.slane %v5022_v11, %v8515_v7 }
 0xddb   :  { %v4810_v20 = vpop.xlane.xlu1 %4809  ;;  %v5202_v17 = vpop.xlane.xlu0 %5201 }
 0xddc   :  { %v4826_v12 = vadd.f32 %v4810_v20, %v8372_v23  ;;  %v5219_v29 = vadd.f32 %v5202_v17, %v8372_v23  ;;  %v4916_v6 = vsel %vm3928_vm15, %v4915_v63, %v4911_v27 }
 0xdde   :  { %v4920_v43 = vrot.slane %v4826_v12, %v8512_v36  ;;  %v5309_v35 = vrot.slane %v5219_v29, %v8515_v7  ;;  %v5108_v7 = vsel %vm3921_vm14, %v5107_v55, %v5103_v2 }
 0xddf   :  { %v5204_v18 = vpop.xlane.xlu1 %5203  ;;  %v5007_v13 = vpop.xlane.xlu0 %5006  ;;  %v5113_v28 = vsel %vm3928_vm15, %v5112_v45, %v5108_v7 }
 0xde0   :  { %v4921_v26 = vsel %vm3935_vm0, %v4920_v43, %v4916_v6  ;;  %v5220_v56 = vadd.f32 %v5204_v18, %v8372_v23  ;;  %v5023_v33 = vadd.f32 %v5007_v13, %v8372_v23  ;;  %v5310_v1 = vsel %vm3928_vm15, %v5309_v35, %v5305_v59 }
 0xde1   :  { %4923 = vst [vmem:[#allocation14 + $0x5] sm:$0x1] %v4921_v26 }
 0xde2   :  { %v5314_v51 = vrot.slane %v5220_v56, %v8512_v36  ;;  %v5117_v15 = vrot.slane %v5023_v33, %v8512_v36 }
 0xde4   :  { %v5315_v23 = vsel %vm3935_vm0, %v5314_v51, %v5310_v1  ;;  %v5118_v32 = vsel %vm3935_vm0, %v5117_v15, %v5113_v28 }
 0xde5   :  { %5317 = vst [vmem:[#allocation14 + $0x7] sm:$0x1] %v5315_v23  ;;  %5120 = vst [vmem:[#allocation14 + $0x6] sm:$0x1] %v5118_v32 }
 0xde6   :  { %6511 = shalt.err (!%p6508_p2)
}
 0xde7   :  { %s6512_s27 = scalar_lea.hbm %s9028_s18, 128 }
 0xde8   :  { %p6513_p3 = scmp.ne.s32.totalorder %s9028_s18, %s6512_s27  ;;  %p6516_p4 = scmp.lt.u32.totalorder %s6512_s27, %s9028_s18 }
 0xdea   :  { %p6518_p5 = pnand %p6516_p4, %p6513_p3 }
 0xdec   :  { %6521 = shalt.err (!%p6518_p5)
}
 0xded   :  { %5327 = dma.vmem_to_hbm [thread:$0]  %s5325_s20, 128, %s9028_s18, [#allocation7]  }
 0xdee   :  { %6528 = dma.done.wait [#allocation7], 128  }
 0xdef   :  { %6529 = vsyncadd [#allocation7], 4294967168 }
 0xdf0   :  { %5331 = vsyncpa [#allocation6], 1 }
 0xdf1   :  { %5332 = vsyncpa [#allocation9], 1 }
 0xdf2   :  { %5333 = vsyncpa [#allocation12], 1 }
 0xdf3   :  { %5334 = vsyncpa [#allocation7], 1 }

</bundles_post_ra>
